<compile_context>
chip_gen: v6e
topology: v6e:2x2x1
jax: 0.10.0
libtpu: 0.0.40
codegen_flags: <defaults>
</compile_context>

<pallas_src>
import functools

import jax
import jax.numpy as jnp
from jax.experimental import pallas as pl
from jax.experimental.pallas import tpu as pltpu

_LN_EPS = 1e-5  # torch.nn.LayerNorm default


def _layernorm(x, g, b, eps=_LN_EPS):
    # Fused statistics: one pass over x produces both reductions and removes the
    # dependent (x - mu)**2 pass (review item: halve XLU reduction pressure).
    mu = jnp.mean(x, axis=-1, keepdims=True)
    ms = jnp.mean(x * x, axis=-1, keepdims=True)
    var = jnp.maximum(ms - mu * mu, 0.0)
    return (x - mu) * jax.lax.rsqrt(var + eps) * g + b


# ----------------------------- fused stack kernel ----------------------------
def encoder_stack_kernel(x_ref, ln_g_ref, ln_b_ref, qkv_w_ref,
                         proj_w_ref, proj_b_ref,
                         fc1_w_ref, fc1_b_ref, fc2_w_ref, fc2_b_ref,
                         o_ref, xacc_ref, *, num_heads):
    """One grid step = one encoder layer applied to a (Bk, N, C) batch block.

    Grid = (batch_blocks ["parallel"], layers ["arbitrary"]).  The residual
    stream lives in the f32 VMEM scratch `xacc_ref` across the layer axis, so
    activations never round-trip through HBM between layers.  Per-layer weights
    are streamed (double-buffered) along the layer axis; at very large dims they
    could be single-buffered via pipeline_mode=pl.Buffered(1).
    """
    l = pl.program_id(1)
    n_layers = pl.num_programs(1)

    Bk, N, C = x_ref.shape
    M = Bk * N                       # matmul M dimension (>= 256 in the demo)
    H = num_heads
    D = C // H
    cdt = qkv_w_ref.dtype            # MXU input dtype (bf16)
    f32 = jnp.float32

    @pl.when(l == 0)
    def _():
        # Load the batch block once; (Bk, N, C) -> (Bk*N, C) is a leading-dim
        # merge (no relayout).
        xacc_ref[...] = x_ref[...].reshape(M, C).astype(f32)

    x = xacc_ref[...]                               # (M, C) f32 residual stream
    g = ln_g_ref[...].astype(f32)                   # (1, C), reused by both LNs
    b = ln_b_ref[...].astype(f32)                   # (the module reuses self.ln)

    # ---------------- attention branch: x + proj(MHA(LN(x))) ----------------
    xn = _layernorm(x, g, b)
    # qk scale is pre-folded into the q columns of qkv_w (see _prepare_params);
    # qkv_bias=False in the module, so no bias here.
    qkv = jnp.dot(xn.astype(cdt), qkv_w_ref[...], preferred_element_type=f32)
    qkv = qkv.astype(cdt)            # single bf16 downcast for q/k/v (review item)

    def split_heads(t2d):
        # (M, C) -> (H*Bk, N, D): static lane slices per head + leading-dim
        # concat.  No cross-tile transposes; the attention matmuls below are
        # still single batched MXU einsums over all heads.
        parts = [t2d[:, h * D:(h + 1) * D].reshape(Bk, N, D) for h in range(H)]
        return jnp.concatenate(parts, axis=0)

    qh = split_heads(qkv[:, :C])                    # (H*Bk, N, D) bf16
    kh = split_heads(qkv[:, C:2 * C])
    vh = split_heads(qkv[:, 2 * C:])

    s = jnp.einsum('bnd,bmd->bnm', qh, kh,
                   preferred_element_type=f32)      # (H*Bk, N, N) f32
    s = s - jnp.max(s, axis=-1, keepdims=True)
    p = jnp.exp(s)
    # EUP reciprocal instead of a VPU divide over the (H*Bk, N, N) tile.
    # (approx=True -> ~2^-12 relative error; denominator >= 1 after max-shift.)
    p = p * pl.reciprocal(jnp.sum(p, axis=-1, keepdims=True), approx=True)

    ao = jnp.einsum('bnm,bmd->bnd', p.astype(cdt), vh,
                    preferred_element_type=f32)     # (H*Bk, N, D) f32
    ao = ao.astype(cdt)
    # Back to token-major (M, C): leading-dim slice per head + minor concat,
    # column order h*D + d matches torch's .transpose(1, 2).reshape(B, N, C).
    ao = jnp.concatenate(
        [ao[h * Bk:(h + 1) * Bk].reshape(M, D) for h in range(H)], axis=-1)

    att = (jnp.dot(ao, proj_w_ref[...], preferred_element_type=f32)
           + proj_b_ref[...].astype(f32))
    x = x + att

    # ---------------- MLP branch: x + fc2(GELU(fc1(LN(x)))) -----------------
    xn = _layernorm(x, g, b)
    h1 = (jnp.dot(xn.astype(cdt), fc1_w_ref[...], preferred_element_type=f32)
          + fc1_b_ref[...].astype(f32))
    # tanh-form GELU (EUP path, review item); deviates from torch's exact-erf
    # nn.GELU() by ~1e-3 absolute at most.
    h1 = jax.nn.gelu(h1, approximate=True)
    h2 = (jnp.dot(h1.astype(cdt), fc2_w_ref[...], preferred_element_type=f32)
          + fc2_b_ref[...].astype(f32))
    x = x + h2

    xacc_ref[...] = x

    @pl.when(l == n_layers - 1)
    def _():
        o_ref[...] = x.reshape(Bk, N, C).astype(o_ref.dtype)


# ------------------------------ host-side helpers ----------------------------
def _prepare_params(params, *, num_heads, compute_dtype):
    """Fold the attention scale into the q columns of qkv_w and cast the weight
    matrices to the MXU compute dtype (biases / LN params stay f32)."""
    C = params["qkv_w"].shape[0]
    scale = (C // num_heads) ** -0.5
    qkv_w = params["qkv_w"].astype(jnp.float32)
    qkv_w = qkv_w.at[:, :C].multiply(scale)   # (q*scale) @ k^T == (q @ k^T) * scale
    return {
        "ln_g":   params["ln_g"].astype(jnp.float32),
        "ln_b":   params["ln_b"].astype(jnp.float32),
        "qkv_w":  qkv_w.astype(compute_dtype),
        "proj_w": params["proj_w"].astype(compute_dtype),
        "proj_b": params["proj_b"].astype(jnp.float32),
        "fc1_w":  params["fc1_w"].astype(compute_dtype),
        "fc1_b":  params["fc1_b"].astype(jnp.float32),
        "fc2_w":  params["fc2_w"].astype(compute_dtype),
        "fc2_b":  params["fc2_b"].astype(jnp.float32),
    }


def _pick_vmem_limit(default=48 * 1024 * 1024):
    """Per-generation VMEM limit: ~3/4 of physical, capped at 100 MiB
    (~48 MiB on v7x, 96 MiB on v5e/v6e), conservative fallback otherwise."""
    try:
        info = pltpu.get_tpu_info()
        phys = int(getattr(info, "vmem_capacity_bytes", 0))
        if phys > 0:
            return int(min(phys - phys // 4, 100 * 1024 * 1024))
    except Exception:
        pass
    return default


def _pick_block_batch(B, N, target_rows=256):
    """Largest divisor of B whose row block Bk*N stays near target_rows (so the
    matmul M dimension is >= ~256 without blowing up the activation tile)."""
    want = max(1, -(-target_rows // N))    # ceil(target_rows / N)
    bk = 1
    for cand in range(1, min(B, want) + 1):
        if B % cand == 0:
            bk = cand
    return bk


def transformer_encoder(x, layer_params, *, num_heads,
                        compute_dtype=jnp.bfloat16,
                        block_batch=None, vmem_limit_bytes=None):
    """Run the full encoder stack in one fused pallas_call."""
    B, N, C = x.shape
    assert C % num_heads == 0, "dim must be divisible by num_heads"
    assert C % 128 == 0 and N % 8 == 0, \
        "demo kernel expects lane/sublane-aligned (N, C); pad the sequence first"

    prep = [_prepare_params(p, num_heads=num_heads, compute_dtype=compute_dtype)
            for p in layer_params]
    sp = {k: jnp.stack([pp[k] for pp in prep], axis=0) for k in prep[0]}

    L = sp["qkv_w"].shape[0]
    Hm = sp["fc1_w"].shape[2]
    Bk = block_batch or _pick_block_batch(B, N)
    assert B % Bk == 0
    nb = B // Bk
    if vmem_limit_bytes is None:
        vmem_limit_bytes = _pick_vmem_limit()

    def wspec(shape):
        # Per-layer weight block; leading layer dim squeezed out of the kernel
        # view and streamed (double-buffered) along the "arbitrary" layer axis.
        return pl.BlockSpec((None,) + shape, lambda bb, ll: (ll,) + (0,) * len(shape))

    kernel = functools.partial(encoder_stack_kernel, num_heads=num_heads)

    return pl.pallas_call(
        kernel,
        out_shape=jax.ShapeDtypeStruct((B, N, C), x.dtype),
        grid_spec=pltpu.PrefetchScalarGridSpec(
            num_scalar_prefetch=0,
            grid=(nb, L),                 # layers innermost: residual carried in VMEM
            in_specs=[
                pl.BlockSpec((Bk, N, C), lambda bb, ll: (bb, 0, 0)),   # x (resident over layers)
                wspec((1, C)),            # ln gamma (f32)
                wspec((1, C)),            # ln beta  (f32)
                wspec((C, 3 * C)),        # qkv weight (bf16, q cols pre-scaled)
                wspec((C, C)),            # proj weight (bf16)
                wspec((1, C)),            # proj bias   (f32)
                wspec((C, Hm)),           # fc1 weight  (bf16)
                wspec((1, Hm)),           # fc1 bias    (f32)
                wspec((Hm, C)),           # fc2 weight  (bf16)
                wspec((1, C)),            # fc2 bias    (f32)
            ],
            out_specs=pl.BlockSpec((Bk, N, C), lambda bb, ll: (bb, 0, 0)),
            scratch_shapes=[pltpu.VMEM((Bk * N, C), jnp.float32)],   # residual stream
        ),
        compiler_params=pltpu.CompilerParams(
            dimension_semantics=("parallel", "arbitrary"),
            vmem_limit_bytes=vmem_limit_bytes,
        ),
    )(x, sp["ln_g"], sp["ln_b"], sp["qkv_w"], sp["proj_w"], sp["proj_b"],
      sp["fc1_w"], sp["fc1_b"], sp["fc2_w"], sp["fc2_b"])


# --------------------------- pure-JAX reference ------------------------------
def _encoder_block_ref(x, prep, *, num_heads):
    """Mirrors the kernel math (bf16 matmul inputs, f32 accumulation)."""
    f32 = jnp.float32
    cdt = prep["qkv_w"].dtype
    B, N, C = x.shape
    H = num_heads
    D = C // H
    g, b = prep["ln_g"], prep["ln_b"]

    xn = _layernorm(x, g, b)
    qkv = jnp.einsum('bnc,cf->bnf', xn.astype(cdt), prep["qkv_w"],
                     preferred_element_type=f32).astype(cdt)
    q = qkv[..., :C].reshape(B, N, H, D).transpose(0, 2, 1, 3)
    k = qkv[..., C:2 * C].reshape(B, N, H, D).transpose(0, 2, 1, 3)
    v = qkv[..., 2 * C:].reshape(B, N, H, D).transpose(0, 2, 1, 3)
    s = jnp.einsum('bhnd,bhmd->bhnm', q, k, preferred_element_type=f32)
    s = s - jnp.max(s, -1, keepdims=True)
    p = jnp.exp(s)
    p = p / jnp.sum(p, -1, keepdims=True)
    ao = jnp.einsum('bhnm,bhmd->bhnd', p.astype(cdt), v, preferred_element_type=f32)
    ao = ao.transpose(0, 2, 1, 3).reshape(B, N, C).astype(cdt)
    att = jnp.einsum('bnc,cd->bnd', ao, prep["proj_w"],
                     preferred_element_type=f32) + prep["proj_b"]
    x = x + att

    xn = _layernorm(x, g, b)
    h1 = jnp.einsum('bnc,ch->bnh', xn.astype(cdt), prep["fc1_w"],
                    preferred_element_type=f32) + prep["fc1_b"]
    h1 = jax.nn.gelu(h1, approximate=True)
    h2 = jnp.einsum('bnh,hc->bnc', h1.astype(cdt), prep["fc2_w"],
                    preferred_element_type=f32) + prep["fc2_b"]
    return x + h2


def transformer_encoder_ref(x, layer_params, *, num_heads, compute_dtype=jnp.bfloat16):
    x = x.astype(jnp.float32)
    for params in layer_params:
        prep = _prepare_params(params, num_heads=num_heads, compute_dtype=compute_dtype)
        x = _encoder_block_ref(x, prep, num_heads=num_heads)
    return x


# ------------------------------- parameters ----------------------------------
def init_layer_params(key, dim, mlp_hidden, num_layers):
    """Deterministic synthetic parameters.  Linear weights are stored
    pre-transposed to (in, out) so the kernel computes y = x @ W + b
    (numerically identical to PyTorch's x @ W.T with W of shape (out, in))."""
    layers = []
    for i in range(num_layers):
        ks = jax.random.split(jax.random.fold_in(key, i), 6)
        std = 0.02
        layers.append({
            "ln_g":   jnp.ones((1, dim), jnp.float32),
            "ln_b":   jnp.zeros((1, dim), jnp.float32),
            "qkv_w":  std * jax.random.normal(ks[0], (dim, 3 * dim), jnp.float32),
            "proj_w": std * jax.random.normal(ks[1], (dim, dim), jnp.float32),
            "proj_b": std * jax.random.normal(ks[2], (1, dim), jnp.float32),
            "fc1_w":  std * jax.random.normal(ks[3], (dim, mlp_hidden), jnp.float32),
            "fc1_b":  std * jax.random.normal(ks[4], (1, mlp_hidden), jnp.float32),
            "fc2_w":  std * jax.random.normal(ks[5], (mlp_hidden, dim), jnp.float32),
            "fc2_b":  jnp.zeros((1, dim), jnp.float32),
        })
    return layers


if __name__ == "__main__":
    # Small but TPU-friendly shapes: N and C are multiples of 128 (lane-dense
    # score/output tiles), head_dim = 64, block_batch=2 -> matmul M = 256 and a
    # (4, 2) grid so both v7x TensorCores get multiple pipelined steps.
    B, N, C = 8, 128, 128
    NUM_HEADS = 2                 # head_dim = 64
    MLP_HIDDEN = int(C * 4.0)     # mlp_ratio = 4.0
    NUM_LAYERS = 2

    key = jax.random.PRNGKey(0)
    kx, kp = jax.random.split(key)
    x = jax.random.normal(kx, (B, N, C), jnp.float32)
    layer_params = init_layer_params(kp, C, MLP_HIDDEN, NUM_LAYERS)

    fwd = jax.jit(functools.partial(transformer_encoder, num_heads=NUM_HEADS))
    out = jax.block_until_ready(fwd(x, layer_params))
    assert out.shape == (B, N, C) and out.dtype == jnp.float32
    assert bool(jnp.all(jnp.isfinite(out)))

    # Correctness check against a pure-JAX reference using the same bf16 weight
    # rounding / tanh GELU (approx-reciprocal softmax is the only kernel-side
    # deviation and is far inside this tolerance).
    ref = transformer_encoder_ref(x, layer_params, num_heads=NUM_HEADS)
    max_err = float(jnp.max(jnp.abs(out - ref)))
    assert bool(jnp.allclose(out, ref, rtol=5e-2, atol=5e-2)), max_err
    print("KERNEL_OK")
</pallas_src>

<mosaic_0001>
module attributes {stable_mosaic.version = 11 : i64} {
  func.func @encoder_stack_kernel(%arg0: i32, %arg1: i32, %arg2: memref<2x128x128xf32, #tpu.memory_space<vmem>>, %arg3: memref<1x1x128xf32, #tpu.memory_space<vmem>>, %arg4: memref<1x1x128xf32, #tpu.memory_space<vmem>>, %arg5: memref<1x128x384xbf16, #tpu.memory_space<vmem>>, %arg6: memref<1x128x128xbf16, #tpu.memory_space<vmem>>, %arg7: memref<1x1x128xf32, #tpu.memory_space<vmem>>, %arg8: memref<1x128x512xbf16, #tpu.memory_space<vmem>>, %arg9: memref<1x1x512xf32, #tpu.memory_space<vmem>>, %arg10: memref<1x512x128xbf16, #tpu.memory_space<vmem>>, %arg11: memref<1x1x128xf32, #tpu.memory_space<vmem>>, %arg12: memref<2x128x128xf32, #tpu.memory_space<vmem>>, %arg13: memref<256x128xf32, #tpu.memory_space<vmem>>) attributes {dimension_semantics = [#tpu.dimension_semantics<parallel>, #tpu.dimension_semantics<arbitrary>], iteration_bounds = array<i64: 4, 2>, scalar_prefetch = 0 : i64, scratch_operands = 1 : i64, tpu.core_type = #tpu.core_type<tc>, window_params = [{transform_indices = @transform_0, window_bounds = array<i64: 2, 128, 128>}, {transform_indices = @transform_1, window_bounds = array<i64: 1, 1, 128>}, {transform_indices = @transform_2, window_bounds = array<i64: 1, 1, 128>}, {transform_indices = @transform_3, window_bounds = array<i64: 1, 128, 384>}, {transform_indices = @transform_4, window_bounds = array<i64: 1, 128, 128>}, {transform_indices = @transform_5, window_bounds = array<i64: 1, 1, 128>}, {transform_indices = @transform_6, window_bounds = array<i64: 1, 128, 512>}, {transform_indices = @transform_7, window_bounds = array<i64: 1, 1, 512>}, {transform_indices = @transform_8, window_bounds = array<i64: 1, 512, 128>}, {transform_indices = @transform_9, window_bounds = array<i64: 1, 1, 128>}, {transform_indices = @transform_10, window_bounds = array<i64: 2, 128, 128>}]} {
    %c0_i32 = arith.constant 0 : i32
    %0 = arith.cmpi eq, %arg1, %c0_i32 : i32
    %1 = arith.extui %0 : i1 to i32
    %c0_i32_0 = arith.constant 0 : i32
    %2 = arith.cmpi ne, %1, %c0_i32_0 : i32
    scf.if %2 {
      %c0_55 = arith.constant 0 : index
      %c0_56 = arith.constant 0 : index
      %c0_57 = arith.constant 0 : index
      %140 = vector.load %arg2[%c0_55, %c0_56, %c0_57] : memref<2x128x128xf32, #tpu.memory_space<vmem>>, vector<2x128x128xf32>
      %141 = vector.shape_cast %140 : vector<2x128x128xf32> to vector<256x128xf32>
      %c0_58 = arith.constant 0 : index
      %c0_59 = arith.constant 0 : index
      %142 = vector.load %arg13[%c0_58, %c0_59] : memref<256x128xf32, #tpu.memory_space<vmem>>, vector<256x128xf32>
      tpu.vector_store %arg13[%c0_58, %c0_59], %141 {strides = array<i32>} : memref<256x128xf32, #tpu.memory_space<vmem>>, vector<256x128xf32>,
    } else {
    }
    %c0 = arith.constant 0 : index
    %c0_1 = arith.constant 0 : index
    %3 = vector.load %arg13[%c0, %c0_1] : memref<256x128xf32, #tpu.memory_space<vmem>>, vector<256x128xf32>
    %c0_2 = arith.constant 0 : index
    %c0_3 = arith.constant 0 : index
    %c0_4 = arith.constant 0 : index
    %4 = vector.load %arg3[%c0_2, %c0_3, %c0_4] : memref<1x1x128xf32, #tpu.memory_space<vmem>>, vector<1x1x128xf32>
    %5 = vector.shape_cast %4 : vector<1x1x128xf32> to vector<1x128xf32>
    %c0_5 = arith.constant 0 : index
    %c0_6 = arith.constant 0 : index
    %c0_7 = arith.constant 0 : index
    %6 = vector.load %arg4[%c0_5, %c0_6, %c0_7] : memref<1x1x128xf32, #tpu.memory_space<vmem>>, vector<1x1x128xf32>
    %7 = vector.shape_cast %6 : vector<1x1x128xf32> to vector<1x128xf32>
    %cst = arith.constant dense<0.000000e+00> : vector<256xf32>
    %8 = vector.multi_reduction <add>, %3, %cst [1] : vector<256x128xf32> to vector<256xf32>
    %9 = vector.shape_cast %8 : vector<256xf32> to vector<256x1xf32>
    %cst_8 = arith.constant 1.280000e+02 : f32
    %10 = vector.broadcast %cst_8 : f32 to vector<256x1xf32>
    %11 = arith.divf %9, %10 : vector<256x1xf32>
    %12 = arith.mulf %3, %3 : vector<256x128xf32>
    %cst_9 = arith.constant dense<0.000000e+00> : vector<256xf32>
    %13 = vector.multi_reduction <add>, %12, %cst_9 [1] : vector<256x128xf32> to vector<256xf32>
    %14 = vector.shape_cast %13 : vector<256xf32> to vector<256x1xf32>
    %cst_10 = arith.constant 1.280000e+02 : f32
    %15 = vector.broadcast %cst_10 : f32 to vector<256x1xf32>
    %16 = arith.divf %14, %15 : vector<256x1xf32>
    %17 = arith.mulf %11, %11 : vector<256x1xf32>
    %18 = arith.subf %16, %17 : vector<256x1xf32>
    %cst_11 = arith.constant 0.000000e+00 : f32
    %19 = vector.broadcast %cst_11 : f32 to vector<256x1xf32>
    %20 = arith.maximumf %18, %19 : vector<256x1xf32>
    %21 = vector.broadcast %11 : vector<256x1xf32> to vector<256x128xf32>
    %22 = arith.subf %3, %21 : vector<256x128xf32>
    %cst_12 = arith.constant 9.99999974E-6 : f32
    %23 = vector.broadcast %cst_12 : f32 to vector<256x1xf32>
    %24 = arith.addf %20, %23 : vector<256x1xf32>
    %25 = math.rsqrt %24 : vector<256x1xf32>
    %26 = vector.broadcast %25 : vector<256x1xf32> to vector<256x128xf32>
    %27 = arith.mulf %22, %26 : vector<256x128xf32>
    %28 = vector.broadcast %5 : vector<1x128xf32> to vector<256x128xf32>
    %29 = arith.mulf %27, %28 : vector<256x128xf32>
    %30 = vector.broadcast %7 : vector<1x128xf32> to vector<256x128xf32>
    %31 = arith.addf %29, %30 : vector<256x128xf32>
    %32 = arith.truncf %31 : vector<256x128xf32> to vector<256x128xbf16>
    %c0_13 = arith.constant 0 : index
    %c0_14 = arith.constant 0 : index
    %c0_15 = arith.constant 0 : index
    %33 = vector.load %arg5[%c0_13, %c0_14, %c0_15] : memref<1x128x384xbf16, #tpu.memory_space<vmem>>, vector<1x128x384xbf16>
    %34 = vector.shape_cast %33 : vector<1x128x384xbf16> to vector<128x384xbf16>
    %cst_16 = arith.constant dense<0.000000e+00> : vector<256x384xf32>
    %35 = tpu.matmul %32, %34, %cst_16 {dimension_numbers = #tpu.dot_dimension_numbers<[1], [0], [0], [1], [0, 0, 1, 1], [], []>} : vector<256x128xbf16>, vector<128x384xbf16>, vector<256x384xf32> -> vector<256x384xf32>
    %36 = arith.truncf %35 : vector<256x384xf32> to vector<256x384xbf16>
    %37 = vector.extract_strided_slice %36 {offsets = [0, 0], sizes = [256, 128], strides = [1, 1]} : vector<256x384xbf16> to vector<256x128xbf16>
    %38 = vector.extract_strided_slice %37 {offsets = [0, 0], sizes = [256, 64], strides = [1, 1]} : vector<256x128xbf16> to vector<256x64xbf16>
    %39 = vector.shape_cast %38 : vector<256x64xbf16> to vector<2x128x64xbf16>
    %40 = vector.extract_strided_slice %37 {offsets = [0, 64], sizes = [256, 64], strides = [1, 1]} : vector<256x128xbf16> to vector<256x64xbf16>
    %41 = vector.shape_cast %40 : vector<256x64xbf16> to vector<2x128x64xbf16>
    %42 = tpu.concatenate %39, %41 in 0 : vector<2x128x64xbf16>, vector<2x128x64xbf16> -> vector<4x128x64xbf16>
    %43 = vector.extract_strided_slice %36 {offsets = [0, 128], sizes = [256, 128], strides = [1, 1]} : vector<256x384xbf16> to vector<256x128xbf16>
    %44 = vector.extract_strided_slice %43 {offsets = [0, 0], sizes = [256, 64], strides = [1, 1]} : vector<256x128xbf16> to vector<256x64xbf16>
    %45 = vector.shape_cast %44 : vector<256x64xbf16> to vector<2x128x64xbf16>
    %46 = vector.extract_strided_slice %43 {offsets = [0, 64], sizes = [256, 64], strides = [1, 1]} : vector<256x128xbf16> to vector<256x64xbf16>
    %47 = vector.shape_cast %46 : vector<256x64xbf16> to vector<2x128x64xbf16>
    %48 = tpu.concatenate %45, %47 in 0 : vector<2x128x64xbf16>, vector<2x128x64xbf16> -> vector<4x128x64xbf16>
    %49 = vector.extract_strided_slice %36 {offsets = [0, 256], sizes = [256, 128], strides = [1, 1]} : vector<256x384xbf16> to vector<256x128xbf16>
    %50 = vector.extract_strided_slice %49 {offsets = [0, 0], sizes = [256, 64], strides = [1, 1]} : vector<256x128xbf16> to vector<256x64xbf16>
    %51 = vector.shape_cast %50 : vector<256x64xbf16> to vector<2x128x64xbf16>
    %52 = vector.extract_strided_slice %49 {offsets = [0, 64], sizes = [256, 64], strides = [1, 1]} : vector<256x128xbf16> to vector<256x64xbf16>
    %53 = vector.shape_cast %52 : vector<256x64xbf16> to vector<2x128x64xbf16>
    %54 = tpu.concatenate %51, %53 in 0 : vector<2x128x64xbf16>, vector<2x128x64xbf16> -> vector<4x128x64xbf16>
    "tpu.trace_start"() <{level = 10 : i32, message = "bnd,bmd->bnm"}> : () -> ()
    %cst_17 = arith.constant dense<0.000000e+00> : vector<4x128x128xf32>
    %55 = tpu.matmul %42, %48, %cst_17 {dimension_numbers = #tpu.dot_dimension_numbers<[2], [2], [1], [1], [0, 0, 0, 1, 1, 1], [0], [0]>} : vector<4x128x64xbf16>, vector<4x128x64xbf16>, vector<4x128x128xf32> -> vector<4x128x128xf32>
    "tpu.trace_stop"() : () -> ()
    %cst_18 = arith.constant dense<0xFF800000> : vector<4x128xf32>
    %56 = vector.multi_reduction <maximumf>, %55, %cst_18 [2] : vector<4x128x128xf32> to vector<4x128xf32>
    %57 = vector.shape_cast %56 : vector<4x128xf32> to vector<4x128x1xf32>
    %58 = vector.broadcast %57 : vector<4x128x1xf32> to vector<4x128x128xf32>
    %59 = arith.subf %55, %58 : vector<4x128x128xf32>
    %60 = math.exp %59 : vector<4x128x128xf32>
    %cst_19 = arith.constant dense<0.000000e+00> : vector<4x128xf32>
    %61 = vector.multi_reduction <add>, %60, %cst_19 [2] : vector<4x128x128xf32> to vector<4x128xf32>
    %62 = vector.shape_cast %61 : vector<4x128xf32> to vector<4x128x1xf32>
    %63 = tpu.reciprocal %62 {approx = true} : vector<4x128x1xf32> -> vector<4x128x1xf32>
    %64 = vector.broadcast %63 : vector<4x128x1xf32> to vector<4x128x128xf32>
    %65 = arith.mulf %60, %64 : vector<4x128x128xf32>
    %66 = arith.truncf %65 : vector<4x128x128xf32> to vector<4x128x128xbf16>
    "tpu.trace_start"() <{level = 10 : i32, message = "bnm,bmd->bnd"}> : () -> ()
    %cst_20 = arith.constant dense<0.000000e+00> : vector<4x128x64xf32>
    %67 = tpu.matmul %66, %54, %cst_20 {dimension_numbers = #tpu.dot_dimension_numbers<[2], [1], [1], [2], [0, 0, 0, 1, 1, 2], [0], [0]>} : vector<4x128x128xbf16>, vector<4x128x64xbf16>, vector<4x128x64xf32> -> vector<4x128x64xf32>
    "tpu.trace_stop"() : () -> ()
    %68 = arith.truncf %67 : vector<4x128x64xf32> to vector<4x128x64xbf16>
    %69 = vector.extract_strided_slice %68 {offsets = [0, 0, 0], sizes = [2, 128, 64], strides = [1, 1, 1]} : vector<4x128x64xbf16> to vector<2x128x64xbf16>
    %70 = vector.shape_cast %69 : vector<2x128x64xbf16> to vector<256x64xbf16>
    %71 = vector.extract_strided_slice %68 {offsets = [2, 0, 0], sizes = [2, 128, 64], strides = [1, 1, 1]} : vector<4x128x64xbf16> to vector<2x128x64xbf16>
    %72 = vector.shape_cast %71 : vector<2x128x64xbf16> to vector<256x64xbf16>
    %73 = tpu.concatenate %70, %72 in 1 : vector<256x64xbf16>, vector<256x64xbf16> -> vector<256x128xbf16>
    %c0_21 = arith.constant 0 : index
    %c0_22 = arith.constant 0 : index
    %c0_23 = arith.constant 0 : index
    %74 = vector.load %arg6[%c0_21, %c0_22, %c0_23] : memref<1x128x128xbf16, #tpu.memory_space<vmem>>, vector<1x128x128xbf16>
    %75 = vector.shape_cast %74 : vector<1x128x128xbf16> to vector<128x128xbf16>
    %cst_24 = arith.constant dense<0.000000e+00> : vector<256x128xf32>
    %76 = tpu.matmul %73, %75, %cst_24 {dimension_numbers = #tpu.dot_dimension_numbers<[1], [0], [0], [1], [0, 0, 1, 1], [], []>} : vector<256x128xbf16>, vector<128x128xbf16>, vector<256x128xf32> -> vector<256x128xf32>
    %c0_25 = arith.constant 0 : index
    %c0_26 = arith.constant 0 : index
    %c0_27 = arith.constant 0 : index
    %77 = vector.load %arg7[%c0_25, %c0_26, %c0_27] : memref<1x1x128xf32, #tpu.memory_space<vmem>>, vector<1x1x128xf32>
    %78 = vector.shape_cast %77 : vector<1x1x128xf32> to vector<1x128xf32>
    %79 = vector.broadcast %78 : vector<1x128xf32> to vector<256x128xf32>
    %80 = arith.addf %76, %79 : vector<256x128xf32>
    %81 = arith.addf %3, %80 : vector<256x128xf32>
    %cst_28 = arith.constant dense<0.000000e+00> : vector<256xf32>
    %82 = vector.multi_reduction <add>, %81, %cst_28 [1] : vector<256x128xf32> to vector<256xf32>
    %83 = vector.shape_cast %82 : vector<256xf32> to vector<256x1xf32>
    %cst_29 = arith.constant 1.280000e+02 : f32
    %84 = vector.broadcast %cst_29 : f32 to vector<256x1xf32>
    %85 = arith.divf %83, %84 : vector<256x1xf32>
    %86 = arith.mulf %81, %81 : vector<256x128xf32>
    %cst_30 = arith.constant dense<0.000000e+00> : vector<256xf32>
    %87 = vector.multi_reduction <add>, %86, %cst_30 [1] : vector<256x128xf32> to vector<256xf32>
    %88 = vector.shape_cast %87 : vector<256xf32> to vector<256x1xf32>
    %cst_31 = arith.constant 1.280000e+02 : f32
    %89 = vector.broadcast %cst_31 : f32 to vector<256x1xf32>
    %90 = arith.divf %88, %89 : vector<256x1xf32>
    %91 = arith.mulf %85, %85 : vector<256x1xf32>
    %92 = arith.subf %90, %91 : vector<256x1xf32>
    %cst_32 = arith.constant 0.000000e+00 : f32
    %93 = vector.broadcast %cst_32 : f32 to vector<256x1xf32>
    %94 = arith.maximumf %92, %93 : vector<256x1xf32>
    %95 = vector.broadcast %85 : vector<256x1xf32> to vector<256x128xf32>
    %96 = arith.subf %81, %95 : vector<256x128xf32>
    %cst_33 = arith.constant 9.99999974E-6 : f32
    %97 = vector.broadcast %cst_33 : f32 to vector<256x1xf32>
    %98 = arith.addf %94, %97 : vector<256x1xf32>
    %99 = math.rsqrt %98 : vector<256x1xf32>
    %100 = vector.broadcast %99 : vector<256x1xf32> to vector<256x128xf32>
    %101 = arith.mulf %96, %100 : vector<256x128xf32>
    %102 = vector.broadcast %5 : vector<1x128xf32> to vector<256x128xf32>
    %103 = arith.mulf %101, %102 : vector<256x128xf32>
    %104 = vector.broadcast %7 : vector<1x128xf32> to vector<256x128xf32>
    %105 = arith.addf %103, %104 : vector<256x128xf32>
    %106 = arith.truncf %105 : vector<256x128xf32> to vector<256x128xbf16>
    %c0_34 = arith.constant 0 : index
    %c0_35 = arith.constant 0 : index
    %c0_36 = arith.constant 0 : index
    %107 = vector.load %arg8[%c0_34, %c0_35, %c0_36] : memref<1x128x512xbf16, #tpu.memory_space<vmem>>, vector<1x128x512xbf16>
    %108 = vector.shape_cast %107 : vector<1x128x512xbf16> to vector<128x512xbf16>
    %cst_37 = arith.constant dense<0.000000e+00> : vector<256x512xf32>
    %109 = tpu.matmul %106, %108, %cst_37 {dimension_numbers = #tpu.dot_dimension_numbers<[1], [0], [0], [1], [0, 0, 1, 1], [], []>} : vector<256x128xbf16>, vector<128x512xbf16>, vector<256x512xf32> -> vector<256x512xf32>
    %c0_38 = arith.constant 0 : index
    %c0_39 = arith.constant 0 : index
    %c0_40 = arith.constant 0 : index
    %110 = vector.load %arg9[%c0_38, %c0_39, %c0_40] : memref<1x1x512xf32, #tpu.memory_space<vmem>>, vector<1x1x512xf32>
    %111 = vector.shape_cast %110 : vector<1x1x512xf32> to vector<1x512xf32>
    %112 = vector.broadcast %111 : vector<1x512xf32> to vector<256x512xf32>
    %113 = arith.addf %109, %112 : vector<256x512xf32>
    %114 = arith.mulf %113, %113 : vector<256x512xf32>
    %115 = arith.mulf %113, %114 : vector<256x512xf32>
    %cst_41 = arith.constant 4.471500e-02 : f32
    %116 = vector.broadcast %cst_41 : f32 to vector<256x512xf32>
    %117 = arith.mulf %116, %115 : vector<256x512xf32>
    %118 = arith.addf %113, %117 : vector<256x512xf32>
    %cst_42 = arith.constant 0.797884583 : f32
    %119 = vector.broadcast %cst_42 : f32 to vector<256x512xf32>
    %120 = arith.mulf %119, %118 : vector<256x512xf32>
    %121 = math.tanh %120 : vector<256x512xf32>
    %cst_43 = arith.constant 1.000000e+00 : f32
    %122 = vector.broadcast %cst_43 : f32 to vector<256x512xf32>
    %123 = arith.addf %122, %121 : vector<256x512xf32>
    %cst_44 = arith.constant 5.000000e-01 : f32
    %124 = vector.broadcast %cst_44 : f32 to vector<256x512xf32>
    %125 = arith.mulf %124, %123 : vector<256x512xf32>
    %126 = arith.mulf %113, %125 : vector<256x512xf32>
    %127 = arith.truncf %126 : vector<256x512xf32> to vector<256x512xbf16>
    %c0_45 = arith.constant 0 : index
    %c0_46 = arith.constant 0 : index
    %c0_47 = arith.constant 0 : index
    %128 = vector.load %arg10[%c0_45, %c0_46, %c0_47] : memref<1x512x128xbf16, #tpu.memory_space<vmem>>, vector<1x512x128xbf16>
    %129 = vector.shape_cast %128 : vector<1x512x128xbf16> to vector<512x128xbf16>
    %cst_48 = arith.constant dense<0.000000e+00> : vector<256x128xf32>
    %130 = tpu.matmul %127, %129, %cst_48 {dimension_numbers = #tpu.dot_dimension_numbers<[1], [0], [0], [1], [0, 0, 1, 1], [], []>} : vector<256x512xbf16>, vector<512x128xbf16>, vector<256x128xf32> -> vector<256x128xf32>
    %c0_49 = arith.constant 0 : index
    %c0_50 = arith.constant 0 : index
    %c0_51 = arith.constant 0 : index
    %131 = vector.load %arg11[%c0_49, %c0_50, %c0_51] : memref<1x1x128xf32, #tpu.memory_space<vmem>>, vector<1x1x128xf32>
    %132 = vector.shape_cast %131 : vector<1x1x128xf32> to vector<1x128xf32>
    %133 = vector.broadcast %132 : vector<1x128xf32> to vector<256x128xf32>
    %134 = arith.addf %130, %133 : vector<256x128xf32>
    %135 = arith.addf %81, %134 : vector<256x128xf32>
    %c0_52 = arith.constant 0 : index
    %c0_53 = arith.constant 0 : index
    %136 = vector.load %arg13[%c0_52, %c0_53] : memref<256x128xf32, #tpu.memory_space<vmem>>, vector<256x128xf32>
    tpu.vector_store %arg13[%c0_52, %c0_53], %135 {strides = array<i32>} : memref<256x128xf32, #tpu.memory_space<vmem>>, vector<256x128xf32>,
    %c1_i32 = arith.constant 1 : i32
    %137 = arith.cmpi eq, %arg1, %c1_i32 : i32
    %138 = arith.extui %137 : i1 to i32
    %c0_i32_54 = arith.constant 0 : i32
    %139 = arith.cmpi ne, %138, %c0_i32_54 : i32
    scf.if %139 {
      %140 = vector.shape_cast %135 : vector<256x128xf32> to vector<2x128x128xf32>
      %c0_55 = arith.constant 0 : index
      %c0_56 = arith.constant 0 : index
      %c0_57 = arith.constant 0 : index
      %141 = vector.load %arg12[%c0_55, %c0_56, %c0_57] : memref<2x128x128xf32, #tpu.memory_space<vmem>>, vector<2x128x128xf32>
      tpu.vector_store %arg12[%c0_55, %c0_56, %c0_57], %140 {strides = array<i32>} : memref<2x128x128xf32, #tpu.memory_space<vmem>>, vector<2x128x128xf32>,
    } else {
    }
    return
  }
  func.func @transform_0(%arg0: i32, %arg1: i32) -> (i32, i32, i32) {
    %c0_i32 = arith.constant 0 : i32
    %c0_i32_0 = arith.constant 0 : i32
    %c0_i32_1 = arith.constant 0 : i32
    return %arg0, %c0_i32, %c0_i32_0 : i32, i32, i32
  }
  func.func @transform_1(%arg0: i32, %arg1: i32) -> (i32, i32, i32) {
    %c0_i32 = arith.constant 0 : i32
    %c0_i32_0 = arith.constant 0 : i32
    %c0_i32_1 = arith.constant 0 : i32
    return %arg1, %c0_i32, %c0_i32_0 : i32, i32, i32
  }
  func.func @transform_2(%arg0: i32, %arg1: i32) -> (i32, i32, i32) {
    %c0_i32 = arith.constant 0 : i32
    %c0_i32_0 = arith.constant 0 : i32
    %c0_i32_1 = arith.constant 0 : i32
    return %arg1, %c0_i32, %c0_i32_0 : i32, i32, i32
  }
  func.func @transform_3(%arg0: i32, %arg1: i32) -> (i32, i32, i32) {
    %c0_i32 = arith.constant 0 : i32
    %c0_i32_0 = arith.constant 0 : i32
    %c0_i32_1 = arith.constant 0 : i32
    return %arg1, %c0_i32, %c0_i32_0 : i32, i32, i32
  }
  func.func @transform_4(%arg0: i32, %arg1: i32) -> (i32, i32, i32) {
    %c0_i32 = arith.constant 0 : i32
    %c0_i32_0 = arith.constant 0 : i32
    %c0_i32_1 = arith.constant 0 : i32
    return %arg1, %c0_i32, %c0_i32_0 : i32, i32, i32
  }
  func.func @transform_5(%arg0: i32, %arg1: i32) -> (i32, i32, i32) {
    %c0_i32 = arith.constant 0 : i32
    %c0_i32_0 = arith.constant 0 : i32
    %c0_i32_1 = arith.constant 0 : i32
    return %arg1, %c0_i32, %c0_i32_0 : i32, i32, i32
  }
  func.func @transform_6(%arg0: i32, %arg1: i32) -> (i32, i32, i32) {
    %c0_i32 = arith.constant 0 : i32
    %c0_i32_0 = arith.constant 0 : i32
    %c0_i32_1 = arith.constant 0 : i32
    return %arg1, %c0_i32, %c0_i32_0 : i32, i32, i32
  }
  func.func @transform_7(%arg0: i32, %arg1: i32) -> (i32, i32, i32) {
    %c0_i32 = arith.constant 0 : i32
    %c0_i32_0 = arith.constant 0 : i32
    %c0_i32_1 = arith.constant 0 : i32
    return %arg1, %c0_i32, %c0_i32_0 : i32, i32, i32
  }
  func.func @transform_8(%arg0: i32, %arg1: i32) -> (i32, i32, i32) {
    %c0_i32 = arith.constant 0 : i32
    %c0_i32_0 = arith.constant 0 : i32
    %c0_i32_1 = arith.constant 0 : i32
    return %arg1, %c0_i32, %c0_i32_0 : i32, i32, i32
  }
  func.func @transform_9(%arg0: i32, %arg1: i32) -> (i32, i32, i32) {
    %c0_i32 = arith.constant 0 : i32
    %c0_i32_0 = arith.constant 0 : i32
    %c0_i32_1 = arith.constant 0 : i32
    return %arg1, %c0_i32, %c0_i32_0 : i32, i32, i32
  }
  func.func @transform_10(%arg0: i32, %arg1: i32) -> (i32, i32, i32) {
    %c0_i32 = arith.constant 0 : i32
    %c0_i32_0 = arith.constant 0 : i32
    %c0_i32_1 = arith.constant 0 : i32
    return %arg0, %c0_i32, %c0_i32_0 : i32, i32, i32
  }
}

</mosaic_0001>

<bundles_post_ra>
// kernel: transformer_encoder.1
= control target key start
LH: loop header
LB: loop body
LE: loop exit
PB: predicated region body
PF: predicated region fallthrough
CT: control target
= control target key end

     0   :  { %s13347_s0 = inlined_call_operand.vmem [shape: f32[8,128,128], index: 0, kind: input, shape index: {}]   ;;  %s13348_s1 = inlined_call_operand.vmem [shape: f32[2,1,128], index: 1, kind: input, shape index: {}]   ;;  %s13349_s2 = inlined_call_operand.vmem [shape: f32[2,1,128], index: 2, kind: input, shape index: {}]   ;;  %s13350_s3 = inlined_call_operand.vmem [shape: bf16[2,128,384], index: 3, kind: input, shape index: {}]   ;;  %s13351_s4 = inlined_call_operand.vmem [shape: bf16[2,128,128], index: 4, kind: input, shape index: {}]   ;;  %s13352_s5 = inlined_call_operand.vmem [shape: f32[2,1,128], index: 5, kind: input, shape index: {}]   ;;  %s13353_s6 = inlined_call_operand.vmem [shape: bf16[2,128,512], index: 6, kind: input, shape index: {}]   ;;  %s13354_s7 = inlined_call_operand.vmem [shape: f32[2,1,512], index: 7, kind: input, shape index: {}]   ;;  %s13355_s8 = inlined_call_operand.vmem [shape: bf16[2,512,128], index: 8, kind: input, shape index: {}]   ;;  %s13356_s9 = inlined_call_operand.vmem [shape: f32[2,1,128], index: 9, kind: input, shape index: {}]   ;;  %s13357_s10 = inlined_call_operand.hbm [shape: f32[8,128,128], index: 10, kind: output, shape index: {}]  }
   0x1   :  { %13487 = sst [smem:[#allocation77_spill]] %s13347_s0 }
   0x2   :  { %13488 = sst [smem:[#allocation78_spill]] %s13348_s1 }
   0x3   :  { %13489 = sst [smem:[#allocation79_spill]] %s13349_s2 }
   0x4   :  { %13490 = sst [smem:[#allocation80_spill]] %s13357_s10 }
   0x5   :  { %15 = vsyncpa [#allocation4], 0 }
   0x6   :  { %17 = vsyncpa [#allocation4 + $0x1], 0  ;;  %s9084_s13 = smov 0   ;;  %s9086_s14 = smov 0  }
   0x7   :  { %s9088_s15 = smov 0   ;;  %s9090_s16 = smov 0  }
   0x8   :  { %s9092_s17 = smov 0   ;;  %s9094_s18 = smov 0  }
   0x9   :  { %s9096_s19 = smov 0   ;;  %s9098_s20 = smov 0  }
   0xa LB: > { %13491 = sst [smem:[#allocation6_spill]] %s8994_s13  ;;  %s7093_s21 = sadd.s32 4294967295, %s9022_s20   ;;  %s9022_s20 = sphi %s9098_s20, %s23_s20   ;;  %s9018_s19 = sphi %s9096_s19, %s13826_s19   ;;  %s9014_s18 = sphi %s9094_s18, %s13825_s18   ;;  %s9010_s17 = sphi %s9092_s17, %s13824_s17   ;;  %s9006_s16 = sphi %s9090_s16, %s13823_s16   ;;  %s9002_s15 = sphi %s9088_s15, %s13822_s15   ;;  %s8998_s14 = sphi %s9086_s14, %s13821_s14   ;;  %s8994_s13 = sphi %s9084_s13, %s13820_s13  }
   0xb   : > { %13492 = sst [smem:[#allocation7_spill]] %s8998_s14  ;;  %s7094_s22 = sadd.s32 4294967294, %s9022_s20  }
   0xc   : > { %13493 = sst [smem:[#allocation8_spill]] %s9002_s15  ;;  %s32_s23 = sadd.s32 1, %s9014_s18 }
   0xd   : > { %13494 = sst [smem:[#allocation9_spill]] %s9014_s18  ;;  %p33_p0 = scmp.ge.s32.totalorder %s32_s23, 2 }
   0xe   : > { %13495 = sst [smem:[#allocation10_spill]] %s9018_s19  ;;  %s35_s24 = sadd.s32 1, %s9018_s19 }
   0xf   : > { %13496 = sst [smem:[#allocation11_spill]] %s9022_s20  ;;  %p312_p1 = scmp.ne.s32.totalorder %s9002_s15, %s8998_s14 }
  0x10   : > { %p313_p2 = scmp.eq.s32.totalorder %s7093_s21, 7  ;;  %s13828_s23 = smov (%p33_p0, %s32_s23), 0 }
  0x11   : > { %13497 = sst [smem:[#allocation12_spill]] %s13828_s23  ;;  %s13830_s24 = smov (!%p33_p0, %s35_s24), %s9018_s19 }
  0x12   : > { %p9133_p3 = por %p313_p2, %p312_p1  ;;  %p318_p4 = scmp.ne.s32.totalorder %s8998_s14, %s8994_s13 }
  0x13   : > { %p37_p5 = scmp.ge.s32.totalorder %s13830_s24, 4  ;;  %p319_p6 = scmp.eq.s32.totalorder %s7094_s22, 7 }
  0x14   : > { %s13498_s25 = scalar_select %p9133_p3, 1, 0 }
  0x15   : > { %p7097_p7 = scmp.ge.s32.totalorder %s9022_s20, 1  ;;  %p410_p8 = scmp.lt.s32.totalorder %s9022_s20, 9 }
  0x16   : > { %13499 = sst [smem:[#allocation13_spill]] %s13498_s25  ;;  %s13832_s24 = smov (%p37_p5, %s13830_s24), 0 }
  0x17   : > { %13500 = sst [smem:[#allocation14_spill]] %s13832_s24  ;;  %p9143_p9 = por %p319_p6, %p318_p4 }
  0x18   : > { %p411_p10 = pnand %p7097_p7, %p410_p8  ;;  %s299_s27 = ssub.s32 %s9018_s19, %s13832_s24 }
  0x19   : > { %s13501_s26 = scalar_select %p9143_p9, 1, 0 }
  0x1a   : > { %s302_s28 = sadd.s32 1, %s9002_s15  ;;  %p300_p11 = scmp.eq.s32.totalorder %s299_s27, 0 }
  0x1b   : > { %13502 = sst [smem:[#allocation15_spill]] %s13501_s26  ;;  %414 = sbr.rel (%p411_p10) target bundleno = 2718 (0xa9e), region = 60 }
  0x1c   : > { %s9151_s29 = scalar_select %p300_p11, %s9002_s15, %s302_s28  }
  0x1e   : > { %13503 = sst [smem:[#allocation16_spill]] %s9151_s29 }
  0x20   : > { %s13359_s30 = sand.u32 1, %s8998_s14   ;;  %s7099_s11 = sshll.u32 %s9010_s17, 1 }
  0x21   : > { %s7098_s12 = sshll.u32 %s13359_s30, 8  ;;  %p486_p12 = scmp.lt.s32.totalorder %s7099_s11, 7 }
  0x22   : > { %p492_p13 = scmp.lt.s32.totalorder %s9006_s16, 1  ;;  %s13504_s0 = sld [smem:[#allocation77_spill]] }
  0x23   : > { %s13834_s11 = smov (!%p486_p12, %s7099_s11), 7  ;;  %s13505_s1 = sld [smem:[#allocation78_spill]] }
  0x24   : > { %s9159_s21 = scalar_select %p492_p13, %s9006_s16, 1 }
  0x25   : > { %s7250_s22 = sshll.u32 %s13834_s11, 7  ;;  %s13506_s2 = sld [smem:[#allocation79_spill]] }
  0x26   : > { %s8056_s26 = smul.u32 192, %s9159_s21  ;;  %s7251_s13 = sshll.u32 %s9159_s21, 6 }
  0x27   : > { %s9192_s30 = scalar_lea.vmem %s13351_s4, %s7251_s13  ;;  %s7107_s18 = sshll.u32 %s9159_s21, 2 }
  0x28   : > { %s9164_s24 = scalar_lea.vmem %s13504_s0, %s7250_s22  ;;  %s9187_s22 = scalar_lea.vmem %s13350_s3, %s8056_s26 }
  0x29   : > { %s9170_s19 = scalar_lea.vmem %s13505_s1, %s9159_s21  ;;  %s7252_s0 = sshll.u32 %s9159_s21, 8 }
  0x2a   : > { %s9204_s20 = scalar_lea.vmem %s13354_s7, %s7107_s18  ;;  %s9209_s27 = scalar_lea.vmem %s13355_s8, %s7252_s0 }
  0x2b   : > { %s9176_s15 = scalar_lea.vmem %s13506_s2, %s9159_s21  ;;  %s9199_s2 = scalar_lea.vmem %s13353_s6, %s7252_s0 }
  0x2c   : > { %s527_s23 = scalar_lea.vmem %s13356_s9, %s9159_s21  ;;  %s9215_s11 = scalar_lea.vmem [#allocation3], %s7098_s12 }
  0x2d   : > { %p7110_p0 = scmp.ne.s32.totalorder %s9006_s16, 0 }
  0x2f   : > { %533 = sbr.rel (%p7110_p0) target bundleno = 69 (0x45), region = 64 }
  0x34   : > { %v534_v0 = vld [vmem:[%s9164_s24] sm:$0xff]  ;;  %v535_v1 = vld [vmem:[%s9164_s24 + $0x8] sm:$0xff]  ;;  %v536_v2 = vld [vmem:[%s9164_s24 + $0x10] sm:$0xff] }
  0x35   : > { %566 = vst [vmem:[#allocation2 + $0xb0] sm:$0xff] %v534_v0  ;;  %567 = vst [vmem:[#allocation2] sm:$0xff] %v535_v1  ;;  %v537_v3 = vld [vmem:[%s9164_s24 + $0x18] sm:$0xff]  ;;  %v538_v4 = vld [vmem:[%s9164_s24 + $0x20] sm:$0xff] }
  0x36   : > { %568 = vst [vmem:[#allocation2 + $0xd8] sm:$0xff] %v536_v2  ;;  %v539_v5 = vld [vmem:[%s9164_s24 + $0x28] sm:$0xff]  ;;  %569 = vst [vmem:[#allocation2 + $0x18] sm:$0xff] %v537_v3  ;;  %v540_v6 = vld [vmem:[%s9164_s24 + $0x30] sm:$0xff] }
  0x37   : > { %570 = vst [vmem:[#allocation2 + $0x50] sm:$0xff] %v538_v4  ;;  %571 = vst [vmem:[#allocation2 + $0x68] sm:$0xff] %v539_v5  ;;  %v541_v7 = vld [vmem:[%s9164_s24 + $0x38] sm:$0xff]  ;;  %v542_v8 = vld [vmem:[%s9164_s24 + $0x40] sm:$0xff] }
  0x38   : > { %572 = vst [vmem:[#allocation2 + $0x30] sm:$0xff] %v540_v6  ;;  %573 = vst [vmem:[#allocation2 + $0x48] sm:$0xff] %v541_v7  ;;  %v543_v9 = vld [vmem:[%s9164_s24 + $0x48] sm:$0xff]  ;;  %v544_v10 = vld [vmem:[%s9164_s24 + $0x50] sm:$0xff] }
  0x39   : > { %574 = vst [vmem:[#allocation2 + $0x80] sm:$0xff] %v542_v8  ;;  %v545_v11 = vld [vmem:[%s9164_s24 + $0x58] sm:$0xff]  ;;  %575 = vst [vmem:[#allocation2 + $0x88] sm:$0xff] %v543_v9  ;;  %v546_v12 = vld [vmem:[%s9164_s24 + $0x60] sm:$0xff] }
  0x3a   : > { %576 = vst [vmem:[#allocation2 + $0xe8] sm:$0xff] %v544_v10  ;;  %577 = vst [vmem:[#allocation2 + $0xb8] sm:$0xff] %v545_v11  ;;  %v547_v13 = vld [vmem:[%s9164_s24 + $0x68] sm:$0xff]  ;;  %v548_v14 = vld [vmem:[%s9164_s24 + $0x70] sm:$0xff] }
  0x3b   : > { %578 = vst [vmem:[#allocation2 + $0x60] sm:$0xff] %v546_v12  ;;  %579 = vst [vmem:[#allocation2 + $0xf0] sm:$0xff] %v547_v13  ;;  %v549_v15 = vld [vmem:[%s9164_s24 + $0x78] sm:$0xff]  ;;  %v550_v16 = vld [vmem:[%s9164_s24 + $0x80] sm:$0xff] }
  0x3c   : > { %580 = vst [vmem:[#allocation2 + $0x8] sm:$0xff] %v548_v14  ;;  %v551_v17 = vld [vmem:[%s9164_s24 + $0x88] sm:$0xff]  ;;  %581 = vst [vmem:[#allocation2 + $0x78] sm:$0xff] %v549_v15  ;;  %v552_v18 = vld [vmem:[%s9164_s24 + $0x90] sm:$0xff] }
  0x3d   : > { %582 = vst [vmem:[#allocation2 + $0x38] sm:$0xff] %v550_v16  ;;  %583 = vst [vmem:[#allocation2 + $0x58] sm:$0xff] %v551_v17  ;;  %v553_v19 = vld [vmem:[%s9164_s24 + $0x98] sm:$0xff]  ;;  %v554_v20 = vld [vmem:[%s9164_s24 + $0xa0] sm:$0xff] }
  0x3e   : > { %584 = vst [vmem:[#allocation2 + $0x40] sm:$0xff] %v552_v18  ;;  %585 = vst [vmem:[#allocation2 + $0xc8] sm:$0xff] %v553_v19  ;;  %v555_v21 = vld [vmem:[%s9164_s24 + $0xa8] sm:$0xff]  ;;  %v556_v22 = vld [vmem:[%s9164_s24 + $0xb0] sm:$0xff] }
  0x3f   : > { %586 = vst [vmem:[#allocation2 + $0xe0] sm:$0xff] %v554_v20  ;;  %v557_v23 = vld [vmem:[%s9164_s24 + $0xb8] sm:$0xff]  ;;  %587 = vst [vmem:[#allocation2 + $0x90] sm:$0xff] %v555_v21  ;;  %v558_v24 = vld [vmem:[%s9164_s24 + $0xc0] sm:$0xff] }
  0x40   : > { %588 = vst [vmem:[#allocation2 + $0x70] sm:$0xff] %v556_v22  ;;  %589 = vst [vmem:[#allocation2 + $0xc0] sm:$0xff] %v557_v23  ;;  %v559_v25 = vld [vmem:[%s9164_s24 + $0xc8] sm:$0xff]  ;;  %v560_v26 = vld [vmem:[%s9164_s24 + $0xd0] sm:$0xff] }
  0x41   : > { %590 = vst [vmem:[#allocation2 + $0xa8] sm:$0xff] %v558_v24  ;;  %591 = vst [vmem:[#allocation2 + $0xd0] sm:$0xff] %v559_v25  ;;  %v561_v27 = vld [vmem:[%s9164_s24 + $0xd8] sm:$0xff]  ;;  %v562_v28 = vld [vmem:[%s9164_s24 + $0xe0] sm:$0xff] }
  0x42   : > { %592 = vst [vmem:[#allocation2 + $0x10] sm:$0xff] %v560_v26  ;;  %v563_v29 = vld [vmem:[%s9164_s24 + $0xe8] sm:$0xff]  ;;  %593 = vst [vmem:[#allocation2 + $0x28] sm:$0xff] %v561_v27  ;;  %v564_v30 = vld [vmem:[%s9164_s24 + $0xf0] sm:$0xff] }
  0x43   : > { %594 = vst [vmem:[#allocation2 + $0xa0] sm:$0xff] %v562_v28  ;;  %595 = vst [vmem:[#allocation2 + $0xf8] sm:$0xff] %v563_v29  ;;  %v565_v31 = vld [vmem:[%s9164_s24 + $0xf8] sm:$0xff] }
  0x44   : > { %596 = vst [vmem:[#allocation2 + $0x20] sm:$0xff] %v564_v30  ;;  %597 = vst [vmem:[#allocation2 + $0x98] sm:$0xff] %v565_v31 }
  0x45 PF: > { %v9250_v32 = vld [vmem:[#allocation2 + $0xb0] sm:$0xff]  ;;  %v9252_v33 = vld [vmem:[#allocation2] sm:$0xff]  ;;  %v9260_v36 = vld [vmem:[#allocation2 + $0xd8] sm:$0xff]  ;;  %v13371_v10 = vmov 0   ;;  %vm1895_vm0 = vcmask 523264   ;;  %s9025_s0 = smov 64   ;;  %s13612_s24 = scalar_lea.vmem %s13352_s5, %s9159_s21 }
  0x46   : > { %632 = vadd.xlane.f32.xlu0 %v9250_v32  ;;  %v729_v34 = vmul.f32 %v9250_v32, %v9250_v32  ;;  %v730_v35 = vmul.f32 %v9252_v33, %v9252_v33  ;;  %v9262_v37 = vld [vmem:[#allocation2 + $0x18] sm:$0xff]  ;;  %v731_v38 = vmul.f32 %v9260_v36, %v9260_v36  ;;  %v9270_v40 = vld [vmem:[#allocation2 + $0x50] sm:$0xff]  ;;  %v9273_v42 = vld [vmem:[#allocation2 + $0x68] sm:$0xff]  ;;  %1365 = vmatprep.mubr.bf16.mxu0 %v13371_v10  ;;  %p7243_p1 = scmp.ne.s32.totalorder %s9006_s16, 1 }
  0x47   : > { %v732_v39 = vmul.f32 %v9262_v37, %v9262_v37  ;;  %v8132_v41 = vld [vmem:[%s9187_s22 + $0xac] ss:$12 sps:$4 sm:$0xff]   ;;  %v8134_v43 = vld [vmem:[%s9187_s22 + $0xa8] ss:$12 sps:$4 sm:$0xff]   ;;  %v733_v44 = vmul.f32 %v9270_v40, %v9270_v40  ;;  %v8137_v46 = vld [vmem:[%s9187_s22 + $0x90] ss:$12 sps:$4 sm:$0xff]   ;;  %v734_v47 = vmul.f32 %v9273_v42, %v9273_v42  ;;  %1485 = vmatprep.mubr.bf16.mxu1 %v13371_v10 }
  0x48   : > { %761 = vadd.xlane.f32.xlu1 %v729_v34  ;;  %1333 = vmatprep.subr.bf16.mxu0 %v8132_v41  ;;  %v8135_v45 = vld [vmem:[%s9187_s22 + $0x94] ss:$12 sps:$4 sm:$0xff]   ;;  %v9286_v49 = vld [vmem:[#allocation2 + $0x48] sm:$0xff]  ;;  %v8140_v51 = vld [vmem:[%s9187_s22 + $0x78] ss:$12 sps:$4 sm:$0xff]  }
  0x49   : > { %1334 = vmatpush1.bf16.msra.mxu0 %v8134_v43  ;;  %8008 = vmatprep.subr.bf16.mxu1 %v8132_v41  ;;  %v9284_v48 = vld [vmem:[#allocation2 + $0x30] sm:$0xff]  ;;  %v8138_v50 = vld [vmem:[%s9187_s22 + $0x7c] ss:$12 sps:$4 sm:$0xff]   ;;  %v736_v54 = vmul.f32 %v9286_v49, %v9286_v49  ;;  %v8143_v55 = vld [vmem:[%s9187_s22 + $0x60] ss:$12 sps:$4 sm:$0xff]  }
  0x4a   : > { %634 = vadd.xlane.f32.xlu0 %v9252_v33  ;;  %8016 = vmatpush1.bf16.msra.mxu1 %v8134_v43  ;;  %v735_v52 = vmul.f32 %v9284_v48, %v9284_v48  ;;  %v8141_v53 = vld [vmem:[%s9187_s22 + $0x64] ss:$12 sps:$4 sm:$0xff]   ;;  %v9300_v57 = vld [vmem:[#allocation2 + $0x88] sm:$0xff]  ;;  %v8147_v61 = vld [vmem:[%s9187_s22 + $0x34] ss:$12 sps:$4 sm:$0xff]  }
  0x4b   : > { %1335 = vmatprep.subr.bf16.mxu0 %v8135_v45  ;;  %8009 = vmatprep.subr.bf16.mxu1 %v8135_v45  ;;  %v9298_v56 = vld [vmem:[#allocation2 + $0x80] sm:$0xff]  ;;  %v8144_v58 = vld [vmem:[%s9187_s22 + $0x4c] ss:$12 sps:$4 sm:$0xff]   ;;  %v8146_v59 = vld [vmem:[%s9187_s22 + $0x48] ss:$12 sps:$4 sm:$0xff]   ;;  %v738_v62 = vmul.f32 %v9300_v57, %v9300_v57 }
  0x4c   : > { %763 = vadd.xlane.f32.xlu1 %v730_v35  ;;  %v737_v60 = vmul.f32 %v9298_v56, %v9298_v56  ;;  %v8149_v63 = vld [vmem:[%s9187_s22 + $0x30] ss:$12 sps:$4 sm:$0xff]   ;;  %v9312_v0 = vld [vmem:[#allocation2 + $0xe8] sm:$0xff]  ;;  %v8152_v3 = vld [vmem:[%s9187_s22 + $0x18] ss:$12 sps:$4 sm:$0xff]  }
  0x4d   : > { %1336 = vmatpush1.bf16.msra.mxu0 %v8137_v46  ;;  %v8150_v1 = vld [vmem:[%s9187_s22 + $0x1c] ss:$12 sps:$4 sm:$0xff]   ;;  %v739_v4 = vmul.f32 %v9312_v0, %v9312_v0  ;;  %v8153_v5 = vld [vmem:[%s9187_s22 + $0x4] ss:$12 sps:$4 sm:$0xff]   ;;  %v8155_v7 = vld [vmem:[%s9187_s22] ss:$12 sps:$4 sm:$0xff]  }
  0x4e   : > { %636 = vadd.xlane.f32.xlu0 %v9260_v36  ;;  %8017 = vmatpush1.bf16.msra.mxu1 %v8137_v46  ;;  %v9315_v2 = vld [vmem:[#allocation2 + $0xb8] sm:$0xff]  ;;  %v9326_v8 = vld [vmem:[#allocation2 + $0x60] sm:$0xff]  ;;  %v9328_v9 = vld [vmem:[#allocation2 + $0xf0] sm:$0xff] }
  0x4f   : > { %1337 = vmatprep.subr.bf16.mxu0 %v8138_v50  ;;  %8010 = vmatprep.subr.bf16.mxu1 %v8138_v50  ;;  %v740_v6 = vmul.f32 %v9315_v2, %v9315_v2  ;;  %v741_v11 = vmul.f32 %v9326_v8, %v9326_v8  ;;  %v742_v12 = vmul.f32 %v9328_v9, %v9328_v9  ;;  %v9338_v13 = vld [vmem:[#allocation2 + $0x8] sm:$0xff]  ;;  %v9340_v14 = vld [vmem:[#allocation2 + $0x78] sm:$0xff]  ;;  %v9350_v18 = vld [vmem:[#allocation2 + $0xd0] sm:$0xff] }
  0x50   : > { %638 = vadd.xlane.f32.xlu1 %v9262_v37  ;;  %v743_v15 = vmul.f32 %v9338_v13, %v9338_v13  ;;  %v744_v16 = vmul.f32 %v9340_v14, %v9340_v14  ;;  %v9348_v17 = vld [vmem:[#allocation2 + $0xa8] sm:$0xff]  ;;  %v754_v20 = vmul.f32 %v9350_v18, %v9350_v18  ;;  %v9358_v21 = vld [vmem:[#allocation2 + $0x10] sm:$0xff]  ;;  %v9368_v25 = vld [vmem:[#allocation2 + $0xa0] sm:$0xff] }
  0x51   : > { %1338 = vmatpush1.bf16.msra.mxu0 %v8140_v51  ;;  %v753_v19 = vmul.f32 %v9348_v17, %v9348_v17  ;;  %v9360_v22 = vld [vmem:[#allocation2 + $0x28] sm:$0xff]  ;;  %v755_v23 = vmul.f32 %v9358_v21, %v9358_v21  ;;  %v9370_v26 = vld [vmem:[#allocation2 + $0xf8] sm:$0xff]  ;;  %v757_v27 = vmul.f32 %v9368_v25, %v9368_v25  ;;  %v9378_v29 = vld [vmem:[#allocation2 + $0x20] sm:$0xff] }
  0x52   : > { %765 = vadd.xlane.f32.xlu0 %v731_v38  ;;  %8018 = vmatpush1.bf16.msra.mxu1 %v8140_v51  ;;  %v756_v24 = vmul.f32 %v9360_v22, %v9360_v22  ;;  %v758_v28 = vmul.f32 %v9370_v26, %v9370_v26  ;;  %v9380_v30 = vld [vmem:[#allocation2 + $0x98] sm:$0xff]  ;;  %v759_v31 = vmul.f32 %v9378_v29, %v9378_v29  ;;  %v9398_v43 = vld [vmem:[#allocation2 + $0x40] sm:$0xff]  ;;  %v9413_v51 = vld [vmem:[#allocation2 + $0x90] sm:$0xff] }
  0x53   : > { %1339 = vmatprep.subr.bf16.mxu0 %v8141_v53  ;;  %8011 = vmatprep.subr.bf16.mxu1 %v8141_v53  ;;  %v760_v34 = vmul.f32 %v9380_v30, %v9380_v30  ;;  %v9388_v35 = vld [vmem:[#allocation2 + $0x38] sm:$0xff]  ;;  %v747_v45 = vmul.f32 %v9398_v43, %v9398_v43  ;;  %v750_v53 = vmul.f32 %v9413_v51, %v9413_v51 }
  0x54   : > { %767 = vadd.xlane.f32.xlu1 %v732_v39  ;;  %v9390_v38 = vld [vmem:[#allocation2 + $0x58] sm:$0xff]  ;;  %v745_v39 = vmul.f32 %v9388_v35, %v9388_v35 }
  0x55   : > { %1340 = vmatpush1.bf16.msra.mxu0 %v8143_v55  ;;  %v746_v41 = vmul.f32 %v9390_v38, %v9390_v38  ;;  %v9411_v50 = vld [vmem:[%s9187_s22 + $0xb0] ss:$12 sps:$4 sm:$0xff]  }
  0x56   : > { %640 = vadd.xlane.f32.xlu0 %v9270_v40  ;;  %8019 = vmatpush1.bf16.msra.mxu1 %v8143_v55  ;;  %v621_v55 = vld [vmem:[#allocation2 + $0xc0] sm:$0xff] }
  0x57   : > { %1341 = vmatprep.subr.bf16.mxu0 %v8144_v58  ;;  %8012 = vmatprep.subr.bf16.mxu1 %v8144_v58 }
  0x58   : > { %642 = vadd.xlane.f32.xlu1 %v9273_v42 }
  0x59   : > { %1342 = vmatpush1.bf16.msra.mxu0 %v8146_v59 }
  0x5a   : > { %769 = vadd.xlane.f32.xlu0 %v733_v44  ;;  %8020 = vmatpush1.bf16.msra.mxu1 %v8146_v59  ;;  %v9400_v44 = vld [vmem:[#allocation2 + $0xc8] sm:$0xff]  ;;  %v752_v59 = vmul.f32 %v621_v55, %v621_v55 }
  0x5b   : > { %1343 = vmatprep.subr.bf16.mxu0 %v8147_v61  ;;  %8013 = vmatprep.subr.bf16.mxu1 %v8147_v61  ;;  %v748_v46 = vmul.f32 %v9400_v44, %v9400_v44 }
  0x5c   : > { %771 = vadd.xlane.f32.xlu1 %v734_v47  ;;  %v9408_v47 = vld [vmem:[#allocation2 + $0xe0] sm:$0xff] }
  0x5d   : > { %1344 = vmatpush1.bf16.msra.mxu0 %v8149_v63 }
  0x5e   : > { %644 = vadd.xlane.f32.xlu0 %v9284_v48  ;;  %8021 = vmatpush1.bf16.msra.mxu1 %v8149_v63 }
  0x5f   : > { %1345 = vmatprep.subr.bf16.mxu0 %v8150_v1  ;;  %8014 = vmatprep.subr.bf16.mxu1 %v8150_v1 }
  0x60   : > { %646 = vadd.xlane.f32.xlu1 %v9286_v49 }
  0x61   : > { %1346 = vmatpush1.bf16.msra.mxu0 %v8152_v3 }
  0x62   : > { %773 = vadd.xlane.f32.xlu0 %v735_v52  ;;  %8022 = vmatpush1.bf16.msra.mxu1 %v8152_v3  ;;  %v749_v52 = vmul.f32 %v9408_v47, %v9408_v47 }
  0x63   : > { %1347 = vmatprep.subr.bf16.mxu0 %v8153_v5  ;;  %8015 = vmatprep.subr.bf16.mxu1 %v8153_v5 }
  0x64   : > { %775 = vadd.xlane.f32.xlu1 %v736_v54  ;;  %v620_v54 = vld [vmem:[#allocation2 + $0x70] sm:$0xff] }
  0x65   : > { %1348 = vmatpush1.bf16.msra.mxu0 %v8155_v7  ;;  %v751_v58 = vmul.f32 %v620_v54, %v620_v54 }
  0x66   : > { %648 = vadd.xlane.f32.xlu0 %v9298_v56  ;;  %8023 = vmatpush1.bf16.msra.mxu1 %v8155_v7 }
  0x67   : > { %7656 = vmatprep.subr.bf16.mxu1 %v9411_v50 }
  0x68   : > { %650 = vadd.xlane.f32.xlu1 %v9300_v57 }
  0x6a   : > { %777 = vadd.xlane.f32.xlu0 %v737_v60 }
  0x6c   : > { %779 = vadd.xlane.f32.xlu1 %v738_v62 }
  0x6e   : > { %652 = vadd.xlane.f32.xlu0 %v9312_v0 }
  0x70   : > { %654 = vadd.xlane.f32.xlu1 %v9315_v2 }
  0x72   : > { %781 = vadd.xlane.f32.xlu0 %v739_v4 }
  0x74   : > { %783 = vadd.xlane.f32.xlu1 %v740_v6 }
  0x76   : > { %656 = vadd.xlane.f32.xlu0 %v9326_v8 }
  0x78   : > { %658 = vadd.xlane.f32.xlu1 %v9328_v9 }
  0x7a   : > { %785 = vadd.xlane.f32.xlu0 %v741_v11 }
  0x7c   : > { %787 = vadd.xlane.f32.xlu1 %v742_v12 }
  0x7e   : > { %660 = vadd.xlane.f32.xlu0 %v9338_v13 }
  0x80   : > { %662 = vadd.xlane.f32.xlu1 %v9340_v14 }
  0x82   : > { %789 = vadd.xlane.f32.xlu0 %v743_v15 }
  0x84   : > { %791 = vadd.xlane.f32.xlu1 %v744_v16 }
  0x86   : > { %680 = vadd.xlane.f32.xlu0 %v9348_v17 }
  0x88   : > { %682 = vadd.xlane.f32.xlu1 %v9350_v18 }
  0x8a   : > { %809 = vadd.xlane.f32.xlu0 %v753_v19 }
  0x8c   : > { %811 = vadd.xlane.f32.xlu1 %v754_v20 }
  0x8e   : > { %684 = vadd.xlane.f32.xlu0 %v9358_v21 }
  0x90   : > { %686 = vadd.xlane.f32.xlu1 %v9360_v22 }
  0x92   : > { %813 = vadd.xlane.f32.xlu0 %v755_v23 }
  0x94   : > { %815 = vadd.xlane.f32.xlu1 %v756_v24 }
  0x96   : > { %688 = vadd.xlane.f32.xlu0 %v9368_v25 }
  0x98   : > { %690 = vadd.xlane.f32.xlu1 %v9370_v26 }
  0x9a   : > { %817 = vadd.xlane.f32.xlu0 %v757_v27 }
  0x9c   : > { %819 = vadd.xlane.f32.xlu1 %v758_v28 }
  0x9e   : > { %692 = vadd.xlane.f32.xlu0 %v9378_v29 }
  0xa0   : > { %694 = vadd.xlane.f32.xlu1 %v9380_v30 }
  0xa2   : > { %821 = vadd.xlane.f32.xlu0 %v759_v31 }
  0xa4   : > { %823 = vadd.xlane.f32.xlu1 %v760_v34 }
  0xa6   : > { %664 = vadd.xlane.f32.xlu0 %v9388_v35 }
  0xa8   : > { %666 = vadd.xlane.f32.xlu1 %v9390_v38 }
  0xaa   : > { %793 = vadd.xlane.f32.xlu0 %v745_v39 }
  0xac   : > { %795 = vadd.xlane.f32.xlu1 %v746_v41 }
  0xae   : > { %668 = vadd.xlane.f32.xlu0 %v9398_v43 }
  0xb0   : > { %670 = vadd.xlane.f32.xlu1 %v9400_v44 }
  0xb2   : > { %797 = vadd.xlane.f32.xlu0 %v747_v45 }
  0xb4   : > { %799 = vadd.xlane.f32.xlu1 %v748_v46 }
  0xb6   : > { %672 = vadd.xlane.f32.xlu0 %v9408_v47 }
  0xb8   : > { %674 = vadd.xlane.f32.xlu1 %v9413_v51 }
  0xba   : > { %801 = vadd.xlane.f32.xlu0 %v749_v52 }
  0xbc   : > { %803 = vadd.xlane.f32.xlu1 %v750_v53 }
  0xbe   : > { %676 = vadd.xlane.f32.xlu0 %v620_v54 }
  0xc0   : > { %678 = vadd.xlane.f32.xlu1 %v621_v55 }
  0xc2   : > { %805 = vadd.xlane.f32.xlu0 %v751_v58 }
  0xc4   : > { %807 = vadd.xlane.f32.xlu1 %v752_v59 }
  0xcf   : > { %v633_v60 = vpop.xlane.xlu0 %632 }
  0xd0   : > { %v697_v61 = vmul.f32 0.0078125, %v633_v60 }
  0xd1   : > { %v762_v62 = vpop.xlane.xlu1 %761 }
  0xd2   : > { %v857_v63 = vmul.f32 %v697_v61, %v697_v61  ;;  %v825_v1 = vmul.f32 0.0078125, %v762_v62 }
  0xd3   : > { %v635_v3 = vpop.xlane.xlu0 %634 }
  0xd4   : > { %v889_v4 = vsub.f32 %v825_v1, %v857_v63  ;;  %v698_v5 = vmul.f32 0.0078125, %v635_v3 }
  0xd5   : > { %v764_v6 = vpop.xlane.xlu1 %763 }
  0xd6   : > { %v921_v7 = vmax.f32 %v889_v4, 0.0  ;;  %v858_v11 = vmul.f32 %v698_v5, %v698_v5  ;;  %v826_v12 = vmul.f32 0.0078125, %v764_v6 }
  0xd7   : > { %v637_v15 = vpop.xlane.xlu0 %636 }
  0xd8   : > { %v985_v16 = vadd.f32 1e-05, %v921_v7  ;;  %v890_v19 = vsub.f32 %v826_v12, %v858_v11  ;;  %v9422_v20 = vmul.f32 0.0078125, %v637_v15 }
  0xd9   : > { %v639_v23 = vpop.xlane.xlu1 %638 }
  0xda   : > { %8252 = vrsqrt.f32 %v985_v16  ;;  %v922_v24 = vmax.f32 %v890_v19, 0.0  ;;  %v859_v27 = vmul.f32 %v9422_v20, %v9422_v20  ;;  %v9426_v28 = vmul.f32 0.0078125, %v639_v23 }
  0xdb   : > { %v766_v31 = vpop.xlane.xlu0 %765  ;;  %v953_v19 = vsub.f32 %v9250_v32, %v697_v61 }
  0xdc   : > { %v986_v34 = vadd.f32 1e-05, %v922_v24  ;;  %v827_v39 = vmul.f32 0.0078125, %v766_v31  ;;  %v860_v45 = vmul.f32 %v9426_v28, %v9426_v28 }
  0xdd   : > { %v768_v41 = vpop.xlane.xlu1 %767 }
  0xde   : > { %8254 = vrsqrt.f32 %v986_v34  ;;  %v891_v46 = vsub.f32 %v827_v39, %v859_v27  ;;  %v828_v52 = vmul.f32 0.0078125, %v768_v41  ;;  %v954_v41 = vsub.f32 %v9252_v33, %v698_v5 }
  0xdf   : > { %v641_v53 = vpop.xlane.xlu0 %640 }
  0xe0   : > { %v923_v54 = vmax.f32 %v891_v46, 0.0  ;;  %v892_v55 = vsub.f32 %v828_v52, %v860_v45  ;;  %v9430_v58 = vmul.f32 0.0078125, %v641_v53  ;;  %v9445_v53 = vld [vmem:[%s9170_s19] ss:$0 sm:$0xff] }
  0xe1   : > { %v643_v59 = vpop.xlane.xlu1 %642 }
  0xe2   : > { %v987_v60 = vadd.f32 1e-05, %v923_v54  ;;  %v924_v62 = vmax.f32 %v892_v55, 0.0  ;;  %v861_v63 = vmul.f32 %v9430_v58, %v9430_v58  ;;  %v9434_v1 = vmul.f32 0.0078125, %v643_v59 }
  0xe3   : > { %v770_v3 = vpop.xlane.xlu0 %769 }
  0xe4   : > { %8256 = vrsqrt.f32 %v987_v60  ;;  %v988_v4 = vadd.f32 1e-05, %v924_v62  ;;  %v829_v6 = vmul.f32 0.0078125, %v770_v3  ;;  %v862_v11 = vmul.f32 %v9434_v1, %v9434_v1 }
  0xe5   : > { %v772_v7 = vpop.xlane.xlu1 %771 }
  0xe6   : > { %8258 = vrsqrt.f32 %v988_v4  ;;  %v893_v12 = vsub.f32 %v829_v6, %v861_v63  ;;  %v830_v15 = vmul.f32 0.0078125, %v772_v7  ;;  %v9453_v4 = vld [vmem:[%s9176_s15] ss:$0 sm:$0xff] }
  0xe7   : > { %v8253_v16 = vpop.eup %8252  ;;  %v645_v23 = vpop.xlane.xlu0 %644 }
  0xe8   : > { %v925_v24 = vmax.f32 %v893_v12, 0.0  ;;  %v894_v27 = vsub.f32 %v830_v15, %v862_v11  ;;  %v9439_v31 = vmul.f32 0.0078125, %v645_v23  ;;  %v1049_v39 = vmul.f32 %v8253_v16, %v953_v19 }
  0xe9   : > { %v647_v34 = vpop.xlane.xlu1 %646  ;;  %v955_v23 = vsub.f32 %v9260_v36, %v9422_v20 }
  0xea   : > { %v989_v45 = vadd.f32 1e-05, %v925_v24  ;;  %v926_v46 = vmax.f32 %v894_v27, 0.0  ;;  %v863_v52 = vmul.f32 %v9439_v31, %v9439_v31  ;;  %v9447_v55 = vmul.f32 0.0078125, %v647_v34 }
  0xeb   : > { %v8255_v54 = vpop.eup %8254  ;;  %v774_v32 = vpop.xlane.xlu0 %773  ;;  %v1087_v5 = vmul.f32 %v9445_v53, %v1049_v39  ;;  %v956_v34 = vsub.f32 %v9262_v37, %v9426_v28 }
  0xec   : > { %8260 = vrsqrt.f32 %v989_v45  ;;  %v990_v61 = vadd.f32 1e-05, %v926_v46  ;;  %v831_v59 = vmul.f32 0.0078125, %v774_v32  ;;  %v1050_v60 = vmul.f32 %v8255_v54, %v954_v41 }
  0xed   : > { %v864_v62 = vmul.f32 %v9447_v55, %v9447_v55  ;;  %v776_v33 = vpop.xlane.xlu1 %775  ;;  %v1125_v27 = vadd.f32 %v9453_v4, %v1087_v5 }
  0xee   : > { %8262 = vrsqrt.f32 %v990_v61  ;;  %v895_v63 = vsub.f32 %v831_v59, %v863_v52  ;;  %v832_v3 = vmul.f32 0.0078125, %v776_v33  ;;  %v1088_v6 = vmul.f32 %v9445_v53, %v1050_v60 }
  0xef   : > { %v649_v7 = vpop.xlane.xlu0 %648 }
  0xf0   : > { %v927_v11 = vmax.f32 %v895_v63, 0.0  ;;  %v896_v12 = vsub.f32 %v832_v3, %v864_v62  ;;  %v9456_v15 = vmul.f32 0.0078125, %v649_v7  ;;  %v1126_v16 = vadd.f32 %v9453_v4, %v1088_v6 }
  0xf1   : > { %v8257_v19 = vpop.eup %8256  ;;  %v651_v24 = vpop.xlane.xlu1 %650 }
  0xf2   : > { %v991_v39 = vadd.f32 1e-05, %v927_v11  ;;  %v928_v41 = vmax.f32 %v896_v12, 0.0  ;;  %v865_v45 = vmul.f32 %v9456_v15, %v9456_v15  ;;  %v9466_v52 = vmul.f32 0.0078125, %v651_v24 }
  0xf3   : > { %v8259_v46 = vpop.eup %8258  ;;  %v778_v54 = vpop.xlane.xlu0 %777  ;;  %v9468_v32 = vpack.c.bf16 %v1126_v16, %v1125_v27  ;;  %v1051_v61 = vmul.f32 %v8257_v19, %v955_v23  ;;  %v957_v16 = vsub.f32 %v9270_v40, %v9430_v58  ;;  %v958_v24 = vsub.f32 %v9273_v42, %v9434_v1 }
  0xf4   : > { %8264 = vrsqrt.f32 %v991_v39  ;;  %v992_v36 = vadd.f32 1e-05, %v928_v41  ;;  %v833_v20 = vmul.f32 0.0078125, %v778_v54  ;;  %v1052_v59 = vmul.f32 %v8259_v46, %v956_v34 }
  0xf5   : > { %v866_v60 = vmul.f32 %v9466_v52, %v9466_v52  ;;  %1366 = vmatmul.mubr.bf16.vlgmr.msra.gmra.mxu0 %v9468_v32  ;;  %v780_v37 = vpop.xlane.xlu1 %779  ;;  %v1089_v28 = vmul.f32 %v9445_v53, %v1051_v61 }
  0xf6   : > { %8266 = vrsqrt.f32 %v992_v36  ;;  %v897_v62 = vsub.f32 %v833_v20, %v865_v45  ;;  %v834_v33 = vmul.f32 0.0078125, %v780_v37  ;;  %1375 = vmatprep.mubr.bf16.mxu0 %v13371_v10  ;;  %v1090_v5 = vmul.f32 %v9445_v53, %v1052_v59 }
  0xf7   : > { %v653_v63 = vpop.xlane.xlu0 %652  ;;  %v1127_v23 = vadd.f32 %v9453_v4, %v1089_v28 }
  0xf8   : > { %v929_v3 = vmax.f32 %v897_v62, 0.0  ;;  %v898_v6 = vsub.f32 %v834_v33, %v866_v60  ;;  %v9476_v7 = vmul.f32 0.0078125, %v653_v63  ;;  %v1128_v11 = vadd.f32 %v9453_v4, %v1090_v5 }
  0xf9   : > { %v8261_v12 = vpop.eup %8260  ;;  %v655_v19 = vpop.xlane.xlu1 %654 }
  0xfa   : > { %v993_v27 = vadd.f32 1e-05, %v929_v3  ;;  %v930_v34 = vmax.f32 %v898_v6, 0.0  ;;  %v867_v39 = vmul.f32 %v9476_v7, %v9476_v7  ;;  %v9486_v45 = vmul.f32 0.0078125, %v655_v19 }
  0xfb   : > { %v8263_v41 = vpop.eup %8262  ;;  %v782_v46 = vpop.xlane.xlu0 %781  ;;  %v9488_v54 = vpack.c.bf16 %v1128_v11, %v1127_v23  ;;  %v1053_v61 = vmul.f32 %v8261_v12, %v957_v16  ;;  %v959_v6 = vsub.f32 %v9284_v48, %v9439_v31  ;;  %v960_v16 = vsub.f32 %v9286_v49, %v9447_v55 }
  0xfc   : > { %8268 = vrsqrt.f32 %v993_v27  ;;  %v994_v40 = vadd.f32 1e-05, %v930_v34  ;;  %v835_v58 = vmul.f32 0.0078125, %v782_v46  ;;  %v1054_v36 = vmul.f32 %v8263_v41, %v958_v24 }
  0xfd   : > { %v868_v20 = vmul.f32 %v9486_v45, %v9486_v45  ;;  %1376 = vmatmul.mubr.bf16.gmra.mxu0 %v9488_v54  ;;  %v784_v42 = vpop.xlane.xlu1 %783  ;;  %v1091_v1 = vmul.f32 %v9445_v53, %v1053_v61 }
  0xfe   : > { %8270 = vrsqrt.f32 %v994_v40  ;;  %v899_v59 = vsub.f32 %v835_v58, %v867_v39  ;;  %v836_v60 = vmul.f32 0.0078125, %v784_v42  ;;  %1385 = vmatprep.mubr.bf16.mxu0 %v13371_v10  ;;  %v1092_v37 = vmul.f32 %v9445_v53, %v1054_v36 }
  0xff   : > { %v657_v28 = vpop.xlane.xlu0 %656  ;;  %v1129_v12 = vadd.f32 %v9453_v4, %v1091_v1 }
 0x100   : > { %v931_v62 = vmax.f32 %v899_v59, 0.0  ;;  %v900_v33 = vsub.f32 %v836_v60, %v868_v20  ;;  %v9496_v5 = vmul.f32 0.0078125, %v657_v28  ;;  %v1130_v63 = vadd.f32 %v9453_v4, %v1092_v37 }
 0x101   : > { %v8265_v3 = vpop.eup %8264  ;;  %v659_v11 = vpop.xlane.xlu1 %658 }
 0x102   : > { %v995_v19 = vadd.f32 1e-05, %v931_v62  ;;  %v932_v23 = vmax.f32 %v900_v33, 0.0  ;;  %v869_v24 = vmul.f32 %v9496_v5, %v9496_v5  ;;  %v9506_v34 = vmul.f32 0.0078125, %v659_v11 }
 0x103   : > { %v8267_v27 = vpop.eup %8266  ;;  %v786_v39 = vpop.xlane.xlu0 %785  ;;  %v9508_v41 = vpack.c.bf16 %v1130_v63, %v1129_v12  ;;  %v1055_v46 = vmul.f32 %v8265_v3, %v959_v6  ;;  %v961_v62 = vsub.f32 %v9298_v56, %v9456_v15  ;;  %v962_v3 = vsub.f32 %v9300_v57, %v9466_v52 }
 0x104   : > { %8272 = vrsqrt.f32 %v995_v19  ;;  %v996_v48 = vadd.f32 1e-05, %v932_v23  ;;  %v837_v31 = vmul.f32 0.0078125, %v786_v39  ;;  %v1056_v61 = vmul.f32 %v8267_v27, %v960_v16 }
 0x105   : > { %v870_v40 = vmul.f32 %v9506_v34, %v9506_v34  ;;  %1386 = vmatmul.mubr.bf16.gmra.mxu0 %v9508_v41  ;;  %v788_v49 = vpop.xlane.xlu1 %787  ;;  %v1093_v55 = vmul.f32 %v9445_v53, %v1055_v46 }
 0x106   : > { %8274 = vrsqrt.f32 %v996_v48  ;;  %v901_v58 = vsub.f32 %v837_v31, %v869_v24  ;;  %v838_v36 = vmul.f32 0.0078125, %v788_v49  ;;  %1395 = vmatprep.mubr.bf16.mxu0 %v13371_v10  ;;  %v1094_v20 = vmul.f32 %v9445_v53, %v1056_v61 }
 0x107   : > { %v661_v42 = vpop.xlane.xlu0 %660  ;;  %v1131_v63 = vadd.f32 %v9453_v4, %v1093_v55 }
 0x108   : > { %v933_v1 = vmax.f32 %v901_v58, 0.0  ;;  %v902_v59 = vsub.f32 %v838_v36, %v870_v40  ;;  %v9516_v60 = vmul.f32 0.0078125, %v661_v42  ;;  %v1132_v37 = vadd.f32 %v9453_v4, %v1094_v20 }
 0x109   : > { %v8269_v28 = vpop.eup %8268  ;;  %v663_v33 = vpop.xlane.xlu1 %662  ;;  %v963_v42 = vsub.f32 %v9312_v0, %v9476_v7 }
 0x10a   : > { %v997_v6 = vadd.f32 1e-05, %v933_v1  ;;  %v934_v11 = vmax.f32 %v902_v59, 0.0  ;;  %v871_v12 = vmul.f32 %v9516_v60, %v9516_v60  ;;  %v9526_v19 = vmul.f32 0.0078125, %v663_v33 }
 0x10b   : > { %v8271_v16 = vpop.eup %8270  ;;  %v790_v23 = vpop.xlane.xlu0 %789  ;;  %v9528_v24 = vpack.c.bf16 %v1132_v37, %v1131_v63  ;;  %v1057_v27 = vmul.f32 %v8269_v28, %v961_v62  ;;  %v964_v37 = vsub.f32 %v9315_v2, %v9486_v45 }
 0x10c   : > { %8276 = vrsqrt.f32 %v997_v6  ;;  %v998_v56 = vadd.f32 1e-05, %v934_v11  ;;  %v839_v15 = vmul.f32 0.0078125, %v790_v23  ;;  %v1058_v39 = vmul.f32 %v8271_v16, %v962_v3 }
 0x10d   : > { %v872_v46 = vmul.f32 %v9526_v19, %v9526_v19  ;;  %1396 = vmatmul.mubr.bf16.gmra.mxu0 %v9528_v24  ;;  %v792_v57 = vpop.xlane.xlu1 %791  ;;  %v1095_v52 = vmul.f32 %v9445_v53, %v1057_v27 }
 0x10e   : > { %8278 = vrsqrt.f32 %v998_v56  ;;  %v903_v48 = vsub.f32 %v839_v15, %v871_v12  ;;  %v840_v31 = vmul.f32 0.0078125, %v792_v57  ;;  %1405 = vmatprep.mubr.bf16.mxu0 %v13371_v10  ;;  %v1096_v61 = vmul.f32 %v9445_v53, %v1058_v39 }
 0x10f   : > { %v681_v40 = vpop.xlane.xlu0 %680  ;;  %v1133_v59 = vadd.f32 %v9453_v4, %v1095_v52 }
 0x110   : > { %v935_v49 = vmax.f32 %v903_v48, 0.0  ;;  %v904_v55 = vsub.f32 %v840_v31, %v872_v46  ;;  %v9536_v58 = vmul.f32 0.0078125, %v681_v40  ;;  %v1134_v36 = vadd.f32 %v9453_v4, %v1096_v61 }
 0x111   : > { %v8273_v20 = vpop.eup %8272  ;;  %v683_v1 = vpop.xlane.xlu1 %682  ;;  %v965_v61 = vsub.f32 %v9326_v8, %v9496_v5 }
 0x112   : > { %v999_v28 = vadd.f32 1e-05, %v935_v49  ;;  %v936_v62 = vmax.f32 %v904_v55, 0.0  ;;  %v881_v33 = vmul.f32 %v9536_v58, %v9536_v58  ;;  %v9546_v3 = vmul.f32 0.0078125, %v683_v1 }
 0x113   : > { %v8275_v63 = vpop.eup %8274  ;;  %v810_v6 = vpop.xlane.xlu0 %809  ;;  %v9548_v11 = vpack.c.bf16 %v1134_v36, %v1133_v59  ;;  %v1059_v12 = vmul.f32 %v8273_v20, %v963_v42  ;;  %v966_v55 = vsub.f32 %v9328_v9, %v9506_v34 }
 0x114   : > { %8280 = vrsqrt.f32 %v999_v28  ;;  %v1000_v0 = vadd.f32 1e-05, %v936_v62  ;;  %v849_v7 = vmul.f32 0.0078125, %v810_v6  ;;  %v1060_v16 = vmul.f32 %v8275_v63, %v964_v37 }
 0x115   : > { %v882_v23 = vmul.f32 %v9546_v3, %v9546_v3  ;;  %1406 = vmatmul.mubr.bf16.gmra.mxu0 %v9548_v11  ;;  %v812_v2 = vpop.xlane.xlu1 %811  ;;  %v1097_v45 = vmul.f32 %v9445_v53, %v1059_v12 }
 0x116   : > { %8282 = vrsqrt.f32 %v1000_v0  ;;  %v913_v27 = vsub.f32 %v849_v7, %v881_v33  ;;  %v850_v56 = vmul.f32 0.0078125, %v812_v2  ;;  %1415 = vmatprep.mubr.bf16.mxu0 %v13371_v10  ;;  %v1098_v15 = vmul.f32 %v9445_v53, %v1060_v16 }
 0x117   : > { %v685_v39 = vpop.xlane.xlu0 %684  ;;  %v1135_v49 = vadd.f32 %v9453_v4, %v1097_v45 }
 0x118   : > { %v945_v46 = vmax.f32 %v913_v27, 0.0  ;;  %v914_v57 = vsub.f32 %v850_v56, %v882_v23  ;;  %v9556_v52 = vmul.f32 0.0078125, %v685_v39  ;;  %v1136_v48 = vadd.f32 %v9453_v4, %v1098_v15 }
 0x119   : > { %v8277_v31 = vpop.eup %8276  ;;  %v687_v40 = vpop.xlane.xlu1 %686  ;;  %v967_v56 = vsub.f32 %v9338_v13, %v9516_v60 }
 0x11a   : > { %v1009_v36 = vadd.f32 1e-05, %v945_v46  ;;  %v946_v20 = vmax.f32 %v914_v57, 0.0  ;;  %v883_v42 = vmul.f32 %v9556_v52, %v9556_v52  ;;  %v9566_v59 = vmul.f32 0.0078125, %v687_v40 }
 0x11b   : > { %v8279_v1 = vpop.eup %8278  ;;  %v814_v37 = vpop.xlane.xlu0 %813  ;;  %v9568_v28 = vpack.c.bf16 %v1136_v48, %v1135_v49  ;;  %v1061_v62 = vmul.f32 %v8277_v31, %v965_v61  ;;  %v968_v46 = vsub.f32 %v9340_v14, %v9526_v19 }
 0x11c   : > { %8284 = vrsqrt.f32 %v1009_v36  ;;  %v1010_v8 = vadd.f32 1e-05, %v946_v20  ;;  %v851_v5 = vmul.f32 0.0078125, %v814_v37  ;;  %v1062_v33 = vmul.f32 %v8279_v1, %v966_v55 }
 0x11d   : > { %v884_v63 = vmul.f32 %v9566_v59, %v9566_v59  ;;  %1416 = vmatmul.mubr.bf16.gmra.mxu0 %v9568_v28  ;;  %v816_v9 = vpop.xlane.xlu1 %815  ;;  %v1099_v34 = vmul.f32 %v9445_v53, %v1061_v62 }
 0x11e   : > { %8286 = vrsqrt.f32 %v1010_v8  ;;  %v915_v6 = vsub.f32 %v851_v5, %v883_v42  ;;  %v852_v12 = vmul.f32 0.0078125, %v816_v9  ;;  %1425 = vmatprep.mubr.bf16.mxu0 %v13371_v10  ;;  %v1100_v0 = vmul.f32 %v9445_v53, %v1062_v33 }
 0x11f   : > { %v689_v7 = vpop.xlane.xlu0 %688  ;;  %v1137_v39 = vadd.f32 %v9453_v4, %v1099_v34 }
 0x120   : > { %v947_v16 = vmax.f32 %v915_v6, 0.0  ;;  %v916_v23 = vsub.f32 %v852_v12, %v884_v63  ;;  %v9576_v2 = vmul.f32 0.0078125, %v689_v7  ;;  %v1138_v45 = vadd.f32 %v9453_v4, %v1100_v0 }
 0x121   : > { %v8281_v27 = vpop.eup %8280  ;;  %v691_v15 = vpop.xlane.xlu1 %690  ;;  %v977_v6 = vsub.f32 %v9348_v17, %v9536_v58  ;;  %v978_v7 = vsub.f32 %v9350_v18, %v9546_v3 }
 0x122   : > { %v1011_v57 = vadd.f32 1e-05, %v947_v16  ;;  %v948_v48 = vmax.f32 %v916_v23, 0.0  ;;  %v885_v31 = vmul.f32 %v9576_v2, %v9576_v2  ;;  %v9586_v40 = vmul.f32 0.0078125, %v691_v15 }
 0x123   : > { %v8283_v61 = vpop.eup %8282  ;;  %v818_v49 = vpop.xlane.xlu0 %817  ;;  %v9588_v55 = vpack.c.bf16 %v1138_v45, %v1137_v39  ;;  %v1063_v36 = vmul.f32 %v8281_v27, %v967_v56 }
 0x124   : > { %8288 = vrsqrt.f32 %v1011_v57  ;;  %v1012_v13 = vadd.f32 1e-05, %v948_v48  ;;  %v853_v60 = vmul.f32 0.0078125, %v818_v49  ;;  %v1064_v20 = vmul.f32 %v8283_v61, %v968_v46 }
 0x125   : > { %v886_v42 = vmul.f32 %v9586_v40, %v9586_v40  ;;  %1426 = vmatmul.mubr.bf16.gmra.mxu0 %v9588_v55  ;;  %v820_v14 = vpop.xlane.xlu1 %819  ;;  %v1101_v19 = vmul.f32 %v9445_v53, %v1063_v36 }
 0x126   : > { %8290 = vrsqrt.f32 %v1012_v13  ;;  %v917_v1 = vsub.f32 %v853_v60, %v885_v31  ;;  %v854_v37 = vmul.f32 0.0078125, %v820_v14  ;;  %1435 = vmatprep.mubr.bf16.mxu0 %v13371_v10  ;;  %v1102_v62 = vmul.f32 %v9445_v53, %v1064_v20 }
 0x127   : > { %v693_v8 = vpop.xlane.xlu0 %692  ;;  %v1139_v0 = vadd.f32 %v9453_v4, %v1101_v19  ;;  %v979_v19 = vsub.f32 %v9358_v21, %v9556_v52 }
 0x128   : > { %v949_v5 = vmax.f32 %v917_v1, 0.0  ;;  %v918_v33 = vsub.f32 %v854_v37, %v886_v42  ;;  %v9596_v63 = vmul.f32 0.0078125, %v693_v8  ;;  %v1140_v9 = vadd.f32 %v9453_v4, %v1102_v62 }
 0x129   : > { %v8285_v34 = vpop.eup %8284  ;;  %v695_v12 = vpop.xlane.xlu1 %694  ;;  %v980_v62 = vsub.f32 %v9360_v22, %v9566_v59 }
 0x12a   : > { %v1013_v16 = vadd.f32 1e-05, %v949_v5  ;;  %v950_v23 = vmax.f32 %v918_v33, 0.0  ;;  %v887_v45 = vmul.f32 %v9596_v63, %v9596_v63  ;;  %v9606_v56 = vmul.f32 0.0078125, %v695_v12 }
 0x12b   : > { %v8287_v27 = vpop.eup %8286  ;;  %v822_v15 = vpop.xlane.xlu0 %821  ;;  %v9608_v39 = vpack.c.bf16 %v1140_v9, %v1139_v0  ;;  %v1073_v46 = vmul.f32 %v8285_v34, %v977_v6  ;;  %v8157_v0 = vld [vmem:[%s9187_s22 + $0x98] ss:$12 sps:$4 sm:$0xff]  }
 0x12c   : > { %8292 = vrsqrt.f32 %v1013_v16  ;;  %v1014_v17 = vadd.f32 1e-05, %v950_v23  ;;  %v855_v58 = vmul.f32 0.0078125, %v822_v15  ;;  %v1074_v57 = vmul.f32 %v8287_v27, %v978_v7 }
 0x12d   : > { %v888_v48 = vmul.f32 %v9606_v56, %v9606_v56  ;;  %1436 = vmatmul.mubr.bf16.gmra.mxu0 %v9608_v39  ;;  %v824_v18 = vpop.xlane.xlu1 %823  ;;  %v1111_v3 = vmul.f32 %v9445_v53, %v1073_v46 }
 0x12e   : > { %8294 = vrsqrt.f32 %v1014_v17  ;;  %v919_v31 = vsub.f32 %v855_v58, %v887_v45  ;;  %v856_v61 = vmul.f32 0.0078125, %v824_v18  ;;  %v1112_v49 = vmul.f32 %v9445_v53, %v1074_v57  ;;  %1445 = vmatprep.mubr.bf16.mxu0 %v13371_v10  ;;  %v8158_v17 = vld [vmem:[%s9187_s22 + $0x80] ss:$12 sps:$4 sm:$0xff]  }
 0x12f   : > { %v665_v36 = vpop.xlane.xlu0 %664  ;;  %v1149_v37 = vadd.f32 %v9453_v4, %v1111_v3 }
 0x130   : > { %v951_v13 = vmax.f32 %v919_v31, 0.0  ;;  %v920_v60 = vsub.f32 %v856_v61, %v888_v48  ;;  %v9616_v20 = vmul.f32 0.0078125, %v665_v36  ;;  %v1150_v42 = vadd.f32 %v9453_v4, %v1112_v49 }
 0x131   : > { %v8289_v14 = vpop.eup %8288  ;;  %v667_v1 = vpop.xlane.xlu1 %666  ;;  %v981_v31 = vsub.f32 %v9368_v25, %v9576_v2  ;;  %v982_v49 = vsub.f32 %v9370_v26, %v9586_v40  ;;  %v8159_v25 = vld [vmem:[%s9187_s22 + $0x68] ss:$12 sps:$4 sm:$0xff]  }
 0x132   : > { %v1015_v8 = vadd.f32 1e-05, %v951_v13  ;;  %v952_v5 = vmax.f32 %v920_v60, 0.0  ;;  %v873_v33 = vmul.f32 %v9616_v20, %v9616_v20  ;;  %v9626_v34 = vmul.f32 0.0078125, %v667_v1 }
 0x133   : > { %v8291_v9 = vpop.eup %8290  ;;  %v794_v6 = vpop.xlane.xlu0 %793  ;;  %v9628_v12 = vpack.c.bf16 %v1150_v42, %v1149_v37  ;;  %v1075_v7 = vmul.f32 %v8289_v14, %v979_v19 }
 0x134   : > { %8296 = vrsqrt.f32 %v1015_v8  ;;  %v1016_v21 = vadd.f32 1e-05, %v952_v5  ;;  %v841_v52 = vmul.f32 0.0078125, %v794_v6  ;;  %v1076_v16 = vmul.f32 %v8291_v9, %v980_v62 }
 0x135   : > { %v874_v22 = vmul.f32 %v9626_v34, %v9626_v34  ;;  %1486 = vmatmul.mubr.bf16.vlgmr.msra.gmra.mxu1 %v9628_v12  ;;  %v796_v59 = vpop.xlane.xlu1 %795  ;;  %v1113_v23 = vmul.f32 %v9445_v53, %v1075_v7  ;;  %v8160_v7 = vld [vmem:[%s9187_s22 + $0x50] ss:$12 sps:$4 sm:$0xff]  }
 0x136   : > { %8298 = vrsqrt.f32 %v1016_v21  ;;  %v905_v45 = vsub.f32 %v841_v52, %v873_v33  ;;  %7657 = vmatpush3.bf16.msra.mxu1 %v9411_v50  ;;  %v842_v27 = vmul.f32 0.0078125, %v796_v59  ;;  %1495 = vmatprep.mubr.bf16.mxu1 %v13371_v10  ;;  %v1114_v15 = vmul.f32 %v9445_v53, %v1076_v16 }
 0x137   : > { %v669_v46 = vpop.xlane.xlu0 %668  ;;  %7658 = vmatprep.subr.bf16.mxu1 %v8157_v0  ;;  %v1151_v61 = vadd.f32 %v9453_v4, %v1113_v23  ;;  %v983_v23 = vsub.f32 %v9378_v29, %v9596_v63  ;;  %v8161_v29 = vld [vmem:[%s9187_s22 + $0x38] ss:$12 sps:$4 sm:$0xff]  }
 0x138   : > { %v937_v58 = vmax.f32 %v905_v45, 0.0  ;;  %v906_v57 = vsub.f32 %v842_v27, %v874_v22  ;;  %v9639_v48 = vmul.f32 0.0078125, %v669_v46  ;;  %v1152_v18 = vadd.f32 %v9453_v4, %v1114_v15 }
 0x139   : > { %v8293_v3 = vpop.eup %8292  ;;  %v671_v50 = vpop.xlane.xlu1 %670  ;;  %v984_v15 = vsub.f32 %v9380_v30, %v9606_v56 }
 0x13a   : > { %v1001_v36 = vadd.f32 1e-05, %v937_v58  ;;  %v938_v13 = vmax.f32 %v906_v57, 0.0  ;;  %v875_v60 = vmul.f32 %v9639_v48, %v9639_v48  ;;  %7659 = vmatpush3.bf16.msra.mxu1 %v8157_v0  ;;  %v9649_v14 = vmul.f32 0.0078125, %v671_v50 }
 0x13b   : > { %v8295_v42 = vpop.eup %8294  ;;  %v798_v19 = vpop.xlane.xlu0 %797  ;;  %v9651_v1 = vpack.c.bf16 %v1152_v18, %v1151_v61  ;;  %7660 = vmatprep.subr.bf16.mxu1 %v8158_v17  ;;  %v1077_v2 = vmul.f32 %v8293_v3, %v981_v31 }
 0x13c   : > { %8300 = vrsqrt.f32 %v1001_v36  ;;  %v1002_v37 = vadd.f32 1e-05, %v938_v13  ;;  %v843_v62 = vmul.f32 0.0078125, %v798_v19  ;;  %v1078_v26 = vmul.f32 %v8295_v42, %v982_v49 }
 0x13d   : > { %v876_v40 = vmul.f32 %v9649_v14, %v9649_v14  ;;  %1496 = vmatmul.mubr.bf16.gmra.mxu1 %v9651_v1  ;;  %v800_v8 = vpop.xlane.xlu1 %799  ;;  %v1115_v5 = vmul.f32 %v9445_v53, %v1077_v2 }
 0x13e   : > { %8302 = vrsqrt.f32 %v1002_v37  ;;  %v907_v33 = vsub.f32 %v843_v62, %v875_v60  ;;  %7661 = vmatpush3.bf16.msra.mxu1 %v8158_v17  ;;  %v844_v9 = vmul.f32 0.0078125, %v800_v8  ;;  %1505 = vmatprep.mubr.bf16.mxu1 %v13371_v10  ;;  %v1116_v6 = vmul.f32 %v9445_v53, %v1078_v26 }
 0x13f   : > { %v673_v0 = vpop.xlane.xlu0 %672  ;;  %7662 = vmatprep.subr.bf16.mxu1 %v8159_v25  ;;  %v1153_v27 = vadd.f32 %v9453_v4, %v1115_v5  ;;  %v969_v8 = vsub.f32 %v9388_v35, %v9616_v20  ;;  %v8163_v35 = vld [vmem:[%s9187_s22 + $0x8] ss:$12 sps:$4 sm:$0xff]  }
 0x140   : > { %v939_v21 = vmax.f32 %v907_v33, 0.0  ;;  %v908_v52 = vsub.f32 %v844_v9, %v876_v40  ;;  %v9661_v16 = vmul.f32 0.0078125, %v673_v0  ;;  %v1154_v22 = vadd.f32 %v9453_v4, %v1116_v6 }
 0x141   : > { %v8297_v59 = vpop.eup %8296  ;;  %v675_v45 = vpop.xlane.xlu1 %674  ;;  %v970_v9 = vsub.f32 %v9390_v38, %v9626_v34 }
 0x142   : > { %v1003_v46 = vadd.f32 1e-05, %v939_v21  ;;  %v940_v17 = vmax.f32 %v908_v52, 0.0  ;;  %v877_v58 = vmul.f32 %v9661_v16, %v9661_v16  ;;  %7663 = vmatpush3.bf16.msra.mxu1 %v8159_v25  ;;  %v9671_v18 = vmul.f32 0.0078125, %v675_v45  ;;  %v8162_v25 = vld [vmem:[%s9187_s22 + $0x20] ss:$12 sps:$4 sm:$0xff]  }
 0x143   : > { %v8299_v57 = vpop.eup %8298  ;;  %v802_v3 = vpop.xlane.xlu0 %801  ;;  %v9673_v31 = vpack.c.bf16 %v1154_v22, %v1153_v27  ;;  %7664 = vmatprep.subr.bf16.mxu1 %v8160_v7  ;;  %v1079_v63 = vmul.f32 %v8297_v59, %v983_v23 }
 0x144   : > { %8304 = vrsqrt.f32 %v1003_v46  ;;  %v1004_v50 = vadd.f32 1e-05, %v940_v17  ;;  %v845_v61 = vmul.f32 0.0078125, %v802_v3  ;;  %v1080_v30 = vmul.f32 %v8299_v57, %v984_v15 }
 0x145   : > { %v878_v56 = vmul.f32 %v9671_v18, %v9671_v18  ;;  %1506 = vmatmul.mubr.bf16.gmra.mxu1 %v9673_v31  ;;  %v804_v49 = vpop.xlane.xlu1 %803  ;;  %v1117_v36 = vmul.f32 %v9445_v53, %v1079_v63  ;;  %v971_v57 = vsub.f32 %v9398_v43, %v9639_v48 }
 0x146   : > { %8306 = vrsqrt.f32 %v1004_v50  ;;  %v909_v13 = vsub.f32 %v845_v61, %v877_v58  ;;  %7665 = vmatpush3.bf16.msra.mxu1 %v8160_v7  ;;  %v846_v60 = vmul.f32 0.0078125, %v804_v49  ;;  %1515 = vmatprep.mubr.bf16.mxu1 %v13371_v10  ;;  %v1118_v42 = vmul.f32 %v9445_v53, %v1080_v30 }
 0x147   : > { %v677_v19 = vpop.xlane.xlu0 %676  ;;  %7666 = vmatprep.subr.bf16.mxu1 %v8161_v29  ;;  %v1155_v33 = vadd.f32 %v9453_v4, %v1117_v36  ;;  %v972_v30 = vsub.f32 %v9400_v44, %v9649_v14  ;;  %v973_v14 = vsub.f32 %v9408_v47, %v9661_v16  ;;  %v8892_v16 = vld [vmem:[#allocation2 + $0x70] sm:$0xff] }
 0x148   : > { %v941_v2 = vmax.f32 %v909_v13, 0.0  ;;  %v910_v37 = vsub.f32 %v846_v60, %v878_v56  ;;  %v9683_v62 = vmul.f32 0.0078125, %v677_v19  ;;  %v1156_v26 = vadd.f32 %v9453_v4, %v1118_v42 }
 0x149   : > { %v8301_v40 = vpop.eup %8300  ;;  %v679_v5 = vpop.xlane.xlu1 %678 }
 0x14a   : > { %v1005_v6 = vadd.f32 1e-05, %v941_v2  ;;  %v942_v0 = vmax.f32 %v910_v37, 0.0  ;;  %v879_v7 = vmul.f32 %v9683_v62, %v9683_v62  ;;  %7667 = vmatpush3.bf16.msra.mxu1 %v8161_v29  ;;  %v9693_v52 = vmul.f32 0.0078125, %v679_v5 }
 0x14b   : > { %v8303_v21 = vpop.eup %8302  ;;  %v806_v22 = vpop.xlane.xlu0 %805  ;;  %v9695_v59 = vpack.c.bf16 %v1156_v26, %v1155_v33  ;;  %7668 = vmatprep.subr.bf16.mxu1 %v8162_v25  ;;  %v1065_v20 = vmul.f32 %v8301_v40, %v969_v8  ;;  %v974_v2 = vsub.f32 %v9413_v51, %v9671_v18  ;;  %v975_v8 = vsub.f32 %v8892_v16, %v9683_v62  ;;  %v8893_v33 = vld [vmem:[#allocation2 + $0xc0] sm:$0xff] }
 0x14c   : > { %8308 = vrsqrt.f32 %v1005_v6  ;;  %v1006_v23 = vadd.f32 1e-05, %v942_v0  ;;  %v847_v45 = vmul.f32 0.0078125, %v806_v22  ;;  %v1066_v27 = vmul.f32 %v8303_v21, %v970_v9 }
 0x14d   : > { %v880_v38 = vmul.f32 %v9693_v52, %v9693_v52  ;;  %1516 = vmatmul.mubr.bf16.gmra.mxu1 %v9695_v59  ;;  %v808_v34 = vpop.xlane.xlu1 %807  ;;  %v1103_v15 = vmul.f32 %v9445_v53, %v1065_v20  ;;  %v976_v9 = vsub.f32 %v8893_v33, %v9693_v52 }
 0x14e   : > { %8310 = vrsqrt.f32 %v1006_v23  ;;  %v911_v46 = vsub.f32 %v847_v45, %v879_v7  ;;  %7669 = vmatpush3.bf16.msra.mxu1 %v8162_v25  ;;  %7672 = vmatprep.mubr.bf16.mxu1 %v9468_v32  ;;  %v848_v17 = vmul.f32 0.0078125, %v808_v34  ;;  %v1104_v58 = vmul.f32 %v9445_v53, %v1066_v27 }
 0x14f   : > { %7670 = vmatprep.subr.bf16.mxu1 %v8163_v35  ;;  %v1141_v63 = vadd.f32 %v9453_v4, %v1103_v15 }
 0x150   : > { %v943_v3 = vmax.f32 %v911_v46, 0.0  ;;  %v912_v29 = vsub.f32 %v848_v17, %v880_v38  ;;  %v1142_v50 = vadd.f32 %v9453_v4, %v1104_v58 }
 0x151   : > { %v8305_v61 = vpop.eup %8304 }
 0x152   : > { %v1007_v56 = vadd.f32 1e-05, %v943_v3  ;;  %v944_v49 = vmax.f32 %v912_v29, 0.0  ;;  %7671 = vmatpush3.bf16.msra.mxu1 %v8163_v35  ;;  %v1165_v32 = vpack.c.bf16 %v1142_v50, %v1141_v63  ;;  %v1067_v36 = vmul.f32 %v8305_v61, %v971_v57 }
 0x153   : > { %v8307_v13 = vpop.eup %8306 }
 0x154   : > { %8312 = vrsqrt.f32 %v1007_v56  ;;  %v1008_v60 = vadd.f32 1e-05, %v944_v49  ;;  %1446 = vmatmul.mubr.bf16.gmra.mxu0 %v1165_v32  ;;  %v1068_v43 = vmul.f32 %v8307_v13, %v972_v30  ;;  %v1105_v48 = vmul.f32 %v9445_v53, %v1067_v36 }
 0x155   : > { %7673 = vmatmul.mubr.bf16.vlgmr.msra.gmra.mxu1 %v9488_v54  ;;  %1455 = vmatprep.mubr.bf16.mxu0 %v13371_v10 }
 0x156   : > { %8314 = vrsqrt.f32 %v1008_v60  ;;  %7676 = vmatprep.mubr.bf16.mxu1 %v9508_v41  ;;  %v1106_v44 = vmul.f32 %v9445_v53, %v1068_v43  ;;  %v1143_v42 = vadd.f32 %v9453_v4, %v1105_v48 }
 0x158   : > { %v1144_v19 = vadd.f32 %v9453_v4, %v1106_v44 }
 0x159   : > { %v8309_v25 = vpop.eup %8308 }
 0x15a   : > { %v1166_v37 = vpack.c.bf16 %v1144_v19, %v1143_v42  ;;  %v1069_v54 = vmul.f32 %v8309_v25, %v973_v14 }
 0x15b   : > { %v8311_v26 = vpop.eup %8310 }
 0x15c   : > { %1456 = vmatmul.mubr.bf16.gmra.mxu0 %v1166_v37  ;;  %v1070_v40 = vmul.f32 %v8311_v26, %v974_v2  ;;  %v1107_v41 = vmul.f32 %v9445_v53, %v1069_v54 }
 0x15d   : > { %7677 = vmatmul.mubr.bf16.gmra.mxu1 %v9528_v24  ;;  %1465 = vmatprep.mubr.bf16.mxu0 %v13371_v10 }
 0x15e   : > { %7680 = vmatprep.mubr.bf16.mxu1 %v9548_v11  ;;  %v1108_v47 = vmul.f32 %v9445_v53, %v1070_v40  ;;  %v1145_v51 = vadd.f32 %v9453_v4, %v1107_v41 }
 0x160   : > { %v1146_v18 = vadd.f32 %v9453_v4, %v1108_v47 }
 0x161   : > { %v8313_v5 = vpop.eup %8312 }
 0x162   : > { %v1167_v6 = vpack.c.bf16 %v1146_v18, %v1145_v51  ;;  %v1071_v0 = vmul.f32 %v8313_v5, %v975_v8 }
 0x163   : > { %v8315_v24 = vpop.eup %8314 }
 0x164   : > { %1466 = vmatmul.mubr.bf16.gmra.mxu0 %v1167_v6  ;;  %v1072_v7 = vmul.f32 %v8315_v24, %v976_v9  ;;  %v1109_v11 = vmul.f32 %v9445_v53, %v1071_v0 }
 0x165   : > { %7681 = vmatmul.mubr.bf16.gmra.mxu1 %v9568_v28  ;;  %1475 = vmatprep.mubr.bf16.mxu0 %v13371_v10 }
 0x166   : > { %7684 = vmatprep.mubr.bf16.mxu1 %v9588_v55  ;;  %v1110_v62 = vmul.f32 %v9445_v53, %v1072_v7  ;;  %v1147_v21 = vadd.f32 %v9453_v4, %v1109_v11 }
 0x168   : > { %v1148_v22 = vadd.f32 %v9453_v4, %v1110_v62 }
 0x16a   : > { %v1168_v52 = vpack.c.bf16 %v1148_v22, %v1147_v21 }
 0x16c   : > { %1476 = vmatmul.mubr.bf16.gmra.mxu0 %v1168_v52 }
 0x16d   : > { %7685 = vmatmul.mubr.bf16.gmra.mxu1 %v9608_v39 }
 0x16e   : > { %7688 = vmatprep.mubr.bf16.mxu1 %v1165_v32 }
 0x175   : > { %7689 = vmatmul.mubr.bf16.gmra.mxu1 %v1166_v37 }
 0x176   : > { %7692 = vmatprep.mubr.bf16.mxu1 %v1167_v6 }
 0x17d   : > { %7693 = vmatmul.mubr.bf16.gmra.mxu1 %v1168_v52 }
 0x17e   : > { %7696 = vmatprep.mubr.bf16.mxu1 %v9628_v12 }
 0x185   : > { %7697 = vmatmul.mubr.bf16.gmra.mxu1 %v9651_v1 }
 0x186   : > { %7700 = vmatprep.mubr.bf16.mxu1 %v9673_v31 }
 0x18d   : > { %7701 = vmatmul.mubr.bf16.gmra.mxu1 %v9695_v59 }
 0x1b5   : > { %v1367_v53 = vpop.f32.mrf.mxu0 }
 0x1b7   : > { %v1369_v28 = vpop.f32.mrf.mxu0 }
 0x1b9   : > { %v1371_v55 = vpop.f32.mrf.mxu0 }
 0x1ba   : > { %v9742_v4 = vpack.c.bf16 %v1371_v55, %v1367_v53 }
 0x1bb   : > { %v1373_v35 = vpop.f32.mrf.mxu0 }
 0x1bc   : > { %7720 = vmatprep.mubr.msk.bf16.mxu1 %vm1895_vm0, %v9742_v4  ;;  %v9778_v8 = vpack.c.bf16 %v1373_v35, %v1369_v28 }
 0x1bd   : > { %v1377_v39 = vpop.f32.mrf.mxu0 }
 0x1bf   : > { %v1379_v20 = vpop.f32.mrf.mxu0 }
 0x1c1   : > { %v1381_v23 = vpop.f32.mrf.mxu0 }
 0x1c2   : > { %v9789_v9 = vpack.c.bf16 %v1381_v23, %v1377_v39 }
 0x1c3   : > { %v1383_v12 = vpop.f32.mrf.mxu0 }
 0x1c4   : > { %v9780_v51 = vpack.c.bf16 %v1383_v12, %v1379_v20 }
 0x1c5   : > { %v1387_v45 = vpop.f32.mrf.mxu0 }
 0x1c7   : > { %v1389_v1 = vpop.f32.mrf.mxu0 }
 0x1c9   : > { %v1391_v27 = vpop.f32.mrf.mxu0 }
 0x1ca   : > { %v9746_v31 = vpack.c.bf16 %v1391_v27, %v1387_v45 }
 0x1cb   : > { %v1393_v59 = vpop.f32.mrf.mxu0 }
 0x1cc   : > { %v9770_v26 = vpack.c.bf16 %v1393_v59, %v1389_v1 }
 0x1cd   : > { %v9748_v38 = vpop.f32.mrf.mxu0 }
 0x1cf   : > { %v1399_v34 = vpop.f32.mrf.mxu0 }
 0x1d1   : > { %v9750_v15 = vpop.f32.mrf.mxu0 }
 0x1d3   : > { %v1403_v46 = vpop.f32.mrf.mxu0 }
 0x1d4   : > { %v1697_v40 = vpack.c.bf16 %v1403_v46, %v1399_v34 }
 0x1d5   : > { %v1407_v17 = vpop.f32.mrf.mxu0 }
 0x1d7   : > { %v1409_v58 = vpop.f32.mrf.mxu0 }
 0x1d9   : > { %v1411_v57 = vpop.f32.mrf.mxu0 }
 0x1da   : > { %v9752_v3 = vpack.c.bf16 %v1411_v57, %v1407_v17 }
 0x1db   : > { %v1413_v29 = vpop.f32.mrf.mxu0 }
 0x1dc   : > { %v1700_v19 = vpack.c.bf16 %v1413_v29, %v1409_v58 }
 0x1dd   : > { %v9754_v63 = vpop.f32.mrf.mxu0 }
 0x1de   : > { %v1933_v55 = vsel %vm1895_vm0, %v1700_v19, 0 }
 0x1df   : > { %v1419_v50 = vpop.f32.mrf.mxu0 }
 0x1e1   : > { %v9756_v61 = vpop.f32.mrf.mxu0 }
 0x1e2   : > { %v9831_v34 = vpack.c.bf16 %v9756_v61, %v9754_v63 }
 0x1e3   : > { %v1423_v30 = vpop.f32.mrf.mxu0 }
 0x1e4   : > { %v1703_v44 = vpack.c.bf16 %v1423_v30, %v1419_v50 }
 0x1e5   : > { %v1427_v56 = vpop.f32.mrf.mxu0 }
 0x1e6   : > { %v1936_v11 = vsel %vm1895_vm0, %v1703_v44, 0 }
 0x1e7   : > { %v1429_v49 = vpop.f32.mrf.mxu0 }
 0x1e9   : > { %v1431_v32 = vpop.f32.mrf.mxu0 }
 0x1ea   : > { %v9758_v36 = vpack.c.bf16 %v1431_v32, %v1427_v56  ;;  %v1927_v56 = vsel %vm1895_vm0, %v9770_v26, 0 }
 0x1eb   : > { %v1433_v13 = vpop.f32.mrf.mxu0 }
 0x1ec   : > { %v1706_v60 = vpack.c.bf16 %v1433_v13, %v1429_v49 }
 0x1ed   : > { %v9760_v43 = vpop.f32.mrf.mxu0 }
 0x1ee   : > { %1811 = vrot.lane.b32.xlu1 %v1706_v60, %s9025_s0  ;;  %v1939_v33 = vsel %vm1895_vm0, %v1706_v60, 0 }
 0x1ef   : > { %v1439_v48 = vpop.f32.mrf.mxu0 }
 0x1f1   : > { %v9763_v14 = vpop.f32.mrf.mxu0 }
 0x1f2   : > { %1809 = vrot.lane.b32.xlu1 %v1703_v44, %s9025_s0 }
 0x1f3   : > { %v1443_v42 = vpop.f32.mrf.mxu0 }
 0x1f4   : > { %v1709_v25 = vpack.c.bf16 %v1443_v42, %v1439_v48 }
 0x1f5   : > { %v1487_v2 = vpop.f32.mrf.mxu1 }
 0x1f6   : > { %1807 = vrot.lane.b32.xlu1 %v1700_v19, %s9025_s0  ;;  %1813 = vrot.lane.b32.xlu0 %v1709_v25, %s9025_s0  ;;  %v1942_v37 = vsel %vm1895_vm0, %v1709_v25, 0 }
 0x1f7   : > { %8024 = vmatprep.subr.msk.bf16.mxu1 %vm1895_vm0, %v1709_v25  ;;  %v1489_v54 = vpop.f32.mrf.mxu1 }
 0x1f8   : > { %7705 = vmatpush3.bf16.xpose.msra.mxu1 %v1942_v37 }
 0x1f9   : > { %8025 = vmatprep.subr.msk.bf16.mxu1 %vm1895_vm0, %v1706_v60  ;;  %v1491_v41 = vpop.f32.mrf.mxu1 }
 0x1fa   : > { %v9773_v47 = vpack.c.bf16 %v1491_v41, %v1487_v2  ;;  %1803 = vrot.lane.b32.xlu1 %v9770_v26, %s9025_s0  ;;  %1805 = vrot.lane.b32.xlu0 %v1697_v40, %s9025_s0  ;;  %v1924_v2 = vsel %vm1895_vm0, %v9780_v51, 0 }
 0x1fb   : > { %v1493_v16 = vpop.f32.mrf.mxu1 }
 0x1fc   : > { %v9815_v20 = vpack.c.bf16 %v1493_v16, %v1489_v54 }
 0x1fd   : > { %v9782_v18 = vpop.f32.mrf.mxu1 }
 0x1fe   : > { %1799 = vrot.lane.b32.xlu1 %v9778_v8, %s9025_s0  ;;  %1801 = vrot.lane.b32.xlu0 %v9780_v51, %s9025_s0 }
 0x1ff   : > { %v1499_v5 = vpop.f32.mrf.mxu1 }
 0x200   : > { %7707 = vmatpush3.bf16.xpose.msra.mxu1 %v1939_v33 }
 0x201   : > { %8026 = vmatprep.subr.msk.bf16.mxu1 %vm1895_vm0, %v1703_v44  ;;  %v9792_v6 = vpop.f32.mrf.mxu1 }
 0x202   : > { %1753 = vrot.lane.b32.xlu1 %v9789_v9, %s9025_s0  ;;  %1751 = vrot.lane.b32.xlu0 %v9742_v4, %s9025_s0  ;;  %v9808_v4 = vpack.c.bf16 %v9750_v15, %v9748_v38  ;;  %v1930_v38 = vsel %vm1895_vm0, %v1697_v40, 0 }
 0x203   : > { %v1503_v0 = vpop.f32.mrf.mxu1 }
 0x204   : > { %v1727_v29 = vpack.c.bf16 %v1503_v0, %v1499_v5  ;;  %v9887_v0 = vpack.c.bf16 %v9763_v14, %v9760_v43 }
 0x205   : > { %v1507_v24 = vpop.f32.mrf.mxu1 }
 0x206   : > { %v2081_v37 = vsel %vm1895_vm0, %v1727_v29, 0 }
 0x207   : > { %v1509_v7 = vpop.f32.mrf.mxu1 }
 0x208   : > { %7709 = vmatpush3.bf16.xpose.msra.mxu1 %v1936_v11  ;;  %v2078_v11 = vsel %vm1895_vm0, %v9815_v20, 0 }
 0x209   : > { %8027 = vmatprep.subr.msk.bf16.mxu1 %vm1895_vm0, %v1700_v19  ;;  %v1511_v62 = vpop.f32.mrf.mxu1 }
 0x20a   : > { %v9800_v21 = vpack.c.bf16 %v1511_v62, %v1507_v24 }
 0x20b   : > { %v1513_v22 = vpop.f32.mrf.mxu1 }
 0x20c   : > { %v1730_v52 = vpack.c.bf16 %v1513_v22, %v1509_v7  ;;  %v1921_v7 = vsel %vm1895_vm0, %v9778_v8, 0 }
 0x20d   : > { %v9802_v53 = vpop.f32.mrf.mxu1 }
 0x20e   : > { %1827 = vrot.lane.b32.xlu1 %v1730_v52, %s9025_s0  ;;  %v2084_v49 = vsel %vm1895_vm0, %v1730_v52, 0 }
 0x20f   : > { %v1519_v28 = vpop.f32.mrf.mxu1 }
 0x210   : > { %7711 = vmatpush3.bf16.xpose.msra.mxu1 %v1933_v55 }
 0x211   : > { %8028 = vmatprep.subr.msk.bf16.mxu1 %vm1895_vm0, %v1697_v40  ;;  %v9811_v35 = vpop.f32.mrf.mxu1 }
 0x212   : > { %1757 = vrot.lane.b32.xlu1 %v9808_v4, %s9025_s0 }
 0x213   : > { %v1523_v39 = vpop.f32.mrf.mxu1 }
 0x214   : > { %v1733_v23 = vpack.c.bf16 %v1523_v39, %v1519_v28  ;;  %v1447_v12 = vpop.f32.mrf.mxu0 }
 0x215   : > { %v9817_v45 = vpop.f32.mrf.mxu1 }
 0x216   : > { %1823 = vrot.lane.b32.xlu1 %v9815_v20, %s9025_s0  ;;  %1829 = vrot.lane.b32.xlu0 %v1733_v23, %s9025_s0  ;;  %v9822_v1 = vpop.f32.mrf.mxu0  ;;  %v2087_v27 = vsel %vm1895_vm0, %v1733_v23, 0 }
 0x217   : > { %8032 = vmatprep.subr.msk.bf16.mxu0 %vm1895_vm0, %v1733_v23  ;;  %v9826_v59 = vpop.f32.mrf.mxu1 }
 0x218   : > { %7713 = vmatpush3.bf16.xpose.msra.mxu1 %v1930_v38  ;;  %7737 = vmatpush3.bf16.xpose.msra.mxu0 %v2087_v27  ;;  %v1451_v15 = vpop.f32.mrf.mxu0 }
 0x219   : > { %8029 = vmatprep.subr.msk.bf16.mxu1 %vm1895_vm0, %v9770_v26  ;;  %8033 = vmatprep.subr.msk.bf16.mxu0 %vm1895_vm0, %v1730_v52  ;;  %v9836_v46 = vpack.c.bf16 %v1451_v15, %v1447_v12  ;;  %v9838_v17 = vpop.f32.mrf.mxu1 }
 0x21a   : > { %1761 = vrot.lane.b32.xlu1 %v9831_v34, %s9025_s0  ;;  %1755 = vrot.lane.b32.xlu0 %v9746_v31, %s9025_s0  ;;  %v1453_v58 = vpop.f32.mrf.mxu0 }
 0x21b   : > { %v9844_v57 = vpop.f32.mrf.mxu1  ;;  %7752 = vmatprep.mubr.msk.bf16.mxu0 %vm1895_vm0, %v9836_v46  ;;  %v1712_v28 = vpack.c.bf16 %v1453_v58, %v9822_v1 }
 0x21c   : > { %v1457_v63 = vpop.f32.mrf.mxu0 }
 0x21d   : > { %v9848_v50 = vpop.f32.mrf.mxu1 }
 0x21e   : > { %1825 = vrot.lane.b32.xlu0 %v1727_v29, %s9025_s0  ;;  %v1459_v61 = vpop.f32.mrf.mxu0 }
 0x21f   : > { %v9851_v30 = vpop.f32.mrf.mxu1 }
 0x220   : > { %7715 = vmatpush3.bf16.xpose.msra.mxu1 %v1927_v56  ;;  %7739 = vmatpush3.bf16.xpose.msra.mxu0 %v2084_v49  ;;  %v1461_v32 = vpop.f32.mrf.mxu0  ;;  %v2066_v49 = vsel %vm1895_vm0, %v1712_v28, 0 }
 0x221   : > { %8030 = vmatprep.subr.msk.bf16.mxu1 %vm1895_vm0, %v9780_v51  ;;  %8034 = vmatprep.subr.msk.bf16.mxu0 %vm1895_vm0, %v1727_v29  ;;  %v9859_v13 = vpop.f32.mrf.mxu1  ;;  %v1714_v39 = vpack.c.bf16 %v1461_v32, %v1457_v63 }
 0x222   : > { %1759 = vrot.lane.b32.xlu0 %v9752_v3, %s9025_s0  ;;  %v1463_v60 = vpop.f32.mrf.mxu0 }
 0x223   : > { %v9863_v48 = vpop.f32.mrf.mxu1 }
 0x224   : > { %v9865_v44 = vpop.f32.mrf.mxu0 }
 0x225   : > { %v9867_v42 = vpop.f32.mrf.mxu1 }
 0x226   : > { %v1469_v19 = vpop.f32.mrf.mxu0 }
 0x227   : > { %v9869_v25 = vpop.f32.mrf.mxu1 }
 0x228   : > { %7717 = vmatpush3.bf16.xpose.msra.mxu1 %v1924_v2  ;;  %7741 = vmatpush3.bf16.xpose.msra.mxu0 %v2081_v37  ;;  %v1471_v54 = vpop.f32.mrf.mxu0 }
 0x229   : > { %8031 = vmatprep.subr.msk.bf16.mxu1 %vm1895_vm0, %v9778_v8  ;;  %8035 = vmatprep.subr.msk.bf16.mxu0 %vm1895_vm0, %v9815_v20  ;;  %v9878_v26 = vpop.f32.mrf.mxu1 }
 0x22a   : > { %v1473_v40 = vpop.f32.mrf.mxu0 }
 0x22b   : > { %v1718_v41 = vpack.c.bf16 %v1473_v40, %v1469_v19  ;;  %v9880_v16 = vpop.f32.mrf.mxu1 }
 0x22c   : > { %v1477_v5 = vpop.f32.mrf.mxu0 }
 0x22d   : > { %v9882_v33 = vpop.f32.mrf.mxu1  ;;  %1819 = vrot.lane.b32.xlu1 %v1718_v41, %s9025_s0  ;;  %v2072_v58 = vsel %vm1895_vm0, %v1718_v41, 0 }
 0x22e   : > { %v1479_v51 = vpop.f32.mrf.mxu0 }
 0x22f   : > { %v1608_v24 = vpop.f32.mrf.mxu1 }
 0x230   : > { %7719 = vmatpush3.bf16.xpose.msra.mxu1 %v1921_v7  ;;  %7743 = vmatpush3.bf16.xpose.msra.mxu0 %v2078_v11  ;;  %v1481_v62 = vpop.f32.mrf.mxu0 }
 0x231   : > { %v7687_v22 = vpop.f32.mrf.mxu1  ;;  %1765 = vrot.lane.b32.xlu1 %v9887_v0, %s9025_s0  ;;  %v1720_v1 = vpack.c.bf16 %v1481_v62, %v1477_v5 }
 0x232   : > { %v1483_v52 = vpop.f32.mrf.mxu0  ;;  %v9969_v32 = vpack.c.bf16 %v7687_v22, %v9882_v33 }
 0x233   : > { %v1721_v55 = vpack.c.bf16 %v1483_v52, %v1479_v51  ;;  %v1611_v43 = vpop.f32.mrf.mxu1 }
 0x235   : > { %v7690_v14 = vpop.f32.mrf.mxu1  ;;  %1815 = vrot.lane.b32.xlu1 %v1712_v28, %s9025_s0  ;;  %1821 = vrot.lane.b32.xlu0 %v1721_v55, %s9025_s0  ;;  %v2075_v8 = vsel %vm1895_vm0, %v1721_v55, 0 }
 0x236   : > { %8036 = vmatprep.subr.msk.bf16.mxu0 %vm1895_vm0, %v1721_v55 }
 0x237   : > { %7721 = vmatmul.mubr.msk.bf16.vlgmr.msra.gmra.mxu1 %vm1895_vm0, %v9789_v9  ;;  %v9902_v20 = vpop.f32.mrf.mxu1  ;;  %v1715_v9 = vpack.c.bf16 %v1463_v60, %v1459_v61  ;;  %v9941_v61 = vpack.c.bf16 %v1611_v43, %v1608_v24 }
 0x238   : > { %13507 = vst [vmem:[#allocation17_spill] sm:$0xff] %v9902_v20  ;;  %7724 = vmatprep.mubr.msk.bf16.mxu1 %vm1895_vm0, %v9746_v31  ;;  %7745 = vmatpush3.bf16.xpose.msra.mxu0 %v2075_v8  ;;  %v9918_v31 = vpack.c.bf16 %v9792_v6, %v9782_v18  ;;  %v1732_v18 = vpack.c.bf16 %v9811_v35, %v9802_v53 }
 0x239   : > { %8037 = vmatprep.subr.msk.bf16.mxu0 %vm1895_vm0, %v1718_v41  ;;  %v7691_v23 = vpop.f32.mrf.mxu1  ;;  %1769 = vrot.lane.b32.xlu1 %v1714_v39, %s9025_s0  ;;  %v9955_v35 = vpack.c.bf16 %v9878_v26, %v9867_v42  ;;  %v9989_v42 = vpack.c.bf16 %v9844_v57, %v9826_v59 }
 0x23a   : > { %v9908_v12 = vpack.c.bf16 %v7691_v23, %v7690_v14  ;;  %1763 = vrot.lane.b32.xlu0 %v9758_v36, %s9025_s0 }
 0x23b   : > { %v9912_v27 = vpop.f32.mrf.mxu1 }
 0x23c   : > { %13508 = vst [vmem:[#allocation18_spill] sm:$0xff] %v9908_v12  ;;  %13509 = vst [vmem:[#allocation19_spill] sm:$0xff] %v9912_v27 }
 0x23d   : > { %v7694_v38 = vpop.f32.mrf.mxu1  ;;  %1773 = vrot.lane.b32.xlu1 %v1720_v1, %s9025_s0 }
 0x23e   : > { %1817 = vrot.lane.b32.xlu0 %v1715_v9, %s9025_s0 }
 0x23f   : > { %7725 = vmatmul.mubr.msk.bf16.gmra.mxu1 %vm1895_vm0, %v9808_v4  ;;  %v9922_v15 = vpop.f32.mrf.mxu1  ;;  %v1717_v4 = vpack.c.bf16 %v1471_v54, %v9865_v44 }
 0x240   : > { %13510 = vst [vmem:[#allocation20_spill] sm:$0xff] %v9922_v15  ;;  %7728 = vmatprep.mubr.msk.bf16.mxu1 %vm1895_vm0, %v9752_v3  ;;  %7747 = vmatpush3.bf16.xpose.msra.mxu0 %v2072_v58 }
 0x241   : > { %8038 = vmatprep.subr.msk.bf16.mxu0 %vm1895_vm0, %v1715_v9  ;;  %v7695_v29 = vpop.f32.mrf.mxu1  ;;  %1777 = vrot.lane.b32.xlu1 %v9918_v31, %s9025_s0 }
 0x242   : > { %v9930_v63 = vpack.c.bf16 %v7695_v29, %v7694_v38  ;;  %1767 = vrot.lane.b32.xlu0 %v9836_v46, %s9025_s0  ;;  %v2069_v46 = vsel %vm1895_vm0, %v1715_v9, 0 }
 0x243   : > { %v9936_v6 = vpop.f32.mrf.mxu1 }
 0x244   : > { %13511 = vst [vmem:[#allocation21_spill] sm:$0xff] %v9930_v63  ;;  %13512 = vst [vmem:[#allocation22_spill] sm:$0xff] %v9936_v6 }
 0x245   : > { %v7698_v3 = vpop.f32.mrf.mxu1  ;;  %1781 = vrot.lane.b32.xlu1 %v1732_v18, %s9025_s0 }
 0x246   : > { %1771 = vrot.lane.b32.xlu0 %v1717_v4, %s9025_s0 }
 0x247   : > { %7729 = vmatmul.mubr.msk.bf16.gmra.mxu1 %vm1895_vm0, %v9831_v34  ;;  %v1656_v56 = vpop.f32.mrf.mxu1 }
 0x248   : > { %7732 = vmatprep.mubr.msk.bf16.mxu1 %vm1895_vm0, %v9758_v36  ;;  %7749 = vmatpush3.bf16.xpose.msra.mxu0 %v2069_v46  ;;  %v9963_v36 = vpack.c.bf16 %v9859_v13, %v9848_v50  ;;  %v9977_v50 = vpack.c.bf16 %v9863_v48, %v9851_v30  ;;  %v9981_v13 = vpack.c.bf16 %v9880_v16, %v9869_v25 }
 0x249   : > { %8039 = vmatprep.subr.msk.bf16.mxu0 %vm1895_vm0, %v1712_v28  ;;  %v7699_v53 = vpop.f32.mrf.mxu1  ;;  %1859 = vrot.lane.b32.xlu1 %v9941_v61, %s9025_s0  ;;  %v9994_v30 = vpack.c.bf16 %v9838_v17, %v9817_v45 }
 0x24a   : > { %1775 = vrot.lane.b32.xlu0 %v9773_v47, %s9025_s0  ;;  %v10003_v25 = vpack.c.bf16 %v7699_v53, %v7698_v3 }
 0x24b   : > { %v1659_v34 = vpop.f32.mrf.mxu1 }
 0x24c   : > { %13514 = vst [vmem:[#allocation24_spill] sm:$0xff] %v10003_v25  ;;  %v10009_v45 = vpack.c.bf16 %v1659_v34, %v1656_v56 }
 0x24d   : > { %1857 = vrot.lane.b32.xlu1 %v9955_v35, %s9025_s0  ;;  %v7702_v60 = vpop.f32.mrf.mxu1 }
 0x24e   : > { %1779 = vrot.lane.b32.xlu0 %v9800_v21, %s9025_s0  ;;  %13515 = vst [vmem:[#allocation25_spill] sm:$0xff] %v10009_v45 }
 0x24f   : > { %7733 = vmatmul.mubr.msk.bf16.gmra.mxu1 %vm1895_vm0, %v9887_v0  ;;  %v1672_v44 = vpop.f32.mrf.mxu1 }
 0x250   : > { %7751 = vmatpush3.bf16.xpose.msra.mxu0 %v2066_v49 }
 0x251   : > { %1853 = vrot.lane.b32.xlu1 %v9963_v36, %s9025_s0  ;;  %v7703_v48 = vpop.f32.mrf.mxu1 }
 0x252   : > { %1861 = vrot.lane.b32.xlu0 %v9969_v32, %s9025_s0  ;;  %v10001_v19 = vpack.c.bf16 %v7703_v48, %v7702_v60 }
 0x253   : > { %v1675_v59 = vpop.f32.mrf.mxu1 }
 0x254   : > { %13513 = vst [vmem:[#allocation23_spill] sm:$0xff] %v10001_v19  ;;  %v10016_v17 = vpack.c.bf16 %v1675_v59, %v1672_v44 }
 0x255   : > { %1851 = vrot.lane.b32.xlu1 %v9977_v50, %s9025_s0 }
 0x256   : > { %1855 = vrot.lane.b32.xlu0 %v9981_v13, %s9025_s0  ;;  %13516 = vst [vmem:[#allocation26_spill] sm:$0xff] %v10016_v17 }
 0x257   : > { %7753 = vmatmul.mubr.msk.bf16.vlgmr.msra.gmra.mxu0 %vm1895_vm0, %v1714_v39 }
 0x258   : > { %7756 = vmatprep.mubr.msk.bf16.mxu0 %vm1895_vm0, %v1717_v4 }
 0x259   : > { %1847 = vrot.lane.b32.xlu1 %v9989_v42, %s9025_s0 }
 0x25a   : > { %1849 = vrot.lane.b32.xlu0 %v9994_v30, %s9025_s0 }
 0x25d   : > { %1877 = vrot.lane.b32.xlu1 %v10001_v19, %s9025_s0 }
 0x25e   : > { %1873 = vrot.lane.b32.xlu0 %v10003_v25, %s9025_s0 }
 0x25f   : > { %7757 = vmatmul.mubr.msk.bf16.gmra.mxu0 %vm1895_vm0, %v1720_v1 }
 0x260   : > { %7760 = vmatprep.mubr.msk.bf16.mxu0 %vm1895_vm0, %v9773_v47  ;;  %v1812_v57 = vpop.permute.xlu1 %1811 }
 0x261   : > { %1871 = vrot.lane.b32.xlu1 %v10009_v45, %s9025_s0  ;;  %v2229_v40 = vsel %vm1895_vm0, %v1812_v57, 0 }
 0x264   : > { %v1810_v54 = vpop.permute.xlu1 %1809 }
 0x265   : > { %1875 = vrot.lane.b32.xlu1 %v10016_v17, %s9025_s0  ;;  %v2226_v5 = vsel %vm1895_vm0, %v1810_v54, 0 }
 0x267   : > { %7761 = vmatmul.mubr.msk.bf16.gmra.mxu0 %vm1895_vm0, %v9918_v31 }
 0x268   : > { %7764 = vmatprep.mubr.msk.bf16.mxu0 %vm1895_vm0, %v9800_v21  ;;  %v1814_v2 = vpop.permute.xlu0 %1813  ;;  %v1808_v41 = vpop.permute.xlu1 %1807 }
 0x269   : > { %8040 = vmatprep.subr.msk.bf16.mxu1 %vm1895_vm0, %v1814_v2  ;;  %v2232_v47 = vsel %vm1895_vm0, %v1814_v2, 0  ;;  %v2223_v51 = vsel %vm1895_vm0, %v1808_v41, 0 }
 0x26a   : > { %7769 = vmatpush3.bf16.xpose.msra.mxu1 %v2232_v47 }
 0x26b   : > { %8041 = vmatprep.subr.msk.bf16.mxu1 %vm1895_vm0, %v1812_v57 }
 0x26c   : > { %v1806_v37 = vpop.permute.xlu0 %1805  ;;  %v1804_v16 = vpop.permute.xlu1 %1803 }
 0x26d   : > { %v2220_v11 = vsel %vm1895_vm0, %v1806_v37, 0  ;;  %v2217_v28 = vsel %vm1895_vm0, %v1804_v16, 0 }
 0x26f   : > { %7765 = vmatmul.mubr.msk.bf16.gmra.mxu0 %vm1895_vm0, %v1732_v18 }
 0x270   : > { %v1802_v26 = vpop.permute.xlu0 %1801  ;;  %v1800_v33 = vpop.permute.xlu1 %1799 }
 0x271   : > { %v2214_v8 = vsel %vm1895_vm0, %v1802_v26, 0  ;;  %v2211_v9 = vsel %vm1895_vm0, %v1800_v33, 0 }
 0x272   : > { %7771 = vmatpush3.bf16.xpose.msra.mxu1 %v2229_v40 }
 0x273   : > { %8042 = vmatprep.subr.msk.bf16.mxu1 %vm1895_vm0, %v1810_v54 }
 0x274   : > { %v1752_v21 = vpop.permute.xlu0 %1751  ;;  %v1754_v0 = vpop.permute.xlu1 %1753 }
 0x275   : > { %7784 = vmatprep.mubr.msk.bf16.mxu1 %vm1895_vm0, %v1752_v21 }
 0x27a   : > { %7773 = vmatpush3.bf16.xpose.msra.mxu1 %v2226_v5 }
 0x27b   : > { %8043 = vmatprep.subr.msk.bf16.mxu1 %vm1895_vm0, %v1808_v41 }
 0x280   : > { %v1828_v7 = vpop.permute.xlu1 %1827 }
 0x281   : > { %v2374_v55 = vsel %vm1895_vm0, %v1828_v7, 0 }
 0x282   : > { %7775 = vmatpush3.bf16.xpose.msra.mxu1 %v2223_v51 }
 0x283   : > { %8044 = vmatprep.subr.msk.bf16.mxu1 %vm1895_vm0, %v1806_v37 }
 0x284   : > { %v1758_v52 = vpop.permute.xlu1 %1757 }
 0x288   : > { %v1830_v24 = vpop.permute.xlu0 %1829  ;;  %v1824_v14 = vpop.permute.xlu1 %1823 }
 0x289   : > { %8048 = vmatprep.subr.msk.bf16.mxu0 %vm1895_vm0, %v1830_v24  ;;  %v2377_v62 = vsel %vm1895_vm0, %v1830_v24, 0  ;;  %v2368_v38 = vsel %vm1895_vm0, %v1824_v14, 0 }
 0x28a   : > { %7777 = vmatpush3.bf16.xpose.msra.mxu1 %v2220_v11  ;;  %7801 = vmatpush3.bf16.xpose.msra.mxu0 %v2377_v62 }
 0x28b   : > { %8045 = vmatprep.subr.msk.bf16.mxu1 %vm1895_vm0, %v1804_v16  ;;  %8049 = vmatprep.subr.msk.bf16.mxu0 %vm1895_vm0, %v1828_v7 }
 0x28c   : > { %v1756_v22 = vpop.permute.xlu0 %1755  ;;  %v1762_v23 = vpop.permute.xlu1 %1761 }
 0x290   : > { %v1826_v43 = vpop.permute.xlu0 %1825 }
 0x291   : > { %v2371_v39 = vsel %vm1895_vm0, %v1826_v43, 0 }
 0x292   : > { %7779 = vmatpush3.bf16.xpose.msra.mxu1 %v2217_v28  ;;  %7803 = vmatpush3.bf16.xpose.msra.mxu0 %v2374_v55 }
 0x293   : > { %8046 = vmatprep.subr.msk.bf16.mxu1 %vm1895_vm0, %v1802_v26  ;;  %8050 = vmatprep.subr.msk.bf16.mxu0 %vm1895_vm0, %v1826_v43 }
 0x294   : > { %v1760_v31 = vpop.permute.xlu0 %1759 }
 0x29a   : > { %7781 = vmatpush3.bf16.xpose.msra.mxu1 %v2214_v8  ;;  %7805 = vmatpush3.bf16.xpose.msra.mxu0 %v2371_v39 }
 0x29b   : > { %8047 = vmatprep.subr.msk.bf16.mxu1 %vm1895_vm0, %v1800_v33  ;;  %8051 = vmatprep.subr.msk.bf16.mxu0 %vm1895_vm0, %v1824_v14 }
 0x29f   : > { %v1820_v1 = vpop.permute.xlu1 %1819 }
 0x2a0   : > { %v2362_v53 = vsel %vm1895_vm0, %v1820_v1, 0 }
 0x2a2   : > { %7783 = vmatpush3.bf16.xpose.msra.mxu1 %v2211_v9  ;;  %7807 = vmatpush3.bf16.xpose.msra.mxu0 %v2368_v38 }
 0x2a3   : > { %7832 = vmatprep.subr.bf16.mxu1 %v9969_v32  ;;  %v1766_v58 = vpop.permute.xlu1 %1765 }
 0x2a7   : > { %v1822_v29 = vpop.permute.xlu0 %1821  ;;  %v1816_v4 = vpop.permute.xlu1 %1815 }
 0x2a8   : > { %8052 = vmatprep.subr.msk.bf16.mxu0 %vm1895_vm0, %v1822_v29  ;;  %v2365_v18 = vsel %vm1895_vm0, %v1822_v29, 0  ;;  %v2356_v44 = vsel %vm1895_vm0, %v1816_v4, 0 }
 0x2a9   : > { %7785 = vmatmul.mubr.msk.bf16.vlgmr.msra.gmra.mxu1 %vm1895_vm0, %v1754_v0 }
 0x2aa   : > { %7788 = vmatprep.mubr.msk.bf16.mxu1 %vm1895_vm0, %v1756_v22  ;;  %7809 = vmatpush3.bf16.xpose.msra.mxu0 %v2365_v18 }
 0x2ab   : > { %7833 = vmatpush3.bf16.msra.mxu1 %v9969_v32  ;;  %8053 = vmatprep.subr.msk.bf16.mxu0 %vm1895_vm0, %v1820_v1  ;;  %v1770_v56 = vpop.permute.xlu1 %1769 }
 0x2ac   : > { %7834 = vmatprep.subr.bf16.mxu1 %v9941_v61  ;;  %v1764_v3 = vpop.permute.xlu0 %1763 }
 0x2af   : > { %7835 = vmatpush3.bf16.msra.mxu1 %v9941_v61  ;;  %v1774_v61 = vpop.permute.xlu1 %1773 }
 0x2b0   : > { %7836 = vmatprep.subr.bf16.mxu1 %v9955_v35  ;;  %v1818_v46 = vpop.permute.xlu0 %1817 }
 0x2b1   : > { %7789 = vmatmul.mubr.msk.bf16.gmra.mxu1 %vm1895_vm0, %v1758_v52  ;;  %v2359_v32 = vsel %vm1895_vm0, %v1818_v46, 0 }
 0x2b2   : > { %7792 = vmatprep.mubr.msk.bf16.mxu1 %vm1895_vm0, %v1760_v31  ;;  %7811 = vmatpush3.bf16.xpose.msra.mxu0 %v2362_v53 }
 0x2b3   : > { %7837 = vmatpush3.bf16.msra.mxu1 %v9955_v35  ;;  %8054 = vmatprep.subr.msk.bf16.mxu0 %vm1895_vm0, %v1818_v46  ;;  %v1778_v35 = vpop.permute.xlu1 %1777 }
 0x2b4   : > { %7838 = vmatprep.subr.bf16.mxu1 %v9981_v13  ;;  %v1768_v34 = vpop.permute.xlu0 %1767 }
 0x2b5   : > { %7816 = vmatprep.mubr.msk.bf16.mxu0 %vm1895_vm0, %v1768_v34 }
 0x2b7   : > { %7839 = vmatpush3.bf16.msra.mxu1 %v9981_v13  ;;  %v1782_v48 = vpop.permute.xlu1 %1781 }
 0x2b8   : > { %7840 = vmatprep.subr.bf16.mxu1 %v9963_v36  ;;  %v1772_v49 = vpop.permute.xlu0 %1771 }
 0x2b9   : > { %7793 = vmatmul.mubr.msk.bf16.gmra.mxu1 %vm1895_vm0, %v1762_v23 }
 0x2ba   : > { %7796 = vmatprep.mubr.msk.bf16.mxu1 %vm1895_vm0, %v1764_v3  ;;  %7813 = vmatpush3.bf16.xpose.msra.mxu0 %v2359_v32 }
 0x2bb   : > { %7841 = vmatpush3.bf16.msra.mxu1 %v9963_v36  ;;  %8055 = vmatprep.subr.msk.bf16.mxu0 %vm1895_vm0, %v1816_v4  ;;  %v1860_v59 = vpop.permute.xlu1 %1859 }
 0x2bc   : > { %7842 = vmatprep.subr.bf16.mxu1 %v9977_v50  ;;  %v1776_v60 = vpop.permute.xlu0 %1775 }
 0x2bf   : > { %7843 = vmatpush3.bf16.msra.mxu1 %v9977_v50  ;;  %v1858_v50 = vpop.permute.xlu1 %1857 }
 0x2c0   : > { %7844 = vmatprep.subr.bf16.mxu1 %v9994_v30  ;;  %v1780_v13 = vpop.permute.xlu0 %1779 }
 0x2c1   : > { %7797 = vmatmul.mubr.msk.bf16.gmra.mxu1 %vm1895_vm0, %v1766_v58 }
 0x2c2   : > { %7815 = vmatpush3.bf16.xpose.msra.mxu0 %v2356_v44 }
 0x2c3   : > { %7845 = vmatpush3.bf16.msra.mxu1 %v9994_v30 }
 0x2c4   : > { %7846 = vmatprep.subr.bf16.mxu1 %v9989_v42  ;;  %v1862_v36 = vpop.permute.xlu0 %1861 }
 0x2c5   : > { %7896 = vmatprep.subr.bf16.mxu0 %v1862_v36 }
 0x2c7   : > { %7847 = vmatpush3.bf16.msra.mxu1 %v9989_v42  ;;  %v1854_v42 = vpop.permute.xlu1 %1853 }
 0x2c8   : > { %7864 = vmatprep.subr.bf16.mxu1 %v10001_v19  ;;  %v1856_v30 = vpop.permute.xlu0 %1855 }
 0x2c9   : > { %7817 = vmatmul.mubr.msk.bf16.vlgmr.msra.gmra.mxu0 %vm1895_vm0, %v1770_v56 }
 0x2ca   : > { %7820 = vmatprep.mubr.msk.bf16.mxu0 %vm1895_vm0, %v1772_v49  ;;  %7897 = vmatpush3.bf16.msra.mxu0 %v1862_v36 }
 0x2cb   : > { %7898 = vmatprep.subr.bf16.mxu0 %v1860_v59  ;;  %v1852_v57 = vpop.permute.xlu1 %1851 }
 0x2cc   : > { %v1850_v2 = vpop.permute.xlu0 %1849 }
 0x2ce   : > { %7899 = vmatpush3.bf16.msra.mxu0 %v1860_v59 }
 0x2cf   : > { %7900 = vmatprep.subr.bf16.mxu0 %v1858_v50  ;;  %v1848_v47 = vpop.permute.xlu1 %1847 }
 0x2d0   : > { %v10223_v59 = vpop.permute.xlu0 %1873 }
 0x2d1   : > { %7821 = vmatmul.mubr.msk.bf16.gmra.mxu0 %vm1895_vm0, %v1774_v61  ;;  %13520 = vst [vmem:[#allocation30_spill] sm:$0xff] %v10223_v59 }
 0x2d2   : > { %7824 = vmatprep.mubr.msk.bf16.mxu0 %vm1895_vm0, %v1776_v60  ;;  %7901 = vmatpush3.bf16.msra.mxu0 %v1858_v50 }
 0x2d3   : > { %7902 = vmatprep.subr.bf16.mxu0 %v1856_v30  ;;  %v10225_v50 = vpop.permute.xlu1 %1877 }
 0x2d4   : > { %13521 = vst [vmem:[#allocation31_spill] sm:$0xff] %v10225_v50 }
 0x2d6   : > { %7903 = vmatpush3.bf16.msra.mxu0 %v1856_v30 }
 0x2d7   : > { %7904 = vmatprep.subr.bf16.mxu0 %v1854_v42 }
 0x2d9   : > { %7825 = vmatmul.mubr.msk.bf16.gmra.mxu0 %vm1895_vm0, %v1778_v35 }
 0x2da   : > { %7828 = vmatprep.mubr.msk.bf16.mxu0 %vm1895_vm0, %v1780_v13  ;;  %7905 = vmatpush3.bf16.msra.mxu0 %v1854_v42 }
 0x2db   : > { %7906 = vmatprep.subr.bf16.mxu0 %v1852_v57 }
 0x2de   : > { %7907 = vmatpush3.bf16.msra.mxu0 %v1852_v57 }
 0x2df   : > { %7908 = vmatprep.subr.bf16.mxu0 %v1850_v2 }
 0x2e1   : > { %7829 = vmatmul.mubr.msk.bf16.gmra.mxu0 %vm1895_vm0, %v1782_v48 }
 0x2e2   : > { %7909 = vmatpush3.bf16.msra.mxu0 %v1850_v2  ;;  %v10235_v2 = vpop.permute.xlu1 %1871 }
 0x2e3   : > { %7910 = vmatprep.subr.bf16.mxu0 %v1848_v47  ;;  %13522 = vst [vmem:[#allocation32_spill] sm:$0xff] %v10235_v2 }
 0x2e6   : > { %7911 = vmatpush3.bf16.msra.mxu0 %v1848_v47  ;;  %v10247_v20 = vpop.permute.xlu1 %1875 }
 0x2e7   : > { %13527 = vst [vmem:[#allocation37_spill] sm:$0xff] %v10247_v20 }
 0x2f7   : > { %v10090_v37 = vpop.f32.mrf.mxu1 }
 0x2f8   : > { %2480 = vmax.xlane.f32.xlu0 %v10090_v37 }
 0x2f9   : > { %v10093_v54 = vpop.f32.mrf.mxu1 }
 0x2fb   : > { %v10095_v26 = vpop.f32.mrf.mxu1 }
 0x2fc   : > { %2482 = vmax.xlane.f32.xlu1 %v10095_v26 }
 0x2fd   : > { %v10103_v21 = vpop.f32.mrf.mxu1 }
 0x2ff   : > { %v10109_v5 = vpop.f32.mrf.mxu1 }
 0x301   : > { %v10115_v51 = vpop.f32.mrf.mxu1 }
 0x303   : > { %v10121_v24 = vpop.f32.mrf.mxu1 }
 0x305   : > { %v10127_v11 = vpop.f32.mrf.mxu1 }
 0x307   : > { %v10133_v22 = vpop.f32.mrf.mxu1 }
 0x309   : > { %v10139_v28 = vpop.f32.mrf.mxu1 }
 0x30b   : > { %v10145_v43 = vpop.f32.mrf.mxu1 }
 0x30d   : > { %v10151_v8 = vpop.f32.mrf.mxu1 }
 0x30f   : > { %v10157_v23 = vpop.f32.mrf.mxu1 }
 0x311   : > { %v10163_v9 = vpop.f32.mrf.mxu1 }
 0x313   : > { %v10169_v31 = vpop.f32.mrf.mxu1 }
 0x315   : > { %v10179_v18 = vpop.f32.mrf.mxu1 }
 0x317   : > { %v10098_v40 = vpop.f32.mrf.mxu0 }
 0x318   : > { %2512 = vmax.xlane.f32.xlu0 %v10098_v40 }
 0x319   : > { %v10101_v41 = vpop.f32.mrf.mxu0 }
 0x31b   : > { %v10105_v16 = vpop.f32.mrf.mxu0 }
 0x31c   : > { %2476 = vmax.xlane.f32.xlu0 %v10093_v54  ;;  %2514 = vmax.xlane.f32.xlu1 %v10105_v16 }
 0x31d   : > { %v10111_v33 = vpop.f32.mrf.mxu0 }
 0x31f   : > { %v10117_v0 = vpop.f32.mrf.mxu0 }
 0x320   : > { %2508 = vmax.xlane.f32.xlu0 %v10101_v41  ;;  %2478 = vmax.xlane.f32.xlu1 %v10103_v21 }
 0x321   : > { %v10123_v7 = vpop.f32.mrf.mxu0 }
 0x323   : > { %v10129_v62 = vpop.f32.mrf.mxu0 }
 0x324   : > { %2488 = vmax.xlane.f32.xlu0 %v10109_v5  ;;  %2510 = vmax.xlane.f32.xlu1 %v10111_v33 }
 0x325   : > { %v10135_v52 = vpop.f32.mrf.mxu0 }
 0x327   : > { %v10141_v55 = vpop.f32.mrf.mxu0 }
 0x328   : > { %2490 = vmax.xlane.f32.xlu1 %v10121_v24  ;;  %2520 = vmax.xlane.f32.xlu0 %v10117_v0 }
 0x329   : > { %v10147_v14 = vpop.f32.mrf.mxu0 }
 0x32b   : > { %v10153_v39 = vpop.f32.mrf.mxu0 }
 0x32c   : > { %2484 = vmax.xlane.f32.xlu0 %v10115_v51  ;;  %2522 = vmax.xlane.f32.xlu1 %v10129_v62 }
 0x32d   : > { %v10159_v1 = vpop.f32.mrf.mxu0 }
 0x32f   : > { %v10165_v38 = vpop.f32.mrf.mxu0 }
 0x330   : > { %2516 = vmax.xlane.f32.xlu0 %v10123_v7  ;;  %2486 = vmax.xlane.f32.xlu1 %v10127_v11 }
 0x331   : > { %v10171_v58 = vpop.f32.mrf.mxu0 }
 0x333   : > { %v10175_v29 = vpop.f32.mrf.mxu0 }
 0x334   : > { %2496 = vmax.xlane.f32.xlu0 %v10133_v22  ;;  %2518 = vmax.xlane.f32.xlu1 %v10135_v52 }
 0x335   : > { %v10183_v4 = vpop.f32.mrf.mxu0 }
 0x338   : > { %2498 = vmax.xlane.f32.xlu1 %v10145_v43  ;;  %2528 = vmax.xlane.f32.xlu0 %v10141_v55 }
 0x33c   : > { %2492 = vmax.xlane.f32.xlu0 %v10139_v28  ;;  %2530 = vmax.xlane.f32.xlu1 %v10153_v39 }
 0x340   : > { %2524 = vmax.xlane.f32.xlu0 %v10147_v14  ;;  %2494 = vmax.xlane.f32.xlu1 %v10151_v8 }
 0x344   : > { %2504 = vmax.xlane.f32.xlu0 %v10157_v23  ;;  %2526 = vmax.xlane.f32.xlu1 %v10159_v1 }
 0x348   : > { %2506 = vmax.xlane.f32.xlu1 %v10169_v31  ;;  %2536 = vmax.xlane.f32.xlu0 %v10165_v38 }
 0x34c   : > { %2500 = vmax.xlane.f32.xlu0 %v10163_v9  ;;  %2538 = vmax.xlane.f32.xlu1 %v10175_v29 }
 0x350   : > { %2532 = vmax.xlane.f32.xlu0 %v10171_v58  ;;  %2502 = vmax.xlane.f32.xlu1 %v10179_v18 }
 0x354   : > { %2534 = vmax.xlane.f32.xlu1 %v10183_v4 }
 0x369   : > { %v10186_v3 = vpop.f32.mrf.mxu1 }
 0x36a   : > { %2544 = vmax.xlane.f32.xlu0 %v10186_v3 }
 0x36b   : > { %v10189_v56 = vpop.f32.mrf.mxu1 }
 0x36d   : > { %v10191_v46 = vpop.f32.mrf.mxu1 }
 0x36e   : > { %2546 = vmax.xlane.f32.xlu1 %v10191_v46 }
 0x36f   : > { %v10194_v53 = vpop.f32.mrf.mxu1 }
 0x371   : > { %v10201_v49 = vpop.f32.mrf.mxu1 }
 0x373   : > { %v10209_v60 = vpop.f32.mrf.mxu1 }
 0x375   : > { %v10217_v48 = vpop.f32.mrf.mxu1 }
 0x377   : > { %v10229_v30 = vpop.f32.mrf.mxu1 }
 0x379   : > { %v10237_v47 = vpop.f32.mrf.mxu1 }
 0x37a   : > { %13523 = vst [vmem:[#allocation33_spill] sm:$0xff] %v10237_v47 }
 0x37b   : > { %v10243_v50 = vpop.f32.mrf.mxu1 }
 0x37c   : > { %13525 = vst [vmem:[#allocation35_spill] sm:$0xff] %v10243_v50 }
 0x37d   : > { %v10251_v2 = vpop.f32.mrf.mxu1 }
 0x37e   : > { %13528 = vst [vmem:[#allocation38_spill] sm:$0xff] %v10251_v2 }
 0x37f   : > { %v10257_v15 = vpop.f32.mrf.mxu1 }
 0x380   : > { %13529 = vst [vmem:[#allocation39_spill] sm:$0xff] %v10257_v15 }
 0x381   : > { %v2481_v57 = vpop.xlane.xlu0 %2480 }
 0x382   : > { %v2606_v17 = vsub.f32 %v10090_v37, %v2481_v57 }
 0x385   : > { %v2483_v25 = vpop.xlane.xlu1 %2482 }
 0x389   : > { %v10196_v34 = vpop.f32.mrf.mxu0 }
 0x38a   : > { %2576 = vmax.xlane.f32.xlu0 %v10196_v34 }
 0x38b   : > { %v10199_v61 = vpop.f32.mrf.mxu0 }
 0x38d   : > { %v10203_v32 = vpop.f32.mrf.mxu0 }
 0x38e   : > { %2540 = vmax.xlane.f32.xlu0 %v10189_v56  ;;  %2578 = vmax.xlane.f32.xlu1 %v10203_v32 }
 0x38f   : > { %v10207_v35 = vpop.f32.mrf.mxu0 }
 0x391   : > { %v10211_v13 = vpop.f32.mrf.mxu0 }
 0x392   : > { %13517 = vst [vmem:[#allocation27_spill] sm:$0xff] %v10211_v13  ;;  %2572 = vmax.xlane.f32.xlu0 %v10199_v61  ;;  %2574 = vmax.xlane.f32.xlu1 %v10207_v35 }
 0x393   : > { %v10215_v44 = vpop.f32.mrf.mxu0 }
 0x394   : > { %13518 = vst [vmem:[#allocation28_spill] sm:$0xff] %v10215_v44 }
 0x395   : > { %v10221_v36 = vpop.f32.mrf.mxu0 }
 0x396   : > { %2542 = vmax.xlane.f32.xlu0 %v10194_v53  ;;  %2554 = vmax.xlane.f32.xlu1 %v10217_v48  ;;  %13519 = vst [vmem:[#allocation29_spill] sm:$0xff] %v10221_v36 }
 0x397   : > { %v10231_v42 = vpop.f32.mrf.mxu0 }
 0x399   : > { %v10239_v10 = vpop.f32.mrf.mxu0 }
 0x39a   : > { %2552 = vmax.xlane.f32.xlu0 %v10201_v49  ;;  %2586 = vmax.xlane.f32.xlu1 %v10221_v36  ;;  %13524 = vst [vmem:[#allocation34_spill] sm:$0xff] %v10239_v10 }
 0x39b   : > { %v10245_v27 = vpop.f32.mrf.mxu0 }
 0x39c   : > { %13526 = vst [vmem:[#allocation36_spill] sm:$0xff] %v10245_v27 }
 0x39d   : > { %v10253_v45 = vpop.f32.mrf.mxu0 }
 0x39e   : > { %2584 = vmax.xlane.f32.xlu0 %v10211_v13  ;;  %2550 = vmax.xlane.f32.xlu1 %v10229_v30 }
 0x39f   : > { %v10260_v20 = vpop.f32.mrf.mxu0 }
 0x3a1   : > { %v2513_v59 = vpop.xlane.xlu0 %2512  ;;  %v10267_v63 = vpop.f32.mrf.mxu0 }
 0x3a2   : > { %2548 = vmax.xlane.f32.xlu0 %v10209_v60  ;;  %2582 = vmax.xlane.f32.xlu1 %v10231_v42  ;;  %v2622_v13 = vsub.f32 %v10098_v40, %v2513_v59  ;;  %13530 = vst [vmem:[#allocation40_spill] sm:$0xff] %v10267_v63  ;;  %v2607_v40 = vsub.f32 %v10095_v26, %v2483_v25 }
 0x3a5   : > { %v2477_v12 = vpop.xlane.xlu0 %2476  ;;  %v2515_v19 = vpop.xlane.xlu1 %2514 }
 0x3a6   : > { %2580 = vmax.xlane.f32.xlu0 %v10215_v44  ;;  %2588 = vmax.xlane.f32.xlu1 %v10245_v27  ;;  %v2672_v27 = vmul.f32 1.442695, %v2606_v17  ;;  %v10264_v44 = vpop.f32.mrf.mxu1  ;;  %v10276_v17 = vpop.f32.mrf.mxu0 }
 0x3a7   : > { %13531 = vst [vmem:[#allocation41_spill] sm:$0xff] %v10276_v17 }
 0x3a8   : > { %8316 = vpow2.f32 %v2672_v27  ;;  %v10273_v57 = vpop.f32.mrf.mxu1 }
 0x3a9   : > { %v2509_v6 = vpop.xlane.xlu0 %2508  ;;  %v2479_v37 = vpop.xlane.xlu1 %2478 }
 0x3aa   : > { %2560 = vmax.xlane.f32.xlu0 %v10237_v47  ;;  %2562 = vmax.xlane.f32.xlu1 %v10251_v2  ;;  %v10283_v59 = vpop.f32.mrf.mxu1  ;;  %v2620_v27 = vsub.f32 %v10101_v41, %v2509_v6  ;;  %v2605_v25 = vsub.f32 %v10103_v21, %v2479_v37 }
 0x3ac   : > { %v10292_v26 = vpop.f32.mrf.mxu1 }
 0x3ad   : > { %v2489_v36 = vpop.xlane.xlu0 %2488 }
 0x3ae   : > { %2592 = vmax.xlane.f32.xlu0 %v10239_v10  ;;  %2558 = vmax.xlane.f32.xlu1 %v10257_v15  ;;  %v2704_v10 = vmul.f32 1.442695, %v2622_v13  ;;  %v2604_v15 = vsub.f32 %v10093_v54, %v2477_v12  ;;  %v2674_v12 = vmul.f32 1.442695, %v2607_v40  ;;  %v2623_v54 = vsub.f32 %v10105_v16, %v2515_v19 }
 0x3af   : > { %v2670_v40 = vmul.f32 1.442695, %v2605_v25  ;;  %v2610_v16 = vsub.f32 %v10109_v5, %v2489_v36 }
 0x3b0   : > { %8318 = vpow2.f32 %v2704_v10 }
 0x3b1   : > { %v10269_v2 = vpop.xlane.xlu0 %2520 }
 0x3b2   : > { %2556 = vmax.xlane.f32.xlu0 %v10243_v50  ;;  %2600 = vmax.xlane.f32.xlu1 %v10267_v63  ;;  %v2668_v63 = vmul.f32 1.442695, %v2604_v15  ;;  %v2511_v50 = vpop.xlane.xlu1 %2510  ;;  %v2706_v15 = vmul.f32 1.442695, %v2623_v54  ;;  %v2680_v54 = vmul.f32 1.442695, %v2610_v16  ;;  %v2626_v5 = vsub.f32 %v10117_v0, %v10269_v2 }
 0x3b3   : > { %v2621_v6 = vsub.f32 %v10111_v33, %v2511_v50 }
 0x3b4   : > { %8320 = vpow2.f32 %v2668_v63 }
 0x3b5   : > { %v10278_v47 = vpop.xlane.xlu0 %2484  ;;  %8322 = vpow2.f32 %v2674_v12  ;;  %v10300_v19 = vpop.eup %8316  ;;  %v2702_v37 = vmul.f32 1.442695, %v2621_v6  ;;  %v2712_v6 = vmul.f32 1.442695, %v2626_v5 }
 0x3b6   : > { %2594 = vmax.xlane.f32.xlu0 %v10253_v45  ;;  %2596 = vmax.xlane.f32.xlu1 %v10276_v17  ;;  %v2700_v17 = vmul.f32 1.442695, %v2620_v27  ;;  %v10297_v41 = vpop.xlane.xlu1 %2490  ;;  %v10305_v27 = vpop.f32.mrf.mxu0 }
 0x3b8   : > { %8324 = vpow2.f32 %v2700_v17 }
 0x3b9   : > { %v10286_v13 = vpop.xlane.xlu0 %2516  ;;  %8326 = vpow2.f32 %v2706_v15 }
 0x3ba   : > { %2590 = vmax.xlane.f32.xlu0 %v10260_v20  ;;  %2570 = vmax.xlane.f32.xlu1 %v10283_v59  ;;  %8328 = vpow2.f32 %v2670_v40  ;;  %v2608_v40 = vsub.f32 %v10115_v51, %v10278_v47 }
 0x3bb   : > { %8330 = vpow2.f32 %v2702_v37 }
 0x3bc   : > { %v2676_v37 = vmul.f32 1.442695, %v2608_v40 }
 0x3bd   : > { %v2497_v10 = vpop.xlane.xlu0 %2496  ;;  %v10308_v17 = vpop.eup %8318 }
 0x3be   : > { %2568 = vmax.xlane.f32.xlu0 %v10264_v44  ;;  %2566 = vmax.xlane.f32.xlu1 %v10292_v26  ;;  %v2614_v63 = vsub.f32 %v10133_v22, %v2497_v10  ;;  %v10310_v22 = vpop.xlane.xlu1 %2522 }
 0x3c0   : > { %v2688_v33 = vmul.f32 1.442695, %v2614_v63 }
 0x3c1   : > { %v2529_v21 = vpop.xlane.xlu0 %2528  ;;  %v10317_v10 = vpop.eup %8320 }
 0x3c2   : > { %2564 = vmax.xlane.f32.xlu0 %v10273_v57  ;;  %2800 = vadd.xlane.f32.xlu1 %v10300_v19  ;;  %v2630_v50 = vsub.f32 %v10141_v55, %v2529_v21  ;;  %8332 = vpow2.f32 %v2688_v33  ;;  %v10319_v55 = vpop.f32.mrf.mxu0  ;;  %v2487_v0 = vpop.xlane.xlu1 %2486  ;;  %v2624_v33 = vsub.f32 %v10123_v7, %v10286_v13 }
 0x3c3   : > { %8334 = vpow2.f32 %v2680_v54  ;;  %v10327_v2 = vpop.eup %8322 }
 0x3c4   : > { %v2720_v36 = vmul.f32 1.442695, %v2630_v50 }
 0x3c5   : > { %v2493_v12 = vpop.xlane.xlu0 %2492  ;;  %v10329_v63 = vpop.eup %8324 }
 0x3c6   : > { %2832 = vadd.xlane.f32.xlu1 %v10308_v17  ;;  %2602 = vmax.xlane.f32.xlu0 %v10305_v27  ;;  %v2612_v25 = vsub.f32 %v10139_v28, %v2493_v12  ;;  %8336 = vpow2.f32 %v2720_v36  ;;  %v10336_v51 = vpop.eup %8326  ;;  %v2519_v12 = vpop.xlane.xlu1 %2518  ;;  %v2708_v36 = vmul.f32 1.442695, %v2624_v33 }
 0x3c7   : > { %8338 = vpow2.f32 %v2712_v6  ;;  %v10338_v50 = vpop.eup %8328 }
 0x3c8   : > { %v2684_v28 = vmul.f32 1.442695, %v2612_v25  ;;  %v10345_v7 = vpop.eup %8330 }
 0x3c9   : > { %v10321_v15 = vpop.xlane.xlu0 %2524 }
 0x3ca   : > { %2796 = vadd.xlane.f32.xlu1 %v10317_v10  ;;  %2598 = vmax.xlane.f32.xlu0 %v10319_v55  ;;  %8340 = vpow2.f32 %v2684_v28  ;;  %v2627_v28 = vsub.f32 %v10129_v62, %v10310_v22  ;;  %v2609_v62 = vsub.f32 %v10127_v11, %v2487_v0 }
 0x3cb   : > { %8342 = vpow2.f32 %v2676_v37 }
 0x3cd   : > { %v2505_v21 = vpop.xlane.xlu0 %2504 }
 0x3ce   : > { %v2618_v16 = vsub.f32 %v10157_v23, %v2505_v21  ;;  %2828 = vadd.xlane.f32.xlu0 %v10329_v63  ;;  %2802 = vadd.xlane.f32.xlu1 %v10327_v2  ;;  %v2611_v23 = vsub.f32 %v10121_v24, %v10297_v41  ;;  %v2499_v24 = vpop.xlane.xlu1 %2498 }
 0x3cf   : > { %v10347_v25 = vpop.eup %8332 }
 0x3d0   : > { %v2696_v47 = vmul.f32 1.442695, %v2618_v16  ;;  %v10354_v41 = vpop.eup %8334 }
 0x3d1   : > { %v2537_v54 = vpop.xlane.xlu0 %2536 }
 0x3d2   : > { %v2634_v5 = vsub.f32 %v10165_v38, %v2537_v54  ;;  %2834 = vadd.xlane.f32.xlu0 %v10336_v51  ;;  %2798 = vadd.xlane.f32.xlu1 %v10338_v50  ;;  %8344 = vpow2.f32 %v2696_v47  ;;  %v2682_v38 = vmul.f32 1.442695, %v2611_v23  ;;  %v2678_v23 = vmul.f32 1.442695, %v2609_v62 }
 0x3d3   : > { %8346 = vpow2.f32 %v2708_v36  ;;  %v10356_v16 = vpop.eup %8336  ;;  %v2625_v36 = vsub.f32 %v10135_v52, %v2519_v12  ;;  %v2615_v12 = vsub.f32 %v10145_v43, %v2499_v24 }
 0x3d4   : > { %v2728_v13 = vmul.f32 1.442695, %v2634_v5  ;;  %v10361_v47 = vpop.eup %8338  ;;  %v2531_v5 = vpop.xlane.xlu1 %2530 }
 0x3d5   : > { %v2501_v6 = vpop.xlane.xlu0 %2500 }
 0x3d6   : > { %v2616_v40 = vsub.f32 %v10163_v9, %v2501_v6  ;;  %2816 = vadd.xlane.f32.xlu1 %v10347_v25  ;;  %2830 = vadd.xlane.f32.xlu0 %v10345_v7  ;;  %8348 = vpow2.f32 %v2728_v13  ;;  %v2714_v9 = vmul.f32 1.442695, %v2627_v28  ;;  %v2710_v6 = vmul.f32 1.442695, %v2625_v36 }
 0x3d7   : > { %8350 = vpow2.f32 %v2682_v38  ;;  %v10364_v54 = vpop.eup %8340 }
 0x3d8   : > { %v2692_v21 = vmul.f32 1.442695, %v2616_v40  ;;  %v2495_v11 = vpop.xlane.xlu1 %2494  ;;  %v2628_v40 = vsub.f32 %v10147_v14, %v10321_v15  ;;  %v2690_v15 = vmul.f32 1.442695, %v2615_v12 }
 0x3d9   : > { %v2533_v37 = vpop.xlane.xlu0 %2532  ;;  %v2613_v62 = vsub.f32 %v10151_v8, %v2495_v11 }
 0x3da   : > { %v2632_v33 = vsub.f32 %v10171_v58, %v2533_v37  ;;  %2848 = vadd.xlane.f32.xlu1 %v10356_v16  ;;  %2808 = vadd.xlane.f32.xlu0 %v10354_v41  ;;  %8352 = vpow2.f32 %v2692_v21  ;;  %v10368_v58 = vpop.eup %8342  ;;  %v2716_v28 = vmul.f32 1.442695, %v2628_v40 }
 0x3db   : > { %8354 = vpow2.f32 %v2714_v9 }
 0x3dc   : > { %v2724_v22 = vmul.f32 1.442695, %v2632_v33  ;;  %v2527_v37 = vpop.xlane.xlu1 %2526  ;;  %v2631_v33 = vsub.f32 %v10153_v39, %v2531_v5 }
 0x3dd   : > { %v2629_v39 = vsub.f32 %v10159_v1, %v2527_v37 }
 0x3de   : > { %2812 = vadd.xlane.f32.xlu1 %v10364_v54  ;;  %2840 = vadd.xlane.f32.xlu0 %v10361_v47  ;;  %8356 = vpow2.f32 %v2724_v22  ;;  %v2722_v24 = vmul.f32 1.442695, %v2631_v33 }
 0x3df   : > { %v10371_v13 = vpop.eup %8344  ;;  %8358 = vpow2.f32 %v2678_v23  ;;  %v2686_v23 = vmul.f32 1.442695, %v2613_v62 }
 0x3e0   : > { %v10375_v0 = vpop.eup %8346  ;;  %8360 = vpow2.f32 %v2710_v6  ;;  %v2507_v43 = vpop.xlane.xlu1 %2506  ;;  %v2718_v6 = vmul.f32 1.442695, %v2629_v39 }
 0x3e1   : > { %8362 = vpow2.f32 %v2716_v28  ;;  %v2619_v40 = vsub.f32 %v10169_v31, %v2507_v43 }
 0x3e2   : > { %2824 = vadd.xlane.f32.xlu1 %v10371_v13  ;;  %2804 = vadd.xlane.f32.xlu0 %v10368_v58  ;;  %8364 = vpow2.f32 %v2690_v15 }
 0x3e3   : > { %v10379_v38 = vpop.eup %8348  ;;  %8366 = vpow2.f32 %v2722_v24  ;;  %v2698_v11 = vmul.f32 1.442695, %v2619_v40 }
 0x3e4   : > { %13532 = vst [vmem:[#allocation42_spill] sm:$0xff] %v10379_v38  ;;  %v10383_v52 = vpop.eup %8350  ;;  %v2539_v36 = vpop.xlane.xlu1 %2538  ;;  %8368 = vpow2.f32 %v2686_v23 }
 0x3e5   : > { %8370 = vpow2.f32 %v2718_v6  ;;  %v2635_v28 = vsub.f32 %v10175_v29, %v2539_v36 }
 0x3e6   : > { %2856 = vadd.xlane.f32.xlu1 %v10379_v38  ;;  %2836 = vadd.xlane.f32.xlu0 %v10375_v0  ;;  %8372 = vpow2.f32 %v2698_v11 }
 0x3e7   : > { %v10386_v21 = vpop.eup %8352  ;;  %v2730_v1 = vmul.f32 1.442695, %v2635_v28 }
 0x3e8   : > { %v10390_v14 = vpop.eup %8354  ;;  %v2503_v8 = vpop.xlane.xlu1 %2502 }
 0x3e9   : > { %v2617_v37 = vsub.f32 %v10179_v18, %v2503_v8  ;;  %8374 = vpow2.f32 %v2730_v1 }
 0x3ea   : > { %2820 = vadd.xlane.f32.xlu1 %v10386_v21  ;;  %2810 = vadd.xlane.f32.xlu0 %v10383_v52 }
 0x3eb   : > { %v10393_v9 = vpop.eup %8356  ;;  %v2694_v43 = vmul.f32 1.442695, %v2617_v37 }
 0x3ec   : > { %13533 = vst [vmem:[#allocation43_spill] sm:$0xff] %v10393_v9  ;;  %v10398_v22 = vpop.eup %8358  ;;  %v2535_v31 = vpop.xlane.xlu1 %2534 }
 0x3ed   : > { %v10402_v5 = vpop.eup %8360  ;;  %v2633_v24 = vsub.f32 %v10183_v4, %v2535_v31  ;;  %8376 = vpow2.f32 %v2694_v43 }
 0x3ee   : > { %2852 = vadd.xlane.f32.xlu1 %v10393_v9  ;;  %2842 = vadd.xlane.f32.xlu0 %v10390_v14  ;;  %v10406_v12 = vpop.eup %8362 }
 0x3ef   : > { %v10410_v15 = vpop.eup %8364  ;;  %v2726_v23 = vmul.f32 1.442695, %v2633_v24 }
 0x3f0   : > { %v10414_v33 = vpop.eup %8366 }
 0x3f1   : > { %v10418_v62 = vpop.eup %8368  ;;  %8378 = vpow2.f32 %v2726_v23 }
 0x3f2   : > { %2806 = vadd.xlane.f32.xlu0 %v10398_v22  ;;  %v10422_v36 = vpop.eup %8370 }
 0x3f3   : > { %v2545_v29 = vpop.xlane.xlu0 %2544  ;;  %v10425_v6 = vpop.eup %8372 }
 0x3f4   : > { %v2638_v39 = vsub.f32 %v10186_v3, %v2545_v29 }
 0x3f6   : > { %2838 = vadd.xlane.f32.xlu0 %v10402_v5  ;;  %v2736_v18 = vmul.f32 1.442695, %v2638_v39  ;;  %v10428_v4 = vpop.eup %8374 }
 0x3f7   : > { %13534 = vst [vmem:[#allocation44_spill] sm:$0xff] %v10428_v4  ;;  %v2547_v40 = vpop.xlane.xlu1 %2546 }
 0x3f8   : > { %8380 = vpow2.f32 %v2736_v18  ;;  %v2639_v1 = vsub.f32 %v10191_v46, %v2547_v40 }
 0x3fa   : > { %2844 = vadd.xlane.f32.xlu0 %v10406_v12  ;;  %v10432_v3 = vpop.eup %8376  ;;  %v2738_v23 = vmul.f32 1.442695, %v2639_v1 }
 0x3fe   : > { %2818 = vadd.xlane.f32.xlu0 %v10410_v15  ;;  %v10437_v24 = vpop.eup %8378 }
 0x402   : > { %2850 = vadd.xlane.f32.xlu0 %v10414_v33 }
 0x406   : > { %2814 = vadd.xlane.f32.xlu0 %v10418_v62 }
 0x40a   : > { %2846 = vadd.xlane.f32.xlu0 %v10422_v36 }
 0x40e   : > { %2826 = vadd.xlane.f32.xlu0 %v10425_v6 }
 0x412   : > { %2858 = vadd.xlane.f32.xlu0 %v10428_v4 }
 0x413   : > { %v2577_v8 = vpop.xlane.xlu0 %2576 }
 0x414   : > { %v2654_v11 = vsub.f32 %v10196_v34, %v2577_v8 }
 0x416   : > { %v2768_v28 = vmul.f32 1.442695, %v2654_v11  ;;  %2822 = vadd.xlane.f32.xlu0 %v10432_v3  ;;  %v10442_v11 = vpop.eup %8380 }
 0x417   : > { %v2541_v37 = vpop.xlane.xlu0 %2540  ;;  %v2579_v31 = vpop.xlane.xlu1 %2578  ;;  %13535 = vst [vmem:[#allocation45_spill] sm:$0xff] %v10442_v11 }
 0x418   : > { %8382 = vpow2.f32 %v2768_v28  ;;  %v2636_v43 = vsub.f32 %v10189_v56, %v2541_v37  ;;  %v2655_v34 = vsub.f32 %v10203_v32, %v2579_v31 }
 0x41a   : > { %v2732_v29 = vmul.f32 1.442695, %v2636_v43  ;;  %2854 = vadd.xlane.f32.xlu0 %v10437_v24  ;;  %v2770_v56 = vmul.f32 1.442695, %v2655_v34 }
 0x41b   : > { %v2573_v39 = vpop.xlane.xlu0 %2572  ;;  %v2575_v18 = vpop.xlane.xlu1 %2574 }
 0x41c   : > { %8384 = vpow2.f32 %v2732_v29  ;;  %v2652_v8 = vsub.f32 %v10199_v61, %v2573_v39  ;;  %v2653_v40 = vsub.f32 %v10207_v35, %v2575_v18 }
 0x41d   : > { %8386 = vpow2.f32 %v2738_v23 }
 0x41e   : > { %v2764_v46 = vmul.f32 1.442695, %v2652_v8  ;;  %2864 = vadd.xlane.f32.xlu0 %v10442_v11  ;;  %v2766_v31 = vmul.f32 1.442695, %v2653_v40 }
 0x41f   : > { %v2543_v28 = vpop.xlane.xlu0 %2542  ;;  %v2555_v37 = vpop.xlane.xlu1 %2554 }
 0x420   : > { %8388 = vpow2.f32 %v2764_v46  ;;  %v2637_v1 = vsub.f32 %v10194_v53, %v2543_v28 }
 0x421   : > { %8390 = vpow2.f32 %v2770_v56 }
 0x422   : > { %v2734_v32 = vmul.f32 1.442695, %v2637_v1 }
 0x423   : > { %v2553_v43 = vpop.xlane.xlu0 %2552  ;;  %v10447_v29 = vpop.xlane.xlu1 %2586 }
 0x424   : > { %8392 = vpow2.f32 %v2734_v32  ;;  %v2642_v61 = vsub.f32 %v10201_v49, %v2553_v43  ;;  %v2643_v49 = vsub.f32 %v10217_v48, %v2555_v37 }
 0x425   : > { %v10450_v39 = vpop.eup %8382  ;;  %8394 = vpow2.f32 %v2766_v31 }
 0x426   : > { %13536 = vst [vmem:[#allocation46_spill] sm:$0xff] %v10450_v39  ;;  %v2744_v23 = vmul.f32 1.442695, %v2642_v61  ;;  %2896 = vadd.xlane.f32.xlu0 %v10450_v39  ;;  %v2746_v43 = vmul.f32 1.442695, %v2643_v49 }
 0x427   : > { %v10453_v35 = vpop.xlane.xlu0 %2584  ;;  %v2551_v34 = vpop.xlane.xlu1 %2550 }
 0x428   : > { %8396 = vpow2.f32 %v2744_v23  ;;  %v2641_v61 = vsub.f32 %v10229_v30, %v2551_v34 }
 0x429   : > { %v10455_v53 = vpop.eup %8384 }
 0x42a   : > { %13537 = vst [vmem:[#allocation47_spill] sm:$0xff] %v10455_v53  ;;  %2860 = vadd.xlane.f32.xlu1 %v10455_v53  ;;  %v10458_v46 = vpop.eup %8386  ;;  %v13558_v53 = vld [vmem:[#allocation28_spill] sm:$0xff] }
 0x42b   : > { %v2549_v18 = vpop.xlane.xlu0 %2548  ;;  %v2583_v8 = vpop.xlane.xlu1 %2582  ;;  %13538 = vst [vmem:[#allocation48_spill] sm:$0xff] %v10458_v46 }
 0x42c   : > { %v2640_v56 = vsub.f32 %v10209_v60, %v2549_v18  ;;  %v2742_v18 = vmul.f32 1.442695, %v2641_v61  ;;  %v13545_v61 = vld [vmem:[#allocation35_spill] sm:$0xff] }
 0x42d   : > { %v10462_v40 = vpop.eup %8388 }
 0x42e   : > { %13539 = vst [vmem:[#allocation49_spill] sm:$0xff] %v10462_v40  ;;  %v2740_v28 = vmul.f32 1.442695, %v2640_v56  ;;  %2892 = vadd.xlane.f32.xlu0 %v10462_v40  ;;  %2866 = vadd.xlane.f32.xlu1 %v10458_v46  ;;  %v10470_v31 = vpop.eup %8390  ;;  %v2657_v56 = vsub.f32 %v10231_v42, %v2583_v8 }
 0x42f   : > { %v10466_v1 = vpop.xlane.xlu0 %2580  ;;  %v10468_v32 = vpop.xlane.xlu1 %2588  ;;  %13540 = vst [vmem:[#allocation50_spill] sm:$0xff] %v10470_v31 }
 0x430   : > { %8398 = vpow2.f32 %v2740_v28  ;;  %v2774_v49 = vmul.f32 1.442695, %v2657_v56  ;;  %v13544_v28 = vld [vmem:[#allocation33_spill] sm:$0xff] }
 0x431   : > { %v10473_v48 = vpop.eup %8392  ;;  %8400 = vpow2.f32 %v2746_v43 }
 0x432   : > { %13541 = vst [vmem:[#allocation51_spill] sm:$0xff] %v10473_v48  ;;  %2862 = vadd.xlane.f32.xlu1 %v10473_v48  ;;  %2898 = vadd.xlane.f32.xlu0 %v10470_v31  ;;  %v10477_v23 = vpop.eup %8394  ;;  %8402 = vpow2.f32 %v2742_v18  ;;  %v13547_v18 = vld [vmem:[#allocation38_spill] sm:$0xff] }
 0x433   : > { %v2561_v60 = vpop.xlane.xlu0 %2560  ;;  %v2563_v37 = vpop.xlane.xlu1 %2562  ;;  %13542 = vst [vmem:[#allocation52_spill] sm:$0xff] %v10477_v23  ;;  %8404 = vpow2.f32 %v2774_v49 }
 0x434   : > { %v2646_v31 = vsub.f32 %v13544_v28, %v2561_v60  ;;  %v2647_v56 = vsub.f32 %v13547_v18, %v2563_v37  ;;  %v13549_v28 = vld [vmem:[#allocation39_spill] sm:$0xff] }
 0x435   : > { %v10480_v39 = vpop.eup %8396 }
 0x436   : > { %13543 = vst [vmem:[#allocation53_spill] sm:$0xff] %v10480_v39  ;;  %2872 = vadd.xlane.f32.xlu1 %v10480_v39  ;;  %2894 = vadd.xlane.f32.xlu0 %v10477_v23  ;;  %v2752_v43 = vmul.f32 1.442695, %v2646_v31 }
 0x437   : > { %v10484_v30 = vpop.xlane.xlu0 %2592  ;;  %v2559_v34 = vpop.xlane.xlu1 %2558 }
 0x438   : > { %8406 = vpow2.f32 %v2752_v43  ;;  %v13551_v43 = vld [vmem:[#allocation21_spill] sm:$0xff] }
 0x43b   : > { %v2557_v40 = vpop.xlane.xlu0 %2556  ;;  %v10487_v38 = vpop.xlane.xlu1 %2600 }
 0x43c   : > { %v2644_v42 = vsub.f32 %v13545_v61, %v2557_v40  ;;  %v2754_v40 = vmul.f32 1.442695, %v2647_v56  ;;  %v2645_v61 = vsub.f32 %v13549_v28, %v2559_v34 }
 0x43d   : > { %v10490_v8 = vpop.eup %8398 }
 0x43e   : > { %13546 = vst [vmem:[#allocation33_spill] sm:$0xff] %v10490_v8  ;;  %2868 = vadd.xlane.f32.xlu0 %v10490_v8  ;;  %v2748_v4 = vmul.f32 1.442695, %v2644_v42  ;;  %v10498_v60 = vpop.eup %8400  ;;  %v2750_v42 = vmul.f32 1.442695, %v2645_v61  ;;  %v13555_v61 = vld [vmem:[#allocation27_spill] sm:$0xff] }
 0x43f   : > { %v10493_v39 = vpop.xlane.xlu0 %2594  ;;  %v10495_v23 = vpop.xlane.xlu1 %2596  ;;  %13548 = vst [vmem:[#allocation35_spill] sm:$0xff] %v10498_v60 }
 0x440   : > { %8408 = vpow2.f32 %v2748_v4  ;;  %v10504_v8 = vpop.eup %8402 }
 0x441   : > { %13550 = vst [vmem:[#allocation38_spill] sm:$0xff] %v10504_v8  ;;  %8410 = vpow2.f32 %v2754_v40 }
 0x442   : > { %2874 = vadd.xlane.f32.xlu0 %v10498_v60  ;;  %v10510_v60 = vpop.eup %8404  ;;  %8412 = vpow2.f32 %v2750_v42 }
 0x443   : > { %v10501_v49 = vpop.xlane.xlu0 %2590  ;;  %v2571_v31 = vpop.xlane.xlu1 %2570  ;;  %13552 = vst [vmem:[#allocation39_spill] sm:$0xff] %v10510_v60 }
 0x444   : > { %v2651_v18 = vsub.f32 %v10283_v59, %v2571_v31 }
 0x446   : > { %2870 = vadd.xlane.f32.xlu0 %v10504_v8  ;;  %v2762_v4 = vmul.f32 1.442695, %v2651_v18  ;;  %v10514_v8 = vpop.eup %8406 }
 0x447   : > { %v2569_v11 = vpop.xlane.xlu0 %2568  ;;  %1869 = vrot.lane.b32.xlu1 %v13551_v43, %s9025_s0  ;;  %v2567_v37 = vpop.xlane.xlu1 %2566  ;;  %13553 = vst [vmem:[#allocation21_spill] sm:$0xff] %v10514_v8 }
 0x448   : > { %v2649_v28 = vsub.f32 %v10292_v26, %v2567_v37  ;;  %8414 = vpow2.f32 %v2762_v4 }
 0x44a   : > { %2902 = vadd.xlane.f32.xlu0 %v10510_v60  ;;  %v2758_v59 = vmul.f32 1.442695, %v2649_v28  ;;  %v2658_v60 = vsub.f32 %v13555_v61, %v10453_v35  ;;  %v2656_v35 = vsub.f32 %v13558_v53, %v10466_v1 }
 0x44b   : > { %v2565_v56 = vpop.xlane.xlu0 %2564  ;;  %v2801_v34 = vpop.xlane.xlu1 %2800 }
 0x44c   : > { %8416 = vpow2.f32 %v2758_v59  ;;  %v2776_v18 = vmul.f32 1.442695, %v2658_v60  ;;  %v2772_v46 = vmul.f32 1.442695, %v2656_v35 }
 0x44d   : > { %v10521_v31 = vpop.eup %8408 }
 0x44e   : > { %2880 = vadd.xlane.f32.xlu0 %v10514_v8  ;;  %13554 = vst [vmem:[#allocation54_spill] sm:$0xff] %v10521_v31  ;;  %v10528_v37 = vpop.eup %8410  ;;  %8418 = vpow2.f32 %v2776_v18 }
 0x44f   : > { %v10517_v48 = vpop.xlane.xlu0 %2602  ;;  %v10519_v40 = vpop.xlane.xlu1 %2832  ;;  %13556 = vst [vmem:[#allocation27_spill] sm:$0xff] %v10528_v37 }
 0x450   : > { %v10533_v28 = vpop.eup %8412 }
 0x451   : > { %13557 = vst [vmem:[#allocation55_spill] sm:$0xff] %v10533_v28 }
 0x452   : > { %2876 = vadd.xlane.f32.xlu0 %v10521_v31  ;;  %v13560_v31 = vld [vmem:[#allocation29_spill] sm:$0xff] }
 0x453   : > { %v10526_v42 = vpop.xlane.xlu0 %2598  ;;  %v2797_v26 = vpop.xlane.xlu1 %2796 }
 0x455   : > { %v10540_v60 = vpop.eup %8414 }
 0x456   : > { %2882 = vadd.xlane.f32.xlu0 %v10528_v37  ;;  %13559 = vst [vmem:[#allocation28_spill] sm:$0xff] %v10540_v60  ;;  %v2659_v37 = vsub.f32 %v13560_v31, %v10447_v29 }
 0x457   : > { %v10531_v8 = vpop.xlane.xlu0 %2828  ;;  %v2803_v4 = vpop.xlane.xlu1 %2802 }
 0x458   : > { %8420 = vrcp.f32 %v2803_v4  ;;  %v2778_v1 = vmul.f32 1.442695, %v2659_v37 }
 0x459   : > { %8422 = vrcp.f32 %v2797_v26  ;;  %v10547_v53 = vpop.eup %8416  ;;  %v2650_v26 = vsub.f32 %v10264_v44, %v2569_v11 }
 0x45a   : > { %2878 = vadd.xlane.f32.xlu0 %v10533_v28  ;;  %8424 = vrcp.f32 %v2801_v34  ;;  %13561 = vst [vmem:[#allocation29_spill] sm:$0xff] %v10547_v53  ;;  %v2648_v28 = vsub.f32 %v10273_v57, %v2565_v56 }
 0x45b   : > { %v10538_v61 = vpop.xlane.xlu0 %2834  ;;  %v2799_v59 = vpop.xlane.xlu1 %2798  ;;  %v2760_v4 = vmul.f32 1.442695, %v2650_v26 }
 0x45c   : > { %8426 = vrcp.f32 %v2799_v59  ;;  %v10552_v29 = vpop.eup %8418  ;;  %v2756_v9 = vmul.f32 1.442695, %v2648_v28 }
 0x45d   : > { %8428 = vpow2.f32 %v2772_v46  ;;  %13562 = vst [vmem:[#allocation56_spill] sm:$0xff] %v10552_v29 }
 0x45e   : > { %2890 = vadd.xlane.f32.xlu0 %v10540_v60  ;;  %8430 = vpow2.f32 %v2778_v1 }
 0x45f   : > { %v10545_v18 = vpop.xlane.xlu0 %2830  ;;  %8432 = vpow2.f32 %v2760_v4 }
 0x460   : > { %8434 = vpow2.f32 %v2756_v9  ;;  %v13568_v9 = vld [vmem:[#allocation20_spill] sm:$0xff] }
 0x462   : > { %2886 = vadd.xlane.f32.xlu0 %v10547_v53 }
 0x463   : > { %v2809_v34 = vpop.xlane.xlu0 %2808 }
 0x465   : > { %v8421_v31 = vpop.eup %8420 }
 0x466   : > { %v8423_v59 = vpop.eup %8422  ;;  %v2991_v46 = vmul.f32 %v8421_v31, %v10327_v2  ;;  %v13564_v2 = vld [vmem:[#allocation23_spill] sm:$0xff] }
 0x467   : > { %v10554_v35 = vpop.xlane.xlu0 %2840  ;;  %v8425_v60 = vpop.eup %8424  ;;  %v2988_v11 = vmul.f32 %v8423_v59, %v10317_v10  ;;  %v13566_v10 = vld [vmem:[#allocation26_spill] sm:$0xff]  ;;  %v13570_v59 = vld [vmem:[#allocation24_spill] sm:$0xff] }
 0x468   : > { %v2990_v57 = vmul.f32 %v8425_v60, %v10300_v19  ;;  %v13569_v60 = vld [vmem:[#allocation22_spill] sm:$0xff] }
 0x469   : > { %v8427_v37 = vpop.eup %8426  ;;  %v1719_v31 = vpack.c.bf16 %v13569_v60, %v13568_v9 }
 0x46a   : > { %v2989_v1 = vmul.f32 %v8427_v37, %v10338_v50  ;;  %v10561_v26 = vpop.eup %8428  ;;  %v3053_v53 = vpack.c.bf16 %v2991_v46, %v2990_v57  ;;  %v13572_v46 = vld [vmem:[#allocation25_spill] sm:$0xff] }
 0x46b   : > { %v2805_v44 = vpop.xlane.xlu0 %2804  ;;  %2904 = vadd.xlane.f32.xlu1 %v10552_v29  ;;  %13563 = vst [vmem:[#allocation57_spill] sm:$0xff] %v10561_v26  ;;  %v10567_v28 = vpop.eup %8430 }
 0x46c   : > { %v3052_v56 = vpack.c.bf16 %v2989_v1, %v2988_v11  ;;  %13565 = vst [vmem:[#allocation23_spill] sm:$0xff] %v10567_v28  ;;  %v10572_v19 = vpop.eup %8432  ;;  %v2817_v1 = vpop.xlane.xlu1 %2816 }
 0x46d   : > { %13567 = vst [vmem:[#allocation26_spill] sm:$0xff] %v10572_v19 }
 0x46e   : > { %7848 = vmatprep.mubr.bf16.mxu1 %v3052_v56  ;;  %v13573_v56 = vld [vmem:[#allocation36_spill] sm:$0xff] }
 0x46f   : > { %v10563_v4 = vpop.xlane.xlu0 %2836  ;;  %2900 = vadd.xlane.f32.xlu1 %v10561_v26  ;;  %7849 = vmatmul.mubr.bf16.vlgmr.msra.gmra.mxu1 %v3053_v53  ;;  %v10582_v53 = vpop.eup %8434 }
 0x470   : > { %7865 = vmatpush3.bf16.msra.mxu1 %v13564_v2  ;;  %13571 = vst [vmem:[#allocation20_spill] sm:$0xff] %v10582_v53  ;;  %v2660_v2 = vsub.f32 %v13573_v56, %v10468_v32  ;;  %v13577_v32 = vld [vmem:[#allocation19_spill] sm:$0xff] }
 0x471   : > { %7866 = vmatprep.subr.bf16.mxu1 %v13566_v10 }
 0x472   : > { %v2780_v9 = vmul.f32 1.442695, %v2660_v2 }
 0x473   : > { %v2811_v50 = vpop.xlane.xlu0 %2810  ;;  %2906 = vadd.xlane.f32.xlu1 %v10567_v28  ;;  %v13576_v28 = vld [vmem:[#allocation17_spill] sm:$0xff] }
 0x474   : > { %7867 = vmatpush3.bf16.msra.mxu1 %v13566_v10  ;;  %8436 = vrcp.f32 %v2811_v50  ;;  %v13574_v10 = vld [vmem:[#allocation34_spill] sm:$0xff]  ;;  %v1713_v56 = vpack.c.bf16 %v13577_v32, %v13576_v28 }
 0x475   : > { %7868 = vmatprep.subr.bf16.mxu1 %v13570_v59  ;;  %8438 = vrcp.f32 %v2805_v44  ;;  %v10593_v44 = vpop.xlane.xlu1 %2848  ;;  %v2662_v50 = vsub.f32 %v13574_v10, %v10484_v30 }
 0x476   : > { %8440 = vrcp.f32 %v2809_v34 }
 0x477   : > { %v10577_v37 = vpop.xlane.xlu0 %2842  ;;  %2888 = vadd.xlane.f32.xlu1 %v10572_v19  ;;  %v2663_v19 = vsub.f32 %v10253_v45, %v10493_v39  ;;  %v2665_v39 = vsub.f32 %v10319_v55, %v10526_v42 }
 0x478   : > { %1867 = vrot.lane.b32.xlu0 %v1719_v31, %s9025_s0  ;;  %7869 = vmatpush3.bf16.msra.mxu1 %v13570_v59  ;;  %v13575_v59 = vld [vmem:[#allocation18_spill] sm:$0xff] }
 0x479   : > { %7870 = vmatprep.subr.bf16.mxu1 %v13572_v46  ;;  %v2813_v26 = vpop.xlane.xlu1 %2812  ;;  %v2786_v45 = vmul.f32 1.442695, %v2663_v19 }
 0x47b   : > { %v2807_v11 = vpop.xlane.xlu0 %2806  ;;  %2884 = vadd.xlane.f32.xlu1 %v10582_v53 }
 0x47c   : > { %8442 = vrcp.f32 %v2807_v11  ;;  %7871 = vmatpush3.bf16.msra.mxu1 %v13572_v46 }
 0x47d   : > { %7872 = vmatprep.subr.bf16.mxu1 %v13551_v43  ;;  %8444 = vpow2.f32 %v2780_v9 }
 0x47f   : > { %v10588_v57 = vpop.xlane.xlu0 %2838 }
 0x480   : > { %7873 = vmatpush3.bf16.msra.mxu1 %v13551_v43  ;;  %v2784_v43 = vmul.f32 1.442695, %v2662_v50 }
 0x481   : > { %7874 = vmatprep.subr.bf16.mxu1 %v1719_v31  ;;  %v8437_v60 = vpop.eup %8436 }
 0x482   : > { %v8439_v46 = vpop.eup %8438  ;;  %v2995_v30 = vmul.f32 %v8437_v60, %v10383_v52  ;;  %8446 = vpow2.f32 %v2784_v43 }
 0x483   : > { %v10595_v34 = vpop.xlane.xlu0 %2844  ;;  %v8441_v29 = vpop.eup %8440 }
 0x484   : > { %7875 = vmatpush3.bf16.msra.mxu1 %v1719_v31  ;;  %v2992_v31 = vmul.f32 %v8439_v46, %v10368_v58  ;;  %v2994_v28 = vmul.f32 %v8441_v29, %v10354_v41  ;;  %v13578_v58 = vld [vmem:[#allocation31_spill] sm:$0xff]  ;;  %v2667_v41 = vsub.f32 %v10305_v27, %v10517_v48  ;;  %v2790_v29 = vmul.f32 1.442695, %v2665_v39 }
 0x485   : > { %7876 = vmatprep.subr.bf16.mxu1 %v13575_v59 }
 0x486   : > { %v3055_v52 = vpack.c.bf16 %v2995_v30, %v2994_v28  ;;  %v2794_v42 = vmul.f32 1.442695, %v2667_v41 }
 0x487   : > { %v2819_v11 = vpop.xlane.xlu0 %2818 }
 0x488   : > { %7877 = vmatpush3.bf16.msra.mxu1 %v13575_v59  ;;  %8448 = vrcp.f32 %v2819_v11  ;;  %v2661_v11 = vsub.f32 %v10260_v20, %v10501_v49 }
 0x489   : > { %v8443_v53 = vpop.eup %8442  ;;  %7878 = vmatprep.subr.bf16.mxu1 %v1713_v56  ;;  %8450 = vrcp.f32 %v2813_v26 }
 0x48a   : > { %v2993_v2 = vmul.f32 %v8443_v53, %v10398_v22  ;;  %8452 = vrcp.f32 %v2817_v1  ;;  %v2825_v22 = vpop.xlane.xlu1 %2824  ;;  %v10621_v26 = vpop.eup %8444  ;;  %v2782_v20 = vmul.f32 1.442695, %v2661_v11 }
 0x48b   : > { %v10608_v10 = vpop.xlane.xlu0 %2850 }
 0x48c   : > { %1865 = vrot.lane.b32.xlu1 %v13575_v59, %s9025_s0  ;;  %v3054_v50 = vpack.c.bf16 %v2993_v2, %v2992_v31  ;;  %7879 = vmatpush3.bf16.msra.mxu1 %v1713_v56 }
 0x48d   : > { %7928 = vmatprep.subr.bf16.mxu1 %v13578_v58 }
 0x48e   : > { %7852 = vmatprep.mubr.bf16.mxu1 %v3054_v50  ;;  %v10619_v19 = vpop.xlane.xlu1 %2856 }
 0x48f   : > { %v2815_v53 = vpop.xlane.xlu0 %2814  ;;  %7853 = vmatmul.mubr.bf16.gmra.mxu1 %v3055_v52  ;;  %v10624_v1 = vpop.eup %8446 }
 0x490   : > { %8454 = vrcp.f32 %v2815_v53  ;;  %1863 = vrot.lane.b32.xlu1 %v1713_v56, %s9025_s0 }
 0x491   : > { %8456 = vpow2.f32 %v2786_v45 }
 0x492   : > { %8458 = vpow2.f32 %v2790_v29  ;;  %v2821_v46 = vpop.xlane.xlu1 %2820 }
 0x493   : > { %v2847_v55 = vpop.xlane.xlu0 %2846  ;;  %8460 = vpow2.f32 %v2794_v42 }
 0x494   : > { %8462 = vrcp.f32 %v10531_v8 }
 0x495   : > { %v8449_v60 = vpop.eup %8448  ;;  %8464 = vrcp.f32 %v10545_v18 }
 0x496   : > { %v8451_v59 = vpop.eup %8450  ;;  %v2999_v56 = vmul.f32 %v8449_v60, %v10410_v15  ;;  %v13579_v15 = vld [vmem:[#allocation41_spill] sm:$0xff] }
 0x497   : > { %v2827_v9 = vpop.xlane.xlu0 %2826  ;;  %2908 = vadd.xlane.f32.xlu0 %v10621_v26  ;;  %v8453_v48 = vpop.eup %8452  ;;  %v2996_v8 = vmul.f32 %v8451_v59, %v10364_v54  ;;  %v2664_v50 = vsub.f32 %v13579_v15, %v10495_v23  ;;  %v13580_v54 = vld [vmem:[#allocation40_spill] sm:$0xff] }
 0x498   : > { %8466 = vrcp.f32 %v2827_v9  ;;  %v2998_v2 = vmul.f32 %v8453_v48, %v10347_v25 }
 0x499   : > { %8468 = vrcp.f32 %v2821_v46  ;;  %v2788_v45 = vmul.f32 1.442695, %v2664_v50 }
 0x49a   : > { %8470 = vrcp.f32 %v2825_v22  ;;  %v3057_v18 = vpack.c.bf16 %v2999_v56, %v2998_v2 }
 0x49b   : > { %v10627_v27 = vpop.xlane.xlu0 %2858  ;;  %2912 = vadd.xlane.f32.xlu0 %v10624_v1 }
 0x49d   : > { %v8455_v32 = vpop.eup %8454 }
 0x49e   : > { %v10634_v43 = vpop.eup %8456  ;;  %v2997_v30 = vmul.f32 %v8455_v32, %v10418_v62  ;;  %v2666_v62 = vsub.f32 %v13580_v54, %v10487_v38  ;;  %v13582_v54 = vld [vmem:[#allocation30_spill] sm:$0xff] }
 0x49f   : > { %v2823_v31 = vpop.xlane.xlu0 %2822  ;;  %2914 = vadd.xlane.f32.xlu0 %v10634_v43  ;;  %v10640_v28 = vpop.eup %8458 }
 0x4a0   : > { %8472 = vrcp.f32 %v2823_v31  ;;  %v3056_v49 = vpack.c.bf16 %v2997_v30, %v2996_v8  ;;  %v10648_v25 = vpop.eup %8460  ;;  %v2792_v39 = vmul.f32 1.442695, %v2666_v62 }
 0x4a1   : > { %8474 = vpow2.f32 %v2782_v20  ;;  %v8463_v23 = vpop.eup %8462 }
 0x4a2   : > { %7856 = vmatprep.mubr.bf16.mxu1 %v3056_v49  ;;  %8476 = vrcp.f32 %v10538_v61  ;;  %v8465_v52 = vpop.eup %8464 }
 0x4a3   : > { %2918 = vadd.xlane.f32.xlu0 %v10640_v28  ;;  %7857 = vmatmul.mubr.bf16.gmra.mxu1 %v3057_v18  ;;  %8478 = vrcp.f32 %v10519_v40  ;;  %v2855_v22 = vpop.xlane.xlu0 %2854  ;;  %v3005_v42 = vmul.f32 %v8465_v52, %v10345_v7  ;;  %v13583_v52 = vld [vmem:[#allocation32_spill] sm:$0xff] }
 0x4a4   : > { %8480 = vrcp.f32 %v10588_v57 }
 0x4a5   : > { %8482 = vrcp.f32 %v10563_v4  ;;  %v8467_v53 = vpop.eup %8466  ;;  %v2853_v4 = vpop.xlane.xlu1 %2852 }
 0x4a6   : > { %8484 = vpow2.f32 %v2788_v45  ;;  %v8469_v38 = vpop.eup %8468  ;;  %v3003_v40 = vmul.f32 %v8467_v53, %v10425_v6 }
 0x4a7   : > { %2922 = vadd.xlane.f32.xlu0 %v10648_v25  ;;  %v8471_v41 = vpop.eup %8470  ;;  %8486 = vpow2.f32 %v2792_v39  ;;  %v3000_v57 = vmul.f32 %v8469_v38, %v10386_v21  ;;  %v2865_v9 = vpop.xlane.xlu0 %2864 }
 0x4a8   : > { %8488 = vrcp.f32 %v10577_v37  ;;  %v3002_v60 = vmul.f32 %v8471_v41, %v10371_v13  ;;  %v3004_v37 = vmul.f32 %v8463_v23, %v10329_v63 }
 0x4a9   : > { %8490 = vrcp.f32 %v2847_v55 }
 0x4aa   : > { %8492 = vrcp.f32 %v10554_v35  ;;  %v3059_v6 = vpack.c.bf16 %v3003_v40, %v3002_v60  ;;  %v3060_v21 = vpack.c.bf16 %v3005_v42, %v3004_v37 }
 0x4ab   : > { %8494 = vrcp.f32 %v10595_v34 }
 0x4ac   : > { %8496 = vrcp.f32 %v10608_v10 }
 0x4ad   : > { %v8473_v61 = vpop.eup %8472  ;;  %8498 = vrcp.f32 %v2855_v22 }
 0x4ae   : > { %v3001_v29 = vmul.f32 %v8473_v61, %v10432_v3  ;;  %v10663_v46 = vpop.eup %8474  ;;  %8500 = vrcp.f32 %v10593_v44 }
 0x4af   : > { %v8477_v55 = vpop.eup %8476  ;;  %v10665_v48 = vpop.xlane.xlu0 %2896  ;;  %8502 = vrcp.f32 %v2853_v4 }
 0x4b0   : > { %v3058_v59 = vpack.c.bf16 %v3001_v29, %v3000_v57  ;;  %v8479_v3 = vpop.eup %8478  ;;  %v3007_v13 = vmul.f32 %v8477_v55, %v10336_v51  ;;  %8504 = vrcp.f32 %v10627_v27  ;;  %v13581_v27 = vld [vmem:[#allocation37_spill] sm:$0xff]  ;;  %v13584_v57 = vld [vmem:[#allocation43_spill] sm:$0xff] }
 0x4b1   : > { %v8481_v35 = vpop.eup %8480  ;;  %v3006_v56 = vmul.f32 %v8479_v3, %v10308_v17 }
 0x4b2   : > { %7860 = vmatprep.mubr.bf16.mxu1 %v3058_v59  ;;  %v8483_v63 = vpop.eup %8482  ;;  %v3009_v8 = vmul.f32 %v8481_v35, %v10402_v5  ;;  %v13585_v59 = vld [vmem:[#allocation48_spill] sm:$0xff] }
 0x4b3   : > { %7861 = vmatmul.mubr.bf16.gmra.mxu1 %v3059_v6  ;;  %v2861_v7 = vpop.xlane.xlu1 %2860  ;;  %v10670_v34 = vpop.eup %8484  ;;  %v3061_v51 = vpack.c.bf16 %v3007_v13, %v3006_v56  ;;  %v3008_v10 = vmul.f32 %v8483_v63, %v10375_v0 }
 0x4b4   : > { %2910 = vadd.xlane.f32.xlu1 %v10663_v46  ;;  %7880 = vmatprep.mubr.bf16.mxu1 %v3060_v21  ;;  %v10676_v30 = vpop.eup %8486  ;;  %v13587_v21 = vld [vmem:[#allocation51_spill] sm:$0xff] }
 0x4b5   : > { %v8489_v31 = vpop.eup %8488  ;;  %v3062_v20 = vpack.c.bf16 %v3009_v8, %v3008_v10  ;;  %v13590_v8 = vld [vmem:[#allocation52_spill] sm:$0xff] }
 0x4b6   : > { %v8491_v2 = vpop.eup %8490  ;;  %v3011_v0 = vmul.f32 %v8489_v31, %v10390_v14  ;;  %v13591_v31 = vld [vmem:[#allocation42_spill] sm:$0xff] }
 0x4b7   : > { %v2893_v11 = vpop.xlane.xlu0 %2892  ;;  %v2867_v32 = vpop.xlane.xlu1 %2866  ;;  %v3013_v18 = vmul.f32 %v8491_v2, %v10422_v36 }
 0x4b8   : > { %2916 = vadd.xlane.f32.xlu1 %v10670_v34  ;;  %8506 = vrcp.f32 %v2867_v32  ;;  %v8493_v5 = vpop.eup %8492 }
 0x4b9   : > { %8508 = vrcp.f32 %v2861_v7  ;;  %v8495_v49 = vpop.eup %8494  ;;  %v3010_v50 = vmul.f32 %v8493_v5, %v10361_v47  ;;  %v13588_v7 = vld [vmem:[#allocation45_spill] sm:$0xff] }
 0x4ba   : > { %8510 = vrcp.f32 %v2865_v9  ;;  %v8497_v45 = vpop.eup %8496 }
 0x4bb   : > { %v10680_v44 = vpop.xlane.xlu0 %2898  ;;  %7881 = vmatmul.mubr.bf16.vlgmr.msra.gmra.mxu1 %v3061_v51  ;;  %v2863_v17 = vpop.xlane.xlu1 %2862  ;;  %v3063_v62 = vpack.c.bf16 %v3011_v0, %v3010_v50  ;;  %v3015_v47 = vmul.f32 %v8497_v45, %v10414_v33 }
 0x4bc   : > { %7929 = vmatpush3.bf16.msra.mxu1 %v13578_v58  ;;  %2920 = vadd.xlane.f32.xlu1 %v10676_v30  ;;  %8512 = vrcp.f32 %v2863_v17  ;;  %v3012_v58 = vmul.f32 %v8495_v49, %v10406_v12  ;;  %v8499_v14 = vpop.eup %8498  ;;  %v13592_v17 = vld [vmem:[#allocation49_spill] sm:$0xff] }
 0x4bd   : > { %7884 = vmatprep.mubr.bf16.mxu1 %v3062_v20  ;;  %7930 = vmatprep.subr.bf16.mxu1 %v13581_v27  ;;  %8514 = vrcp.f32 %v10619_v19  ;;  %v8501_v19 = vpop.eup %8500  ;;  %v3017_v12 = vmul.f32 %v8499_v14, %v10437_v24  ;;  %v13586_v24 = vld [vmem:[#allocation47_spill] sm:$0xff]  ;;  %v13595_v14 = vld [vmem:[#allocation38_spill] sm:$0xff] }
 0x4be   : > { %8516 = vrcp.f32 %v2893_v11  ;;  %v3064_v39 = vpack.c.bf16 %v3013_v18, %v3012_v58  ;;  %v8503_v36 = vpop.eup %8502  ;;  %v3014_v41 = vmul.f32 %v8501_v19, %v10356_v16  ;;  %v13589_v11 = vld [vmem:[#allocation44_spill] sm:$0xff] }
 0x4bf   : > { %v2895_v15 = vpop.xlane.xlu0 %2894  ;;  %v2873_v23 = vpop.xlane.xlu1 %2872  ;;  %v3016_v29 = vmul.f32 %v8503_v36, %v13584_v57 }
 0x4c0   : > { %8518 = vrcp.f32 %v2895_v15  ;;  %7931 = vmatpush3.bf16.msra.mxu1 %v13581_v27  ;;  %v8505_v22 = vpop.eup %8504  ;;  %v3065_v4 = vpack.c.bf16 %v3015_v47, %v3014_v41 }
 0x4c1   : > { %7932 = vmatprep.subr.bf16.mxu1 %v13582_v54  ;;  %v3066_v60 = vpack.c.bf16 %v3017_v12, %v3016_v29  ;;  %v3019_v32 = vmul.f32 %v8505_v22, %v13589_v11 }
 0x4c3   : > { %7885 = vmatmul.mubr.bf16.gmra.mxu1 %v3063_v62  ;;  %v1870_v40 = vpop.permute.xlu1 %1869  ;;  %v13593_v62 = vld [vmem:[#allocation35_spill] sm:$0xff] }
 0x4c4   : > { %7933 = vmatpush3.bf16.msra.mxu1 %v13582_v54  ;;  %7888 = vmatprep.mubr.bf16.mxu1 %v3064_v39 }
 0x4c5   : > { %7934 = vmatprep.subr.bf16.mxu1 %v13583_v52  ;;  %v8507_v53 = vpop.eup %8506 }
 0x4c6   : > { %v8509_v61 = vpop.eup %8508  ;;  %v3023_v33 = vmul.f32 %v8507_v53, %v13585_v59 }
 0x4c7   : > { %v2869_v38 = vpop.xlane.xlu0 %2868  ;;  %v8511_v42 = vpop.eup %8510  ;;  %v3020_v55 = vmul.f32 %v8509_v61, %v13586_v24 }
 0x4c8   : > { %7935 = vmatpush3.bf16.msra.mxu1 %v13583_v52  ;;  %v3022_v35 = vmul.f32 %v8511_v42, %v13588_v7  ;;  %v13596_v52 = vld [vmem:[#allocation53_spill] sm:$0xff] }
 0x4c9   : > { %7936 = vmatprep.subr.bf16.mxu1 %v1870_v40  ;;  %v8513_v9 = vpop.eup %8512 }
 0x4ca   : > { %v8515_v37 = vpop.eup %8514  ;;  %v3021_v16 = vmul.f32 %v8513_v9, %v13587_v21  ;;  %v3069_v56 = vpack.c.bf16 %v3023_v33, %v3022_v35  ;;  %v13599_v33 = vld [vmem:[#allocation55_spill] sm:$0xff] }
 0x4cb   : > { %v2875_v6 = vpop.xlane.xlu0 %2874  ;;  %7889 = vmatmul.mubr.bf16.gmra.mxu1 %v3065_v4  ;;  %v8517_v3 = vpop.eup %8516  ;;  %v3018_v2 = vmul.f32 %v8515_v37, %v13591_v31  ;;  %v13597_v4 = vld [vmem:[#allocation27_spill] sm:$0xff] }
 0x4cc   : > { %7937 = vmatpush3.bf16.msra.mxu1 %v1870_v40  ;;  %7892 = vmatprep.mubr.bf16.mxu1 %v3066_v60  ;;  %8520 = vrcp.f32 %v2875_v6  ;;  %v3068_v63 = vpack.c.bf16 %v3021_v16, %v3020_v55  ;;  %v3036_v20 = vmul.f32 %v8517_v3, %v13592_v17  ;;  %v13598_v60 = vld [vmem:[#allocation54_spill] sm:$0xff]  ;;  %v13600_v6 = vld [vmem:[#allocation21_spill] sm:$0xff] }
 0x4cd   : > { %v8519_v13 = vpop.eup %8518  ;;  %8522 = vrcp.f32 %v2869_v38  ;;  %v3067_v5 = vpack.c.bf16 %v3019_v32, %v3018_v2  ;;  %v13603_v17 = vld [vmem:[#allocation46_spill] sm:$0xff] }
 0x4ce   : > { %v3037_v51 = vmul.f32 %v8519_v13, %v13590_v8  ;;  %8524 = vrcp.f32 %v2873_v23  ;;  %7912 = vmatprep.mubr.bf16.mxu0 %v3068_v63  ;;  %v13594_v23 = vld [vmem:[#allocation33_spill] sm:$0xff]  ;;  %v13601_v8 = vld [vmem:[#allocation50_spill] sm:$0xff] }
 0x4cf   : > { %v2871_v10 = vpop.xlane.xlu0 %2870  ;;  %7913 = vmatmul.mubr.bf16.vlgmr.msra.gmra.mxu0 %v3069_v56 }
 0x4d0   : > { %8526 = vrcp.f32 %v2871_v10  ;;  %v3076_v49 = vpack.c.bf16 %v3037_v51, %v3036_v20 }
 0x4d3   : > { %v2903_v27 = vpop.xlane.xlu0 %2902  ;;  %7893 = vmatmul.mubr.bf16.gmra.mxu1 %v3067_v5 }
 0x4d4   : > { %7944 = vmatprep.mubr.bf16.mxu1 %v3076_v49  ;;  %v13604_v49 = vld [vmem:[#allocation39_spill] sm:$0xff] }
 0x4d7   : > { %v2881_v0 = vpop.xlane.xlu0 %2880 }
 0x4d9   : > { %v8521_v18 = vpop.eup %8520 }
 0x4da   : > { %v8523_v15 = vpop.eup %8522  ;;  %v3027_v45 = vmul.f32 %v8521_v18, %v13593_v62  ;;  %v13605_v62 = vld [vmem:[#allocation26_spill] sm:$0xff] }
 0x4db   : > { %v2877_v50 = vpop.xlane.xlu0 %2876  ;;  %v8525_v58 = vpop.eup %8524  ;;  %v3024_v39 = vmul.f32 %v8523_v15, %v13594_v23  ;;  %v13606_v23 = vld [vmem:[#allocation20_spill] sm:$0xff] }
 0x4dc   : > { %v3026_v47 = vmul.f32 %v8525_v58, %v13596_v52 }
 0x4dd   : > { %v8527_v54 = vpop.eup %8526 }
 0x4de   : > { %v3025_v19 = vmul.f32 %v8527_v54, %v13595_v14  ;;  %v3071_v12 = vpack.c.bf16 %v3027_v45, %v3026_v47  ;;  %v13607_v14 = vld [vmem:[#allocation29_spill] sm:$0xff]  ;;  %v13609_v47 = vld [vmem:[#allocation28_spill] sm:$0xff] }
 0x4df   : > { %v2883_v36 = vpop.xlane.xlu0 %2882 }
 0x4e0   : > { %v3070_v22 = vpack.c.bf16 %v3025_v19, %v3024_v39  ;;  %8528 = vrcp.f32 %v2883_v36  ;;  %v13608_v36 = vld [vmem:[#allocation23_spill] sm:$0xff] }
 0x4e1   : > { %8530 = vrcp.f32 %v2877_v50 }
 0x4e2   : > { %7916 = vmatprep.mubr.bf16.mxu0 %v3070_v22  ;;  %8532 = vrcp.f32 %v2881_v0 }
 0x4e3   : > { %v2879_v53 = vpop.xlane.xlu0 %2878  ;;  %7917 = vmatmul.mubr.bf16.gmra.mxu0 %v3071_v12 }
 0x4e4   : > { %8534 = vrcp.f32 %v2879_v53  ;;  %v13610_v53 = vld [vmem:[#allocation56_spill] sm:$0xff] }
 0x4e5   : > { %8536 = vrcp.f32 %v10680_v44 }
 0x4e7   : > { %v2891_v38 = vpop.xlane.xlu0 %2890 }
 0x4eb   : > { %v2887_v41 = vpop.xlane.xlu0 %2886 }
 0x4ed   : > { %v8529_v61 = vpop.eup %8528 }
 0x4ee   : > { %v8531_v40 = vpop.eup %8530  ;;  %v3031_v9 = vmul.f32 %v8529_v61, %v13597_v4 }
 0x4ef   : > { %v1868_v57 = vpop.permute.xlu0 %1867  ;;  %v8533_v29 = vpop.eup %8532  ;;  %v3028_v59 = vmul.f32 %v8531_v40, %v13598_v60 }
 0x4f0   : > { %7938 = vmatprep.subr.bf16.mxu1 %v1868_v57  ;;  %v3030_v24 = vmul.f32 %v8533_v29, %v13600_v6 }
 0x4f1   : > { %v8535_v42 = vpop.eup %8534  ;;  %7939 = vmatpush3.bf16.msra.mxu1 %v1868_v57 }
 0x4f2   : > { %v3029_v37 = vmul.f32 %v8535_v42, %v13599_v33  ;;  %v3073_v16 = vpack.c.bf16 %v3031_v9, %v3030_v24  ;;  %v8537_v63 = vpop.eup %8536 }
 0x4f3   : > { %v3039_v51 = vmul.f32 %v8537_v63, %v13601_v8 }
 0x4f4   : > { %v2905_v55 = vpop.xlane.xlu1 %2904  ;;  %v3072_v21 = vpack.c.bf16 %v3029_v37, %v3028_v59 }
 0x4f6   : > { %7920 = vmatprep.mubr.bf16.mxu0 %v3072_v21 }
 0x4f7   : > { %7921 = vmatmul.mubr.bf16.gmra.mxu0 %v3073_v16 }
 0x4f8   : > { %v2901_v3 = vpop.xlane.xlu1 %2900 }
 0x4f9   : > { %8538 = vrcp.f32 %v2901_v3 }
 0x4fa   : > { %8540 = vrcp.f32 %v10665_v48  ;;  %v13602_v48 = vld [vmem:[#allocation57_spill] sm:$0xff] }
 0x4fb   : > { %8542 = vrcp.f32 %v2903_v27 }
 0x4fc   : > { %v2907_v7 = vpop.xlane.xlu1 %2906  ;;  %8544 = vrcp.f32 %v2891_v38 }
 0x4fd   : > { %8546 = vrcp.f32 %v2887_v41 }
 0x500   : > { %v2889_v35 = vpop.xlane.xlu1 %2888 }
 0x501   : > { %8548 = vrcp.f32 %v2889_v35 }
 0x502   : > { %8550 = vrcp.f32 %v2907_v7 }
 0x503   : > { %8552 = vrcp.f32 %v2905_v55 }
 0x504   : > { %v2885_v13 = vpop.xlane.xlu1 %2884 }
 0x505   : > { %8554 = vrcp.f32 %v2885_v13 }
 0x506   : > { %v8539_v32 = vpop.eup %8538 }
 0x507   : > { %v8541_v56 = vpop.eup %8540  ;;  %v3040_v31 = vmul.f32 %v8539_v32, %v13602_v48 }
 0x508   : > { %v1866_v11 = vpop.permute.xlu1 %1865  ;;  %v8543_v44 = vpop.eup %8542  ;;  %v3038_v20 = vmul.f32 %v8541_v56, %v13603_v17 }
 0x509   : > { %7940 = vmatprep.subr.bf16.mxu1 %v1866_v11  ;;  %v8545_v2 = vpop.eup %8544  ;;  %v3041_v27 = vmul.f32 %v8543_v44, %v13604_v49 }
 0x50a   : > { %7941 = vmatpush3.bf16.msra.mxu1 %v1866_v11  ;;  %v8547_v5 = vpop.eup %8546  ;;  %v3077_v18 = vpack.c.bf16 %v3039_v51, %v3038_v20  ;;  %v3035_v22 = vmul.f32 %v8545_v2, %v13609_v47  ;;  %v13611_v20 = vmov 0   ;;  %v8170_v47 = vld [vmem:[%s9192_s30 + $0x8] sm:$0xff]  }
 0x50b   : > { %v3078_v50 = vpack.c.bf16 %v3041_v27, %v3040_v31  ;;  %v3033_v19 = vmul.f32 %v8547_v5, %v13607_v14 }
 0x50c   : > { %v1864_v10 = vpop.permute.xlu1 %1863 }
 0x50d   : > { %7942 = vmatprep.subr.bf16.mxu1 %v1864_v10 }
 0x50e   : > { %7943 = vmatpush3.bf16.msra.mxu1 %v1864_v10  ;;  %v8549_v0 = vpop.eup %8548 }
 0x50f   : > { %v8551_v15 = vpop.eup %8550  ;;  %v3034_v45 = vmul.f32 %v8549_v0, %v13605_v62 }
 0x510   : > { %v8553_v58 = vpop.eup %8552  ;;  %v3043_v52 = vmul.f32 %v8551_v15, %v13608_v36  ;;  %v8165_v15 = vld [vmem:[%s9192_s30 + $0x30] sm:$0xff]  }
 0x511   : > { %7945 = vmatmul.mubr.bf16.vlgmr.msra.gmra.mxu1 %v3077_v18  ;;  %v3042_v38 = vmul.f32 %v8553_v58, %v13610_v53  ;;  %v3075_v41 = vpack.c.bf16 %v3035_v22, %v3034_v45  ;;  %v8167_v58 = vld [vmem:[%s9192_s30 + $0x20] sm:$0xff]   ;;  %v8168_v45 = vld [vmem:[%s9192_s30 + $0x18] sm:$0xff]  }
 0x512   : > { %v8555_v54 = vpop.eup %8554  ;;  %7948 = vmatprep.mubr.bf16.mxu1 %v3078_v50 }
 0x513   : > { %v3032_v39 = vmul.f32 %v8555_v54, %v13606_v23  ;;  %v3079_v61 = vpack.c.bf16 %v3043_v52, %v3042_v38 }
 0x515   : > { %v3074_v12 = vpack.c.bf16 %v3033_v19, %v3032_v39  ;;  %v8169_v19 = vld [vmem:[%s9192_s30 + $0x10] sm:$0xff]  }
 0x517   : > { %7924 = vmatprep.mubr.bf16.mxu0 %v3074_v12 }
 0x518   : > { %7925 = vmatmul.mubr.bf16.gmra.mxu0 %v3075_v41 }
 0x519   : > { %7949 = vmatmul.mubr.bf16.gmra.mxu1 %v3079_v61 }
 0x520   : > { %v2909_v40 = vpop.xlane.xlu0 %2908 }
 0x524   : > { %v2913_v57 = vpop.xlane.xlu0 %2912 }
 0x528   : > { %v2915_v9 = vpop.xlane.xlu0 %2914 }
 0x529   : > { %8556 = vrcp.f32 %v2915_v9  ;;  %v8171_v9 = vld [vmem:[%s9192_s30] sm:$0xff]  }
 0x52a   : > { %8558 = vrcp.f32 %v2909_v40 }
 0x52b   : > { %8560 = vrcp.f32 %v2913_v57 }
 0x52c   : > { %v2919_v59 = vpop.xlane.xlu0 %2918 }
 0x52f   : > { %v10727_v29 = vpop.f32.mrf.mxu1 }
 0x530   : > { %v2923_v37 = vpop.xlane.xlu0 %2922 }
 0x531   : > { %v10729_v42 = vpop.f32.mrf.mxu1 }
 0x533   : > { %v10731_v4 = vpop.f32.mrf.mxu1 }
 0x534   : > { %v3473_v60 = vpack.c.bf16 %v10731_v4, %v10727_v29 }
 0x535   : > { %v10738_v11 = vpop.f32.mrf.mxu1 }
 0x536   : > { %v8557_v55 = vpop.eup %8556 }
 0x537   : > { %v8559_v21 = vpop.eup %8558  ;;  %v3047_v7 = vmul.f32 %v8557_v55, %v10634_v43 }
 0x538   : > { %v8561_v16 = vpop.eup %8560  ;;  %v3044_v35 = vmul.f32 %v8559_v21, %v10621_v26 }
 0x539   : > { %v3046_v32 = vmul.f32 %v8561_v16, %v10624_v1 }
 0x53b   : > { %v3081_v51 = vpack.c.bf16 %v3047_v7, %v3046_v32 }
 0x53d   : > { %v2911_v33 = vpop.xlane.xlu1 %2910 }
 0x53e   : > { %8562 = vrcp.f32 %v2911_v33 }
 0x53f   : > { %8564 = vrcp.f32 %v2919_v59 }
 0x541   : > { %v2917_v6 = vpop.xlane.xlu1 %2916 }
 0x542   : > { %8566 = vrcp.f32 %v2917_v6 }
 0x543   : > { %8568 = vrcp.f32 %v2923_v37 }
 0x545   : > { %v2921_v24 = vpop.xlane.xlu1 %2920 }
 0x546   : > { %8570 = vrcp.f32 %v2921_v24 }
 0x54b   : > { %v8563_v3 = vpop.eup %8562 }
 0x54c   : > { %v3045_v13 = vmul.f32 %v8563_v3, %v10663_v46  ;;  %v8565_v63 = vpop.eup %8564 }
 0x54d   : > { %v3049_v48 = vmul.f32 %v8565_v63, %v10640_v28 }
 0x54e   : > { %v3080_v56 = vpack.c.bf16 %v3045_v13, %v3044_v35 }
 0x54f   : > { %v8567_v44 = vpop.eup %8566  ;;  %v10741_v8 = vpop.f32.mrf.mxu1 }
 0x550   : > { %7952 = vmatprep.mubr.bf16.mxu1 %v3080_v56  ;;  %v3048_v10 = vmul.f32 %v8567_v44, %v10670_v34  ;;  %v8569_v43 = vpop.eup %8568 }
 0x551   : > { %v10745_v31 = vpop.f32.mrf.mxu1  ;;  %7953 = vmatmul.mubr.bf16.gmra.mxu1 %v3081_v51  ;;  %v3051_v34 = vmul.f32 %v8569_v43, %v10648_v25  ;;  %v8166_v25 = vld [vmem:[%s9192_s30 + $0x28] sm:$0xff]  }
 0x552   : > { %v3082_v26 = vpack.c.bf16 %v3049_v48, %v3048_v10 }
 0x553   : > { %v8571_v46 = vpop.eup %8570  ;;  %v10747_v2 = vpop.f32.mrf.mxu1 }
 0x554   : > { %v3475_v1 = vpack.c.bf16 %v10747_v2, %v10741_v8  ;;  %7956 = vmatprep.mubr.bf16.mxu1 %v3082_v26  ;;  %v3050_v17 = vmul.f32 %v8571_v46, %v10676_v30  ;;  %v8164_v30 = vld [vmem:[%s9192_s30 + $0x38] sm:$0xff]  }
 0x555   : > { %v10754_v5 = vpop.f32.mrf.mxu1  ;;  %7960 = vmatprep.subr.bf16.mxu0 %v8164_v30 }
 0x556   : > { %v3083_v28 = vpack.c.bf16 %v3051_v34, %v3050_v17  ;;  %7961 = vmatpush3.bf16.msra.mxu0 %v8164_v30 }
 0x557   : > { %7962 = vmatprep.subr.bf16.mxu0 %v8165_v15 }
 0x559   : > { %7957 = vmatmul.mubr.bf16.gmra.mxu1 %v3083_v28 }
 0x55a   : > { %4654 = vmatprep.mubr.bf16.mxu1 %v13611_v20  ;;  %7963 = vmatpush3.bf16.msra.mxu0 %v8165_v15 }
 0x55b   : > { %7964 = vmatprep.subr.bf16.mxu0 %v8166_v25 }
 0x55e   : > { %7965 = vmatpush3.bf16.msra.mxu0 %v8166_v25 }
 0x55f   : > { %7966 = vmatprep.subr.bf16.mxu0 %v8167_v58 }
 0x562   : > { %7967 = vmatpush3.bf16.msra.mxu0 %v8167_v58 }
 0x563   : > { %v10756_v49 = vpop.f32.mrf.mxu1  ;;  %7968 = vmatprep.subr.bf16.mxu0 %v8168_v45 }
 0x565   : > { %v10758_v27 = vpop.f32.mrf.mxu1 }
 0x566   : > { %7969 = vmatpush3.bf16.msra.mxu0 %v8168_v45 }
 0x567   : > { %v10760_v0 = vpop.f32.mrf.mxu1  ;;  %7970 = vmatprep.subr.bf16.mxu0 %v8169_v19 }
 0x568   : > { %v3477_v18 = vpack.c.bf16 %v10760_v0, %v10756_v49 }
 0x569   : > { %v10767_v50 = vpop.f32.mrf.mxu1 }
 0x56a   : > { %7971 = vmatpush3.bf16.msra.mxu0 %v8169_v19 }
 0x56b   : > { %7972 = vmatprep.subr.bf16.mxu0 %v8170_v47 }
 0x56e   : > { %7973 = vmatpush3.bf16.msra.mxu0 %v8170_v47 }
 0x56f   : > { %7974 = vmatprep.subr.bf16.mxu0 %v8171_v9 }
 0x572   : > { %7975 = vmatpush3.bf16.msra.mxu0 %v8171_v9 }
 0x573   : > { %v10770_v54 = vpop.f32.mrf.mxu1 }
 0x575   : > { %v10772_v62 = vpop.f32.mrf.mxu1 }
 0x577   : > { %v10775_v23 = vpop.f32.mrf.mxu1 }
 0x578   : > { %v3479_v39 = vpack.c.bf16 %v10775_v23, %v10770_v54 }
 0x579   : > { %v10779_v14 = vpop.f32.mrf.mxu1 }
 0x57a   : > { %v3478_v8 = vpack.c.bf16 %v10779_v14, %v10772_v62 }
 0x57b   : > { %v10782_v36 = vpop.f32.mrf.mxu1 }
 0x57d   : > { %v10784_v52 = vpop.f32.mrf.mxu1 }
 0x57f   : > { %v10787_v22 = vpop.f32.mrf.mxu1 }
 0x580   : > { %v3481_v12 = vpack.c.bf16 %v10787_v22, %v10782_v36 }
 0x581   : > { %v10791_v53 = vpop.f32.mrf.mxu1 }
 0x583   : > { %v10793_v38 = vpop.f32.mrf.mxu1 }
 0x585   : > { %v10795_v41 = vpop.f32.mrf.mxu1 }
 0x587   : > { %v10797_v61 = vpop.f32.mrf.mxu1 }
 0x588   : > { %v3483_v40 = vpack.c.bf16 %v10797_v61, %v10793_v38 }
 0x589   : > { %v10801_v57 = vpop.f32.mrf.mxu1 }
 0x58a   : > { %v3482_v14 = vpack.c.bf16 %v10801_v57, %v10795_v41 }
 0x58b   : > { %v10804_v59 = vpop.f32.mrf.mxu1 }
 0x58d   : > { %v10806_v33 = vpop.f32.mrf.mxu1 }
 0x58f   : > { %v10808_v37 = vpop.f32.mrf.mxu1  ;;  %v7914_v24 = vpop.f32.mrf.mxu0 }
 0x590   : > { %v3485_v6 = vpack.c.bf16 %v10808_v37, %v10804_v59  ;;  %v10902_v37 = vld [vmem:[%s13612_s24] ss:$0 sm:$0xff] }
 0x591   : > { %v10812_v55 = vpop.f32.mrf.mxu1  ;;  %v3312_v21 = vpop.f32.mrf.mxu0 }
 0x593   : > { %v10814_v16 = vpop.f32.mrf.mxu1  ;;  %v7915_v3 = vpop.f32.mrf.mxu0 }
 0x594   : > { %v3489_v7 = vpack.c.bf16 %v7915_v3, %v7914_v24 }
 0x595   : > { %v10816_v35 = vpop.f32.mrf.mxu1  ;;  %v3315_v13 = vpop.f32.mrf.mxu0 }
 0x596   : > { %v3488_v63 = vpack.c.bf16 %v3315_v13, %v3312_v21  ;;  %3522 = vrot.lane.b32.xlu0 %v3489_v7, %s9025_s0 }
 0x597   : > { %v10819_v32 = vpop.f32.mrf.mxu1 }
 0x598   : > { %v3487_v56 = vpack.c.bf16 %v10819_v32, %v10814_v16  ;;  %3520 = vrot.lane.b32.xlu1 %v3488_v63, %s9025_s0 }
 0x599   : > { %v10828_v25 = vpop.f32.mrf.mxu1 }
 0x5a3   : > { %v7918_v44 = vpop.f32.mrf.mxu0 }
 0x5a5   : > { %v3328_v51 = vpop.f32.mrf.mxu0 }
 0x5a7   : > { %v7919_v10 = vpop.f32.mrf.mxu0 }
 0x5a8   : > { %v3491_v26 = vpack.c.bf16 %v7919_v10, %v7918_v44 }
 0x5a9   : > { %v3331_v48 = vpop.f32.mrf.mxu0 }
 0x5aa   : > { %v3490_v43 = vpack.c.bf16 %v3331_v48, %v3328_v51 }
 0x5ac   : > { %3524 = vrot.lane.b32.xlu1 %v3490_v43, %s9025_s0 }
 0x5b0   : > { %3526 = vrot.lane.b32.xlu1 %v3491_v26, %s9025_s0 }
 0x5b7   : > { %v7922_v46 = vpop.f32.mrf.mxu0 }
 0x5b9   : > { %v3344_v17 = vpop.f32.mrf.mxu0 }
 0x5bb   : > { %v7923_v34 = vpop.f32.mrf.mxu0 }
 0x5bc   : > { %v3493_v28 = vpack.c.bf16 %v7923_v34, %v7922_v46 }
 0x5bd   : > { %v3347_v30 = vpop.f32.mrf.mxu0 }
 0x5be   : > { %v3492_v15 = vpack.c.bf16 %v3347_v30, %v3344_v17  ;;  %3530 = vrot.lane.b32.xlu1 %v3493_v28, %s9025_s0  ;;  %v3472_v17 = vpack.c.bf16 %v10738_v11, %v10729_v42 }
 0x5c0   : > { %3528 = vrot.lane.b32.xlu0 %v3492_v15, %s9025_s0 }
 0x5d1   : > { %v7946_v58 = vpop.f32.mrf.mxu1 }
 0x5d3   : > { %v3409_v45 = vpop.f32.mrf.mxu1 }
 0x5d5   : > { %v7947_v19 = vpop.f32.mrf.mxu1 }
 0x5d6   : > { %v3497_v10 = vpack.c.bf16 %v7947_v19, %v7946_v58 }
 0x5d7   : > { %v3412_v47 = vpop.f32.mrf.mxu1 }
 0x5d8   : > { %v7926_v9 = vpop.f32.mrf.mxu0  ;;  %v3496_v48 = vpack.c.bf16 %v3412_v47, %v3409_v45 }
 0x5d9   : > { %v7950_v24 = vpop.f32.mrf.mxu1 }
 0x5da   : > { %v3360_v21 = vpop.f32.mrf.mxu0 }
 0x5db   : > { %v3425_v3 = vpop.f32.mrf.mxu1 }
 0x5dc   : > { %v7927_v7 = vpop.f32.mrf.mxu0 }
 0x5dd   : > { %v3495_v13 = vpack.c.bf16 %v7927_v7, %v7926_v9  ;;  %v7951_v51 = vpop.f32.mrf.mxu1 }
 0x5de   : > { %v3363_v63 = vpop.f32.mrf.mxu0  ;;  %v3499_v26 = vpack.c.bf16 %v7951_v51, %v7950_v24 }
 0x5df   : > { %v3494_v44 = vpack.c.bf16 %v3363_v63, %v3360_v21  ;;  %3534 = vrot.lane.b32.xlu1 %v3495_v13, %s9025_s0  ;;  %v3428_v43 = vpop.f32.mrf.mxu1  ;;  %v3474_v21 = vpack.c.bf16 %v10754_v5, %v10745_v31  ;;  %v3476_v31 = vpack.c.bf16 %v10767_v50, %v10758_v27  ;;  %v3480_v50 = vpack.c.bf16 %v10791_v53, %v10784_v52 }
 0x5e0   : > { %v3498_v46 = vpack.c.bf16 %v3428_v43, %v3425_v3  ;;  %v3484_v53 = vpack.c.bf16 %v10812_v55, %v10806_v33 }
 0x5e1   : > { %3532 = vrot.lane.b32.xlu0 %v3494_v44, %s9025_s0 }
 0x5e3   : > { %3538 = vrot.lane.b32.xlu1 %v3497_v10, %s9025_s0 }
 0x5e5   : > { %3536 = vrot.lane.b32.xlu0 %v3496_v48, %s9025_s0 }
 0x5e7   : > { %3542 = vrot.lane.b32.xlu1 %v3499_v26, %s9025_s0 }
 0x5e9   : > { %3540 = vrot.lane.b32.xlu0 %v3498_v46, %s9025_s0  ;;  %v8895_v46 = vld [vmem:[#allocation2] sm:$0xff] }
 0x608   : > { %v3523_v34 = vpop.permute.xlu0 %3522 }
 0x609   : > { %v3558_v15 = vsel %vm1895_vm0, %v3473_v60, %v3523_v34 }
 0x60a   : > { %v3521_v28 = vpop.permute.xlu1 %3520 }
 0x60b   : > { %v3554_v30 = vsel %vm1895_vm0, %v3472_v17, %v3521_v28  ;;  %v8896_v28 = vld [vmem:[#allocation2 + $0xd8] sm:$0xff] }
 0x60c   : > { %7976 = vmatprep.mubr.bf16.mxu0 %v3554_v30 }
 0x60d   : > { %7977 = vmatmul.mubr.bf16.vlgmr.msra.gmra.mxu0 %v3558_v15 }
 0x611   : > { %v7954_v58 = vpop.f32.mrf.mxu1 }
 0x613   : > { %v3441_v45 = vpop.f32.mrf.mxu1 }
 0x615   : > { %v7955_v19 = vpop.f32.mrf.mxu1 }
 0x616   : > { %v3501_v47 = vpack.c.bf16 %v7955_v19, %v7954_v58 }
 0x617   : > { %v3444_v9 = vpop.f32.mrf.mxu1 }
 0x618   : > { %v3500_v24 = vpack.c.bf16 %v3444_v9, %v3441_v45  ;;  %3546 = vrot.lane.b32.xlu1 %v3501_v47, %s9025_s0  ;;  %v8897_v45 = vld [vmem:[#allocation2 + $0x18] sm:$0xff] }
 0x619   : > { %v7958_v42 = vpop.f32.mrf.mxu1 }
 0x61a   : > { %3544 = vrot.lane.b32.xlu0 %v3500_v24, %s9025_s0 }
 0x61b   : > { %v3457_v11 = vpop.f32.mrf.mxu1 }
 0x61d   : > { %v7959_v29 = vpop.f32.mrf.mxu1 }
 0x61e   : > { %v3503_v4 = vpack.c.bf16 %v7959_v29, %v7958_v42  ;;  %v3525_v60 = vpop.permute.xlu1 %3524  ;;  %v8174_v42 = vld [vmem:[%s9199_s2 + $0xe4] ss:$16 sps:$4 sm:$0xff]   ;;  %v8175_v29 = vld [vmem:[%s9199_s2 + $0xe8] ss:$16 sps:$4 sm:$0xff]  }
 0x61f   : > { %v3460_v3 = vpop.f32.mrf.mxu1  ;;  %v3562_v7 = vsel %vm1895_vm0, %v3474_v21, %v3525_v60  ;;  %v8172_v21 = vld [vmem:[%s9199_s2 + $0xe0] ss:$16 sps:$4 sm:$0xff]   ;;  %4622 = vmatprep.subr.bf16.mxu1 %v8174_v42 }
 0x620   : > { %v3502_v13 = vpack.c.bf16 %v3460_v3, %v3457_v11  ;;  %3550 = vrot.lane.b32.xlu1 %v3503_v4, %s9025_s0  ;;  %7980 = vmatprep.mubr.bf16.mxu0 %v3562_v7  ;;  %v8177_v11 = vld [vmem:[%s9199_s2 + $0xec] ss:$16 sps:$4 sm:$0xff]   ;;  %v8180_v7 = vld [vmem:[%s9199_s2 + $0xc4] ss:$16 sps:$4 sm:$0xff]  }
 0x621   : > { %4815 = vmatprep.subr.bf16.mxu0 %v8177_v11  ;;  %4623 = vmatpush1.bf16.msra.mxu1 %v8172_v21  ;;  %v8216_v11 = vld [vmem:[%s9199_s2 + $0x4] ss:$16 sps:$4 sm:$0xff]   ;;  %v8219_v21 = vld [vmem:[%s9199_s2 + $0xc] ss:$16 sps:$4 sm:$0xff]  }
 0x622   : > { %3548 = vrot.lane.b32.xlu0 %v3502_v13, %s9025_s0  ;;  %v3527_v63 = vpop.permute.xlu1 %3526  ;;  %4816 = vmatpush1.bf16.msra.mxu0 %v8175_v29  ;;  %v8183_v13 = vld [vmem:[%s9199_s2 + $0xcc] ss:$16 sps:$4 sm:$0xff]   ;;  %v8214_v29 = vld [vmem:[%s9199_s2] ss:$16 sps:$4 sm:$0xff]  }
 0x623   : > { %v3566_v44 = vsel %vm1895_vm0, %v3475_v1, %v3527_v63  ;;  %v8898_v63 = vld [vmem:[#allocation2 + $0x50] sm:$0xff]  ;;  %4624 = vmatprep.subr.bf16.mxu1 %v8180_v7  ;;  %4817 = vmatprep.subr.bf16.mxu0 %v8183_v13 }
 0x624   : > { %7981 = vmatmul.mubr.bf16.gmra.mxu0 %v3566_v44 }
 0x630   : > { %v3531_v5 = vpop.permute.xlu1 %3530 }
 0x631   : > { %v3574_v48 = vsel %vm1895_vm0, %v3477_v18, %v3531_v5  ;;  %v8181_v5 = vld [vmem:[%s9199_s2 + $0xc8] ss:$16 sps:$4 sm:$0xff]  }
 0x632   : > { %v3529_v51 = vpop.permute.xlu0 %3528  ;;  %4818 = vmatpush1.bf16.msra.mxu0 %v8181_v5 }
 0x633   : > { %v3570_v10 = vsel %vm1895_vm0, %v3476_v31, %v3529_v51  ;;  %v8178_v31 = vld [vmem:[%s9199_s2 + $0xc0] ss:$16 sps:$4 sm:$0xff]  }
 0x634   : > { %7984 = vmatprep.mubr.bf16.mxu0 %v3570_v10  ;;  %4625 = vmatpush1.bf16.msra.mxu1 %v8178_v31 }
 0x635   : > { %7985 = vmatmul.mubr.bf16.gmra.mxu0 %v3574_v48  ;;  %v8186_v48 = vld [vmem:[%s9199_s2 + $0xa4] ss:$16 sps:$4 sm:$0xff]  }
 0x636   : > { %4626 = vmatprep.subr.bf16.mxu1 %v8186_v48 }
 0x651   : > { %v3535_v2 = vpop.permute.xlu1 %3534 }
 0x652   : > { %v3582_v27 = vsel %vm1895_vm0, %v3479_v39, %v3535_v2 }
 0x653   : > { %v3533_v1 = vpop.permute.xlu0 %3532 }
 0x654   : > { %v3578_v43 = vsel %vm1895_vm0, %v3478_v8, %v3533_v1  ;;  %v8189_v8 = vld [vmem:[%s9199_s2 + $0xac] ss:$16 sps:$4 sm:$0xff]  }
 0x655   : > { %7988 = vmatprep.mubr.bf16.mxu0 %v3578_v43  ;;  %v3539_v18 = vpop.permute.xlu1 %3538  ;;  %v8899_v1 = vld [vmem:[#allocation2 + $0x68] sm:$0xff]  ;;  %4819 = vmatprep.subr.bf16.mxu0 %v8189_v8 }
 0x656   : > { %7989 = vmatmul.mubr.bf16.gmra.mxu0 %v3582_v27  ;;  %v3590_v54 = vsel %vm1895_vm0, %v3481_v12, %v3539_v18  ;;  %v3486_v12 = vpack.c.bf16 %v10828_v25, %v10816_v35  ;;  %v8894_v25 = vld [vmem:[#allocation2 + $0xb0] sm:$0xff]  ;;  %v8195_v18 = vld [vmem:[%s9199_s2 + $0x8c] ss:$16 sps:$4 sm:$0xff]  }
 0x657   : > { %v3537_v49 = vpop.permute.xlu0 %3536 }
 0x658   : > { %v3586_v0 = vsel %vm1895_vm0, %v3480_v50, %v3537_v49  ;;  %v8184_v50 = vld [vmem:[%s9199_s2 + $0xa0] ss:$16 sps:$4 sm:$0xff]   ;;  %v8187_v49 = vld [vmem:[%s9199_s2 + $0xa8] ss:$16 sps:$4 sm:$0xff]  }
 0x659   : > { %7992 = vmatprep.mubr.bf16.mxu0 %v3586_v0  ;;  %v3543_v39 = vpop.permute.xlu1 %3542  ;;  %4627 = vmatpush1.bf16.msra.mxu1 %v8184_v50  ;;  %v8192_v0 = vld [vmem:[%s9199_s2 + $0x84] ss:$16 sps:$4 sm:$0xff]  }
 0x65a   : > { %v3598_v52 = vsel %vm1895_vm0, %v3483_v40, %v3543_v39  ;;  %4820 = vmatpush1.bf16.msra.mxu0 %v8187_v49  ;;  %v8190_v39 = vld [vmem:[%s9199_s2 + $0x80] ss:$16 sps:$4 sm:$0xff]   ;;  %4628 = vmatprep.subr.bf16.mxu1 %v8192_v0 }
 0x65b   : > { %v3541_v62 = vpop.permute.xlu0 %3540  ;;  %4821 = vmatprep.subr.bf16.mxu0 %v8195_v18 }
 0x65c   : > { %v3594_v23 = vsel %vm1895_vm0, %v3482_v14, %v3541_v62  ;;  %v8900_v62 = vld [vmem:[#allocation2 + $0x30] sm:$0xff] }
 0x65d   : > { %4629 = vmatpush1.bf16.msra.mxu1 %v8190_v39 }
 0x65e   : > { %7993 = vmatmul.mubr.bf16.gmra.mxu0 %v3590_v54 }
 0x65f   : > { %7996 = vmatprep.mubr.bf16.mxu0 %v3594_v23 }
 0x666   : > { %7997 = vmatmul.mubr.bf16.gmra.mxu0 %v3598_v52  ;;  %v8193_v52 = vld [vmem:[%s9199_s2 + $0x88] ss:$16 sps:$4 sm:$0xff]  }
 0x667   : > { %4822 = vmatpush1.bf16.msra.mxu0 %v8193_v52  ;;  %v8908_v52 = vld [vmem:[#allocation2 + $0x8] sm:$0xff] }
 0x68a   : > { %v3547_v41 = vpop.permute.xlu1 %3546 }
 0x68b   : > { %v3606_v22 = vsel %vm1895_vm0, %v3485_v6, %v3547_v41  ;;  %v8201_v41 = vld [vmem:[%s9199_s2 + $0x6c] ss:$16 sps:$4 sm:$0xff]  }
 0x68c   : > { %v3545_v57 = vpop.permute.xlu0 %3544  ;;  %4823 = vmatprep.subr.bf16.mxu0 %v8201_v41 }
 0x68d   : > { %v3602_v36 = vsel %vm1895_vm0, %v3484_v53, %v3545_v57  ;;  %v8198_v53 = vld [vmem:[%s9199_s2 + $0x64] ss:$16 sps:$4 sm:$0xff]   ;;  %v8901_v57 = vld [vmem:[#allocation2 + $0x48] sm:$0xff] }
 0x68e   : > { %8000 = vmatprep.mubr.bf16.mxu0 %v3602_v36  ;;  %4630 = vmatprep.subr.bf16.mxu1 %v8198_v53 }
 0x68f   : > { %8001 = vmatmul.mubr.bf16.gmra.mxu0 %v3606_v22 }
 0x692   : > { %v3551_v38 = vpop.permute.xlu1 %3550 }
 0x693   : > { %v3614_v33 = vsel %vm1895_vm0, %v3487_v56, %v3551_v38  ;;  %v8196_v38 = vld [vmem:[%s9199_s2 + $0x60] ss:$16 sps:$4 sm:$0xff]  }
 0x694   : > { %v3549_v61 = vpop.permute.xlu0 %3548  ;;  %4631 = vmatpush1.bf16.msra.mxu1 %v8196_v38 }
 0x695   : > { %v3610_v40 = vsel %vm1895_vm0, %v3486_v12, %v3549_v61  ;;  %v8199_v61 = vld [vmem:[%s9199_s2 + $0x68] ss:$16 sps:$4 sm:$0xff]  }
 0x696   : > { %8004 = vmatprep.mubr.bf16.mxu0 %v3610_v40  ;;  %4824 = vmatpush1.bf16.msra.mxu0 %v8199_v61 }
 0x697   : > { %8005 = vmatmul.mubr.bf16.gmra.mxu0 %v3614_v33 }
 0x698   : > { %4847 = vmatprep.mubr.bf16.mxu0 %v13611_v20 }
 0x6cd   : > { %v7978_v59 = vpop.f32.mrf.mxu0 }
 0x6ce   : > { %v3730_v56 = vadd.f32 %v7978_v59, %v10902_v37  ;;  %v8204_v59 = vld [vmem:[%s9199_s2 + $0x44] ss:$16 sps:$4 sm:$0xff]  }
 0x6cf   : > { %v3721_v6 = vpop.f32.mrf.mxu0  ;;  %4632 = vmatprep.subr.bf16.mxu1 %v8204_v59  ;;  %v8910_v59 = vld [vmem:[#allocation2 + $0x38] sm:$0xff] }
 0x6d0   : > { %v3722_v55 = vadd.f32 %v10902_v37, %v3721_v6  ;;  %v10915_v30 = vadd.f32 %v8896_v28, %v3730_v56  ;;  %v8207_v6 = vld [vmem:[%s9199_s2 + $0x4c] ss:$16 sps:$4 sm:$0xff]   ;;  %v8210_v28 = vld [vmem:[%s9199_s2 + $0x24] ss:$16 sps:$4 sm:$0xff]  }
 0x6d1   : > { %v7979_v35 = vpop.f32.mrf.mxu0  ;;  %4825 = vmatprep.subr.bf16.mxu0 %v8207_v6 }
 0x6d2   : > { %v10905_v26 = vadd.f32 %v8894_v25, %v3722_v55  ;;  %13615 = vst [vmem:[#allocation25_spill] sm:$0xff] %v10915_v30  ;;  %v3733_v15 = vadd.f32 %v7979_v35, %v10902_v37  ;;  %v3978_v47 = vmul.f32 %v10915_v30, %v10915_v30  ;;  %v8202_v25 = vld [vmem:[%s9199_s2 + $0x40] ss:$16 sps:$4 sm:$0xff]  }
 0x6d3   : > { %v3724_v16 = vpop.f32.mrf.mxu0  ;;  %4633 = vmatpush1.bf16.msra.mxu1 %v8202_v25 }
 0x6d4   : > { %13613 = vst [vmem:[#allocation22_spill] sm:$0xff] %v10905_v26  ;;  %v3725_v32 = vadd.f32 %v10902_v37, %v3724_v16  ;;  %3880 = vadd.xlane.f32.xlu0 %v10905_v26  ;;  %v3976_v34 = vmul.f32 %v10905_v26, %v10905_v26  ;;  %v10921_v19 = vadd.f32 %v8897_v45, %v3733_v15  ;;  %v8205_v16 = vld [vmem:[%s9199_s2 + $0x48] ss:$16 sps:$4 sm:$0xff]   ;;  %v8213_v15 = vld [vmem:[%s9199_s2 + $0x2c] ss:$16 sps:$4 sm:$0xff]  }
 0x6d5   : > { %4826 = vmatpush1.bf16.msra.mxu0 %v8205_v16  ;;  %v8211_v45 = vld [vmem:[%s9199_s2 + $0x28] ss:$16 sps:$4 sm:$0xff]   ;;  %4634 = vmatprep.subr.bf16.mxu1 %v8210_v28 }
 0x6d6   : > { %v10910_v17 = vadd.f32 %v8895_v46, %v3725_v32  ;;  %13616 = vst [vmem:[#allocation36_spill] sm:$0xff] %v10921_v19  ;;  %v3979_v9 = vmul.f32 %v10921_v19, %v10921_v19  ;;  %v8902_v32 = vld [vmem:[#allocation2 + $0x80] sm:$0xff]  ;;  %4827 = vmatprep.subr.bf16.mxu0 %v8213_v15 }
 0x6d7   : > { %v8912_v15 = vld [vmem:[#allocation2 + $0x40] sm:$0xff] }
 0x6d8   : > { %13614 = vst [vmem:[#allocation24_spill] sm:$0xff] %v10910_v17  ;;  %3882 = vadd.xlane.f32.xlu1 %v10910_v17  ;;  %4008 = vadd.xlane.f32.xlu0 %v3976_v34  ;;  %v3977_v58 = vmul.f32 %v10910_v17, %v10910_v17 }
 0x6d9   : > { %4828 = vmatpush1.bf16.msra.mxu0 %v8211_v45 }
 0x6da   : > { %4829 = vmatprep.subr.bf16.mxu0 %v8219_v21 }
 0x6dc   : > { %3884 = vadd.xlane.f32.xlu1 %v10915_v30  ;;  %4010 = vadd.xlane.f32.xlu0 %v3977_v58  ;;  %v8208_v58 = vld [vmem:[%s9199_s2 + $0x20] ss:$16 sps:$4 sm:$0xff]  }
 0x6dd   : > { %4635 = vmatpush1.bf16.msra.mxu1 %v8208_v58 }
 0x6de   : > { %4636 = vmatprep.subr.bf16.mxu1 %v8216_v11 }
 0x6e0   : > { %4012 = vadd.xlane.f32.xlu1 %v3978_v47  ;;  %3886 = vadd.xlane.f32.xlu0 %v10921_v19 }
 0x6e1   : > { %4637 = vmatpush1.bf16.msra.mxu1 %v8214_v29 }
 0x6e4   : > { %v7982_v24 = vpop.f32.mrf.mxu0  ;;  %4014 = vadd.xlane.f32.xlu0 %v3979_v9  ;;  %v8903_v9 = vld [vmem:[#allocation2 + $0x88] sm:$0xff] }
 0x6e5   : > { %v3746_v2 = vadd.f32 %v7982_v24, %v10902_v37 }
 0x6e6   : > { %v3737_v4 = vpop.f32.mrf.mxu0 }
 0x6e7   : > { %v3738_v60 = vadd.f32 %v10902_v37, %v3737_v4  ;;  %v10953_v14 = vadd.f32 %v8900_v62, %v3746_v2  ;;  %v8217_v4 = vld [vmem:[%s9199_s2 + $0x8] ss:$16 sps:$4 sm:$0xff]   ;;  %v8907_v62 = vld [vmem:[#allocation2 + $0xf0] sm:$0xff] }
 0x6e8   : > { %v7983_v3 = vpop.f32.mrf.mxu0  ;;  %4830 = vmatpush1.bf16.msra.mxu0 %v8217_v4 }
 0x6e9   : > { %v10935_v44 = vadd.f32 %v8898_v63, %v3738_v60  ;;  %13619 = vst [vmem:[#allocation17_spill] sm:$0xff] %v10953_v14  ;;  %v3749_v54 = vadd.f32 %v7983_v3, %v10902_v37  ;;  %v3982_v12 = vmul.f32 %v10953_v14, %v10953_v14  ;;  %v8904_v60 = vld [vmem:[#allocation2 + $0xe8] sm:$0xff]  ;;  %v8905_v63 = vld [vmem:[#allocation2 + $0xb8] sm:$0xff] }
 0x6ea   : > { %v3740_v51 = vpop.f32.mrf.mxu0 }
 0x6eb   : > { %13617 = vst [vmem:[#allocation34_spill] sm:$0xff] %v10935_v44  ;;  %v3741_v10 = vadd.f32 %v10902_v37, %v3740_v51  ;;  %3888 = vadd.xlane.f32.xlu1 %v10935_v44  ;;  %v3980_v27 = vmul.f32 %v10935_v44, %v10935_v44  ;;  %v10963_v36 = vadd.f32 %v8901_v57, %v3749_v54 }
 0x6ed   : > { %v10944_v43 = vadd.f32 %v8899_v1, %v3741_v10  ;;  %13620 = vst [vmem:[#allocation19_spill] sm:$0xff] %v10963_v36  ;;  %v3983_v35 = vmul.f32 %v10963_v36, %v10963_v36  ;;  %v8906_v1 = vld [vmem:[#allocation2 + $0x60] sm:$0xff] }
 0x6ef   : > { %13618 = vst [vmem:[#allocation18_spill] sm:$0xff] %v10944_v43  ;;  %3890 = vadd.xlane.f32.xlu0 %v10944_v43  ;;  %4016 = vadd.xlane.f32.xlu1 %v3980_v27  ;;  %v3981_v23 = vmul.f32 %v10944_v43, %v10944_v43 }
 0x6f3   : > { %4018 = vadd.xlane.f32.xlu0 %v3981_v23  ;;  %3892 = vadd.xlane.f32.xlu1 %v10953_v14 }
 0x6f5   : > { %v7986_v22 = vpop.f32.mrf.mxu0 }
 0x6f6   : > { %v3762_v47 = vadd.f32 %v7986_v22, %v10902_v37 }
 0x6f7   : > { %3894 = vadd.xlane.f32.xlu0 %v10963_v36  ;;  %4020 = vadd.xlane.f32.xlu1 %v3982_v12  ;;  %v3753_v40 = vpop.f32.mrf.mxu0  ;;  %v8909_v12 = vld [vmem:[#allocation2 + $0x78] sm:$0xff] }
 0x6f8   : > { %v3754_v33 = vadd.f32 %v10902_v37, %v3753_v40  ;;  %v10995_v3 = vadd.f32 %v8904_v60, %v3762_v47  ;;  %v8914_v60 = vld [vmem:[#allocation2 + $0xe0] sm:$0xff] }
 0x6f9   : > { %v7987_v55 = vpop.f32.mrf.mxu0 }
 0x6fa   : > { %v10977_v56 = vadd.f32 %v8902_v32, %v3754_v33  ;;  %13623 = vst [vmem:[#allocation40_spill] sm:$0xff] %v10995_v3  ;;  %v3765_v7 = vadd.f32 %v7987_v55, %v10902_v37  ;;  %v3986_v5 = vmul.f32 %v10995_v3, %v10995_v3  ;;  %v8911_v32 = vld [vmem:[#allocation2 + $0x58] sm:$0xff] }
 0x6fb   : > { %4022 = vadd.xlane.f32.xlu0 %v3983_v35  ;;  %v3756_v46 = vpop.f32.mrf.mxu0 }
 0x6fc   : > { %13621 = vst [vmem:[#allocation31_spill] sm:$0xff] %v10977_v56  ;;  %v3757_v34 = vadd.f32 %v10902_v37, %v3756_v46  ;;  %3896 = vadd.xlane.f32.xlu1 %v10977_v56  ;;  %v3984_v42 = vmul.f32 %v10977_v56, %v10977_v56  ;;  %v11001_v31 = vadd.f32 %v8905_v63, %v3765_v7 }
 0x6fe   : > { %v10986_v24 = vadd.f32 %v8903_v9, %v3757_v34  ;;  %13624 = vst [vmem:[#allocation37_spill] sm:$0xff] %v11001_v31  ;;  %v3987_v51 = vmul.f32 %v11001_v31, %v11001_v31 }
 0x700   : > { %13622 = vst [vmem:[#allocation41_spill] sm:$0xff] %v10986_v24  ;;  %3898 = vadd.xlane.f32.xlu0 %v10986_v24  ;;  %4024 = vadd.xlane.f32.xlu1 %v3984_v42  ;;  %v3985_v13 = vmul.f32 %v10986_v24, %v10986_v24  ;;  %v8913_v42 = vld [vmem:[#allocation2 + $0xc8] sm:$0xff] }
 0x704   : > { %4026 = vadd.xlane.f32.xlu0 %v3985_v13  ;;  %3900 = vadd.xlane.f32.xlu1 %v10995_v3 }
 0x708   : > { %3902 = vadd.xlane.f32.xlu0 %v11001_v31  ;;  %4028 = vadd.xlane.f32.xlu1 %v3986_v5 }
 0x70c   : > { %4030 = vadd.xlane.f32.xlu0 %v3987_v51  ;;  %v8915_v51 = vld [vmem:[#allocation2 + $0x90] sm:$0xff] }
 0x716   : > { %v7990_v10 = vpop.f32.mrf.mxu0 }
 0x717   : > { %v3778_v18 = vadd.f32 %v7990_v10, %v10902_v37 }
 0x718   : > { %v3769_v48 = vpop.f32.mrf.mxu0 }
 0x719   : > { %v3770_v8 = vadd.f32 %v10902_v37, %v3769_v48  ;;  %v11019_v53 = vadd.f32 %v8908_v52, %v3778_v18 }
 0x71a   : > { %v7991_v2 = vpop.f32.mrf.mxu0 }
 0x71b   : > { %v11009_v27 = vadd.f32 %v8906_v1, %v3770_v8  ;;  %13627 = vst [vmem:[#allocation43_spill] sm:$0xff] %v11019_v53  ;;  %v3781_v41 = vadd.f32 %v7991_v2, %v10902_v37  ;;  %v3990_v40 = vmul.f32 %v11019_v53, %v11019_v53  ;;  %v8916_v8 = vld [vmem:[#allocation2 + $0x70] sm:$0xff] }
 0x71c   : > { %v3772_v50 = vpop.f32.mrf.mxu0 }
 0x71d   : > { %13625 = vst [vmem:[#allocation30_spill] sm:$0xff] %v11009_v27  ;;  %v3773_v49 = vadd.f32 %v10902_v37, %v3772_v50  ;;  %3904 = vadd.xlane.f32.xlu1 %v11009_v27  ;;  %v3988_v23 = vmul.f32 %v11009_v27, %v11009_v27  ;;  %v11025_v38 = vadd.f32 %v8909_v12, %v3781_v41 }
 0x71e   : > { %v7994_v0 = vpop.f32.mrf.mxu0 }
 0x71f   : > { %v11014_v54 = vadd.f32 %v8907_v62, %v3773_v49  ;;  %13628 = vst [vmem:[#allocation48_spill] sm:$0xff] %v11025_v38  ;;  %v3991_v35 = vmul.f32 %v11025_v38, %v11025_v38  ;;  %v3794_v16 = vadd.f32 %v7994_v0, %v10902_v37  ;;  %v8917_v49 = vld [vmem:[#allocation2 + $0xc0] sm:$0xff] }
 0x720   : > { %v3785_v39 = vpop.f32.mrf.mxu0 }
 0x721   : > { %13626 = vst [vmem:[#allocation32_spill] sm:$0xff] %v11014_v54  ;;  %3906 = vadd.xlane.f32.xlu0 %v11014_v54  ;;  %4032 = vadd.xlane.f32.xlu1 %v3988_v23  ;;  %v3989_v57 = vmul.f32 %v11014_v54, %v11014_v54  ;;  %v3786_v61 = vadd.f32 %v10902_v37, %v3785_v39 }
 0x722   : > { %v7995_v22 = vpop.f32.mrf.mxu0  ;;  %v11043_v58 = vadd.f32 %v8912_v15, %v3794_v16  ;;  %v8920_v16 = vld [vmem:[#allocation2 + $0x10] sm:$0xff] }
 0x723   : > { %v11031_v6 = vadd.f32 %v8910_v59, %v3786_v61  ;;  %v3797_v45 = vadd.f32 %v7995_v22, %v10902_v37  ;;  %v8919_v59 = vld [vmem:[#allocation2 + $0xd0] sm:$0xff] }
 0x724   : > { %v3788_v33 = vpop.f32.mrf.mxu0  ;;  %13631 = vst [vmem:[#allocation45_spill] sm:$0xff] %v11043_v58  ;;  %v3994_v29 = vmul.f32 %v11043_v58, %v11043_v58 }
 0x725   : > { %4034 = vadd.xlane.f32.xlu0 %v3989_v57  ;;  %3908 = vadd.xlane.f32.xlu1 %v11019_v53  ;;  %13629 = vst [vmem:[#allocation47_spill] sm:$0xff] %v11031_v6  ;;  %v3789_v55 = vadd.f32 %v10902_v37, %v3788_v33  ;;  %v3992_v34 = vmul.f32 %v11031_v6, %v11031_v6  ;;  %v8918_v57 = vld [vmem:[#allocation2 + $0xa8] sm:$0xff] }
 0x726   : > { %v7998_v25 = vpop.f32.mrf.mxu0  ;;  %v11049_v11 = vadd.f32 %v8913_v42, %v3797_v45 }
 0x727   : > { %v11038_v46 = vadd.f32 %v8911_v32, %v3789_v55  ;;  %v3810_v5 = vadd.f32 %v7998_v25, %v10902_v37 }
 0x728   : > { %v3801_v28 = vpop.f32.mrf.mxu0  ;;  %13632 = vst [vmem:[#allocation44_spill] sm:$0xff] %v11049_v11  ;;  %v3995_v63 = vmul.f32 %v11049_v11, %v11049_v11 }
 0x729   : > { %3910 = vadd.xlane.f32.xlu0 %v11025_v38  ;;  %4036 = vadd.xlane.f32.xlu1 %v3990_v40  ;;  %13630 = vst [vmem:[#allocation51_spill] sm:$0xff] %v11038_v46  ;;  %v3993_v47 = vmul.f32 %v11038_v46, %v11038_v46  ;;  %v3802_v21 = vadd.f32 %v10902_v37, %v3801_v28 }
 0x72a   : > { %v7999_v9 = vpop.f32.mrf.mxu0  ;;  %v11067_v2 = vadd.f32 %v8916_v8, %v3810_v5 }
 0x72b   : > { %v11055_v7 = vadd.f32 %v8914_v60, %v3802_v21  ;;  %v3813_v1 = vadd.f32 %v7999_v9, %v10902_v37  ;;  %v8921_v9 = vld [vmem:[#allocation2 + $0x28] sm:$0xff] }
 0x72c   : > { %v3804_v4 = vpop.f32.mrf.mxu0  ;;  %13635 = vst [vmem:[#allocation49_spill] sm:$0xff] %v11067_v2  ;;  %v3998_v18 = vmul.f32 %v11067_v2, %v11067_v2 }
 0x72d   : > { %4038 = vadd.xlane.f32.xlu0 %v3991_v35  ;;  %3912 = vadd.xlane.f32.xlu1 %v11031_v6  ;;  %13633 = vst [vmem:[#allocation52_spill] sm:$0xff] %v11055_v7  ;;  %v3805_v13 = vadd.f32 %v10902_v37, %v3804_v4  ;;  %v3996_v48 = vmul.f32 %v11055_v7, %v11055_v7 }
 0x72e   : > { %v11073_v0 = vadd.f32 %v8917_v49, %v3813_v1 }
 0x72f   : > { %v11062_v10 = vadd.f32 %v8915_v51, %v3805_v13 }
 0x730   : > { %13636 = vst [vmem:[#allocation35_spill] sm:$0xff] %v11073_v0  ;;  %v3999_v62 = vmul.f32 %v11073_v0, %v11073_v0 }
 0x731   : > { %3914 = vadd.xlane.f32.xlu0 %v11038_v46  ;;  %4040 = vadd.xlane.f32.xlu1 %v3992_v34  ;;  %13634 = vst [vmem:[#allocation42_spill] sm:$0xff] %v11062_v10  ;;  %v3997_v50 = vmul.f32 %v11062_v10, %v11062_v10 }
 0x735   : > { %4042 = vadd.xlane.f32.xlu0 %v3993_v47  ;;  %3916 = vadd.xlane.f32.xlu1 %v11043_v58 }
 0x739   : > { %3918 = vadd.xlane.f32.xlu0 %v11049_v11  ;;  %4044 = vadd.xlane.f32.xlu1 %v3994_v29 }
 0x73d   : > { %4046 = vadd.xlane.f32.xlu0 %v3995_v63  ;;  %3920 = vadd.xlane.f32.xlu1 %v11055_v7 }
 0x741   : > { %3922 = vadd.xlane.f32.xlu0 %v11062_v10  ;;  %4048 = vadd.xlane.f32.xlu1 %v3996_v48  ;;  %v8922_v48 = vld [vmem:[#allocation2 + $0xa0] sm:$0xff] }
 0x745   : > { %4050 = vadd.xlane.f32.xlu0 %v3997_v50  ;;  %3924 = vadd.xlane.f32.xlu1 %v11067_v2 }
 0x749   : > { %3926 = vadd.xlane.f32.xlu0 %v11073_v0  ;;  %4052 = vadd.xlane.f32.xlu1 %v3998_v18 }
 0x74d   : > { %4054 = vadd.xlane.f32.xlu0 %v3999_v62 }
 0x74f   : > { %v8002_v23 = vpop.f32.mrf.mxu0 }
 0x750   : > { %v3826_v33 = vadd.f32 %v8002_v23, %v10902_v37 }
 0x751   : > { %v3817_v39 = vpop.f32.mrf.mxu0 }
 0x752   : > { %v3818_v52 = vadd.f32 %v10902_v37, %v3817_v39  ;;  %v11091_v32 = vadd.f32 %v8920_v16, %v3826_v33 }
 0x753   : > { %v8003_v41 = vpop.f32.mrf.mxu0 }
 0x754   : > { %v11081_v22 = vadd.f32 %v8918_v57, %v3818_v52  ;;  %13639 = vst [vmem:[#allocation53_spill] sm:$0xff] %v11091_v32  ;;  %v3829_v34 = vadd.f32 %v8003_v41, %v10902_v37  ;;  %v4002_v29 = vmul.f32 %v11091_v32, %v11091_v32 }
 0x755   : > { %v3820_v12 = vpop.f32.mrf.mxu0 }
 0x756   : > { %13637 = vst [vmem:[#allocation33_spill] sm:$0xff] %v11081_v22  ;;  %v3821_v61 = vadd.f32 %v10902_v37, %v3820_v12  ;;  %3928 = vadd.xlane.f32.xlu1 %v11081_v22  ;;  %v4000_v35 = vmul.f32 %v11081_v22, %v11081_v22  ;;  %v11099_v42 = vadd.f32 %v8921_v9, %v3829_v34  ;;  %v8923_v12 = vld [vmem:[#allocation2 + $0xf8] sm:$0xff]  ;;  %v8924_v9 = vld [vmem:[#allocation2 + $0x20] sm:$0xff] }
 0x757   : > { %v8006_v40 = vpop.f32.mrf.mxu0 }
 0x758   : > { %v11086_v55 = vadd.f32 %v8919_v59, %v3821_v61  ;;  %13640 = vst [vmem:[#allocation27_spill] sm:$0xff] %v11099_v42  ;;  %v4003_v50 = vmul.f32 %v11099_v42, %v11099_v42  ;;  %v3842_v57 = vadd.f32 %v8006_v40, %v10902_v37 }
 0x759   : > { %v3833_v25 = vpop.f32.mrf.mxu0 }
 0x75a   : > { %13638 = vst [vmem:[#allocation38_spill] sm:$0xff] %v11086_v55  ;;  %3930 = vadd.xlane.f32.xlu0 %v11086_v55  ;;  %4056 = vadd.xlane.f32.xlu1 %v4000_v35  ;;  %v4001_v28 = vmul.f32 %v11086_v55, %v11086_v55  ;;  %v3834_v21 = vadd.f32 %v10902_v37, %v3833_v25 }
 0x75b   : > { %v8007_v15 = vpop.f32.mrf.mxu0 }
 0x75c   : > { %v11109_v8 = vadd.f32 %v8922_v48, %v3834_v21  ;;  %v11129_v21 = vadd.f32 %v8924_v9, %v3842_v57 }
 0x75d   : > { %v3881_v45 = vpop.xlane.xlu0 %3880  ;;  %v3836_v4 = vpop.f32.mrf.mxu0 }
 0x75e   : > { %4058 = vadd.xlane.f32.xlu0 %v4001_v28  ;;  %3932 = vadd.xlane.f32.xlu1 %v11091_v32  ;;  %v11097_v47 = vmul.f32 0.0078125, %v3881_v45  ;;  %13641 = vst [vmem:[#allocation54_spill] sm:$0xff] %v11109_v8  ;;  %v3837_v1 = vadd.f32 %v10902_v37, %v3836_v4  ;;  %v4004_v33 = vmul.f32 %v11109_v8, %v11109_v8  ;;  %13643 = vst [vmem:[#allocation21_spill] sm:$0xff] %v11129_v21 }
 0x760   : > { %v4104_v63 = vmul.f32 %v11097_v47, %v11097_v47  ;;  %v11120_v61 = vadd.f32 %v8923_v12, %v3837_v1 }
 0x761   : > { %v4009_v60 = vpop.xlane.xlu0 %4008  ;;  %v3883_v13 = vpop.xlane.xlu1 %3882 }
 0x762   : > { %3934 = vadd.xlane.f32.xlu0 %v11099_v42  ;;  %4060 = vadd.xlane.f32.xlu1 %v4002_v29  ;;  %v4072_v5 = vmul.f32 0.0078125, %v4009_v60  ;;  %v11107_v51 = vmul.f32 0.0078125, %v3883_v13  ;;  %13642 = vst [vmem:[#allocation55_spill] sm:$0xff] %v11120_v61  ;;  %v3845_v29 = vadd.f32 %v8007_v15, %v10902_v37  ;;  %v4005_v4 = vmul.f32 %v11120_v61, %v11120_v61 }
 0x763   : > { %v4006_v37 = vmul.f32 %v11129_v21, %v11129_v21 }
 0x764   : > { %v4136_v49 = vsub.f32 %v4072_v5, %v4104_v63  ;;  %v4105_v39 = vmul.f32 %v11107_v51, %v11107_v51 }
 0x765   : > { %v4011_v18 = vpop.xlane.xlu0 %4010  ;;  %v3885_v62 = vpop.xlane.xlu1 %3884 }
 0x766   : > { %4062 = vadd.xlane.f32.xlu0 %v4003_v50  ;;  %3936 = vadd.xlane.f32.xlu1 %v11109_v8  ;;  %v4168_v23 = vmax.f32 %v4136_v49, 0.0  ;;  %v4073_v52 = vmul.f32 0.0078125, %v4011_v18  ;;  %v11117_v41 = vmul.f32 0.0078125, %v3885_v62  ;;  %v8925_v50 = vld [vmem:[#allocation2 + $0x98] sm:$0xff] }
 0x767   : > { %v11137_v49 = vadd.f32 %v8925_v50, %v3845_v29 }
 0x768   : > { %v4232_v59 = vadd.f32 1e-05, %v4168_v23  ;;  %v4137_v35 = vsub.f32 %v4073_v52, %v4105_v39  ;;  %v4106_v25 = vmul.f32 %v11117_v41, %v11117_v41 }
 0x769   : > { %v3887_v16 = vpop.xlane.xlu0 %3886  ;;  %v4013_v34 = vpop.xlane.xlu1 %4012  ;;  %13644 = vst [vmem:[#allocation50_spill] sm:$0xff] %v11137_v49  ;;  %v4007_v39 = vmul.f32 %v11137_v49, %v11137_v49 }
 0x76a   : > { %3938 = vadd.xlane.f32.xlu0 %v11120_v61  ;;  %4064 = vadd.xlane.f32.xlu1 %v4004_v33  ;;  %8572 = vrsqrt.f32 %v4232_v59  ;;  %v4169_v28 = vmax.f32 %v4137_v35, 0.0  ;;  %v11127_v45 = vmul.f32 0.0078125, %v3887_v16  ;;  %v4074_v40 = vmul.f32 0.0078125, %v4013_v34 }
 0x76b   : > { %v4200_v33 = vsub.f32 %v10905_v26, %v11097_v47 }
 0x76c   : > { %v4233_v60 = vadd.f32 1e-05, %v4169_v28  ;;  %v4138_v13 = vsub.f32 %v4074_v40, %v4106_v25  ;;  %v4107_v5 = vmul.f32 %v11127_v45, %v11127_v45  ;;  %v4201_v40 = vsub.f32 %v10910_v17, %v11107_v51 }
 0x76d   : > { %v4015_v63 = vpop.xlane.xlu0 %4014 }
 0x76e   : > { %4066 = vadd.xlane.f32.xlu0 %v4005_v4  ;;  %3940 = vadd.xlane.f32.xlu1 %v11129_v21  ;;  %8574 = vrsqrt.f32 %v4233_v60  ;;  %v4170_v48 = vmax.f32 %v4138_v13, 0.0  ;;  %v4075_v1 = vmul.f32 0.0078125, %v4015_v63 }
 0x770   : > { %v4234_v15 = vadd.f32 1e-05, %v4170_v48  ;;  %v4139_v18 = vsub.f32 %v4075_v1, %v4107_v5  ;;  %v11159_v1 = vld [vmem:[%s9170_s19] ss:$0 sm:$0xff] }
 0x772   : > { %3942 = vadd.xlane.f32.xlu0 %v11137_v49  ;;  %4068 = vadd.xlane.f32.xlu1 %v4006_v37  ;;  %8576 = vrsqrt.f32 %v4234_v15  ;;  %v4171_v62 = vmax.f32 %v4139_v18, 0.0 }
 0x774   : > { %v3889_v23 = vpop.xlane.xlu1 %3888  ;;  %v4235_v52 = vadd.f32 1e-05, %v4171_v62  ;;  %v4202_v62 = vsub.f32 %v10915_v30, %v11117_v41  ;;  %v4203_v41 = vsub.f32 %v10921_v19, %v11127_v45 }
 0x775   : > { %v11144_v57 = vmul.f32 0.0078125, %v3889_v23 }
 0x776   : > { %4070 = vadd.xlane.f32.xlu0 %v4007_v39  ;;  %8578 = vrsqrt.f32 %v4235_v52 }
 0x777   : > { %v8573_v12 = vpop.eup %8572  ;;  %v4108_v25 = vmul.f32 %v11144_v57, %v11144_v57 }
 0x778   : > { %v3891_v59 = vpop.xlane.xlu0 %3890  ;;  %v4017_v35 = vpop.xlane.xlu1 %4016  ;;  %v4296_v28 = vmul.f32 %v8573_v12, %v4200_v33 }
 0x779   : > { %v11150_v16 = vmul.f32 0.0078125, %v3891_v59  ;;  %v4076_v34 = vmul.f32 0.0078125, %v4017_v35  ;;  %v11170_v35 = vld [vmem:[%s9176_s15] ss:$0 sm:$0xff] }
 0x77a   : > { %v4328_v50 = vmul.f32 %v11159_v1, %v4296_v28 }
 0x77b   : > { %v4140_v9 = vsub.f32 %v4076_v34, %v4108_v25  ;;  %v8575_v29 = vpop.eup %8574  ;;  %v4109_v4 = vmul.f32 %v11150_v16, %v11150_v16 }
 0x77c   : > { %v4019_v60 = vpop.xlane.xlu0 %4018  ;;  %v3893_v47 = vpop.xlane.xlu1 %3892  ;;  %v4297_v13 = vmul.f32 %v8575_v29, %v4201_v40  ;;  %v4360_v25 = vadd.f32 %v11170_v35, %v4328_v50 }
 0x77d   : > { %v4172_v63 = vmax.f32 %v4140_v9, 0.0  ;;  %v4077_v5 = vmul.f32 0.0078125, %v4019_v60  ;;  %v11156_v48 = vmul.f32 0.0078125, %v3893_v47 }
 0x77e   : > { %v4329_v37 = vmul.f32 %v11159_v1, %v4297_v13 }
 0x77f   : > { %v4236_v51 = vadd.f32 1e-05, %v4172_v63  ;;  %v4141_v15 = vsub.f32 %v4077_v5, %v4109_v4  ;;  %v8577_v18 = vpop.eup %8576  ;;  %v4110_v23 = vmul.f32 %v11156_v48, %v11156_v48 }
 0x780   : > { %v3895_v39 = vpop.xlane.xlu0 %3894  ;;  %v4021_v52 = vpop.xlane.xlu1 %4020  ;;  %v4361_v34 = vadd.f32 %v11170_v35, %v4329_v37  ;;  %v4298_v28 = vmul.f32 %v8577_v18, %v4202_v62 }
 0x781   : > { %8580 = vrsqrt.f32 %v4236_v51  ;;  %v4173_v12 = vmax.f32 %v4141_v15, 0.0  ;;  %v11167_v33 = vmul.f32 0.0078125, %v3895_v39  ;;  %v4078_v59 = vmul.f32 0.0078125, %v4021_v52 }
 0x782   : > { %v4392_v47 = vpack.c.bf16 %v4361_v34, %v4360_v25  ;;  %v4330_v13 = vmul.f32 %v11159_v1, %v4298_v28 }
 0x783   : > { %v4237_v40 = vadd.f32 1e-05, %v4173_v12  ;;  %v4142_v9 = vsub.f32 %v4078_v59, %v4110_v23  ;;  %v8579_v29 = vpop.eup %8578  ;;  %v4111_v4 = vmul.f32 %v11167_v33, %v11167_v33 }
 0x784   : > { %v4023_v60 = vpop.xlane.xlu0 %4022  ;;  %v4299_v51 = vmul.f32 %v8579_v29, %v4203_v41  ;;  %4655 = vmatmul.mubr.bf16.vlgmr.msra.gmra.mxu1 %v4392_v47  ;;  %4848 = vmatmul.mubr.bf16.vlgmr.msra.gmra.mxu0 %v4392_v47  ;;  %v4362_v52 = vadd.f32 %v11170_v35, %v4330_v13 }
 0x785   : > { %8582 = vrsqrt.f32 %v4237_v40  ;;  %v4174_v63 = vmax.f32 %v4142_v9, 0.0  ;;  %v4079_v5 = vmul.f32 0.0078125, %v4023_v60  ;;  %v3897_v50 = vpop.xlane.xlu1 %3896  ;;  %4664 = vmatprep.mubr.bf16.mxu1 %v13611_v20  ;;  %4857 = vmatprep.mubr.bf16.mxu0 %v13611_v20  ;;  %v4204_v9 = vsub.f32 %v10935_v44, %v11144_v57 }
 0x786   : > { %v11179_v37 = vmul.f32 0.0078125, %v3897_v50  ;;  %v4331_v18 = vmul.f32 %v11159_v1, %v4299_v51  ;;  %v8220_v50 = vld [vmem:[%s9209_s27 + $0x78] sm:$0xff]  }
 0x787   : > { %v4238_v45 = vadd.f32 1e-05, %v4174_v63  ;;  %v4143_v15 = vsub.f32 %v4079_v5, %v4111_v4  ;;  %v8221_v51 = vld [vmem:[%s9209_s27 + $0x38] sm:$0xff]   ;;  %7432 = vmatprep.subr.bf16.mxu1 %v8220_v50 }
 0x788   : > { %v4363_v12 = vadd.f32 %v11170_v35, %v4331_v18  ;;  %v4112_v59 = vmul.f32 %v11179_v37, %v11179_v37  ;;  %7433 = vmatpush3.bf16.msra.mxu1 %v8221_v51 }
 0x789   : > { %8584 = vrsqrt.f32 %v4238_v45  ;;  %v4175_v62 = vmax.f32 %v4143_v15, 0.0  ;;  %v3899_v23 = vpop.xlane.xlu0 %3898  ;;  %v4025_v39 = vpop.xlane.xlu1 %4024  ;;  %v8222_v45 = vld [vmem:[%s9209_s27 + $0xf8] sm:$0xff]  }
 0x78a   : > { %v11188_v25 = vmul.f32 0.0078125, %v3899_v23  ;;  %v4080_v34 = vmul.f32 0.0078125, %v4025_v39  ;;  %v4393_v41 = vpack.c.bf16 %v4363_v12, %v4362_v52  ;;  %v4205_v23 = vsub.f32 %v10944_v43, %v11150_v16  ;;  %7544 = vmatprep.subr.bf16.mxu0 %v8222_v45 }
 0x78b   : > { %v4239_v28 = vadd.f32 1e-05, %v4175_v62  ;;  %v8223_v62 = vld [vmem:[%s9209_s27 + $0xb8] sm:$0xff]  }
 0x78c   : > { %v4144_v40 = vsub.f32 %v4080_v34, %v4112_v59  ;;  %v4113_v47 = vmul.f32 %v11188_v25, %v11188_v25  ;;  %4665 = vmatmul.mubr.bf16.gmra.mxu1 %v4393_v41  ;;  %4858 = vmatmul.mubr.bf16.gmra.mxu0 %v4393_v41 }
 0x78d   : > { %8586 = vrsqrt.f32 %v4239_v28  ;;  %v4027_v29 = vpop.xlane.xlu0 %4026  ;;  %v3901_v4 = vpop.xlane.xlu1 %3900  ;;  %4674 = vmatprep.mubr.bf16.mxu1 %v13611_v20  ;;  %4867 = vmatprep.mubr.bf16.mxu0 %v13611_v20 }
 0x78e   : > { %v8581_v60 = vpop.eup %8580  ;;  %v4176_v13 = vmax.f32 %v4144_v40, 0.0  ;;  %v4081_v63 = vmul.f32 0.0078125, %v4027_v29  ;;  %v11194_v5 = vmul.f32 0.0078125, %v3901_v4  ;;  %7545 = vmatpush3.bf16.msra.mxu0 %v8223_v62  ;;  %v4206_v4 = vsub.f32 %v10953_v14, %v11156_v48 }
 0x78f   : > { %v4300_v57 = vmul.f32 %v8581_v60, %v4204_v9  ;;  %v4207_v48 = vsub.f32 %v10963_v36, %v11167_v33 }
 0x790   : > { %v4240_v15 = vadd.f32 1e-05, %v4176_v13  ;;  %v4145_v18 = vsub.f32 %v4081_v63, %v4113_v47  ;;  %v4114_v39 = vmul.f32 %v11194_v5, %v11194_v5 }
 0x791   : > { %v3903_v52 = vpop.xlane.xlu0 %3902  ;;  %v4029_v12 = vpop.xlane.xlu1 %4028  ;;  %v4332_v9 = vmul.f32 %v11159_v1, %v4300_v57 }
 0x792   : > { %v8583_v59 = vpop.eup %8582  ;;  %8588 = vrsqrt.f32 %v4240_v15  ;;  %v4177_v34 = vmax.f32 %v4145_v18, 0.0  ;;  %v11206_v28 = vmul.f32 0.0078125, %v3903_v52  ;;  %v4082_v41 = vmul.f32 0.0078125, %v4029_v12 }
 0x793   : > { %v4301_v40 = vmul.f32 %v8583_v59, %v4205_v23  ;;  %v4364_v51 = vadd.f32 %v11170_v35, %v4332_v9 }
 0x794   : > { %v4241_v29 = vadd.f32 1e-05, %v4177_v34  ;;  %v4146_v16 = vsub.f32 %v4082_v41, %v4114_v39  ;;  %v4115_v63 = vmul.f32 %v11206_v28, %v11206_v28  ;;  %v4208_v41 = vsub.f32 %v10977_v56, %v11179_v37  ;;  %v8230_v37 = vld [vmem:[%s9209_s27 + $0xe8] sm:$0xff]  }
 0x795   : > { %v4031_v60 = vpop.xlane.xlu0 %4030  ;;  %v4333_v47 = vmul.f32 %v11159_v1, %v4301_v40 }
 0x796   : > { %v8585_v13 = vpop.eup %8584  ;;  %8590 = vrsqrt.f32 %v4241_v29  ;;  %v4178_v50 = vmax.f32 %v4146_v16, 0.0  ;;  %v4083_v45 = vmul.f32 0.0078125, %v4031_v60  ;;  %v8224_v16 = vld [vmem:[%s9209_s27 + $0x70] sm:$0xff]  }
 0x797   : > { %v4365_v15 = vadd.f32 %v11170_v35, %v4333_v47  ;;  %v4302_v57 = vmul.f32 %v8585_v13, %v4206_v4  ;;  %v8225_v4 = vld [vmem:[%s9209_s27 + $0x30] sm:$0xff]   ;;  %7434 = vmatprep.subr.bf16.mxu1 %v8224_v16 }
 0x798   : > { %v4242_v18 = vadd.f32 1e-05, %v4178_v50  ;;  %v4147_v62 = vsub.f32 %v4083_v45, %v4115_v63  ;;  %v8226_v60 = vld [vmem:[%s9209_s27 + $0xf0] sm:$0xff]   ;;  %v8228_v50 = vld [vmem:[%s9209_s27 + $0x68] sm:$0xff]   ;;  %v4209_v45 = vsub.f32 %v10986_v24, %v11188_v25  ;;  %7435 = vmatpush3.bf16.msra.mxu1 %v8225_v4  ;;  %v4210_v25 = vsub.f32 %v10995_v3, %v11194_v5 }
 0x799   : > { %v4394_v23 = vpack.c.bf16 %v4365_v15, %v4364_v51  ;;  %v4334_v59 = vmul.f32 %v11159_v1, %v4302_v57  ;;  %v8227_v13 = vld [vmem:[%s9209_s27 + $0xb0] sm:$0xff]   ;;  %7546 = vmatprep.subr.bf16.mxu0 %v8226_v60  ;;  %v8229_v51 = vld [vmem:[%s9209_s27 + $0x28] sm:$0xff]   ;;  %7436 = vmatprep.subr.bf16.mxu1 %v8228_v50  ;;  %v4211_v5 = vsub.f32 %v11001_v31, %v11206_v28 }
 0x79a   : > { %v8587_v39 = vpop.eup %8586  ;;  %8592 = vrsqrt.f32 %v4242_v18  ;;  %v4179_v52 = vmax.f32 %v4147_v62, 0.0  ;;  %7547 = vmatpush3.bf16.msra.mxu0 %v8227_v13  ;;  %v8231_v15 = vld [vmem:[%s9209_s27 + $0xa8] sm:$0xff]   ;;  %v8232_v18 = vld [vmem:[%s9209_s27 + $0x60] sm:$0xff]  }
 0x79b   : > { %4675 = vmatmul.mubr.bf16.gmra.mxu1 %v4394_v23  ;;  %4868 = vmatmul.mubr.bf16.gmra.mxu0 %v4394_v23  ;;  %v4303_v12 = vmul.f32 %v8587_v39, %v4207_v48  ;;  %v4366_v9 = vadd.f32 %v11170_v35, %v4334_v59  ;;  %v8234_v62 = vld [vmem:[%s9209_s27 + $0xe0] sm:$0xff]  }
 0x79c   : > { %v4243_v34 = vadd.f32 1e-05, %v4179_v52  ;;  %4684 = vmatprep.mubr.bf16.mxu1 %v13611_v20  ;;  %4877 = vmatprep.mubr.bf16.mxu0 %v13611_v20  ;;  %v8235_v59 = vld [vmem:[%s9209_s27 + $0xa0] sm:$0xff]  }
 0x79d   : > { %v4335_v33 = vmul.f32 %v11159_v1, %v4303_v12  ;;  %7548 = vmatprep.subr.bf16.mxu0 %v8230_v37  ;;  %7437 = vmatpush3.bf16.msra.mxu1 %v8229_v51  ;;  %v8233_v12 = vld [vmem:[%s9209_s27 + $0x20] sm:$0xff]  }
 0x79e   : > { %8594 = vrsqrt.f32 %v4243_v34  ;;  %7549 = vmatpush3.bf16.msra.mxu0 %v8231_v15  ;;  %7438 = vmatprep.subr.bf16.mxu1 %v8232_v18 }
 0x79f   : > { %v8589_v40 = vpop.eup %8588  ;;  %v4367_v29 = vadd.f32 %v11170_v35, %v4335_v33  ;;  %7550 = vmatprep.subr.bf16.mxu0 %v8234_v62 }
 0x7a0   : > { %v4304_v47 = vmul.f32 %v8589_v40, %v4208_v41 }
 0x7a1   : > { %v4395_v63 = vpack.c.bf16 %v4367_v29, %v4366_v9  ;;  %7439 = vmatpush3.bf16.msra.mxu1 %v8233_v12 }
 0x7a2   : > { %v4336_v23 = vmul.f32 %v11159_v1, %v4304_v47  ;;  %7551 = vmatpush3.bf16.msra.mxu0 %v8235_v59 }
 0x7a3   : > { %v8591_v57 = vpop.eup %8590  ;;  %4685 = vmatmul.mubr.bf16.gmra.mxu1 %v4395_v63  ;;  %4878 = vmatmul.mubr.bf16.gmra.mxu0 %v4395_v63 }
 0x7a4   : > { %4694 = vmatprep.mubr.bf16.mxu1 %v13611_v20  ;;  %4887 = vmatprep.mubr.bf16.mxu0 %v13611_v20  ;;  %v4305_v48 = vmul.f32 %v8591_v57, %v4209_v45  ;;  %v4368_v41 = vadd.f32 %v11170_v35, %v4336_v23 }
 0x7a6   : > { %v3905_v39 = vpop.xlane.xlu1 %3904  ;;  %v4337_v52 = vmul.f32 %v11159_v1, %v4305_v48 }
 0x7a7   : > { %v8593_v34 = vpop.eup %8592  ;;  %v11246_v33 = vmul.f32 0.0078125, %v3905_v39 }
 0x7a8   : > { %v4369_v40 = vadd.f32 %v11170_v35, %v4337_v52  ;;  %v4306_v9 = vmul.f32 %v8593_v34, %v4210_v25 }
 0x7a9   : > { %v4116_v47 = vmul.f32 %v11246_v33, %v11246_v33 }
 0x7aa   : > { %v3907_v29 = vpop.xlane.xlu0 %3906  ;;  %v4033_v16 = vpop.xlane.xlu1 %4032  ;;  %v4396_v4 = vpack.c.bf16 %v4369_v40, %v4368_v41  ;;  %v4338_v37 = vmul.f32 %v11159_v1, %v4306_v9 }
 0x7ab   : > { %v8595_v60 = vpop.eup %8594  ;;  %v11254_v13 = vmul.f32 0.0078125, %v3907_v29  ;;  %v4084_v63 = vmul.f32 0.0078125, %v4033_v16 }
 0x7ac   : > { %4695 = vmatmul.mubr.bf16.gmra.mxu1 %v4396_v4  ;;  %4888 = vmatmul.mubr.bf16.gmra.mxu0 %v4396_v4  ;;  %v4307_v50 = vmul.f32 %v8595_v60, %v4211_v5  ;;  %v4370_v23 = vadd.f32 %v11170_v35, %v4338_v37 }
 0x7ad   : > { %v4148_v45 = vsub.f32 %v4084_v63, %v4116_v47  ;;  %4704 = vmatprep.mubr.bf16.mxu1 %v13611_v20  ;;  %4897 = vmatprep.mubr.bf16.mxu0 %v13611_v20  ;;  %v4117_v57 = vmul.f32 %v11254_v13, %v11254_v13 }
 0x7ae   : > { %v4035_v28 = vpop.xlane.xlu0 %4034  ;;  %v3909_v51 = vpop.xlane.xlu1 %3908  ;;  %v4339_v15 = vmul.f32 %v11159_v1, %v4307_v50 }
 0x7af   : > { %v4180_v18 = vmax.f32 %v4148_v45, 0.0  ;;  %v4085_v62 = vmul.f32 0.0078125, %v4035_v28  ;;  %v11262_v48 = vmul.f32 0.0078125, %v3909_v51 }
 0x7b0   : > { %v4371_v25 = vadd.f32 %v11170_v35, %v4339_v15 }
 0x7b1   : > { %v4244_v39 = vadd.f32 1e-05, %v4180_v18  ;;  %v4149_v52 = vsub.f32 %v4085_v62, %v4117_v57  ;;  %v4118_v12 = vmul.f32 %v11262_v48, %v11262_v48 }
 0x7b2   : > { %v3911_v59 = vpop.xlane.xlu0 %3910  ;;  %v4037_v34 = vpop.xlane.xlu1 %4036  ;;  %v4397_v41 = vpack.c.bf16 %v4371_v25, %v4370_v23 }
 0x7b3   : > { %8596 = vrsqrt.f32 %v4244_v39  ;;  %v4181_v40 = vmax.f32 %v4149_v52, 0.0  ;;  %v11268_v9 = vmul.f32 0.0078125, %v3911_v59  ;;  %v4086_v5 = vmul.f32 0.0078125, %v4037_v34 }
 0x7b4   : > { %4705 = vmatmul.mubr.bf16.gmra.mxu1 %v4397_v41  ;;  %4898 = vmatmul.mubr.bf16.gmra.mxu0 %v4397_v41 }
 0x7b5   : > { %v4245_v29 = vadd.f32 1e-05, %v4181_v40  ;;  %v4150_v16 = vsub.f32 %v4086_v5, %v4118_v12  ;;  %4714 = vmatprep.mubr.bf16.mxu1 %v13611_v20  ;;  %4907 = vmatprep.mubr.bf16.mxu0 %v13611_v20  ;;  %v4119_v4 = vmul.f32 %v11268_v9, %v11268_v9 }
 0x7b6   : > { %v4039_v60 = vpop.xlane.xlu0 %4038  ;;  %v3913_v47 = vpop.xlane.xlu1 %3912 }
 0x7b7   : > { %8598 = vrsqrt.f32 %v4245_v29  ;;  %v4182_v63 = vmax.f32 %v4150_v16, 0.0  ;;  %v4087_v50 = vmul.f32 0.0078125, %v4039_v60  ;;  %v11274_v37 = vmul.f32 0.0078125, %v3913_v47 }
 0x7b8   : > { %v4212_v29 = vsub.f32 %v11009_v27, %v11246_v33 }
 0x7b9   : > { %v4246_v45 = vadd.f32 1e-05, %v4182_v63  ;;  %v4151_v28 = vsub.f32 %v4087_v50, %v4119_v4  ;;  %v4120_v51 = vmul.f32 %v11274_v37, %v11274_v37 }
 0x7ba   : > { %v3915_v15 = vpop.xlane.xlu0 %3914  ;;  %v4041_v57 = vpop.xlane.xlu1 %4040 }
 0x7bb   : > { %8600 = vrsqrt.f32 %v4246_v45  ;;  %v4183_v18 = vmax.f32 %v4151_v28, 0.0  ;;  %v11278_v62 = vmul.f32 0.0078125, %v3915_v15  ;;  %v4088_v23 = vmul.f32 0.0078125, %v4041_v57 }
 0x7bc   : > { %v4213_v57 = vsub.f32 %v11014_v54, %v11254_v13 }
 0x7bd   : > { %v4247_v25 = vadd.f32 1e-05, %v4183_v18  ;;  %v4152_v39 = vsub.f32 %v4088_v23, %v4120_v51  ;;  %v4121_v52 = vmul.f32 %v11278_v62, %v11278_v62 }
 0x7be   : > { %v4043_v12 = vpop.xlane.xlu0 %4042  ;;  %v3917_v59 = vpop.xlane.xlu1 %3916 }
 0x7bf   : > { %8602 = vrsqrt.f32 %v4247_v25  ;;  %v4184_v34 = vmax.f32 %v4152_v39, 0.0  ;;  %v4089_v41 = vmul.f32 0.0078125, %v4043_v12  ;;  %v11282_v40 = vmul.f32 0.0078125, %v3917_v59 }
 0x7c0   : > { %v8597_v5 = vpop.eup %8596 }
 0x7c1   : > { %v4248_v16 = vadd.f32 1e-05, %v4184_v34  ;;  %v4153_v4 = vsub.f32 %v4089_v41, %v4121_v52  ;;  %v4122_v60 = vmul.f32 %v11282_v40, %v11282_v40  ;;  %v4308_v50 = vmul.f32 %v8597_v5, %v4212_v29 }
 0x7c2   : > { %v3919_v47 = vpop.xlane.xlu0 %3918  ;;  %v4045_v63 = vpop.xlane.xlu1 %4044  ;;  %v4214_v29 = vsub.f32 %v11019_v53, %v11262_v48 }
 0x7c3   : > { %8604 = vrsqrt.f32 %v4248_v16  ;;  %v4185_v45 = vmax.f32 %v4153_v4, 0.0  ;;  %v11288_v28 = vmul.f32 0.0078125, %v3919_v47  ;;  %v4090_v51 = vmul.f32 0.0078125, %v4045_v63 }
 0x7c4   : > { %v8599_v15 = vpop.eup %8598  ;;  %v4340_v12 = vmul.f32 %v11159_v1, %v4308_v50 }
 0x7c5   : > { %v4249_v18 = vadd.f32 1e-05, %v4185_v45  ;;  %v4154_v23 = vsub.f32 %v4090_v51, %v4122_v60  ;;  %v4123_v33 = vmul.f32 %v11288_v28, %v11288_v28  ;;  %v4309_v52 = vmul.f32 %v8599_v15, %v4213_v57 }
 0x7c6   : > { %v4047_v25 = vpop.xlane.xlu0 %4046  ;;  %v3921_v39 = vpop.xlane.xlu1 %3920  ;;  %v4372_v50 = vadd.f32 %v11170_v35, %v4340_v12 }
 0x7c7   : > { %8606 = vrsqrt.f32 %v4249_v18  ;;  %v4186_v59 = vmax.f32 %v4154_v23, 0.0  ;;  %v4091_v34 = vmul.f32 0.0078125, %v4047_v25  ;;  %v11295_v41 = vmul.f32 0.0078125, %v3921_v39 }
 0x7c8   : > { %v8601_v5 = vpop.eup %8600  ;;  %v4341_v13 = vmul.f32 %v11159_v1, %v4309_v52  ;;  %v4215_v23 = vsub.f32 %v11025_v38, %v11268_v9 }
 0x7c9   : > { %v4250_v16 = vadd.f32 1e-05, %v4186_v59  ;;  %v4155_v4 = vsub.f32 %v4091_v34, %v4123_v33  ;;  %v4124_v60 = vmul.f32 %v11295_v41, %v11295_v41  ;;  %v4310_v51 = vmul.f32 %v8601_v5, %v4214_v29 }
 0x7ca   : > { %v3923_v47 = vpop.xlane.xlu0 %3922  ;;  %v4049_v63 = vpop.xlane.xlu1 %4048  ;;  %v4373_v45 = vadd.f32 %v11170_v35, %v4341_v13 }
 0x7cb   : > { %8608 = vrsqrt.f32 %v4250_v16  ;;  %v4187_v15 = vmax.f32 %v4155_v4, 0.0  ;;  %v11304_v57 = vmul.f32 0.0078125, %v3923_v47  ;;  %v4092_v18 = vmul.f32 0.0078125, %v4049_v63 }
 0x7cc   : > { %v8603_v48 = vpop.eup %8602  ;;  %v4398_v33 = vpack.c.bf16 %v4373_v45, %v4372_v50  ;;  %v4342_v5 = vmul.f32 %v11159_v1, %v4310_v51  ;;  %v4216_v4 = vsub.f32 %v11031_v6, %v11274_v37 }
 0x7cd   : > { %v4251_v25 = vadd.f32 1e-05, %v4187_v15  ;;  %v4156_v39 = vsub.f32 %v4092_v18, %v4124_v60  ;;  %v4125_v52 = vmul.f32 %v11304_v57, %v11304_v57  ;;  %v4311_v34 = vmul.f32 %v8603_v48, %v4215_v23 }
 0x7ce   : > { %4715 = vmatmul.mubr.bf16.gmra.mxu1 %v4398_v33  ;;  %4908 = vmatmul.mubr.bf16.gmra.mxu0 %v4398_v33  ;;  %v4051_v12 = vpop.xlane.xlu0 %4050  ;;  %v3925_v59 = vpop.xlane.xlu1 %3924  ;;  %v4374_v15 = vadd.f32 %v11170_v35, %v4342_v5 }
 0x7cf   : > { %8610 = vrsqrt.f32 %v4251_v25  ;;  %v4188_v29 = vmax.f32 %v4156_v39, 0.0  ;;  %v4093_v13 = vmul.f32 0.0078125, %v4051_v12  ;;  %v11311_v16 = vmul.f32 0.0078125, %v3925_v59  ;;  %4724 = vmatprep.mubr.bf16.mxu1 %v13611_v20  ;;  %4917 = vmatprep.mubr.bf16.mxu0 %v13611_v20 }
 0x7d0   : > { %v8605_v9 = vpop.eup %8604  ;;  %v4343_v60 = vmul.f32 %v11159_v1, %v4311_v34  ;;  %v4217_v39 = vsub.f32 %v11038_v46, %v11278_v62  ;;  %v4218_v34 = vsub.f32 %v11043_v58, %v11282_v40 }
 0x7d1   : > { %v4252_v47 = vadd.f32 1e-05, %v4188_v29  ;;  %v4157_v63 = vsub.f32 %v4093_v13, %v4125_v52  ;;  %v4126_v50 = vmul.f32 %v11311_v16, %v11311_v16  ;;  %v4312_v48 = vmul.f32 %v8605_v9, %v4216_v4 }
 0x7d2   : > { %v3927_v45 = vpop.xlane.xlu0 %3926  ;;  %v4053_v51 = vpop.xlane.xlu1 %4052  ;;  %v4375_v18 = vadd.f32 %v11170_v35, %v4343_v60 }
 0x7d3   : > { %8612 = vrsqrt.f32 %v4252_v47  ;;  %v4189_v23 = vmax.f32 %v4157_v63, 0.0  ;;  %v11322_v33 = vmul.f32 0.0078125, %v3927_v45  ;;  %v4094_v25 = vmul.f32 0.0078125, %v4053_v51 }
 0x7d4   : > { %v8607_v37 = vpop.eup %8606  ;;  %v4399_v52 = vpack.c.bf16 %v4375_v18, %v4374_v15  ;;  %v4344_v13 = vmul.f32 %v11159_v1, %v4312_v48  ;;  %v4219_v15 = vsub.f32 %v11049_v11, %v11288_v28 }
 0x7d5   : > { %v4253_v12 = vadd.f32 1e-05, %v4189_v23  ;;  %v4158_v59 = vsub.f32 %v4094_v25, %v4126_v50  ;;  %v4313_v29 = vmul.f32 %v8607_v37, %v4217_v39  ;;  %v4127_v9 = vmul.f32 %v11322_v33, %v11322_v33 }
 0x7d6   : > { %4725 = vmatmul.mubr.bf16.gmra.mxu1 %v4399_v52  ;;  %4918 = vmatmul.mubr.bf16.gmra.mxu0 %v4399_v52  ;;  %v4055_v5 = vpop.xlane.xlu0 %4054  ;;  %v4376_v45 = vadd.f32 %v11170_v35, %v4344_v13  ;;  %v4220_v52 = vsub.f32 %v11055_v7, %v11295_v41  ;;  %v4221_v41 = vsub.f32 %v11062_v10, %v11304_v57  ;;  %v8238_v57 = vld [vmem:[%s9209_s27 + $0xd8] sm:$0xff]  }
 0x7d7   : > { %8614 = vrsqrt.f32 %v4253_v12  ;;  %v4190_v4 = vmax.f32 %v4158_v59, 0.0  ;;  %v4095_v60 = vmul.f32 0.0078125, %v4055_v5  ;;  %4734 = vmatprep.mubr.bf16.mxu1 %v13611_v20  ;;  %4927 = vmatprep.mubr.bf16.mxu0 %v13611_v20  ;;  %v4345_v47 = vmul.f32 %v11159_v1, %v4313_v29 }
 0x7d8   : > { %v8609_v62 = vpop.eup %8608  ;;  %7552 = vmatprep.subr.bf16.mxu0 %v8238_v57 }
 0x7d9   : > { %v4254_v40 = vadd.f32 1e-05, %v4190_v4  ;;  %v4159_v63 = vsub.f32 %v4095_v60, %v4127_v9  ;;  %v4314_v50 = vmul.f32 %v8609_v62, %v4218_v34  ;;  %v4377_v51 = vadd.f32 %v11170_v35, %v4345_v47 }
 0x7db   : > { %8616 = vrsqrt.f32 %v4254_v40  ;;  %v4191_v18 = vmax.f32 %v4159_v63, 0.0  ;;  %v4400_v23 = vpack.c.bf16 %v4377_v51, %v4376_v45  ;;  %v4346_v39 = vmul.f32 %v11159_v1, %v4314_v50 }
 0x7dc   : > { %v8611_v48 = vpop.eup %8610 }
 0x7dd   : > { %v4255_v25 = vadd.f32 1e-05, %v4191_v18  ;;  %v4315_v37 = vmul.f32 %v8611_v48, %v4219_v15  ;;  %v4378_v5 = vadd.f32 %v11170_v35, %v4346_v39  ;;  %v8236_v15 = vld [vmem:[%s9209_s27 + $0x58] sm:$0xff]   ;;  %v4222_v18 = vsub.f32 %v11067_v2, %v11311_v16 }
 0x7de   : > { %4735 = vmatmul.mubr.bf16.gmra.mxu1 %v4400_v23  ;;  %4928 = vmatmul.mubr.bf16.gmra.mxu0 %v4400_v23  ;;  %v8239_v16 = vld [vmem:[%s9209_s27 + $0x98] sm:$0xff]  }
 0x7df   : > { %8618 = vrsqrt.f32 %v4255_v25  ;;  %v3929_v12 = vpop.xlane.xlu1 %3928  ;;  %4744 = vmatprep.mubr.bf16.mxu1 %v13611_v20  ;;  %4937 = vmatprep.mubr.bf16.mxu0 %v13611_v20  ;;  %v4347_v28 = vmul.f32 %v11159_v1, %v4315_v37  ;;  %v8237_v37 = vld [vmem:[%s9209_s27 + $0x18] sm:$0xff]  }
 0x7e0   : > { %v8613_v59 = vpop.eup %8612  ;;  %v11344_v34 = vmul.f32 0.0078125, %v3929_v12  ;;  %7440 = vmatprep.subr.bf16.mxu1 %v8236_v15  ;;  %7553 = vmatpush3.bf16.msra.mxu0 %v8239_v16 }
 0x7e1   : > { %v4379_v29 = vadd.f32 %v11170_v35, %v4347_v28  ;;  %v4316_v13 = vmul.f32 %v8613_v59, %v4220_v52  ;;  %7441 = vmatpush3.bf16.msra.mxu1 %v8237_v37 }
 0x7e2   : > { %v4128_v47 = vmul.f32 %v11344_v34, %v11344_v34 }
 0x7e3   : > { %v3931_v9 = vpop.xlane.xlu0 %3930  ;;  %v4057_v4 = vpop.xlane.xlu1 %4056  ;;  %v4401_v60 = vpack.c.bf16 %v4379_v29, %v4378_v5  ;;  %v4348_v45 = vmul.f32 %v11159_v1, %v4316_v13 }
 0x7e4   : > { %v8615_v62 = vpop.eup %8614  ;;  %v11352_v40 = vmul.f32 0.0078125, %v3931_v9  ;;  %v4096_v63 = vmul.f32 0.0078125, %v4057_v4  ;;  %v4223_v4 = vsub.f32 %v11073_v0, %v11322_v33 }
 0x7e5   : > { %v4317_v50 = vmul.f32 %v8615_v62, %v4221_v41  ;;  %v4380_v5 = vadd.f32 %v11170_v35, %v4348_v45 }
 0x7e6   : > { %v4160_v51 = vsub.f32 %v4096_v63, %v4128_v47  ;;  %4745 = vmatmul.mubr.bf16.gmra.mxu1 %v4401_v60  ;;  %4938 = vmatmul.mubr.bf16.gmra.mxu0 %v4401_v60  ;;  %v4129_v52 = vmul.f32 %v11352_v40, %v11352_v40 }
 0x7e7   : > { %v4059_v48 = vpop.xlane.xlu0 %4058  ;;  %v3933_v23 = vpop.xlane.xlu1 %3932  ;;  %4754 = vmatprep.mubr.bf16.mxu1 %v13611_v20  ;;  %4947 = vmatprep.mubr.bf16.mxu0 %v13611_v20  ;;  %v4349_v25 = vmul.f32 %v11159_v1, %v4317_v50 }
 0x7e8   : > { %v8617_v39 = vpop.eup %8616  ;;  %v4192_v12 = vmax.f32 %v4160_v51, 0.0  ;;  %v4097_v28 = vmul.f32 0.0078125, %v4059_v48  ;;  %v11365_v59 = vmul.f32 0.0078125, %v3933_v23  ;;  %v8240_v48 = vld [vmem:[%s9209_s27 + $0x50] sm:$0xff]  }
 0x7e9   : > { %v4381_v29 = vadd.f32 %v11170_v35, %v4349_v25  ;;  %v4318_v13 = vmul.f32 %v8617_v39, %v4222_v18  ;;  %v8241_v25 = vld [vmem:[%s9209_s27 + $0x10] sm:$0xff]   ;;  %7442 = vmatprep.subr.bf16.mxu1 %v8240_v48 }
 0x7ea   : > { %v4256_v41 = vadd.f32 1e-05, %v4192_v12  ;;  %v4161_v9 = vsub.f32 %v4097_v28, %v4129_v52  ;;  %v4130_v60 = vmul.f32 %v11365_v59, %v11365_v59  ;;  %7443 = vmatpush3.bf16.msra.mxu1 %v8241_v25 }
 0x7eb   : > { %v3935_v62 = vpop.xlane.xlu0 %3934  ;;  %v4061_v47 = vpop.xlane.xlu1 %4060  ;;  %v4402_v63 = vpack.c.bf16 %v4381_v29, %v4380_v5  ;;  %v4350_v18 = vmul.f32 %v11159_v1, %v4318_v13  ;;  %v8242_v29 = vld [vmem:[%s9209_s27 + $0xd0] sm:$0xff]  }
 0x7ec   : > { %v8619_v50 = vpop.eup %8618  ;;  %8620 = vrsqrt.f32 %v4256_v41  ;;  %v4193_v45 = vmax.f32 %v4161_v9, 0.0  ;;  %v11374_v51 = vmul.f32 0.0078125, %v3935_v62  ;;  %v4098_v15 = vmul.f32 0.0078125, %v4061_v47  ;;  %v8243_v9 = vld [vmem:[%s9209_s27 + $0x90] sm:$0xff]   ;;  %7554 = vmatprep.subr.bf16.mxu0 %v8242_v29  ;;  %v8245_v29 = vld [vmem:[%s9209_s27 + $0xc8] sm:$0xff]  }
 0x7ed   : > { %v4319_v57 = vmul.f32 %v8619_v50, %v4223_v4  ;;  %v4382_v13 = vadd.f32 %v11170_v35, %v4350_v18  ;;  %7555 = vmatpush3.bf16.msra.mxu0 %v8243_v9  ;;  %v8246_v9 = vld [vmem:[%s9209_s27 + $0x8] sm:$0xff]  }
 0x7ee   : > { %v4257_v23 = vadd.f32 1e-05, %v4193_v45  ;;  %v4162_v33 = vsub.f32 %v4098_v15, %v4130_v60  ;;  %4755 = vmatmul.mubr.bf16.gmra.mxu1 %v4402_v63  ;;  %4948 = vmatmul.mubr.bf16.gmra.mxu0 %v4402_v63  ;;  %v4131_v37 = vmul.f32 %v11374_v51, %v11374_v51 }
 0x7ef   : > { %v4063_v39 = vpop.xlane.xlu0 %4062  ;;  %v3937_v52 = vpop.xlane.xlu1 %3936  ;;  %4764 = vmatprep.mubr.bf16.mxu1 %v13611_v20  ;;  %4957 = vmatprep.mubr.bf16.mxu0 %v13611_v20  ;;  %v4351_v12 = vmul.f32 %v11159_v1, %v4319_v57 }
 0x7f0   : > { %8622 = vrsqrt.f32 %v4257_v23  ;;  %v4194_v28 = vmax.f32 %v4162_v33, 0.0  ;;  %v4099_v16 = vmul.f32 0.0078125, %v4063_v39  ;;  %v11384_v5 = vmul.f32 0.0078125, %v3937_v52  ;;  %7556 = vmatprep.subr.bf16.mxu0 %v8245_v29 }
 0x7f1   : > { %v4383_v41 = vadd.f32 %v11170_v35, %v4351_v12 }
 0x7f2   : > { %v4258_v4 = vadd.f32 1e-05, %v4194_v28  ;;  %v4163_v60 = vsub.f32 %v4099_v16, %v4131_v37  ;;  %v4132_v62 = vmul.f32 %v11384_v5, %v11384_v5  ;;  %v4224_v28 = vsub.f32 %v11081_v22, %v11344_v34  ;;  %v8244_v16 = vld [vmem:[%s9209_s27 + $0x48] sm:$0xff]  }
 0x7f3   : > { %v3939_v47 = vpop.xlane.xlu0 %3938  ;;  %v4065_v63 = vpop.xlane.xlu1 %4064  ;;  %v4403_v50 = vpack.c.bf16 %v4383_v41, %v4382_v13  ;;  %7444 = vmatprep.subr.bf16.mxu1 %v8244_v16 }
 0x7f4   : > { %8624 = vrsqrt.f32 %v4258_v4  ;;  %v4195_v45 = vmax.f32 %v4163_v60, 0.0  ;;  %v11392_v15 = vmul.f32 0.0078125, %v3939_v47  ;;  %v4100_v57 = vmul.f32 0.0078125, %v4065_v63  ;;  %v8247_v4 = vld [vmem:[%s9209_s27 + $0x88] sm:$0xff]   ;;  %7445 = vmatpush3.bf16.msra.mxu1 %v8246_v9 }
 0x7f5   : > { %7557 = vmatpush3.bf16.msra.mxu0 %v8247_v4 }
 0x7f6   : > { %v4259_v18 = vadd.f32 1e-05, %v4195_v45  ;;  %v4164_v48 = vsub.f32 %v4100_v57, %v4132_v62  ;;  %4765 = vmatmul.mubr.bf16.gmra.mxu1 %v4403_v50  ;;  %4958 = vmatmul.mubr.bf16.gmra.mxu0 %v4403_v50  ;;  %v4133_v23 = vmul.f32 %v11392_v15, %v11392_v15 }
 0x7f7   : > { %v4067_v33 = vpop.xlane.xlu0 %4066  ;;  %v3941_v25 = vpop.xlane.xlu1 %3940  ;;  %4774 = vmatprep.mubr.bf16.mxu1 %v13611_v20  ;;  %4967 = vmatprep.mubr.bf16.mxu0 %v13611_v20 }
 0x7f8   : > { %8626 = vrsqrt.f32 %v4259_v18  ;;  %v4196_v37 = vmax.f32 %v4164_v48, 0.0  ;;  %v4101_v39 = vmul.f32 0.0078125, %v4067_v33  ;;  %v11398_v52 = vmul.f32 0.0078125, %v3941_v25 }
 0x7f9   : > { %v8621_v12 = vpop.eup %8620  ;;  %v4225_v18 = vsub.f32 %v11086_v55, %v11352_v40  ;;  %v4226_v33 = vsub.f32 %v11091_v32, %v11365_v59 }
 0x7fa   : > { %v4260_v13 = vadd.f32 1e-05, %v4196_v37  ;;  %v4165_v41 = vsub.f32 %v4101_v39, %v4133_v23  ;;  %v4134_v60 = vmul.f32 %v11398_v52, %v11398_v52  ;;  %v4320_v63 = vmul.f32 %v8621_v12, %v4224_v28 }
 0x7fb   : > { %v3943_v62 = vpop.xlane.xlu0 %3942  ;;  %v4069_v47 = vpop.xlane.xlu1 %4068 }
 0x7fc   : > { %8628 = vrsqrt.f32 %v4260_v13  ;;  %v4197_v50 = vmax.f32 %v4165_v41, 0.0  ;;  %v11408_v45 = vmul.f32 0.0078125, %v3943_v62  ;;  %v4102_v57 = vmul.f32 0.0078125, %v4069_v47  ;;  %v8248_v47 = vld [vmem:[%s9209_s27 + $0x40] sm:$0xff]  }
 0x7fd   : > { %v8623_v34 = vpop.eup %8622  ;;  %v4352_v39 = vmul.f32 %v11159_v1, %v4320_v63  ;;  %v8249_v63 = vld [vmem:[%s9209_s27 + $0xc0] sm:$0xff]   ;;  %7446 = vmatprep.subr.bf16.mxu1 %v8248_v47 }
 0x7fe   : > { %v4261_v48 = vadd.f32 1e-05, %v4197_v50  ;;  %v4166_v23 = vsub.f32 %v4102_v57, %v4134_v60  ;;  %v4321_v37 = vmul.f32 %v8623_v34, %v4225_v18  ;;  %v4135_v12 = vmul.f32 %v11408_v45, %v11408_v45  ;;  %v8250_v34 = vld [vmem:[%s9209_s27] sm:$0xff]   ;;  %7558 = vmatprep.subr.bf16.mxu0 %v8249_v63 }
 0x7ff   : > { %v4071_v25 = vpop.xlane.xlu0 %4070  ;;  %v4384_v9 = vadd.f32 %v11170_v35, %v4352_v39  ;;  %v4227_v60 = vsub.f32 %v11099_v42, %v11374_v51  ;;  %v8251_v18 = vld [vmem:[%s9209_s27 + $0x80] sm:$0xff]   ;;  %7447 = vmatpush3.bf16.msra.mxu1 %v8250_v34 }
 0x800   : > { %8630 = vrsqrt.f32 %v4261_v48  ;;  %v4198_v28 = vmax.f32 %v4166_v23, 0.0  ;;  %v4103_v16 = vmul.f32 0.0078125, %v4071_v25  ;;  %v4353_v29 = vmul.f32 %v11159_v1, %v4321_v37  ;;  %7559 = vmatpush3.bf16.msra.mxu0 %v8251_v18  ;;  %v8929_v34 = vld [vmem:[%s9176_s15] ss:$0 sm:$0xff] }
 0x801   : > { %v8625_v40 = vpop.eup %8624 }
 0x802   : > { %v4262_v13 = vadd.f32 1e-05, %v4198_v28  ;;  %v4167_v41 = vsub.f32 %v4103_v16, %v4135_v12  ;;  %v4322_v59 = vmul.f32 %v8625_v40, %v4226_v33  ;;  %v4385_v4 = vadd.f32 %v11170_v35, %v4353_v29 }
 0x803   : > { %v4228_v33 = vsub.f32 %v11109_v8, %v11384_v5  ;;  %v4229_v16 = vsub.f32 %v11120_v61, %v11392_v15 }
 0x804   : > { %8632 = vrsqrt.f32 %v4262_v13  ;;  %v4199_v62 = vmax.f32 %v4167_v41, 0.0  ;;  %v4404_v57 = vpack.c.bf16 %v4385_v4, %v4384_v9  ;;  %v4354_v25 = vmul.f32 %v11159_v1, %v4322_v59  ;;  %v8928_v59 = vld [vmem:[%s9170_s19] ss:$0 sm:$0xff] }
 0x805   : > { %v8627_v50 = vpop.eup %8626  ;;  %v4230_v41 = vsub.f32 %v11129_v21, %v11398_v52 }
 0x806   : > { %v4263_v48 = vadd.f32 1e-05, %v4199_v62  ;;  %v4323_v23 = vmul.f32 %v8627_v50, %v4227_v60  ;;  %4775 = vmatmul.mubr.bf16.gmra.mxu1 %v4404_v57  ;;  %4968 = vmatmul.mubr.bf16.gmra.mxu0 %v4404_v57  ;;  %v4386_v39 = vadd.f32 %v11170_v35, %v4354_v25 }
 0x807   : > { %4784 = vmatprep.mubr.bf16.mxu1 %v13611_v20  ;;  %4977 = vmatprep.mubr.bf16.mxu0 %v13611_v20 }
 0x808   : > { %8634 = vrsqrt.f32 %v4263_v48  ;;  %v4355_v51 = vmul.f32 %v11159_v1, %v4323_v23  ;;  %v4442_v23 = vlaneseq }
 0x809   : > { %v8629_v37 = vpop.eup %8628 }
 0x80a   : > { %v4387_v12 = vadd.f32 %v11170_v35, %v4355_v51  ;;  %v4324_v28 = vmul.f32 %v8629_v37, %v4228_v33  ;;  %v4440_v51 = vld [vmem:[%s9204_s20] sm:$0xf] }
 0x80c   : > { %v4405_v5 = vpack.c.bf16 %v4387_v12, %v4386_v39  ;;  %v4356_v13 = vmul.f32 %v11159_v1, %v4324_v28  ;;  %v4231_v1 = vsub.f32 %v11137_v49, %v11408_v45  ;;  %v4443_v45 = vshrl.u32 %v4442_v23, 7 }
 0x80d   : > { %v8631_v40 = vpop.eup %8630 }
 0x80e   : > { %v4325_v29 = vmul.f32 %v8631_v40, %v4229_v16  ;;  %4785 = vmatmul.mubr.bf16.gmra.mxu1 %v4405_v5  ;;  %4978 = vmatmul.mubr.bf16.gmra.mxu0 %v4405_v5  ;;  %v4388_v15 = vadd.f32 %v11170_v35, %v4356_v13  ;;  %v4444_v25 = vsub.s32 0, %v4443_v45  ;;  %v4452_v33 = vsub.s32 2, %v4443_v45 }
 0x80f   : > { %4794 = vmatprep.mubr.bf16.mxu1 %v13611_v20  ;;  %4987 = vmatprep.mubr.bf16.mxu0 %v13611_v20  ;;  %v4448_v37 = vsub.s32 1, %v4443_v45  ;;  %v4456_v39 = vsub.s32 3, %v4443_v45 }
 0x810   : > { %v4357_v9 = vmul.f32 %v8928_v59, %v4325_v29  ;;  %v11450_v12 = vrot.slane %v4440_v51, %v4444_v25  ;;  %v11452_v28 = vrot.slane %v4440_v51, %v4452_v33 }
 0x811   : > { %v8633_v4 = vpop.eup %8632  ;;  %v11454_v16 = vrot.slane %v4440_v51, %v4448_v37 }
 0x812   : > { %v4389_v60 = vadd.f32 %v11170_v35, %v4357_v9  ;;  %v4326_v62 = vmul.f32 %v8633_v4, %v4230_v41 }
 0x814   : > { %v4406_v47 = vpack.c.bf16 %v4389_v60, %v4388_v15  ;;  %v4358_v52 = vmul.f32 %v8928_v59, %v4326_v62 }
 0x815   : > { %v8635_v63 = vpop.eup %8634 }
 0x816   : > { %v4327_v50 = vmul.f32 %v8635_v63, %v4231_v1  ;;  %4795 = vmatmul.mubr.bf16.gmra.mxu1 %v4406_v47  ;;  %4988 = vmatmul.mubr.bf16.gmra.mxu0 %v4406_v47  ;;  %v4390_v18 = vadd.f32 %v8929_v34, %v4358_v52 }
 0x817   : > { %4804 = vmatprep.mubr.bf16.mxu1 %v13611_v20  ;;  %4997 = vmatprep.mubr.bf16.mxu0 %v13611_v20  ;;  %v11456_v20 = vrot.slane %v4440_v51, %v4456_v39 }
 0x818   : > { %v4359_v57 = vmul.f32 %v8928_v59, %v4327_v50 }
 0x81a   : > { %v4391_v48 = vadd.f32 %v8929_v34, %v4359_v57 }
 0x81c   : > { %v4407_v35 = vpack.c.bf16 %v4391_v48, %v4390_v18 }
 0x81e   : > { %4805 = vmatmul.mubr.bf16.gmra.mxu1 %v4407_v35  ;;  %4998 = vmatmul.mubr.bf16.gmra.mxu0 %v4407_v35 }
 0x844   : > { %v4656_v5 = vpop.f32.mrf.mxu1  ;;  %v4849_v40 = vpop.f32.mrf.mxu0 }
 0x845   : > { %v11459_v29 = vadd.f32 %v4656_v5, %v11450_v12  ;;  %v11462_v13 = vadd.f32 %v4849_v40, %v11452_v28 }
 0x846   : > { %v4658_v41 = vpop.f32.mrf.mxu1  ;;  %v4851_v59 = vpop.f32.mrf.mxu0 }
 0x847   : > { %v5008_v9 = vmul.f32 %v11459_v29, %v11459_v29  ;;  %v5010_v4 = vmul.f32 %v11462_v13, %v11462_v13  ;;  %v11469_v15 = vadd.f32 %v4658_v41, %v11454_v16  ;;  %v11472_v60 = vadd.f32 %v4851_v59, %v11456_v20 }
 0x848   : > { %v4660_v62 = vpop.f32.mrf.mxu1  ;;  %v4853_v1 = vpop.f32.mrf.mxu0 }
 0x849   : > { %v5136_v47 = vmul.f32 %v5008_v9, %v11459_v29  ;;  %v5138_v63 = vmul.f32 %v5010_v4, %v11462_v13  ;;  %v5009_v50 = vmul.f32 %v11469_v15, %v11469_v15  ;;  %v5011_v52 = vmul.f32 %v11472_v60, %v11472_v60 }
 0x84a   : > { %v11481_v57 = vadd.f32 %v4660_v62, %v11450_v12  ;;  %v11484_v34 = vadd.f32 %v4853_v1, %v11452_v28  ;;  %v4662_v18 = vpop.f32.mrf.mxu1  ;;  %v4855_v48 = vpop.f32.mrf.mxu0 }
 0x84b   : > { %v5264_v35 = vmul.f32 0.044715, %v5136_v47  ;;  %v5266_v23 = vmul.f32 0.044715, %v5138_v63  ;;  %v5137_v45 = vmul.f32 %v5009_v50, %v11469_v15  ;;  %v5139_v25 = vmul.f32 %v5011_v52, %v11472_v60 }
 0x84c   : > { %v5012_v33 = vmul.f32 %v11481_v57, %v11481_v57  ;;  %v5014_v51 = vmul.f32 %v11484_v34, %v11484_v34  ;;  %v11493_v37 = vadd.f32 %v4662_v18, %v11454_v16  ;;  %v11496_v39 = vadd.f32 %v4855_v48, %v11456_v20  ;;  %v4666_v5 = vpop.f32.mrf.mxu1  ;;  %v4859_v40 = vpop.f32.mrf.mxu0 }
 0x84d   : > { %v5392_v41 = vadd.f32 %v5264_v35, %v11459_v29  ;;  %v5394_v59 = vadd.f32 %v5266_v23, %v11462_v13  ;;  %v5265_v9 = vmul.f32 0.044715, %v5137_v45  ;;  %v5267_v18 = vmul.f32 0.044715, %v5139_v25 }
 0x84e   : > { %v5140_v4 = vmul.f32 %v5012_v33, %v11481_v57  ;;  %v5142_v62 = vmul.f32 %v5014_v51, %v11484_v34  ;;  %v5013_v1 = vmul.f32 %v11493_v37, %v11493_v37  ;;  %v5015_v47 = vmul.f32 %v11496_v39, %v11496_v39  ;;  %v4668_v48 = vpop.f32.mrf.mxu1  ;;  %v4861_v33 = vpop.f32.mrf.mxu0 }
 0x84f   : > { %v5520_v63 = vmul.f32 0.7978846, %v5392_v41  ;;  %v5522_v50 = vmul.f32 0.7978846, %v5394_v59  ;;  %v5393_v52 = vadd.f32 %v5265_v9, %v11469_v15  ;;  %v11510_v21 = vadd.f32 %v4666_v5, %v11450_v12 }
 0x850   : > { %v5268_v35 = vmul.f32 0.044715, %v5140_v4  ;;  %v5270_v49 = vmul.f32 0.044715, %v5142_v62  ;;  %v5141_v23 = vmul.f32 %v5013_v1, %v11493_v37  ;;  %v5143_v45 = vmul.f32 %v5015_v47, %v11496_v39  ;;  %v4670_v47 = vpop.f32.mrf.mxu1 }
 0x851   : > { %8636 = vtanh.f32 %v5520_v63  ;;  %v5521_v51 = vmul.f32 0.7978846, %v5393_v52  ;;  %v5395_v25 = vadd.f32 %v5267_v18, %v11472_v60  ;;  %v5016_v62 = vmul.f32 %v11510_v21, %v11510_v21  ;;  %v4863_v52 = vpop.f32.mrf.mxu0 }
 0x852   : > { %8638 = vtanh.f32 %v5522_v50  ;;  %v5396_v41 = vadd.f32 %v5268_v35, %v11481_v57  ;;  %v5398_v59 = vadd.f32 %v5270_v49, %v11484_v34  ;;  %v5269_v9 = vmul.f32 0.044715, %v5141_v23 }
 0x853   : > { %v5271_v4 = vmul.f32 0.044715, %v5143_v45  ;;  %v11518_v1 = vadd.f32 %v4859_v40, %v11452_v28  ;;  %8640 = vtanh.f32 %v5521_v51  ;;  %v5144_v49 = vmul.f32 %v5016_v62, %v11510_v21 }
 0x854   : > { %v5524_v63 = vmul.f32 0.7978846, %v5396_v41  ;;  %v5526_v5 = vmul.f32 0.7978846, %v5398_v59  ;;  %v5397_v50 = vadd.f32 %v5269_v9, %v11493_v37  ;;  %v11526_v23 = vadd.f32 %v4668_v48, %v11454_v16  ;;  %v4672_v9 = vpop.f32.mrf.mxu1 }
 0x855   : > { %v5399_v35 = vadd.f32 %v5271_v4, %v11496_v39  ;;  %v5018_v18 = vmul.f32 %v11518_v1, %v11518_v1  ;;  %v11529_v40 = vadd.f32 %v4861_v33, %v11456_v20  ;;  %v11532_v45 = vadd.f32 %v4670_v47, %v11450_v12 }
 0x856   : > { %8642 = vtanh.f32 %v5524_v63  ;;  %v5523_v51 = vmul.f32 0.7978846, %v5395_v25  ;;  %v5272_v41 = vmul.f32 0.044715, %v5144_v49  ;;  %v5525_v4 = vmul.f32 0.7978846, %v5397_v50  ;;  %v4865_v63 = vpop.f32.mrf.mxu0 }
 0x857   : > { %8644 = vtanh.f32 %v5526_v5  ;;  %v5146_v59 = vmul.f32 %v5018_v18, %v11518_v1  ;;  %v5017_v62 = vmul.f32 %v11526_v23, %v11526_v23  ;;  %v5019_v48 = vmul.f32 %v11529_v40, %v11529_v40 }
 0x858   : > { %v5020_v33 = vmul.f32 %v11532_v45, %v11532_v45  ;;  %v5527_v61 = vmul.f32 0.7978846, %v5399_v35  ;;  %v5400_v47 = vadd.f32 %v5272_v41, %v11510_v21  ;;  %v11543_v5 = vadd.f32 %v4863_v52, %v11452_v28 }
 0x859   : > { %v5274_v25 = vmul.f32 0.044715, %v5146_v59  ;;  %v5145_v49 = vmul.f32 %v5017_v62, %v11526_v23  ;;  %v5147_v50 = vmul.f32 %v5019_v48, %v11529_v40  ;;  %v11549_v8 = vadd.f32 %v4672_v9, %v11454_v16 }
 0x85a   : > { %v5148_v18 = vmul.f32 %v5020_v33, %v11532_v45  ;;  %v5528_v42 = vmul.f32 0.7978846, %v5400_v47  ;;  %v5022_v35 = vmul.f32 %v11543_v5, %v11543_v5  ;;  %v11555_v41 = vadd.f32 %v4865_v63, %v11456_v20 }
 0x85b   : > { %v5402_v32 = vadd.f32 %v5274_v25, %v11518_v1  ;;  %v5273_v52 = vmul.f32 0.044715, %v5145_v49  ;;  %v5275_v59 = vmul.f32 0.044715, %v5147_v50  ;;  %v5021_v62 = vmul.f32 %v11549_v8, %v11549_v8  ;;  %v4676_v47 = vpop.f32.mrf.mxu1 }
 0x85c   : > { %v5276_v55 = vmul.f32 0.044715, %v5148_v18  ;;  %8646 = vtanh.f32 %v5528_v42  ;;  %v5150_v9 = vmul.f32 %v5022_v35, %v11543_v5  ;;  %v5023_v33 = vmul.f32 %v11555_v41, %v11555_v41  ;;  %v4869_v18 = vpop.f32.mrf.mxu0 }
 0x85d   : > { %v5530_v48 = vmul.f32 0.7978846, %v5402_v32  ;;  %v5401_v22 = vadd.f32 %v5273_v52, %v11526_v23  ;;  %v5403_v63 = vadd.f32 %v5275_v59, %v11529_v40  ;;  %v5149_v50 = vmul.f32 %v5021_v62, %v11549_v8 }
 0x85e   : > { %v8637_v25 = vpop.eup %8636  ;;  %v5404_v49 = vadd.f32 %v5276_v55, %v11532_v45  ;;  %v5278_v32 = vmul.f32 0.044715, %v5150_v9  ;;  %v5151_v42 = vmul.f32 %v5023_v33, %v11555_v41  ;;  %v11568_v7 = vadd.f32 %v4676_v47, %v11450_v12  ;;  %v4678_v9 = vpop.f32.mrf.mxu1 }
 0x85f   : > { %v8639_v0 = vpop.eup %8638  ;;  %v5776_v2 = vadd.f32 1.0, %v8637_v25  ;;  %8648 = vtanh.f32 %v5530_v48  ;;  %v5529_v10 = vmul.f32 0.7978846, %v5401_v22  ;;  %v5277_v62 = vmul.f32 0.044715, %v5149_v50 }
 0x860   : > { %v5778_v35 = vadd.f32 1.0, %v8639_v0  ;;  %8650 = vtanh.f32 %v5523_v51  ;;  %v11570_v52 = vpop.eup %8640  ;;  %v5532_v59 = vmul.f32 0.7978846, %v5404_v49  ;;  %v5406_v55 = vadd.f32 %v5278_v32, %v11543_v5  ;;  %v4871_v0 = vpop.f32.mrf.mxu0 }
 0x861   : > { %8652 = vtanh.f32 %v5525_v4  ;;  %v5904_v11 = vmul.f32 0.5, %v5776_v2  ;;  %v5279_v25 = vmul.f32 0.044715, %v5151_v42  ;;  %v5024_v48 = vmul.f32 %v11568_v7, %v11568_v7 }
 0x862   : > { %8654 = vtanh.f32 %v5527_v61  ;;  %v5531_v22 = vmul.f32 0.7978846, %v5403_v63  ;;  %v5534_v33 = vmul.f32 0.7978846, %v5406_v55  ;;  %v5405_v47 = vadd.f32 %v5277_v62, %v11549_v8  ;;  %v4873_v55 = vpop.f32.mrf.mxu0 }
 0x863   : > { %v8643_v51 = vpop.eup %8642  ;;  %8656 = vtanh.f32 %v5529_v10  ;;  %v5906_v4 = vmul.f32 0.5, %v5778_v35  ;;  %v5407_v50 = vadd.f32 %v5279_v25, %v11555_v41  ;;  %v5152_v32 = vmul.f32 %v5024_v48, %v11568_v7  ;;  %v4680_v35 = vpop.f32.mrf.mxu1 }
 0x864   : > { %v8645_v58 = vpop.eup %8644  ;;  %v5780_v49 = vadd.f32 1.0, %v8643_v51  ;;  %8658 = vtanh.f32 %v5532_v59  ;;  %v5533_v61 = vmul.f32 0.7978846, %v5405_v47  ;;  %v11579_v42 = vmul.f32 %v5904_v11, %v11459_v29 }
 0x865   : > { %v5782_v2 = vadd.f32 1.0, %v8645_v58  ;;  %8660 = vtanh.f32 %v5534_v33  ;;  %v11582_v10 = vadd.f32 %v4869_v18, %v11452_v28  ;;  %v11585_v63 = vadd.f32 %v4678_v9, %v11454_v16 }
 0x866   : > { %v5908_v46 = vmul.f32 0.5, %v5780_v49  ;;  %8662 = vtanh.f32 %v5531_v22  ;;  %v5535_v59 = vmul.f32 0.7978846, %v5407_v50  ;;  %v5280_v62 = vmul.f32 0.044715, %v5152_v32  ;;  %v4875_v49 = vpop.f32.mrf.mxu0 }
 0x867   : > { %v11588_v58 = vadd.f32 %v4871_v0, %v11456_v20  ;;  %v11591_v25 = vmul.f32 %v5906_v4, %v11462_v13  ;;  %v5910_v11 = vmul.f32 0.5, %v5782_v2  ;;  %v5026_v29 = vmul.f32 %v11582_v10, %v11582_v10  ;;  %v4682_v4 = vpop.f32.mrf.mxu1 }
 0x868   : > { %v5025_v18 = vmul.f32 %v11585_v63, %v11585_v63  ;;  %8664 = vtanh.f32 %v5533_v61  ;;  %v5408_v48 = vadd.f32 %v5280_v62, %v11568_v7  ;;  %v11601_v51 = vadd.f32 %v4680_v35, %v11450_v12  ;;  %v4879_v38 = vpop.f32.mrf.mxu0 }
 0x869   : > { %v5027_v9 = vmul.f32 %v11588_v58, %v11588_v58  ;;  %v8647_v0 = vpop.eup %8646  ;;  %v11604_v13 = vmul.f32 %v5908_v46, %v11481_v57  ;;  %v5154_v22 = vmul.f32 %v5026_v29, %v11582_v10  ;;  %v11609_v47 = vadd.f32 %v4873_v55, %v11452_v28  ;;  %v4686_v6 = vpop.f32.mrf.mxu1 }
 0x86a   : > { %v5153_v33 = vmul.f32 %v5025_v18, %v11585_v63  ;;  %v5784_v50 = vadd.f32 1.0, %v8647_v0  ;;  %8666 = vtanh.f32 %v5535_v59  ;;  %v5536_v2 = vmul.f32 0.7978846, %v5408_v48 }
 0x86b   : > { %v5155_v61 = vmul.f32 %v5027_v9, %v11588_v58  ;;  %v5282_v35 = vmul.f32 0.044715, %v5154_v22  ;;  %v5028_v46 = vmul.f32 %v11601_v51, %v11601_v51  ;;  %v5030_v57 = vmul.f32 %v11609_v47, %v11609_v47 }
 0x86c   : > { %v8649_v32 = vpop.eup %8648  ;;  %v5281_v62 = vmul.f32 0.044715, %v5153_v33  ;;  %v11619_v55 = vmul.f32 %v5910_v11, %v11484_v34  ;;  %8668 = vtanh.f32 %v5536_v2  ;;  %v5912_v11 = vmul.f32 0.5, %v5784_v50 }
 0x86d   : > { %v11616_v29 = vpop.eup %8650  ;;  %v5786_v18 = vadd.f32 1.0, %v8649_v32  ;;  %v5283_v59 = vmul.f32 0.044715, %v5155_v61  ;;  %v5410_v9 = vadd.f32 %v5282_v35, %v11582_v10  ;;  %v5156_v22 = vmul.f32 %v5028_v46, %v11601_v51 }
 0x86e   : > { %v11621_v48 = vpop.eup %8652  ;;  %v5409_v0 = vadd.f32 %v5281_v62, %v11585_v63  ;;  %v5158_v33 = vmul.f32 %v5030_v57, %v11609_v47  ;;  %v11632_v61 = vadd.f32 %v4682_v4, %v11454_v16  ;;  %v11638_v57 = vadd.f32 %v4875_v49, %v11456_v20  ;;  %v4881_v49 = vpop.f32.mrf.mxu0 }
 0x86f   : > { %v11627_v53 = vpop.eup %8654  ;;  %v5914_v2 = vmul.f32 0.5, %v5786_v18  ;;  %v5538_v35 = vmul.f32 0.7978846, %v5410_v9  ;;  %v5411_v62 = vadd.f32 %v5283_v59, %v11588_v58  ;;  %v5284_v46 = vmul.f32 0.044715, %v5156_v22  ;;  %v4688_v22 = vpop.f32.mrf.mxu1 }
 0x870   : > { %v11634_v32 = vpop.eup %8656  ;;  %13645 = vst [vmem:[#allocation57_spill] sm:$0xff] %v11638_v57  ;;  %v5537_v31 = vmul.f32 0.7978846, %v5409_v0  ;;  %v5286_v34 = vmul.f32 0.044715, %v5158_v33  ;;  %v5029_v50 = vmul.f32 %v11632_v61, %v11632_v61  ;;  %v5031_v59 = vmul.f32 %v11638_v57, %v11638_v57 }
 0x871   : > { %v8659_v54 = vpop.eup %8658  ;;  %8670 = vtanh.f32 %v5538_v35  ;;  %v5412_v9 = vadd.f32 %v5284_v46, %v11601_v51  ;;  %v11648_v3 = vmul.f32 %v5912_v11, %v11510_v21  ;;  %v5539_v35 = vmul.f32 0.7978846, %v5411_v62 }
 0x872   : > { %v8661_v4 = vpop.eup %8660  ;;  %v5788_v18 = vadd.f32 1.0, %v8659_v54  ;;  %v5414_v0 = vadd.f32 %v5286_v34, %v11609_v47  ;;  %v5157_v33 = vmul.f32 %v5029_v50, %v11632_v61  ;;  %v11655_v54 = vmul.f32 %v5914_v2, %v11518_v1  ;;  %v4690_v1 = vpop.f32.mrf.mxu1 }
 0x873   : > { %v5790_v24 = vadd.f32 1.0, %v8661_v4  ;;  %v11652_v27 = vpop.eup %8662  ;;  %v5540_v46 = vmul.f32 0.7978846, %v5412_v9  ;;  %v5159_v56 = vmul.f32 %v5031_v59, %v11638_v57  ;;  %8672 = vtanh.f32 %v5537_v31  ;;  %v4883_v2 = vpop.f32.mrf.mxu0 }
 0x874   : > { %v5542_v36 = vmul.f32 0.7978846, %v5414_v0  ;;  %v5285_v14 = vmul.f32 0.044715, %v5157_v33  ;;  %v11659_v21 = vadd.f32 %v4686_v6, %v11450_v12  ;;  %v5916_v34 = vmul.f32 0.5, %v5788_v18 }
 0x875   : > { %v11661_v11 = vpop.eup %8664  ;;  %8674 = vtanh.f32 %v5540_v46  ;;  %v5287_v50 = vmul.f32 0.044715, %v5159_v56  ;;  %v11664_v4 = vadd.f32 %v4879_v38, %v11452_v28  ;;  %v5918_v62 = vmul.f32 0.5, %v5790_v24 }
 0x876   : > { %8676 = vtanh.f32 %v5542_v36  ;;  %v5413_v9 = vadd.f32 %v5285_v14, %v11632_v61  ;;  %v5032_v31 = vmul.f32 %v11659_v21, %v11659_v21  ;;  %v11675_v56 = vadd.f32 %v4688_v22, %v11454_v16 }
 0x877   : > { %v11669_v59 = vpop.eup %8666  ;;  %v5415_v6 = vadd.f32 %v5287_v50, %v11638_v57  ;;  %v5034_v18 = vmul.f32 %v11664_v4, %v11664_v4  ;;  %v11678_v38 = vadd.f32 %v4881_v49, %v11456_v20  ;;  %8678 = vtanh.f32 %v5539_v35  ;;  %v4885_v57 = vpop.f32.mrf.mxu0 }
 0x878   : > { %13646 = vst [vmem:[#allocation46_spill] sm:$0xff] %v11675_v56  ;;  %v5160_v36 = vmul.f32 %v5032_v31, %v11659_v21  ;;  %v11682_v14 = vadd.f32 %v4690_v1, %v11450_v12  ;;  %v11685_v24 = vadd.f32 %v4883_v2, %v11452_v28  ;;  %v11688_v33 = vmul.f32 %v5916_v34, %v11532_v45  ;;  %v4692_v31 = vpop.f32.mrf.mxu1 }
 0x879   : > { %13647 = vst [vmem:[#allocation39_spill] sm:$0xff] %v11678_v38  ;;  %v8669_v0 = vpop.eup %8668  ;;  %v5162_v46 = vmul.f32 %v5034_v18, %v11664_v4  ;;  %v5033_v22 = vmul.f32 %v11675_v56, %v11675_v56  ;;  %v5035_v49 = vmul.f32 %v11678_v38, %v11678_v38  ;;  %v11696_v35 = vmul.f32 %v5918_v62, %v11543_v5 }
 0x87a   : > { %v5541_v50 = vmul.f32 0.7978846, %v5413_v9  ;;  %v5288_v1 = vmul.f32 0.044715, %v5160_v36  ;;  %v5036_v2 = vmul.f32 %v11682_v14, %v11682_v14  ;;  %v5543_v43 = vmul.f32 0.7978846, %v5415_v6 }
 0x87b   : > { %v5290_v45 = vmul.f32 0.044715, %v5162_v46  ;;  %v5161_v34 = vmul.f32 %v5033_v22, %v11675_v56  ;;  %v5163_v18 = vmul.f32 %v5035_v49, %v11678_v38  ;;  %v5792_v44 = vadd.f32 1.0, %v8669_v0 }
 0x87c   : > { %v5416_v19 = vadd.f32 %v5288_v1, %v11659_v21  ;;  %v5164_v30 = vmul.f32 %v5036_v2, %v11682_v14  ;;  %v5038_v5 = vmul.f32 %v11685_v24, %v11685_v24  ;;  %v11708_v17 = vadd.f32 %v4692_v31, %v11454_v16 }
 0x87d   : > { %v5418_v62 = vadd.f32 %v5290_v45, %v11664_v4  ;;  %v5289_v9 = vmul.f32 0.044715, %v5161_v34  ;;  %v5291_v36 = vmul.f32 0.044715, %v5163_v18  ;;  %8680 = vtanh.f32 %v5541_v50  ;;  %v4696_v18 = vpop.f32.mrf.mxu1 }
 0x87e   : > { %13648 = vst [vmem:[#allocation26_spill] sm:$0xff] %v11708_v17  ;;  %v8671_v6 = vpop.eup %8670  ;;  %v5544_v46 = vmul.f32 0.7978846, %v5416_v19  ;;  %v5292_v22 = vmul.f32 0.044715, %v5164_v30  ;;  %v5166_v0 = vmul.f32 %v5038_v5, %v11685_v24  ;;  %v5037_v31 = vmul.f32 %v11708_v17, %v11708_v17 }
 0x87f   : > { %v5794_v49 = vadd.f32 1.0, %v8671_v6  ;;  %v5546_v1 = vmul.f32 0.7978846, %v5418_v62  ;;  %v5417_v2 = vadd.f32 %v5289_v9, %v11675_v56  ;;  %v5419_v26 = vadd.f32 %v5291_v36, %v11678_v38 }
 0x880   : > { %8682 = vtanh.f32 %v5544_v46  ;;  %v5420_v45 = vadd.f32 %v5292_v22, %v11682_v14  ;;  %v5294_v34 = vmul.f32 0.044715, %v5166_v0  ;;  %v11716_v50 = vpop.eup %8672  ;;  %v5920_v30 = vmul.f32 0.5, %v5792_v44  ;;  %v4889_v44 = vpop.f32.mrf.mxu0 }
 0x881   : > { %v5922_v19 = vmul.f32 0.5, %v5794_v49  ;;  %8684 = vtanh.f32 %v5546_v1  ;;  %v5545_v5 = vmul.f32 0.7978846, %v5417_v2  ;;  %v5165_v36 = vmul.f32 %v5037_v31, %v11708_v17 }
 0x882   : > { %v8675_v62 = vpop.eup %8674  ;;  %v5548_v6 = vmul.f32 0.7978846, %v5420_v45  ;;  %v5422_v9 = vadd.f32 %v5294_v34, %v11685_v24  ;;  %v11721_v46 = vadd.f32 %v4885_v57, %v11456_v20  ;;  %8686 = vtanh.f32 %v5543_v43 }
 0x883   : > { %v8677_v22 = vpop.eup %8676  ;;  %v5796_v0 = vadd.f32 1.0, %v8675_v62  ;;  %v5547_v38 = vmul.f32 0.7978846, %v5419_v26  ;;  %v11724_v56 = vadd.f32 %v4696_v18, %v11450_v12  ;;  %8688 = vtanh.f32 %v5545_v5 }
 0x884   : > { %v5798_v49 = vadd.f32 1.0, %v8677_v22  ;;  %v5550_v1 = vmul.f32 0.7978846, %v5422_v9  ;;  %v5293_v2 = vmul.f32 0.044715, %v5165_v36  ;;  %v11726_v45 = vpop.eup %8678  ;;  %v11729_v34 = vmul.f32 %v5920_v30, %v11568_v7 }
 0x885   : > { %8690 = vtanh.f32 %v5548_v6  ;;  %v5039_v57 = vmul.f32 %v11721_v46, %v11721_v46  ;;  %v5040_v26 = vmul.f32 %v11724_v56, %v11724_v56  ;;  %v11736_v43 = vmul.f32 %v5922_v19, %v11582_v10  ;;  %v4698_v6 = vpop.f32.mrf.mxu1 }
 0x886   : > { %v5924_v31 = vmul.f32 0.5, %v5796_v0  ;;  %8692 = vtanh.f32 %v5550_v1  ;;  %v11739_v18 = vadd.f32 %v4889_v44, %v11452_v28  ;;  %v5421_v5 = vadd.f32 %v5293_v2, %v11708_v17 }
 0x887   : > { %13649 = vst [vmem:[#allocation20_spill] sm:$0xff] %v11736_v43  ;;  %v5167_v7 = vmul.f32 %v5039_v57, %v11721_v46  ;;  %v5168_v30 = vmul.f32 %v5040_v26, %v11724_v56  ;;  %v5777_v62 = vadd.f32 1.0, %v11570_v52  ;;  %v5926_v9 = vmul.f32 0.5, %v5798_v49  ;;  %v4891_v49 = vpop.f32.mrf.mxu0 }
 0x888   : > { %8694 = vtanh.f32 %v5547_v38  ;;  %v5042_v10 = vmul.f32 %v11739_v18, %v11739_v18  ;;  %v5781_v19 = vadd.f32 1.0, %v11621_v48  ;;  %v5779_v44 = vadd.f32 1.0, %v11616_v29 }
 0x889   : > { %v5295_v36 = vmul.f32 0.044715, %v5167_v7  ;;  %v5296_v22 = vmul.f32 0.044715, %v5168_v30  ;;  %v5905_v0 = vmul.f32 0.5, %v5777_v62  ;;  %v11750_v1 = vmul.f32 %v5924_v31, %v11601_v51  ;;  %v4700_v30 = vpop.f32.mrf.mxu1 }
 0x88a   : > { %v5170_v2 = vmul.f32 %v5042_v10, %v11739_v18  ;;  %v5909_v57 = vmul.f32 0.5, %v5781_v19  ;;  %v5783_v52 = vadd.f32 1.0, %v11627_v53  ;;  %v11754_v38 = vpop.eup %8680  ;;  %v5549_v26 = vmul.f32 0.7978846, %v5421_v5 }
 0x88b   : > { %v5424_v17 = vadd.f32 %v5296_v22, %v11724_v56  ;;  %v6033_v48 = vmul.f32 %v5905_v0, %v11469_v15  ;;  %v5907_v7 = vmul.f32 0.5, %v5779_v44  ;;  %v11760_v31 = vadd.f32 %v4698_v6, %v11454_v16 }
 0x88c   : > { %v5298_v62 = vmul.f32 0.044715, %v5170_v2  ;;  %v6037_v29 = vmul.f32 %v5909_v57, %v11493_v37  ;;  %v5911_v51 = vmul.f32 0.5, %v5783_v52  ;;  %v5423_v53 = vadd.f32 %v5295_v36, %v11721_v46  ;;  %v4893_v2 = vpop.f32.mrf.mxu0 }
 0x88d   : > { %v8683_v10 = vpop.eup %8682  ;;  %v5552_v19 = vmul.f32 0.7978846, %v5424_v17  ;;  %v6035_v43 = vmul.f32 %v5907_v7, %v11472_v60  ;;  %v11765_v5 = vadd.f32 %v4891_v49, %v11456_v20  ;;  %8696 = vtanh.f32 %v5549_v26  ;;  %v4702_v60 = vpop.f32.mrf.mxu1 }
 0x88e   : > { %v8685_v22 = vpop.eup %8684  ;;  %v5800_v15 = vadd.f32 1.0, %v8683_v10  ;;  %v5426_v0 = vadd.f32 %v5298_v62, %v11739_v18  ;;  %v6161_v44 = vpack.c.bf16 %v6037_v29, %v6033_v48  ;;  %v6039_v37 = vmul.f32 %v5911_v51, %v11496_v39 }
 0x88f   : > { %13650 = vst [vmem:[#allocation29_spill] sm:$0xff] %v11765_v5  ;;  %v5802_v57 = vadd.f32 1.0, %v8685_v22  ;;  %v5041_v6 = vmul.f32 %v11760_v31, %v11760_v31  ;;  %v5043_v17 = vmul.f32 %v11765_v5, %v11765_v5  ;;  %v11773_v36 = vpop.eup %8686  ;;  %v11776_v52 = vmul.f32 %v5926_v9, %v11609_v47 }
 0x890   : > { %8698 = vtanh.f32 %v5552_v19  ;;  %v5554_v49 = vmul.f32 0.7978846, %v5426_v0  ;;  %6519 = vmatprep.mubr.bf16.mxu1 %v6161_v44  ;;  %v6163_v48 = vpack.c.bf16 %v6039_v37, %v6035_v43  ;;  %v11778_v39 = vpop.eup %8688  ;;  %v5551_v7 = vmul.f32 0.7978846, %v5423_v53  ;;  %v4895_v53 = vpop.f32.mrf.mxu0 }
 0x891   : > { %v5169_v26 = vmul.f32 %v5041_v6, %v11760_v31  ;;  %v5171_v62 = vmul.f32 %v5043_v17, %v11765_v5  ;;  %v13651_v29 = vpack.c.bf16 %v11604_v13, %v11579_v42  ;;  %v11786_v51 = vadd.f32 %v4700_v30, %v11450_v12 }
 0x892   : > { %v8691_v47 = vpop.eup %8690  ;;  %v5928_v9 = vmul.f32 0.5, %v5800_v15  ;;  %8700 = vtanh.f32 %v5554_v49  ;;  %6680 = vmatprep.mubr.bf16.mxu0 %v6163_v48  ;;  %v11789_v43 = vadd.f32 %v4893_v2, %v11452_v28  ;;  %v11792_v10 = vadd.f32 %v4702_v60, %v11454_v16 }
 0x893   : > { %6520 = vmatmul.mubr.bf16.vlgmr.msra.gmra.mxu1 %v13651_v29  ;;  %v8693_v19 = vpop.eup %8692  ;;  %v5930_v22 = vmul.f32 0.5, %v5802_v57  ;;  %v5804_v0 = vadd.f32 1.0, %v8691_v47  ;;  %v5297_v44 = vmul.f32 0.044715, %v5169_v26  ;;  %v5299_v42 = vmul.f32 0.044715, %v5171_v62  ;;  %v4706_v26 = vpop.f32.mrf.mxu1 }
 0x894   : > { %13652 = vst [vmem:[#allocation23_spill] sm:$0xff] %v11792_v10  ;;  %v13653_v13 = vpack.c.bf16 %v11619_v55, %v11591_v25  ;;  %v5806_v30 = vadd.f32 1.0, %v8693_v19  ;;  %v5044_v15 = vmul.f32 %v11786_v51, %v11786_v51  ;;  %v5046_v37 = vmul.f32 %v11789_v43, %v11789_v43  ;;  %v4899_v62 = vpop.f32.mrf.mxu0 }
 0x895   : > { %v5045_v2 = vmul.f32 %v11792_v10, %v11792_v10  ;;  %v11803_v6 = vpop.eup %8694  ;;  %v5932_v57 = vmul.f32 0.5, %v5804_v0  ;;  %8702 = vtanh.f32 %v5551_v7  ;;  %v5425_v17 = vadd.f32 %v5297_v44, %v11760_v31 }
 0x896   : > { %6681 = vmatmul.mubr.bf16.vlgmr.msra.gmra.mxu0 %v13653_v13  ;;  %v11807_v60 = vadd.f32 %v4895_v53, %v11456_v20  ;;  %v5427_v25 = vadd.f32 %v5299_v42, %v11765_v5  ;;  %v5172_v55 = vmul.f32 %v5044_v15, %v11786_v51  ;;  %v5174_v49 = vmul.f32 %v5046_v37, %v11789_v43 }
 0x897   : > { %v5173_v48 = vmul.f32 %v5045_v2, %v11792_v10  ;;  %v11814_v29 = vmul.f32 %v5928_v9, %v11659_v21  ;;  %v5934_v47 = vmul.f32 0.5, %v5806_v30  ;;  %v5553_v7 = vmul.f32 0.7978846, %v5425_v17 }
 0x898   : > { %13654 = vst [vmem:[#allocation28_spill] sm:$0xff] %v11807_v60  ;;  %v5047_v19 = vmul.f32 %v11807_v60, %v11807_v60  ;;  %v11819_v53 = vmul.f32 %v5930_v22, %v11664_v4  ;;  %v5300_v0 = vmul.f32 0.044715, %v5172_v55  ;;  %v5302_v44 = vmul.f32 0.044715, %v5174_v49  ;;  %v4708_v55 = vpop.f32.mrf.mxu1 }
 0x899   : > { %v5301_v42 = vmul.f32 0.044715, %v5173_v48  ;;  %v11822_v13 = vmul.f32 %v5932_v57, %v11682_v14  ;;  %v11826_v37 = vadd.f32 %v4706_v26, %v11450_v12  ;;  %v11829_v21 = vadd.f32 %v4899_v62, %v11452_v28 }
 0x89a   : > { %v5175_v15 = vmul.f32 %v5047_v19, %v11807_v60  ;;  %v5555_v9 = vmul.f32 0.7978846, %v5427_v25  ;;  %v5428_v30 = vadd.f32 %v5300_v0, %v11786_v51  ;;  %v5430_v4 = vadd.f32 %v5302_v44, %v11789_v43  ;;  %v11839_v49 = vpop.eup %8696 }
 0x89b   : > { %v5429_v22 = vadd.f32 %v5301_v42, %v11792_v10  ;;  %v5048_v14 = vmul.f32 %v11826_v37, %v11826_v37  ;;  %v5050_v57 = vmul.f32 %v11829_v21, %v11829_v21  ;;  %v5785_v17 = vadd.f32 1.0, %v11634_v32 }
 0x89c   : > { %v5303_v2 = vmul.f32 0.044715, %v5175_v15  ;;  %8704 = vtanh.f32 %v5553_v7  ;;  %v5556_v25 = vmul.f32 0.7978846, %v5428_v30  ;;  %v5558_v48 = vmul.f32 0.7978846, %v5430_v4  ;;  %v4901_v15 = vpop.f32.mrf.mxu0 }
 0x89d   : > { %v5557_v26 = vmul.f32 0.7978846, %v5429_v22  ;;  %v8699_v62 = vpop.eup %8698  ;;  %v5176_v0 = vmul.f32 %v5048_v14, %v11826_v37  ;;  %v5178_v44 = vmul.f32 %v5050_v57, %v11829_v21  ;;  %v5789_v42 = vadd.f32 1.0, %v11661_v11  ;;  %v4710_v11 = vpop.f32.mrf.mxu1 }
 0x89e   : > { %v5431_v19 = vadd.f32 %v5303_v2, %v11807_v60  ;;  %v5808_v5 = vadd.f32 1.0, %v8699_v62  ;;  %8706 = vtanh.f32 %v5556_v25  ;;  %v5913_v32 = vmul.f32 0.5, %v5785_v17  ;;  %v4903_v62 = vpop.f32.mrf.mxu0 }
 0x89f   : > { %v11846_v10 = vadd.f32 %v4708_v55, %v11454_v16  ;;  %v8701_v7 = vpop.eup %8700  ;;  %8708 = vtanh.f32 %v5558_v48  ;;  %v5304_v30 = vmul.f32 0.044715, %v5176_v0  ;;  %v5306_v4 = vmul.f32 0.044715, %v5178_v44 }
 0x8a0   : > { %v5787_v22 = vadd.f32 1.0, %v11652_v27  ;;  %v11850_v2 = vmul.f32 %v5934_v47, %v11685_v24  ;;  %v5810_v14 = vadd.f32 1.0, %v8701_v7  ;;  %8710 = vtanh.f32 %v5555_v9 }
 0x8a1   : > { %v5917_v57 = vmul.f32 0.5, %v5789_v42  ;;  %v11852_v60 = vmul.f32 0.5, %v5808_v5  ;;  %v5559_v25 = vmul.f32 0.7978846, %v5431_v19  ;;  %v5432_v17 = vadd.f32 %v5304_v30, %v11826_v37 }
 0x8a2   : > { %v5434_v55 = vadd.f32 %v5306_v4, %v11829_v21  ;;  %v11856_v48 = vpop.eup %8702  ;;  %8712 = vtanh.f32 %v5557_v26  ;;  %v6041_v27 = vmul.f32 %v5913_v32, %v11526_v23  ;;  %v5791_v47 = vadd.f32 1.0, %v11669_v59  ;;  %v4712_v4 = vpop.f32.mrf.mxu1 }
 0x8a3   : > { %v6045_v24 = vmul.f32 %v5917_v57, %v11549_v8  ;;  %v5560_v9 = vmul.f32 0.7978846, %v5432_v17  ;;  %v5915_v44 = vmul.f32 0.5, %v5787_v22  ;;  %v5049_v5 = vmul.f32 %v11846_v10, %v11846_v10  ;;  %v4905_v26 = vpop.f32.mrf.mxu0 }
 0x8a4   : > { %v5562_v0 = vmul.f32 0.7978846, %v5434_v55  ;;  %v5938_v19 = vmul.f32 0.5, %v5810_v14  ;;  %v5919_v7 = vmul.f32 0.5, %v5791_v47  ;;  %v11864_v30 = vadd.f32 %v4901_v15, %v11456_v20 }
 0x8a5   : > { %v6165_v42 = vpack.c.bf16 %v6045_v24, %v6041_v27  ;;  %8714 = vtanh.f32 %v5560_v9  ;;  %v6043_v23 = vmul.f32 %v5915_v44, %v11529_v40  ;;  %v5177_v8 = vmul.f32 %v5049_v5, %v11846_v10 }
 0x8a6   : > { %v6164_v59 = vpack.c.bf16 %v11688_v33, %v11648_v3  ;;  %8716 = vtanh.f32 %v5562_v0  ;;  %v6047_v32 = vmul.f32 %v5919_v7, %v11555_v41  ;;  %v5051_v22 = vmul.f32 %v11864_v30, %v11864_v30 }
 0x8a7   : > { %6527 = vmatprep.mubr.bf16.mxu1 %v6165_v42  ;;  %v6166_v15 = vpack.c.bf16 %v11696_v35, %v11655_v54  ;;  %v5305_v14 = vmul.f32 0.044715, %v5177_v8  ;;  %v11876_v40 = vadd.f32 %v4710_v11, %v11450_v12  ;;  %v11879_v57 = vadd.f32 %v4903_v62, %v11452_v28 }
 0x8a8   : > { %6528 = vmatmul.mubr.bf16.gmra.mxu1 %v6164_v59  ;;  %v11882_v3 = vadd.f32 %v4712_v4, %v11454_v16  ;;  %v6167_v33 = vpack.c.bf16 %v6047_v32, %v6043_v23  ;;  %v5179_v41 = vmul.f32 %v5051_v22, %v11864_v30  ;;  %v11886_v17 = vadd.f32 %v4905_v26, %v11456_v20 }
 0x8a9   : > { %v5793_v55 = vadd.f32 1.0, %v11716_v50  ;;  %v11889_v54 = vpop.eup %8704  ;;  %v5433_v35 = vadd.f32 %v5305_v14, %v11846_v10  ;;  %v5052_v11 = vmul.f32 %v11876_v40, %v11876_v40  ;;  %v5054_v62 = vmul.f32 %v11879_v57, %v11879_v57 }
 0x8aa   : > { %v5053_v27 = vmul.f32 %v11882_v3, %v11882_v3  ;;  %6688 = vmatprep.mubr.bf16.mxu0 %v6167_v33  ;;  %v5307_v24 = vmul.f32 0.044715, %v5179_v41  ;;  %v5055_v47 = vmul.f32 %v11886_v17, %v11886_v17  ;;  %v5797_v50 = vadd.f32 1.0, %v11754_v38 }
 0x8ab   : > { %v5921_v9 = vmul.f32 0.5, %v5793_v55  ;;  %v8707_v0 = vpop.eup %8706  ;;  %v5561_v44 = vmul.f32 0.7978846, %v5433_v35  ;;  %6689 = vmatmul.mubr.bf16.gmra.mxu0 %v6166_v15  ;;  %v5180_v5 = vmul.f32 %v5052_v11, %v11876_v40  ;;  %v5182_v42 = vmul.f32 %v5054_v62, %v11879_v57 }
 0x8ac   : > { %v5181_v7 = vmul.f32 %v5053_v27, %v11882_v3  ;;  %v8709_v4 = vpop.eup %8708  ;;  %v5812_v23 = vadd.f32 1.0, %v8707_v0  ;;  %v5435_v8 = vadd.f32 %v5307_v24, %v11864_v30  ;;  %v5183_v59 = vmul.f32 %v5055_v47, %v11886_v17 }
 0x8ad   : > { %v5925_v26 = vmul.f32 0.5, %v5797_v50  ;;  %v11906_v32 = vpop.eup %8710  ;;  %v5814_v38 = vadd.f32 1.0, %v8709_v4  ;;  %8718 = vtanh.f32 %v5559_v25  ;;  %v5308_v22 = vmul.f32 0.044715, %v5180_v5 }
 0x8ae   : > { %v5310_v14 = vmul.f32 0.044715, %v5182_v42  ;;  %v11910_v15 = vmul.f32 %v11852_v60, %v11724_v56  ;;  %v11913_v33 = vmul.f32 %v5938_v19, %v11739_v18  ;;  %8720 = vtanh.f32 %v5561_v44  ;;  %v4716_v60 = vpop.f32.mrf.mxu1 }
 0x8af   : > { %v5309_v41 = vmul.f32 0.044715, %v5181_v7  ;;  %v11915_v55 = vpop.eup %8712  ;;  %v5940_v35 = vmul.f32 0.5, %v5812_v23  ;;  %v5436_v11 = vadd.f32 %v5308_v22, %v11876_v40  ;;  %v5311_v27 = vmul.f32 0.044715, %v5183_v59  ;;  %v4909_v23 = vpop.f32.mrf.mxu0 }
 0x8b0   : > { %v5438_v62 = vadd.f32 %v5310_v14, %v11879_v57  ;;  %v5563_v25 = vmul.f32 0.7978846, %v5435_v8  ;;  %v6049_v47 = vmul.f32 %v5921_v9, %v11585_v63  ;;  %v6053_v56 = vmul.f32 %v5925_v26, %v11632_v61  ;;  %v4718_v22 = vpop.f32.mrf.mxu1 }
 0x8b1   : > { %v5437_v24 = vadd.f32 %v5309_v41, %v11882_v3  ;;  %v5942_v18 = vmul.f32 0.5, %v5814_v38  ;;  %v5564_v19 = vmul.f32 0.7978846, %v5436_v11  ;;  %v5439_v0 = vadd.f32 %v5311_v27, %v11886_v17  ;;  %v13656_v11 = vld [vmem:[#allocation20_spill] sm:$0xff] }
 0x8b2   : > { %v5566_v50 = vmul.f32 0.7978846, %v5438_v62  ;;  %v8715_v44 = vpop.eup %8714  ;;  %v6169_v42 = vpack.c.bf16 %v6053_v56, %v6049_v47  ;;  %v5795_v7 = vadd.f32 1.0, %v11726_v45  ;;  %v5799_v4 = vadd.f32 1.0, %v11773_v36 }
 0x8b3   : > { %v5565_v5 = vmul.f32 0.7978846, %v5437_v24  ;;  %v8717_v8 = vpop.eup %8716  ;;  %v11926_v59 = vmul.f32 %v5940_v35, %v11786_v51  ;;  %v5816_v63 = vadd.f32 1.0, %v8715_v44  ;;  %8722 = vtanh.f32 %v5564_v19  ;;  %v4911_v35 = vpop.f32.mrf.mxu0  ;;  %v13657_v19 = vld [vmem:[#allocation46_spill] sm:$0xff] }
 0x8b4   : > { %v6168_v61 = vpack.c.bf16 %v11750_v1, %v11729_v34  ;;  %v5818_v9 = vadd.f32 1.0, %v8717_v8  ;;  %8724 = vtanh.f32 %v5566_v50  ;;  %6535 = vmatprep.mubr.bf16.mxu1 %v6169_v42  ;;  %v5923_v26 = vmul.f32 0.5, %v5795_v7  ;;  %v13655_v34 = vld [vmem:[#allocation57_spill] sm:$0xff]  ;;  %v13658_v7 = vld [vmem:[#allocation26_spill] sm:$0xff] }
 0x8b5   : > { %v5927_v38 = vmul.f32 0.5, %v5799_v4  ;;  %v11931_v45 = vmul.f32 %v5942_v18, %v11789_v43  ;;  %8726 = vtanh.f32 %v5563_v25  ;;  %v5567_v36 = vmul.f32 0.7978846, %v5439_v0 }
 0x8b6   : > { %6536 = vmatmul.mubr.bf16.gmra.mxu1 %v6168_v61  ;;  %v5801_v51 = vadd.f32 1.0, %v11778_v39  ;;  %v11934_v14 = vmul.f32 0.5, %v5816_v63  ;;  %8728 = vtanh.f32 %v5565_v5  ;;  %v6051_v41 = vmul.f32 %v5923_v26, %v11588_v58  ;;  %v4720_v58 = vpop.f32.mrf.mxu1  ;;  %v4913_v5 = vpop.f32.mrf.mxu0 }
 0x8b7   : > { %v6055_v1 = vmul.f32 %v5927_v38, %v13655_v34  ;;  %v6170_v62 = vpack.c.bf16 %v11776_v52, %v13656_v11  ;;  %v5805_v27 = vadd.f32 1.0, %v11839_v49  ;;  %v5803_v25 = vadd.f32 1.0, %v11803_v6 }
 0x8b8   : > { %v5929_v43 = vmul.f32 0.5, %v5801_v51  ;;  %v11942_v24 = vmul.f32 0.5, %v5818_v9  ;;  %v5807_v39 = vadd.f32 1.0, %v11856_v48  ;;  %v11946_v56 = vadd.f32 %v4716_v60, %v11450_v12 }
 0x8b9   : > { %v6171_v47 = vpack.c.bf16 %v6055_v1, %v6051_v41  ;;  %v5933_v18 = vmul.f32 0.5, %v5805_v27  ;;  %v5931_v0 = vmul.f32 0.5, %v5803_v25  ;;  %v11950_v52 = vadd.f32 %v4909_v23, %v11452_v28  ;;  %v13659_v23 = vld [vmem:[#allocation39_spill] sm:$0xff] }
 0x8ba   : > { %v6057_v50 = vmul.f32 %v5929_v43, %v13657_v19  ;;  %v11952_v49 = vpop.eup %8718  ;;  %v5935_v6 = vmul.f32 0.5, %v5807_v39  ;;  %v5056_v44 = vmul.f32 %v11946_v56, %v11946_v56  ;;  %v6172_v48 = vpack.c.bf16 %v11822_v13, %v11814_v29 }
 0x8bb   : > { %6696 = vmatprep.mubr.bf16.mxu0 %v6171_v47  ;;  %v6174_v60 = vpack.c.bf16 %v11850_v2, %v11819_v53  ;;  %v11960_v42 = vpop.eup %8720  ;;  %v6061_v4 = vmul.f32 %v5933_v18, %v13658_v7  ;;  %v6059_v8 = vmul.f32 %v5931_v0, %v13659_v23  ;;  %v5058_v63 = vmul.f32 %v11950_v52, %v11950_v52  ;;  %v4722_v2 = vpop.f32.mrf.mxu1 }
 0x8bc   : > { %6697 = vmatmul.mubr.bf16.gmra.mxu0 %v6170_v62  ;;  %v11967_v61 = vadd.f32 %v4718_v22, %v11454_v16  ;;  %v6063_v9 = vmul.f32 %v5935_v6, %v11721_v46  ;;  %v5184_v29 = vmul.f32 %v5056_v44, %v11946_v56  ;;  %v11972_v53 = vadd.f32 %v4911_v35, %v11456_v20  ;;  %v4915_v6 = vpop.f32.mrf.mxu0 }
 0x8bd   : > { %v11975_v13 = vadd.f32 %v4720_v58, %v11450_v12  ;;  %v6173_v26 = vpack.c.bf16 %v6061_v4, %v6057_v50  ;;  %v5186_v38 = vmul.f32 %v5058_v63, %v11950_v52  ;;  %v11981_v22 = vadd.f32 %v4913_v5, %v11452_v28 }
 0x8be   : > { %v5057_v51 = vmul.f32 %v11967_v61, %v11967_v61  ;;  %v6175_v41 = vpack.c.bf16 %v6063_v9, %v6059_v8  ;;  %v5312_v46 = vmul.f32 0.044715, %v5184_v29  ;;  %v5059_v34 = vmul.f32 %v11972_v53, %v11972_v53 }
 0x8bf   : > { %v5060_v1 = vmul.f32 %v11975_v13, %v11975_v13  ;;  %6543 = vmatprep.mubr.bf16.mxu1 %v6173_v26  ;;  %v5314_v35 = vmul.f32 0.044715, %v5186_v38  ;;  %v5062_v62 = vmul.f32 %v11981_v22, %v11981_v22  ;;  %v11991_v27 = vadd.f32 %v4722_v2, %v11454_v16  ;;  %v4726_v38 = vpop.f32.mrf.mxu1 }
 0x8c0   : > { %v5185_v11 = vmul.f32 %v5057_v51, %v11967_v61  ;;  %v8723_v43 = vpop.eup %8722  ;;  %8730 = vtanh.f32 %v5567_v36  ;;  %6704 = vmatprep.mubr.bf16.mxu0 %v6175_v41  ;;  %v5440_v25 = vadd.f32 %v5312_v46, %v11946_v56  ;;  %6544 = vmatmul.mubr.bf16.gmra.mxu1 %v6172_v48  ;;  %v5187_v47 = vmul.f32 %v5059_v34, %v11972_v53 }
 0x8c1   : > { %v5188_v39 = vmul.f32 %v5060_v1, %v11975_v13  ;;  %v8725_v58 = vpop.eup %8724  ;;  %v5820_v18 = vadd.f32 1.0, %v8723_v43  ;;  %v5442_v19 = vadd.f32 %v5314_v35, %v11950_v52  ;;  %v5190_v0 = vmul.f32 %v5062_v62, %v11981_v22 }
 0x8c2   : > { %v5313_v50 = vmul.f32 0.044715, %v5185_v11  ;;  %v11998_v44 = vpop.eup %8726  ;;  %v5822_v5 = vadd.f32 1.0, %v8725_v58  ;;  %v5568_v36 = vmul.f32 0.7978846, %v5440_v25  ;;  %v5061_v48 = vmul.f32 %v11991_v27, %v11991_v27 }
 0x8c3   : > { %v5315_v7 = vmul.f32 0.044715, %v5187_v47  ;;  %v12002_v4 = vpop.eup %8728  ;;  %v12006_v23 = vmul.f32 %v11934_v14, %v11826_v37  ;;  %v5570_v8 = vmul.f32 0.7978846, %v5442_v19  ;;  %v5316_v9 = vmul.f32 0.044715, %v5188_v39  ;;  %v4919_v37 = vpop.f32.mrf.mxu0 }
 0x8c4   : > { %6705 = vmatmul.mubr.bf16.gmra.mxu0 %v6174_v60  ;;  %v5441_v63 = vadd.f32 %v5313_v50, %v11967_v61  ;;  %v12011_v29 = vmul.f32 %v11942_v24, %v11829_v21  ;;  %8732 = vtanh.f32 %v5568_v36  ;;  %v5318_v26 = vmul.f32 0.044715, %v5190_v0  ;;  %v4728_v50 = vpop.f32.mrf.mxu1 }
 0x8c5   : > { %v5443_v2 = vadd.f32 %v5315_v7, %v11972_v53  ;;  %8734 = vtanh.f32 %v5570_v8  ;;  %v5444_v41 = vadd.f32 %v5316_v9, %v11975_v13  ;;  %v5809_v14 = vadd.f32 1.0, %v11889_v54 }
 0x8c6   : > { %v5569_v51 = vmul.f32 0.7978846, %v5441_v63  ;;  %v5948_v60 = vmul.f32 0.5, %v5820_v18  ;;  %v12016_v46 = vmul.f32 0.5, %v5822_v5  ;;  %v5446_v34 = vadd.f32 %v5318_v26, %v11981_v22  ;;  %v13660_v26 = vld [vmem:[#allocation23_spill] sm:$0xff] }
 0x8c7   : > { %v5189_v21 = vmul.f32 %v5061_v48, %v11991_v27  ;;  %v5571_v24 = vmul.f32 0.7978846, %v5443_v2  ;;  %v5572_v1 = vmul.f32 0.7978846, %v5444_v41  ;;  %v12021_v35 = vadd.f32 %v4915_v6, %v11456_v20  ;;  %v4921_v41 = vpop.f32.mrf.mxu0 }
 0x8c8   : > { %v12024_v11 = vadd.f32 %v4726_v38, %v11450_v12  ;;  %8736 = vtanh.f32 %v5569_v51  ;;  %v5574_v62 = vmul.f32 0.7978846, %v5446_v34  ;;  %v12027_v54 = vadd.f32 %v4919_v37, %v11452_v28  ;;  %v4730_v34 = vpop.f32.mrf.mxu1 }
 0x8c9   : > { %v5317_v43 = vmul.f32 0.044715, %v5189_v21  ;;  %8738 = vtanh.f32 %v5572_v1  ;;  %v5063_v25 = vmul.f32 %v12021_v35, %v12021_v35  ;;  %v5813_v39 = vadd.f32 1.0, %v11915_v55 }
 0x8ca   : > { %v5064_v47 = vmul.f32 %v12024_v11, %v12024_v11  ;;  %8740 = vtanh.f32 %v5574_v62  ;;  %v5066_v18 = vmul.f32 %v12027_v54, %v12027_v54  ;;  %v5937_v19 = vmul.f32 0.5, %v5809_v14  ;;  %v13661_v62 = vld [vmem:[#allocation29_spill] sm:$0xff] }
 0x8cb   : > { %v5445_v58 = vadd.f32 %v5317_v43, %v11991_v27  ;;  %v5191_v0 = vmul.f32 %v5063_v25, %v12021_v35  ;;  %v5941_v5 = vmul.f32 0.5, %v5813_v39  ;;  %v5811_v36 = vadd.f32 1.0, %v11906_v32  ;;  %v13662_v25 = vld [vmem:[#allocation28_spill] sm:$0xff] }
 0x8cc   : > { %v5192_v6 = vmul.f32 %v5064_v47, %v12024_v11  ;;  %v5194_v48 = vmul.f32 %v5066_v18, %v12027_v54  ;;  %v6065_v55 = vmul.f32 %v5937_v19, %v11760_v31  ;;  %v5815_v8 = vadd.f32 1.0, %v11952_v49 }
 0x8cd   : > { %v5573_v7 = vmul.f32 0.7978846, %v5445_v58  ;;  %v12043_v63 = vpop.eup %8730  ;;  %v5319_v9 = vmul.f32 0.044715, %v5191_v0  ;;  %v6069_v38 = vmul.f32 %v5941_v5, %v13660_v26  ;;  %v5939_v51 = vmul.f32 0.5, %v5811_v36 }
 0x8ce   : > { %v5320_v2 = vmul.f32 0.044715, %v5192_v6  ;;  %v12047_v37 = vmul.f32 %v5948_v60, %v11876_v40  ;;  %8742 = vtanh.f32 %v5571_v24  ;;  %v5322_v32 = vmul.f32 0.044715, %v5194_v48 }
 0x8cf   : > { %v5943_v14 = vmul.f32 0.5, %v5815_v8  ;;  %8744 = vtanh.f32 %v5573_v7  ;;  %v6177_v21 = vpack.c.bf16 %v6069_v38, %v6065_v55  ;;  %v6176_v49 = vpack.c.bf16 %v11926_v59, %v11910_v15  ;;  %v4923_v15 = vpop.f32.mrf.mxu0  ;;  %v4732_v55 = vpop.f32.mrf.mxu1 }
 0x8d0   : > { %v5448_v31 = vadd.f32 %v5320_v2, %v12024_v11  ;;  %v5450_v1 = vadd.f32 %v5322_v32, %v12027_v54  ;;  %v6067_v43 = vmul.f32 %v5939_v51, %v13661_v62  ;;  %v12056_v40 = vadd.f32 %v4728_v50, %v11454_v16 }
 0x8d1   : > { %v6071_v47 = vmul.f32 %v5943_v14, %v13662_v25  ;;  %v8733_v60 = vpop.eup %8732  ;;  %v5447_v24 = vadd.f32 %v5319_v9, %v12021_v35  ;;  %6551 = vmatprep.mubr.bf16.mxu1 %v6177_v21  ;;  %v12060_v58 = vadd.f32 %v4921_v41, %v11456_v20  ;;  %v12063_v18 = vadd.f32 %v4730_v34, %v11450_v12  ;;  %v4925_v14 = vpop.f32.mrf.mxu0 }
 0x8d2   : > { %v5576_v39 = vmul.f32 0.7978846, %v5448_v31  ;;  %v8735_v59 = vpop.eup %8734  ;;  %v5824_v19 = vadd.f32 1.0, %v8733_v60  ;;  %v5578_v0 = vmul.f32 0.7978846, %v5450_v1  ;;  %6552 = vmatmul.mubr.bf16.gmra.mxu1 %v6176_v49  ;;  %v5065_v50 = vmul.f32 %v12056_v40, %v12056_v40  ;;  %v4736_v60 = vpop.f32.mrf.mxu1 }
 0x8d3   : > { %v6179_v6 = vpack.c.bf16 %v6071_v47, %v6067_v43  ;;  %v5826_v5 = vadd.f32 1.0, %v8735_v59  ;;  %v6178_v36 = vpack.c.bf16 %v11931_v45, %v11913_v33  ;;  %v5067_v7 = vmul.f32 %v12060_v58, %v12060_v58 }
 0x8d4   : > { %v5068_v48 = vmul.f32 %v12063_v18, %v12063_v18  ;;  %v12075_v8 = vmul.f32 %v12016_v46, %v11879_v57  ;;  %8746 = vtanh.f32 %v5576_v39  ;;  %v5193_v9 = vmul.f32 %v5065_v50, %v12056_v40  ;;  %v4929_v50 = vpop.f32.mrf.mxu0 }
 0x8d5   : > { %6712 = vmatprep.mubr.bf16.mxu0 %v6179_v6  ;;  %v12079_v2 = vadd.f32 %v4923_v15, %v11452_v28  ;;  %v12081_v26 = vpop.eup %8736  ;;  %v5575_v33 = vmul.f32 0.7978846, %v5447_v24  ;;  %8748 = vtanh.f32 %v5578_v0  ;;  %v5195_v45 = vmul.f32 %v5067_v7, %v12060_v58 }
 0x8d6   : > { %6713 = vmatmul.mubr.bf16.gmra.mxu0 %v6178_v36  ;;  %v5196_v38 = vmul.f32 %v5068_v48, %v12063_v18  ;;  %v8739_v51 = vpop.eup %8738  ;;  %v5952_v41 = vmul.f32 0.5, %v5824_v19  ;;  %v5321_v57 = vmul.f32 0.044715, %v5193_v9  ;;  %v12088_v32 = vadd.f32 %v4732_v55, %v11454_v16 }
 0x8d7   : > { %v5070_v46 = vmul.f32 %v12079_v2, %v12079_v2  ;;  %v8741_v34 = vpop.eup %8740  ;;  %v5954_v31 = vmul.f32 0.5, %v5826_v5  ;;  %v5828_v21 = vadd.f32 1.0, %v8739_v51  ;;  %v5323_v49 = vmul.f32 0.044715, %v5195_v45  ;;  %v4738_v51 = vpop.f32.mrf.mxu1 }
 0x8d8   : > { %v5324_v1 = vmul.f32 0.044715, %v5196_v38  ;;  %v5830_v62 = vadd.f32 1.0, %v8741_v34  ;;  %v5449_v43 = vadd.f32 %v5321_v57, %v12056_v40  ;;  %v5069_v47 = vmul.f32 %v12088_v32, %v12088_v32 }
 0x8d9   : > { %v5198_v25 = vmul.f32 %v5070_v46, %v12079_v2  ;;  %v5956_v24 = vmul.f32 0.5, %v5828_v21  ;;  %v5451_v39 = vadd.f32 %v5323_v49, %v12060_v58  ;;  %v12097_v59 = vadd.f32 %v4925_v14, %v11456_v20 }
 0x8da   : > { %v5452_v15 = vadd.f32 %v5324_v1, %v12063_v18  ;;  %v12100_v19 = vmul.f32 %v5952_v41, %v11946_v56  ;;  %8750 = vtanh.f32 %v5575_v33  ;;  %v5197_v6 = vmul.f32 %v5069_v47, %v12088_v32 }
 0x8db   : > { %v5326_v0 = vmul.f32 0.044715, %v5198_v25  ;;  %v12103_v5 = vpop.eup %8742  ;;  %v12106_v36 = vmul.f32 %v5954_v31, %v11950_v52  ;;  %v5958_v7 = vmul.f32 0.5, %v5830_v62  ;;  %v5071_v55 = vmul.f32 %v12097_v59, %v12097_v59  ;;  %v4931_v62 = vpop.f32.mrf.mxu0 }
 0x8dc   : > { %v5580_v48 = vmul.f32 0.7978846, %v5452_v15  ;;  %v12110_v9 = vpop.eup %8744  ;;  %v12113_v56 = vmul.f32 %v5956_v24, %v11975_v13  ;;  %v5577_v33 = vmul.f32 0.7978846, %v5449_v43  ;;  %v5325_v38 = vmul.f32 0.044715, %v5197_v6 }
 0x8dd   : > { %v5454_v45 = vadd.f32 %v5326_v0, %v12079_v2  ;;  %v5579_v41 = vmul.f32 0.7978846, %v5451_v39  ;;  %v5199_v57 = vmul.f32 %v5071_v55, %v12097_v59  ;;  %v12118_v52 = vadd.f32 %v4736_v60, %v11450_v12  ;;  %v4740_v60 = vpop.f32.mrf.mxu1 }
 0x8de   : > { %v12121_v46 = vadd.f32 %v4929_v50, %v11452_v28  ;;  %8752 = vtanh.f32 %v5580_v48  ;;  %v5453_v34 = vadd.f32 %v5325_v38, %v12088_v32  ;;  %v5817_v13 = vadd.f32 1.0, %v11960_v42 }
 0x8df   : > { %v5582_v14 = vmul.f32 0.7978846, %v5454_v45  ;;  %v5327_v31 = vmul.f32 0.044715, %v5199_v57  ;;  %v5072_v21 = vmul.f32 %v12118_v52, %v12118_v52  ;;  %v5821_v1 = vadd.f32 1.0, %v12002_v4  ;;  %v4933_v57 = vpop.f32.mrf.mxu0 }
 0x8e0   : > { %v5074_v49 = vmul.f32 %v12121_v46, %v12121_v46  ;;  %v5581_v43 = vmul.f32 0.7978846, %v5453_v34  ;;  %v5945_v25 = vmul.f32 0.5, %v5817_v13  ;;  %v5819_v47 = vadd.f32 1.0, %v11998_v44 }
 0x8e1   : > { %8754 = vtanh.f32 %v5582_v14  ;;  %v8747_v24 = vpop.eup %8746  ;;  %v5455_v39 = vadd.f32 %v5327_v31, %v12097_v59  ;;  %v5200_v42 = vmul.f32 %v5072_v21, %v12118_v52  ;;  %v5949_v0 = vmul.f32 0.5, %v5821_v1  ;;  %v4742_v31 = vpop.f32.mrf.mxu1 }
 0x8e2   : > { %v5202_v15 = vmul.f32 %v5074_v49, %v12121_v46  ;;  %v8749_v6 = vpop.eup %8748  ;;  %v12135_v50 = vmul.f32 %v5958_v7, %v11981_v22  ;;  %v5832_v4 = vadd.f32 1.0, %v8747_v24  ;;  %8756 = vtanh.f32 %v5577_v33 }
 0x8e3   : > { %v5823_v48 = vadd.f32 1.0, %v12043_v63  ;;  %v5834_v55 = vadd.f32 1.0, %v8749_v6  ;;  %v5328_v45 = vmul.f32 0.044715, %v5200_v42  ;;  %v6073_v44 = vmul.f32 %v5945_v25, %v11846_v10 }
 0x8e4   : > { %v6077_v38 = vmul.f32 %v5949_v0, %v11882_v3  ;;  %8758 = vtanh.f32 %v5579_v41  ;;  %v5330_v14 = vmul.f32 0.044715, %v5202_v15  ;;  %v5947_v34 = vmul.f32 0.5, %v5819_v47  ;;  %v4935_v47 = vpop.f32.mrf.mxu0 }
 0x8e5   : > { %v5951_v13 = vmul.f32 0.5, %v5823_v48  ;;  %8760 = vtanh.f32 %v5581_v43  ;;  %v5583_v21 = vmul.f32 0.7978846, %v5455_v39  ;;  %v5456_v22 = vadd.f32 %v5328_v45, %v12118_v52 }
 0x8e6   : > { %v6181_v7 = vpack.c.bf16 %v6077_v38, %v6073_v44  ;;  %v5960_v33 = vmul.f32 0.5, %v5832_v4  ;;  %v5458_v63 = vadd.f32 %v5330_v14, %v12121_v46  ;;  %v6075_v49 = vmul.f32 %v5947_v34, %v11864_v30 }
 0x8e7   : > { %v6079_v10 = vmul.f32 %v5951_v13, %v11886_v17  ;;  %v12144_v1 = vpop.eup %8750  ;;  %v5962_v3 = vmul.f32 0.5, %v5834_v55  ;;  %v5584_v41 = vmul.f32 0.7978846, %v5456_v22  ;;  %v6180_v25 = vpack.c.bf16 %v12047_v37, %v12006_v23  ;;  %v4746_v17 = vpop.f32.mrf.mxu1 }
 0x8e8   : > { %6559 = vmatprep.mubr.bf16.mxu1 %v6181_v7  ;;  %v6182_v43 = vpack.c.bf16 %v12075_v8, %v12011_v29  ;;  %v5586_v24 = vmul.f32 0.7978846, %v5458_v63  ;;  %v12151_v42 = vadd.f32 %v4738_v51, %v11454_v16  ;;  %v12154_v30 = vadd.f32 %v4931_v62, %v11456_v20 }
 0x8e9   : > { %v6183_v39 = vpack.c.bf16 %v6079_v10, %v6075_v49  ;;  %8762 = vtanh.f32 %v5584_v41  ;;  %6560 = vmatmul.mubr.bf16.gmra.mxu1 %v6180_v25  ;;  %v12157_v15 = vadd.f32 %v4740_v60, %v11450_v12  ;;  %v12160_v23 = vadd.f32 %v4933_v57, %v11452_v28  ;;  %v4748_v10 = vpop.f32.mrf.mxu1 }
 0x8ea   : > { %13663 = vst [vmem:[#allocation56_spill] sm:$0xff] %v12151_v42  ;;  %13664 = vst [vmem:[#allocation57_spill] sm:$0xff] %v12154_v30  ;;  %v12163_v29 = vadd.f32 %v4742_v31, %v11454_v16  ;;  %8764 = vtanh.f32 %v5586_v24  ;;  %v5073_v37 = vmul.f32 %v12151_v42, %v12151_v42  ;;  %v5075_v8 = vmul.f32 %v12154_v30, %v12154_v30  ;;  %v4939_v31 = vpop.f32.mrf.mxu0 }
 0x8eb   : > { %6720 = vmatprep.mubr.bf16.mxu0 %v6183_v39  ;;  %v12170_v51 = vadd.f32 %v4935_v47, %v11456_v20  ;;  %v8753_v62 = vpop.eup %8752  ;;  %v5076_v60 = vmul.f32 %v12157_v15, %v12157_v15  ;;  %v5078_v0 = vmul.f32 %v12160_v23, %v12160_v23  ;;  %v12179_v4 = vadd.f32 %v4746_v17, %v11450_v12 }
 0x8ec   : > { %13665 = vst [vmem:[#allocation20_spill] sm:$0xff] %v12163_v29  ;;  %6721 = vmatmul.mubr.bf16.gmra.mxu0 %v6182_v43  ;;  %v5077_v6 = vmul.f32 %v12163_v29, %v12163_v29  ;;  %v5836_v48 = vadd.f32 1.0, %v8753_v62  ;;  %v5201_v55 = vmul.f32 %v5073_v37, %v12151_v42  ;;  %v5203_v45 = vmul.f32 %v5075_v8, %v12154_v30 }
 0x8ed   : > { %13666 = vst [vmem:[#allocation46_spill] sm:$0xff] %v12170_v51  ;;  %v5079_v44 = vmul.f32 %v12170_v51, %v12170_v51  ;;  %v5204_v57 = vmul.f32 %v5076_v60, %v12157_v15  ;;  %v5206_v14 = vmul.f32 %v5078_v0, %v12160_v23  ;;  %v5080_v13 = vmul.f32 %v12179_v4, %v12179_v4 }
 0x8ee   : > { %v8755_v38 = vpop.eup %8754  ;;  %v5205_v34 = vmul.f32 %v5077_v6, %v12163_v29  ;;  %v5964_v22 = vmul.f32 0.5, %v5836_v48  ;;  %v5329_v63 = vmul.f32 0.044715, %v5201_v55  ;;  %v5331_v49 = vmul.f32 0.044715, %v5203_v45  ;;  %v4941_v48 = vpop.f32.mrf.mxu0 }
 0x8ef   : > { %v5838_v7 = vadd.f32 1.0, %v8755_v38  ;;  %v12190_v41 = vpop.eup %8756  ;;  %v5332_v25 = vmul.f32 0.044715, %v5204_v57  ;;  %v5334_v43 = vmul.f32 0.044715, %v5206_v14  ;;  %v5207_v24 = vmul.f32 %v5079_v44, %v12170_v51  ;;  %v4750_v44 = vpop.f32.mrf.mxu1 }
 0x8f0   : > { %v5333_v47 = vmul.f32 0.044715, %v5205_v34  ;;  %v12194_v39 = vmul.f32 %v5960_v33, %v12024_v11  ;;  %8766 = vtanh.f32 %v5583_v21  ;;  %v5457_v17 = vadd.f32 %v5329_v63, %v12151_v42 }
 0x8f1   : > { %v5459_v37 = vadd.f32 %v5331_v49, %v12154_v30  ;;  %v12198_v8 = vpop.eup %8758  ;;  %v5460_v62 = vadd.f32 %v5332_v25, %v12157_v15  ;;  %v5462_v60 = vadd.f32 %v5334_v43, %v12160_v23  ;;  %v5335_v6 = vmul.f32 0.044715, %v5207_v24 }
 0x8f2   : > { %v5461_v0 = vadd.f32 %v5333_v47, %v12163_v29  ;;  %v12203_v55 = vpop.eup %8760  ;;  %v12206_v11 = vmul.f32 %v5962_v3, %v12027_v54  ;;  %v5966_v21 = vmul.f32 0.5, %v5838_v7  ;;  %v5585_v33 = vmul.f32 0.7978846, %v5457_v17 }
 0x8f3   : > { %v5208_v45 = vmul.f32 %v5080_v13, %v12179_v4  ;;  %v12210_v38 = vmul.f32 %v5964_v22, %v12063_v18  ;;  %v5587_v57 = vmul.f32 0.7978846, %v5459_v37  ;;  %v5588_v14 = vmul.f32 0.7978846, %v5460_v62  ;;  %v4943_v22 = vpop.f32.mrf.mxu0  ;;  %v4752_v62 = vpop.f32.mrf.mxu1 }
 0x8f4   : > { %13667 = vst [vmem:[#allocation26_spill] sm:$0xff] %v12206_v11  ;;  %v5590_v34 = vmul.f32 0.7978846, %v5462_v60  ;;  %v5463_v63 = vadd.f32 %v5335_v6, %v12170_v51  ;;  %v12214_v25 = vadd.f32 %v4939_v31, %v11452_v28  ;;  %v12217_v54 = vadd.f32 %v4748_v10, %v11454_v16 }
 0x8f5   : > { %v5336_v49 = vmul.f32 0.044715, %v5208_v45  ;;  %8768 = vtanh.f32 %v5585_v33  ;;  %v5589_v3 = vmul.f32 0.7978846, %v5461_v0  ;;  %v12220_v13 = vadd.f32 %v4941_v48, %v11456_v20 }
 0x8f6   : > { %13668 = vst [vmem:[#allocation39_spill] sm:$0xff] %v12217_v54  ;;  %v12223_v18 = vadd.f32 %v4750_v44, %v11450_v12  ;;  %v8763_v7 = vpop.eup %8762  ;;  %8770 = vtanh.f32 %v5588_v14  ;;  %v5082_v31 = vmul.f32 %v12214_v25, %v12214_v25  ;;  %v5081_v10 = vmul.f32 %v12217_v54, %v12217_v54  ;;  %v4945_v44 = vpop.f32.mrf.mxu0 }
 0x8f7   : > { %13669 = vst [vmem:[#allocation23_spill] sm:$0xff] %v12220_v13  ;;  %v5464_v43 = vadd.f32 %v5336_v49, %v12179_v4  ;;  %v8765_v47 = vpop.eup %8764  ;;  %v5840_v24 = vadd.f32 1.0, %v8763_v7  ;;  %8772 = vtanh.f32 %v5590_v34  ;;  %v5083_v17 = vmul.f32 %v12220_v13, %v12220_v13 }
 0x8f8   : > { %v5084_v37 = vmul.f32 %v12223_v18, %v12223_v18  ;;  %8774 = vtanh.f32 %v5587_v57  ;;  %v5591_v60 = vmul.f32 0.7978846, %v5463_v63  ;;  %v5210_v6 = vmul.f32 %v5082_v31, %v12214_v25  ;;  %v4756_v31 = vpop.f32.mrf.mxu1 }
 0x8f9   : > { %v5592_v0 = vmul.f32 0.7978846, %v5464_v43  ;;  %v12236_v48 = vmul.f32 %v5966_v21, %v12079_v2  ;;  %8776 = vtanh.f32 %v5589_v3  ;;  %v5209_v33 = vmul.f32 %v5081_v10, %v12217_v54 }
 0x8fa   : > { %v5211_v45 = vmul.f32 %v5083_v17, %v12220_v13  ;;  %v5842_v14 = vadd.f32 1.0, %v8765_v47  ;;  %v5338_v34 = vmul.f32 0.044715, %v5210_v6  ;;  %v5212_v49 = vmul.f32 %v5084_v37, %v12223_v18  ;;  %v4949_v37 = vpop.f32.mrf.mxu0 }
 0x8fb   : > { %13670 = vst [vmem:[#allocation29_spill] sm:$0xff] %v12236_v48  ;;  %8778 = vtanh.f32 %v5592_v0  ;;  %v5968_v7 = vmul.f32 0.5, %v5840_v24  ;;  %v5337_v57 = vmul.f32 0.044715, %v5209_v33  ;;  %v12242_v43 = vadd.f32 %v4943_v22, %v11452_v28 }
 0x8fc   : > { %v5339_v63 = vmul.f32 0.044715, %v5211_v45  ;;  %8780 = vtanh.f32 %v5591_v60  ;;  %v5466_v2 = vadd.f32 %v5338_v34, %v12214_v25  ;;  %v5340_v21 = vmul.f32 0.044715, %v5212_v49 }
 0x8fd   : > { %v12246_v3 = vadd.f32 %v4752_v62, %v11454_v16  ;;  %v12248_v10 = vpop.eup %8766  ;;  %v5465_v47 = vadd.f32 %v5337_v57, %v12217_v54  ;;  %v5086_v24 = vmul.f32 %v12242_v43, %v12242_v43  ;;  %v12255_v22 = vadd.f32 %v4945_v44, %v11456_v20  ;;  %v4758_v57 = vpop.f32.mrf.mxu1 }
 0x8fe   : > { %v5467_v17 = vadd.f32 %v5339_v63, %v12220_v13  ;;  %v5594_v60 = vmul.f32 0.7978846, %v5466_v2  ;;  %v5468_v0 = vadd.f32 %v5340_v21, %v12223_v18  ;;  %v12261_v6 = vadd.f32 %v4756_v31, %v11450_v12 }
 0x8ff   : > { %13671 = vst [vmem:[#allocation28_spill] sm:$0xff] %v12246_v3  ;;  %13672 = vst [vmem:[#allocation58_spill] sm:$0xff] %v12255_v22  ;;  %v5085_v62 = vmul.f32 %v12246_v3, %v12246_v3  ;;  %v5970_v33 = vmul.f32 0.5, %v5842_v14  ;;  %v5593_v45 = vmul.f32 0.7978846, %v5465_v47  ;;  %v5214_v34 = vmul.f32 %v5086_v24, %v12242_v43  ;;  %v4951_v47 = vpop.f32.mrf.mxu0 }
 0x900   : > { %v5087_v49 = vmul.f32 %v12255_v22, %v12255_v22  ;;  %8782 = vtanh.f32 %v5594_v60  ;;  %v5596_v44 = vmul.f32 0.7978846, %v5468_v0  ;;  %v5088_v2 = vmul.f32 %v12261_v6, %v12261_v6 }
 0x901   : > { %v5213_v63 = vmul.f32 %v5085_v62, %v12246_v3  ;;  %v5595_v21 = vmul.f32 0.7978846, %v5467_v17  ;;  %v5342_v13 = vmul.f32 0.044715, %v5214_v34  ;;  %v12271_v14 = vadd.f32 %v4949_v37, %v11452_v28  ;;  %v4760_v37 = vpop.f32.mrf.mxu1 }
 0x902   : > { %v5215_v31 = vmul.f32 %v5087_v49, %v12255_v22  ;;  %v12273_v24 = vpop.eup %8768  ;;  %8784 = vtanh.f32 %v5593_v45  ;;  %v5216_v60 = vmul.f32 %v5088_v2, %v12261_v6  ;;  %v12277_v0 = vadd.f32 %v4758_v57, %v11454_v16 }
 0x903   : > { %13673 = vst [vmem:[#allocation59_spill] sm:$0xff] %v12273_v24  ;;  %v5341_v54 = vmul.f32 0.044715, %v5213_v63  ;;  %v8771_v62 = vpop.eup %8770  ;;  %8786 = vtanh.f32 %v5596_v44  ;;  %v5470_v17 = vadd.f32 %v5342_v13, %v12242_v43  ;;  %v5090_v49 = vmul.f32 %v12271_v14, %v12271_v14 }
 0x904   : > { %13674 = vst [vmem:[#allocation60_spill] sm:$0xff] %v12277_v0  ;;  %v5343_v34 = vmul.f32 0.044715, %v5215_v31  ;;  %v8773_v51 = vpop.eup %8772  ;;  %v5844_v30 = vadd.f32 1.0, %v8771_v62  ;;  %v5344_v45 = vmul.f32 0.044715, %v5216_v60  ;;  %v5089_v63 = vmul.f32 %v12277_v0, %v12277_v0  ;;  %v4953_v31 = vpop.f32.mrf.mxu0 }
 0x905   : > { %v5469_v29 = vadd.f32 %v5341_v54, %v12246_v3  ;;  %v12285_v2 = vpop.eup %8774  ;;  %v5846_v57 = vadd.f32 1.0, %v8773_v51  ;;  %v5598_v42 = vmul.f32 0.7978846, %v5470_v17  ;;  %v5218_v13 = vmul.f32 %v5090_v49, %v12271_v14 }
 0x906   : > { %13675 = vst [vmem:[#allocation61_spill] sm:$0xff] %v12285_v2  ;;  %v5471_v44 = vadd.f32 %v5343_v34, %v12255_v22  ;;  %v12289_v48 = vpop.eup %8776  ;;  %v5972_v11 = vmul.f32 0.5, %v5844_v30  ;;  %v5472_v62 = vadd.f32 %v5344_v45, %v12261_v6  ;;  %v5217_v54 = vmul.f32 %v5089_v63, %v12277_v0  ;;  %v4762_v34 = vpop.f32.mrf.mxu1 }
 0x907   : > { %13676 = vst [vmem:[#allocation62_spill] sm:$0xff] %v12289_v48  ;;  %v5597_v24 = vmul.f32 0.7978846, %v5469_v29  ;;  %v12294_v3 = vmul.f32 %v5968_v7, %v12118_v52  ;;  %v12297_v51 = vmul.f32 %v5970_v33, %v12121_v46  ;;  %8788 = vtanh.f32 %v5598_v42  ;;  %v4955_v48 = vpop.f32.mrf.mxu0 }
 0x908   : > { %v8779_v60 = vpop.eup %8778  ;;  %v5346_v17 = vmul.f32 0.044715, %v5218_v13  ;;  %v5974_v49 = vmul.f32 0.5, %v5846_v57  ;;  %8790 = vtanh.f32 %v5595_v21  ;;  %v5599_v22 = vmul.f32 0.7978846, %v5471_v44  ;;  %v4766_v57 = vpop.f32.mrf.mxu1 }
 0x909   : > { %13677 = vst [vmem:[#allocation63_spill] sm:$0xff] %v12297_v51  ;;  %v5600_v2 = vmul.f32 0.7978846, %v5472_v62  ;;  %v12299_v30 = vpop.eup %8780  ;;  %v5848_v29 = vadd.f32 1.0, %v8779_v60  ;;  %8792 = vtanh.f32 %v5597_v24  ;;  %v5345_v63 = vmul.f32 0.044715, %v5217_v54 }
 0x90a   : > { %v5474_v45 = vadd.f32 %v5346_v17, %v12271_v14  ;;  %v12303_v52 = vmul.f32 %v5972_v11, %v12157_v15  ;;  %v12306_v46 = vadd.f32 %v4951_v47, %v11456_v20  ;;  %v12309_v42 = vadd.f32 %v4760_v37, %v11450_v12 }
 0x90b   : > { %8794 = vtanh.f32 %v5600_v2  ;;  %v5473_v33 = vadd.f32 %v5345_v63, %v12277_v0  ;;  %v12313_v21 = vadd.f32 %v4953_v31, %v11452_v28  ;;  %v12316_v24 = vadd.f32 %v4762_v34, %v11454_v16 }
 0x90c   : > { %13678 = vst [vmem:[#allocation64_spill] sm:$0xff] %v12303_v52  ;;  %13679 = vst [vmem:[#allocation65_spill] sm:$0xff] %v12306_v46  ;;  %v5602_v7 = vmul.f32 0.7978846, %v5474_v45  ;;  %v12319_v15 = vmul.f32 %v5974_v49, %v12160_v23  ;;  %v5091_v11 = vmul.f32 %v12306_v46, %v12306_v46  ;;  %v5092_v47 = vmul.f32 %v12309_v42, %v12309_v42  ;;  %v12343_v45 = vpop.f32.mrf.mxu1 }
 0x90d   : > { %13680 = vst [vmem:[#allocation66_spill] sm:$0xff] %v12316_v24  ;;  %v12326_v37 = vadd.f32 %v4955_v48, %v11456_v20  ;;  %v8783_v2 = vpop.eup %8782  ;;  %v5976_v44 = vmul.f32 0.5, %v5848_v29  ;;  %v5094_v13 = vmul.f32 %v12313_v21, %v12313_v21  ;;  %v5093_v31 = vmul.f32 %v12316_v24, %v12316_v24 }
 0x90e   : > { %13681 = vst [vmem:[#allocation67_spill] sm:$0xff] %v12319_v15  ;;  %8796 = vtanh.f32 %v5602_v7  ;;  %v5850_v23 = vadd.f32 1.0, %v8783_v2  ;;  %v5219_v62 = vmul.f32 %v5091_v11, %v12306_v46  ;;  %v5220_v54 = vmul.f32 %v5092_v47, %v12309_v42 }
 0x90f   : > { %13682 = vst [vmem:[#allocation68_spill] sm:$0xff] %v12326_v37  ;;  %v5095_v60 = vmul.f32 %v12326_v37, %v12326_v37  ;;  %v12336_v17 = vpop.eup %8784  ;;  %v5601_v48 = vmul.f32 0.7978846, %v5473_v33  ;;  %v5222_v34 = vmul.f32 %v5094_v13, %v12313_v21  ;;  %v5221_v49 = vmul.f32 %v5093_v31, %v12316_v24  ;;  %v4959_v13 = vpop.f32.mrf.mxu0 }
 0x910   : > { %13683 = vst [vmem:[#allocation69_spill] sm:$0xff] %v12336_v17  ;;  %v12341_v29 = vadd.f32 %v4766_v57, %v11450_v12  ;;  %v8787_v63 = vpop.eup %8786  ;;  %v5978_v7 = vmul.f32 0.5, %v5850_v23  ;;  %v5347_v11 = vmul.f32 0.044715, %v5219_v62  ;;  %v5348_v2 = vmul.f32 0.044715, %v5220_v54 }
 0x911   : > { %v5223_v47 = vmul.f32 %v5095_v60, %v12326_v37  ;;  %v5852_v0 = vadd.f32 1.0, %v8787_v63  ;;  %v5350_v15 = vmul.f32 0.044715, %v5222_v34  ;;  %v5349_v51 = vmul.f32 0.044715, %v5221_v49  ;;  %v12356_v60 = vpop.f32.mrf.mxu1 }
 0x912   : > { %v5096_v33 = vmul.f32 %v12341_v29, %v12341_v29  ;;  %8798 = vtanh.f32 %v5599_v22  ;;  %v5475_v31 = vadd.f32 %v5347_v11, %v12306_v46  ;;  %v5476_v57 = vadd.f32 %v5348_v2, %v12309_v42  ;;  %v4961_v2 = vpop.f32.mrf.mxu0 }
 0x913   : > { %v5351_v17 = vmul.f32 0.044715, %v5223_v47  ;;  %v12351_v52 = vmul.f32 %v5976_v44, %v12179_v4  ;;  %v5478_v23 = vadd.f32 %v5350_v15, %v12313_v21  ;;  %v5477_v62 = vadd.f32 %v5349_v51, %v12316_v24 }
 0x914   : > { %v5224_v54 = vmul.f32 %v5096_v33, %v12341_v29  ;;  %v8789_v34 = vpop.eup %8788  ;;  %v12359_v49 = vmul.f32 %v5978_v7, %v12214_v25  ;;  %8800 = vtanh.f32 %v5601_v48  ;;  %v5604_v22 = vmul.f32 0.7978846, %v5476_v57  ;;  %v4772_v57 = vpop.f32.mrf.mxu1 }
 0x915   : > { %v12362_v63 = vadd.f32 %v4959_v13, %v11452_v28  ;;  %v12364_v11 = vpop.eup %8790  ;;  %v5980_v4 = vmul.f32 0.5, %v5852_v0  ;;  %v5854_v44 = vadd.f32 1.0, %v8789_v34  ;;  %v5606_v15 = vmul.f32 0.7978846, %v5478_v23 }
 0x916   : > { %13684 = vst [vmem:[#allocation70_spill] sm:$0xff] %v12359_v49  ;;  %v5479_v51 = vadd.f32 %v5351_v17, %v12326_v37  ;;  %v12367_v47 = vpop.eup %8792  ;;  %v5603_v33 = vmul.f32 0.7978846, %v5475_v31  ;;  %v5605_v46 = vmul.f32 0.7978846, %v5477_v62  ;;  %8802 = vtanh.f32 %v5604_v22  ;;  %v4963_v49 = vpop.f32.mrf.mxu0 }
 0x917   : > { %v5352_v24 = vmul.f32 0.044715, %v5224_v54  ;;  %v5098_v25 = vmul.f32 %v12362_v63, %v12362_v63  ;;  %v5982_v7 = vmul.f32 0.5, %v5854_v44  ;;  %v5825_v13 = vadd.f32 1.0, %v12081_v26  ;;  %v12378_v44 = vpop.f32.mrf.mxu1 }
 0x918   : > { %v8795_v48 = vpop.eup %8794  ;;  %v5829_v0 = vadd.f32 1.0, %v12110_v9  ;;  %8804 = vtanh.f32 %v5606_v15  ;;  %v12376_v31 = vmul.f32 %v5980_v4, %v12223_v18  ;;  %v5607_v62 = vmul.f32 0.7978846, %v5479_v51 }
 0x919   : > { %v5856_v23 = vadd.f32 1.0, %v8795_v48  ;;  %v5480_v17 = vadd.f32 %v5352_v24, %v12341_v29  ;;  %v5226_v34 = vmul.f32 %v5098_v25, %v12362_v63  ;;  %v5953_v54 = vmul.f32 0.5, %v5825_v13 }
 0x91a   : > { %v5957_v37 = vmul.f32 0.5, %v5829_v0  ;;  %v12381_v26 = vmul.f32 %v5982_v7, %v12242_v43  ;;  %8806 = vtanh.f32 %v5603_v33  ;;  %v5827_v18 = vadd.f32 1.0, %v12103_v5  ;;  %v12392_v7 = vpop.f32.mrf.mxu1 }
 0x91b   : > { %v8797_v22 = vpop.eup %8796  ;;  %v5608_v9 = vmul.f32 0.7978846, %v5480_v17  ;;  %v5354_v15 = vmul.f32 0.044715, %v5226_v34  ;;  %8808 = vtanh.f32 %v5605_v46  ;;  %v6081_v24 = vmul.f32 %v5953_v54, %v11967_v61  ;;  %v4965_v46 = vpop.f32.mrf.mxu0 }
 0x91c   : > { %v6085_v25 = vmul.f32 %v5957_v37, %v11991_v27  ;;  %v5984_v4 = vmul.f32 0.5, %v5856_v23  ;;  %v5831_v48 = vadd.f32 1.0, %v12144_v1  ;;  %v5955_v43 = vmul.f32 0.5, %v5827_v18 }
 0x91d   : > { %8810 = vtanh.f32 %v5608_v9  ;;  %v5482_v51 = vadd.f32 %v5354_v15, %v12362_v63  ;;  %v12390_v33 = vadd.f32 %v12343_v45, %v11454_v16  ;;  %v12395_v5 = vadd.f32 %v4961_v2, %v11456_v20  ;;  %v12406_v34 = vpop.f32.mrf.mxu0 }
 0x91e   : > { %8812 = vtanh.f32 %v5607_v62  ;;  %v6185_v13 = vpack.c.bf16 %v6085_v25, %v6081_v24  ;;  %v5959_v27 = vmul.f32 0.5, %v5831_v48  ;;  %v6184_v37 = vpack.c.bf16 %v12113_v56, %v12100_v19 }
 0x91f   : > { %13685 = vst [vmem:[#allocation71_spill] sm:$0xff] %v12390_v33  ;;  %v5610_v61 = vmul.f32 0.7978846, %v5482_v51  ;;  %13686 = vst [vmem:[#allocation72_spill] sm:$0xff] %v12395_v5  ;;  %v12399_v0 = vpop.eup %8798  ;;  %v5858_v1 = vadd.f32 1.0, %v8797_v22  ;;  %v6083_v23 = vmul.f32 %v5955_v43, %v11972_v53  ;;  %v5097_v45 = vmul.f32 %v12390_v33, %v12390_v33  ;;  %v12439_v18 = vpop.f32.mrf.mxu0 }
 0x920   : > { %6567 = vmatprep.mubr.bf16.mxu1 %v6185_v13  ;;  %v6186_v17 = vpack.c.bf16 %v12135_v50, %v12106_v36  ;;  %v6087_v2 = vmul.f32 %v5959_v27, %v12021_v35  ;;  %v5099_v19 = vmul.f32 %v12395_v5, %v12395_v5  ;;  %v12413_v56 = vadd.f32 %v12356_v60, %v11450_v12  ;;  %v12427_v50 = vpop.f32.mrf.mxu1 }
 0x921   : > { %8814 = vtanh.f32 %v5610_v61  ;;  %6568 = vmatmul.mubr.bf16.gmra.mxu1 %v6184_v37  ;;  %v12415_v53 = vpop.eup %8800  ;;  %v5225_v62 = vmul.f32 %v5097_v45, %v12390_v33  ;;  %v12419_v54 = vadd.f32 %v4963_v49, %v11452_v28  ;;  %v12422_v36 = vadd.f32 %v4772_v57, %v11454_v16 }
 0x922   : > { %v12425_v35 = vadd.f32 %v4965_v46, %v11456_v20  ;;  %v6187_v22 = vpack.c.bf16 %v6087_v2, %v6083_v23  ;;  %v5227_v9 = vmul.f32 %v5099_v19, %v12395_v5  ;;  %v5100_v60 = vmul.f32 %v12413_v56, %v12413_v56  ;;  %v12446_v45 = vpop.f32.mrf.mxu1 }
 0x923   : > { %v5833_v15 = vadd.f32 1.0, %v12190_v41  ;;  %v5353_v24 = vmul.f32 0.044715, %v5225_v62  ;;  %v5102_v49 = vmul.f32 %v12419_v54, %v12419_v54  ;;  %v5101_v57 = vmul.f32 %v12422_v36, %v12422_v36  ;;  %v8803_v51 = vpop.eup %8802 }
 0x924   : > { %13687 = vst [vmem:[#allocation73_spill] sm:$0xff] %v12425_v35  ;;  %v5103_v25 = vmul.f32 %v12425_v35, %v12425_v35  ;;  %v5986_v48 = vmul.f32 0.5, %v5858_v1  ;;  %6728 = vmatprep.mubr.bf16.mxu0 %v6187_v22  ;;  %v5355_v13 = vmul.f32 0.044715, %v5227_v9  ;;  %v5228_v43 = vmul.f32 %v5100_v60, %v12413_v56 }
 0x925   : > { %v5837_v41 = vadd.f32 1.0, %v12203_v55  ;;  %v8805_v46 = vpop.eup %8804  ;;  %v5860_v61 = vadd.f32 1.0, %v8803_v51  ;;  %v5481_v27 = vadd.f32 %v5353_v24, %v12390_v33  ;;  %6729 = vmatmul.mubr.bf16.gmra.mxu0 %v6186_v17  ;;  %v5230_v37 = vmul.f32 %v5102_v49, %v12419_v54  ;;  %v12455_v24 = vpop.f32.mrf.mxu0 }
 0x926   : > { %v5229_v23 = vmul.f32 %v5101_v57, %v12422_v36  ;;  %v5862_v2 = vadd.f32 1.0, %v8805_v46  ;;  %v5483_v1 = vadd.f32 %v5355_v13, %v12395_v5  ;;  %v5356_v19 = vmul.f32 0.044715, %v5228_v43 }
 0x927   : > { %v5231_v62 = vmul.f32 %v5103_v25, %v12425_v35  ;;  %v12450_v22 = vpop.eup %8806  ;;  %v12453_v55 = vmul.f32 %v5984_v4, %v12261_v6  ;;  %v5609_v9 = vmul.f32 0.7978846, %v5481_v27  ;;  %v5358_v60 = vmul.f32 0.044715, %v5230_v37  ;;  %v12464_v27 = vpop.f32.mrf.mxu1 }
 0x928   : > { %v5961_v17 = vmul.f32 0.5, %v5833_v15  ;;  %v12457_v49 = vpop.eup %8808  ;;  %v12460_v57 = vmul.f32 %v5986_v48, %v12271_v14  ;;  %v5484_v51 = vadd.f32 %v5356_v19, %v12413_v56  ;;  %v5357_v13 = vmul.f32 0.044715, %v5229_v23 }
 0x929   : > { %13688 = vst [vmem:[#allocation74_spill] sm:$0xff] %v12453_v55  ;;  %v5965_v43 = vmul.f32 0.5, %v5837_v41  ;;  %v5988_v46 = vmul.f32 0.5, %v5860_v61  ;;  %v5990_v5 = vmul.f32 0.5, %v5862_v2  ;;  %v5486_v6 = vadd.f32 %v5358_v60, %v12419_v54  ;;  %v12471_v61 = vpop.f32.mrf.mxu0 }
 0x92a   : > { %v8811_v25 = vpop.eup %8810  ;;  %v5359_v4 = vmul.f32 0.044715, %v5231_v62  ;;  %8816 = vtanh.f32 %v5609_v9  ;;  %v5611_v33 = vmul.f32 0.7978846, %v5483_v1  ;;  %v5612_v55 = vmul.f32 0.7978846, %v5484_v51 }
 0x92b   : > { %v12466_v15 = vpop.eup %8812  ;;  %v5864_v37 = vadd.f32 1.0, %v8811_v25  ;;  %v5614_v14 = vmul.f32 0.7978846, %v5486_v6  ;;  %v5485_v48 = vadd.f32 %v5357_v13, %v12422_v36  ;;  %v6089_v41 = vmul.f32 %v5961_v17, %v12056_v40  ;;  %v12479_v13 = vpop.f32.mrf.mxu1 }
 0x92c   : > { %v5487_v23 = vadd.f32 %v5359_v4, %v12425_v35  ;;  %8818 = vtanh.f32 %v5612_v55  ;;  %v6093_v19 = vmul.f32 %v5965_v43, %v12088_v32  ;;  %v5835_v62 = vadd.f32 1.0, %v12198_v8  ;;  %v12489_v25 = vpop.f32.mrf.mxu0 }
 0x92d   : > { %v5992_v2 = vmul.f32 0.5, %v5864_v37  ;;  %v12476_v9 = vmul.f32 %v5988_v46, %v12309_v42  ;;  %8820 = vtanh.f32 %v5614_v14  ;;  %v5613_v1 = vmul.f32 0.7978846, %v5485_v48  ;;  %v12503_v4 = vpop.f32.mrf.mxu1  ;;  %v13692_v37 = vld [vmem:[#allocation26_spill] sm:$0xff]  ;;  %v13693_v14 = vld [vmem:[#allocation29_spill] sm:$0xff] }
 0x92e   : > { %v8815_v60 = vpop.eup %8814  ;;  %v5839_v51 = vadd.f32 1.0, %v12248_v10  ;;  %v12482_v40 = vmul.f32 %v5990_v5, %v12313_v21  ;;  %8822 = vtanh.f32 %v5611_v33  ;;  %v6189_v17 = vpack.c.bf16 %v6093_v19, %v6089_v41  ;;  %v13690_v5 = vld [vmem:[#allocation59_spill] sm:$0xff]  ;;  %v13694_v48 = vld [vmem:[#allocation61_spill] sm:$0xff] }
 0x92f   : > { %v5963_v55 = vmul.f32 0.5, %v5835_v62  ;;  %v12485_v32 = vmul.f32 %v5992_v2, %v12341_v29  ;;  %v5615_v8 = vmul.f32 0.7978846, %v5487_v23  ;;  %v6188_v42 = vpack.c.bf16 %v12210_v38, %v12194_v39  ;;  %v13691_v38 = vld [vmem:[#allocation62_spill] sm:$0xff]  ;;  %v12513_v62 = vpop.f32.mrf.mxu0 }
 0x930   : > { %v5967_v43 = vmul.f32 0.5, %v5839_v51  ;;  %v5866_v46 = vadd.f32 1.0, %v8815_v60  ;;  %8824 = vtanh.f32 %v5613_v1  ;;  %6575 = vmatprep.mubr.bf16.mxu1 %v6189_v17  ;;  %v12494_v21 = vadd.f32 %v12378_v44, %v11450_v12 }
 0x931   : > { %13689 = vst [vmem:[#allocation75_spill] sm:$0xff] %v12485_v32  ;;  %v6091_v10 = vmul.f32 %v5963_v55, %v12060_v58  ;;  %6576 = vmatmul.mubr.bf16.gmra.mxu1 %v6188_v42  ;;  %v12499_v29 = vadd.f32 %v12406_v34, %v11452_v28  ;;  %v5841_v39 = vadd.f32 1.0, %v13690_v5  ;;  %v5845_v6 = vadd.f32 1.0, %v13691_v38  ;;  %v13696_v5 = vld [vmem:[#allocation20_spill] sm:$0xff]  ;;  %v12521_v38 = vpop.f32.mrf.mxu1 }
 0x932   : > { %v6095_v33 = vmul.f32 %v5967_v43, %v12097_v59  ;;  %v6190_v58 = vpack.c.bf16 %v13693_v14, %v13692_v37  ;;  %v5104_v44 = vmul.f32 %v12494_v21, %v12494_v21  ;;  %v5843_v23 = vadd.f32 1.0, %v13694_v48  ;;  %v13695_v43 = vld [vmem:[#allocation56_spill] sm:$0xff]  ;;  %v13699_v37 = vld [vmem:[#allocation46_spill] sm:$0xff] }
 0x933   : > { %v5847_v59 = vadd.f32 1.0, %v12299_v30  ;;  %v5106_v34 = vmul.f32 %v12499_v29, %v12499_v29  ;;  %v5969_v2 = vmul.f32 0.5, %v5841_v39  ;;  %v5973_v19 = vmul.f32 0.5, %v5845_v6  ;;  %v13698_v6 = vld [vmem:[#allocation57_spill] sm:$0xff] }
 0x934   : > { %v6191_v41 = vpack.c.bf16 %v6095_v33, %v6091_v10  ;;  %v5994_v60 = vmul.f32 0.5, %v5866_v46  ;;  %v5232_v1 = vmul.f32 %v5104_v44, %v12494_v21  ;;  %v5971_v51 = vmul.f32 0.5, %v5843_v23  ;;  %v13697_v10 = vld [vmem:[#allocation64_spill] sm:$0xff] }
 0x935   : > { %v5975_v17 = vmul.f32 0.5, %v5847_v59  ;;  %v5234_v55 = vmul.f32 %v5106_v34, %v12499_v29  ;;  %v6097_v42 = vmul.f32 %v5969_v2, %v13695_v43  ;;  %v6101_v30 = vmul.f32 %v5973_v19, %v13696_v5 }
 0x936   : > { %6736 = vmatprep.mubr.bf16.mxu0 %v6191_v41  ;;  %v6192_v33 = vpack.c.bf16 %v13697_v10, %v12294_v3  ;;  %v5360_v39 = vmul.f32 0.044715, %v5232_v1  ;;  %v6099_v46 = vmul.f32 %v5971_v51, %v13698_v6  ;;  %v12527_v44 = vadd.f32 %v12392_v7, %v11454_v16 }
 0x937   : > { %6737 = vmatmul.mubr.bf16.gmra.mxu0 %v6190_v58  ;;  %v6103_v14 = vmul.f32 %v5975_v17, %v13699_v37  ;;  %v12529_v48 = vpop.eup %8816  ;;  %v5362_v23 = vmul.f32 0.044715, %v5234_v55  ;;  %v6193_v59 = vpack.c.bf16 %v6101_v30, %v6097_v42  ;;  %v12533_v41 = vadd.f32 %v12439_v18, %v11456_v20  ;;  %v12539_v58 = vpop.f32.mrf.mxu0  ;;  %v13704_v37 = vld [vmem:[#allocation67_spill] sm:$0xff] }
 0x938   : > { %13700 = vst [vmem:[#allocation59_spill] sm:$0xff] %v12527_v44  ;;  %v12537_v3 = vadd.f32 %v12427_v50, %v11450_v12  ;;  %v5488_v34 = vadd.f32 %v5360_v39, %v12494_v21  ;;  %v5105_v7 = vmul.f32 %v12527_v44, %v12527_v44  ;;  %v12546_v19 = vadd.f32 %v12455_v24, %v11452_v28  ;;  %v12553_v17 = vpop.f32.mrf.mxu1 }
 0x939   : > { %13701 = vst [vmem:[#allocation62_spill] sm:$0xff] %v12533_v41  ;;  %v6195_v2 = vpack.c.bf16 %v6103_v14, %v6099_v46  ;;  %v8819_v1 = vpop.eup %8818  ;;  %8826 = vtanh.f32 %v5615_v8  ;;  %v5490_v18 = vadd.f32 %v5362_v23, %v12499_v29  ;;  %6583 = vmatprep.mubr.bf16.mxu1 %v6193_v59  ;;  %v5107_v50 = vmul.f32 %v12533_v41, %v12533_v41  ;;  %v12566_v46 = vpop.f32.mrf.mxu0 }
 0x93a   : > { %v5108_v51 = vmul.f32 %v12537_v3, %v12537_v3  ;;  %v8821_v55 = vpop.eup %8820  ;;  %v5616_v43 = vmul.f32 0.7978846, %v5488_v34  ;;  %6584 = vmatmul.mubr.bf16.gmra.mxu1 %v6192_v33  ;;  %v5233_v24 = vmul.f32 %v5105_v7, %v12527_v44  ;;  %v5110_v8 = vmul.f32 %v12546_v19, %v12546_v19  ;;  %v13703_v33 = vld [vmem:[#allocation63_spill] sm:$0xff] }
 0x93b   : > { %6744 = vmatprep.mubr.bf16.mxu0 %v6195_v2  ;;  %v12560_v42 = vadd.f32 %v12446_v45, %v11454_v16  ;;  %v12562_v5 = vpop.eup %8822  ;;  %v5868_v30 = vadd.f32 1.0, %v8819_v1  ;;  %v5618_v10 = vmul.f32 0.7978846, %v5490_v18  ;;  %v5235_v39 = vmul.f32 %v5107_v50, %v12533_v41  ;;  %v12573_v1 = vpop.f32.mrf.mxu1 }
 0x93c   : > { %v5236_v6 = vmul.f32 %v5108_v51, %v12537_v3  ;;  %8828 = vtanh.f32 %v5616_v43  ;;  %v6194_v14 = vpack.c.bf16 %v13704_v37, %v13703_v33  ;;  %v5361_v23 = vmul.f32 0.044715, %v5233_v24 }
 0x93d   : > { %13702 = vst [vmem:[#allocation26_spill] sm:$0xff] %v12560_v42  ;;  %v5238_v59 = vmul.f32 %v5110_v8, %v12546_v19  ;;  %v12571_v34 = vpop.eup %8824  ;;  %v5870_v45 = vadd.f32 1.0, %v8821_v55  ;;  %8830 = vtanh.f32 %v5618_v10  ;;  %v5363_v2 = vmul.f32 0.044715, %v5235_v39  ;;  %v12587_v39 = vpop.f32.mrf.mxu0 }
 0x93e   : > { %v5364_v7 = vmul.f32 0.044715, %v5236_v6  ;;  %v12576_v18 = vmul.f32 %v5994_v60, %v12362_v63  ;;  %v5489_v50 = vadd.f32 %v5361_v23, %v12527_v44  ;;  %v5109_v43 = vmul.f32 %v12560_v42, %v12560_v42  ;;  %v12601_v23 = vpop.f32.mrf.mxu1 }
 0x93f   : > { %6745 = vmatmul.mubr.bf16.gmra.mxu0 %v6194_v14  ;;  %v5366_v51 = vmul.f32 0.044715, %v5238_v59  ;;  %v5996_v24 = vmul.f32 0.5, %v5868_v30  ;;  %v5491_v8 = vadd.f32 %v5363_v2, %v12533_v41  ;;  %v12585_v10 = vadd.f32 %v12471_v61, %v11456_v20 }
 0x940   : > { %13705 = vst [vmem:[#allocation29_spill] sm:$0xff] %v12576_v18  ;;  %v5492_v55 = vadd.f32 %v5364_v7, %v12537_v3  ;;  %v5617_v63 = vmul.f32 0.7978846, %v5489_v50  ;;  %v5237_v6 = vmul.f32 %v5109_v43, %v12560_v42  ;;  %v12593_v33 = vadd.f32 %v12464_v27, %v11450_v12 }
 0x941   : > { %13706 = vst [vmem:[#allocation61_spill] sm:$0xff] %v12585_v10  ;;  %v5494_v60 = vadd.f32 %v5366_v51, %v12546_v19  ;;  %v5998_v30 = vmul.f32 0.5, %v5870_v45  ;;  %v5111_v14 = vmul.f32 %v12585_v10, %v12585_v10  ;;  %v12599_v61 = vadd.f32 %v12489_v25, %v11452_v28  ;;  %v13707_v51 = vld [vmem:[#allocation69_spill] sm:$0xff] }
 0x942   : > { %v5620_v37 = vmul.f32 0.7978846, %v5492_v55  ;;  %v5619_v59 = vmul.f32 0.7978846, %v5491_v8  ;;  %v5365_v7 = vmul.f32 0.044715, %v5237_v6  ;;  %v5112_v50 = vmul.f32 %v12593_v33, %v12593_v33  ;;  %v12609_v55 = vpop.f32.mrf.mxu0 }
 0x943   : > { %v5622_v2 = vmul.f32 0.7978846, %v5494_v60  ;;  %8832 = vtanh.f32 %v5617_v63  ;;  %v5239_v27 = vmul.f32 %v5111_v14, %v12585_v10  ;;  %v5114_v45 = vmul.f32 %v12599_v61, %v12599_v61  ;;  %v12615_v14 = vpop.f32.mrf.mxu1 }
 0x944   : > { %v5849_v43 = vadd.f32 1.0, %v13707_v51  ;;  %8834 = vtanh.f32 %v5620_v37  ;;  %v5493_v25 = vadd.f32 %v5365_v7, %v12560_v42  ;;  %v5240_v8 = vmul.f32 %v5112_v50, %v12593_v33  ;;  %v13710_v42 = vld [vmem:[#allocation28_spill] sm:$0xff] }
 0x945   : > { %v5853_v60 = vadd.f32 1.0, %v12367_v47  ;;  %8836 = vtanh.f32 %v5622_v2  ;;  %v5367_v6 = vmul.f32 0.044715, %v5239_v27  ;;  %v5242_v63 = vmul.f32 %v5114_v45, %v12599_v61  ;;  %v12622_v2 = vpop.f32.mrf.mxu0  ;;  %v13709_v45 = vld [vmem:[#allocation39_spill] sm:$0xff] }
 0x946   : > { %v5977_v41 = vmul.f32 0.5, %v5849_v43  ;;  %v12617_v44 = vpop.eup %8826  ;;  %v5621_v35 = vmul.f32 0.7978846, %v5493_v25  ;;  %v5368_v51 = vmul.f32 0.044715, %v5240_v8  ;;  %v5851_v37 = vadd.f32 1.0, %v12364_v11 }
 0x947   : > { %13708 = vst [vmem:[#allocation56_spill] sm:$0xff] %v12617_v44  ;;  %v5981_v18 = vmul.f32 0.5, %v5853_v60  ;;  %8838 = vtanh.f32 %v5619_v59  ;;  %v5495_v7 = vadd.f32 %v5367_v6, %v12585_v10  ;;  %v5370_v50 = vmul.f32 0.044715, %v5242_v63  ;;  %v12628_v60 = vpop.f32.mrf.mxu1 }
 0x948   : > { %v5855_v47 = vadd.f32 1.0, %v12399_v0  ;;  %v5496_v27 = vadd.f32 %v5368_v51, %v12593_v33  ;;  %v6105_v43 = vmul.f32 %v5977_v41, %v13709_v45  ;;  %v5979_v44 = vmul.f32 0.5, %v5851_v37  ;;  %v13711_v45 = vld [vmem:[#allocation23_spill] sm:$0xff] }
 0x949   : > { %v6109_v32 = vmul.f32 %v5981_v18, %v13710_v42  ;;  %v8829_v25 = vpop.eup %8828  ;;  %8840 = vtanh.f32 %v5621_v35  ;;  %v5623_v8 = vmul.f32 0.7978846, %v5495_v7  ;;  %v5498_v11 = vadd.f32 %v5370_v50, %v12599_v61  ;;  %v13712_v18 = vld [vmem:[#allocation58_spill] sm:$0xff]  ;;  %v12634_v35 = vpop.f32.mrf.mxu0 }
 0x94a   : > { %v5983_v59 = vmul.f32 0.5, %v5855_v47  ;;  %v8831_v6 = vpop.eup %8830  ;;  %v5872_v63 = vadd.f32 1.0, %v8829_v25  ;;  %v5624_v0 = vmul.f32 0.7978846, %v5496_v27  ;;  %v6196_v51 = vpack.c.bf16 %v12376_v31, %v12351_v52  ;;  %v12650_v47 = vpop.f32.mrf.mxu1 }
 0x94b   : > { %v6197_v10 = vpack.c.bf16 %v6109_v32, %v6105_v43  ;;  %8842 = vtanh.f32 %v5623_v8  ;;  %v5626_v41 = vmul.f32 0.7978846, %v5498_v11  ;;  %v6107_v42 = vmul.f32 %v5979_v44, %v13711_v45  ;;  %v12674_v43 = vpop.f32.mrf.mxu0 }
 0x94c   : > { %v6111_v37 = vmul.f32 %v5983_v59, %v13712_v18  ;;  %v12637_v7 = vmul.f32 %v5996_v24, %v12413_v56  ;;  %v5874_v50 = vadd.f32 1.0, %v8831_v6  ;;  %8844 = vtanh.f32 %v5624_v0  ;;  %v13714_v56 = vld [vmem:[#allocation70_spill] sm:$0xff]  ;;  %v12692_v0 = vpop.f32.mrf.mxu1 }
 0x94d   : > { %6591 = vmatprep.mubr.bf16.mxu1 %v6197_v10  ;;  %v12641_v32 = vadd.f32 %v12479_v13, %v11454_v16  ;;  %v12644_v52 = vmul.f32 %v5998_v30, %v12419_v54  ;;  %8846 = vtanh.f32 %v5626_v41  ;;  %v12648_v44 = vadd.f32 %v12513_v62, %v11456_v20  ;;  %13718 = vst [vmem:[#allocation63_spill] sm:$0xff] %v12692_v0 }
 0x94e   : > { %v6199_v31 = vpack.c.bf16 %v6111_v37, %v6107_v42  ;;  %6592 = vmatmul.mubr.bf16.gmra.mxu1 %v6196_v51  ;;  %v6198_v24 = vpack.c.bf16 %v12381_v26, %v13714_v56  ;;  %v12658_v13 = vadd.f32 %v12503_v4, %v11450_v12  ;;  %v12662_v54 = vadd.f32 %v12539_v58, %v11452_v28 }
 0x94f   : > { %13713 = vst [vmem:[#allocation20_spill] sm:$0xff] %v12648_v44  ;;  %v5113_v10 = vmul.f32 %v12641_v32, %v12641_v32  ;;  %v6000_v30 = vmul.f32 0.5, %v5872_v63  ;;  %v5115_v62 = vmul.f32 %v12648_v44, %v12648_v44  ;;  %v12668_v27 = vadd.f32 %v12521_v38, %v11454_v16 }
 0x950   : > { %6752 = vmatprep.mubr.bf16.mxu0 %v6199_v31  ;;  %v12672_v26 = vadd.f32 %v12566_v46, %v11456_v20  ;;  %v12676_v4 = vpop.eup %8832  ;;  %v6002_v25 = vmul.f32 0.5, %v5874_v50  ;;  %v5116_v8 = vmul.f32 %v12658_v13, %v12658_v13  ;;  %v5118_v11 = vmul.f32 %v12662_v54, %v12662_v54 }
 0x951   : > { %13715 = vst [vmem:[#allocation64_spill] sm:$0xff] %v12668_v27  ;;  %13717 = vst [vmem:[#allocation46_spill] sm:$0xff] %v12676_v4  ;;  %6753 = vmatmul.mubr.bf16.gmra.mxu0 %v6198_v24  ;;  %v5241_v58 = vmul.f32 %v5113_v10, %v12641_v32  ;;  %v8835_v38 = vpop.eup %8834  ;;  %v5243_v59 = vmul.f32 %v5115_v62, %v12648_v44  ;;  %v5117_v46 = vmul.f32 %v12668_v27, %v12668_v27  ;;  %v12698_v24 = vpop.f32.mrf.mxu0 }
 0x952   : > { %13716 = vst [vmem:[#allocation57_spill] sm:$0xff] %v12672_v26  ;;  %v5119_v6 = vmul.f32 %v12672_v26, %v12672_v26  ;;  %v12690_v63 = vadd.f32 %v12553_v17, %v11450_v12  ;;  %v8837_v51 = vpop.eup %8836  ;;  %v5876_v41 = vadd.f32 1.0, %v8835_v38  ;;  %v5244_v42 = vmul.f32 %v5116_v8, %v12658_v13 }
 0x953   : > { %v5369_v45 = vmul.f32 0.044715, %v5241_v58  ;;  %v5246_v18 = vmul.f32 %v5118_v11, %v12662_v54  ;;  %v5878_v37 = vadd.f32 1.0, %v8837_v51  ;;  %v5371_v50 = vmul.f32 0.044715, %v5243_v59  ;;  %v12708_v59 = vpop.f32.mrf.mxu1 }
 0x954   : > { %v5245_v31 = vmul.f32 %v5117_v46, %v12668_v27  ;;  %v5247_v56 = vmul.f32 %v5119_v6, %v12672_v26  ;;  %v12700_v10 = vpop.eup %8838  ;;  %v6004_v17 = vmul.f32 0.5, %v5876_v41  ;;  %v5372_v4 = vmul.f32 0.044715, %v5244_v42 }
 0x955   : > { %v5497_v62 = vadd.f32 %v5369_v45, %v12641_v32  ;;  %v5374_v38 = vmul.f32 0.044715, %v5246_v18  ;;  %v5499_v58 = vadd.f32 %v5371_v50, %v12648_v44  ;;  %v12706_v11 = vadd.f32 %v12587_v39, %v11452_v28 }
 0x956   : > { %v5373_v8 = vmul.f32 0.044715, %v5245_v31  ;;  %v5375_v0 = vmul.f32 0.044715, %v5247_v56  ;;  %v12710_v46 = vpop.eup %8840  ;;  %v12713_v6 = vmul.f32 %v6000_v30, %v12494_v21  ;;  %v5500_v41 = vadd.f32 %v5372_v4, %v12658_v13  ;;  %v12724_v31 = vpop.f32.mrf.mxu0 }
 0x957   : > { %v5625_v51 = vmul.f32 0.7978846, %v5497_v62  ;;  %v5502_v45 = vadd.f32 %v5374_v38, %v12662_v54  ;;  %v12718_v42 = vmul.f32 %v6002_v25, %v12499_v29  ;;  %v12721_v18 = vmul.f32 %v6004_v17, %v12537_v3  ;;  %v12726_v56 = vpop.f32.mrf.mxu1 }
 0x958   : > { %v6006_v39 = vmul.f32 0.5, %v5878_v37  ;;  %v5501_v50 = vadd.f32 %v5373_v8, %v12668_v27  ;;  %13719 = vst [vmem:[#allocation67_spill] sm:$0xff] %v12726_v56  ;;  %v12728_v21 = vpop.eup %8842  ;;  %v5627_v30 = vmul.f32 0.7978846, %v5499_v58  ;;  %v5628_v62 = vmul.f32 0.7978846, %v5500_v41 }
 0x959   : > { %v5630_v4 = vmul.f32 0.7978846, %v5502_v45  ;;  %v5120_v38 = vmul.f32 %v12690_v63, %v12690_v63  ;;  %v8845_v29 = vpop.eup %8844  ;;  %8848 = vtanh.f32 %v5625_v51  ;;  %v5503_v3 = vadd.f32 %v5375_v0, %v12672_v26  ;;  %v12739_v51 = vpop.f32.mrf.mxu0 }
 0x95a   : > { %v5629_v25 = vmul.f32 0.7978846, %v5501_v50  ;;  %v5122_v37 = vmul.f32 %v12706_v11, %v12706_v11  ;;  %v8847_v17 = vpop.eup %8846  ;;  %v5880_v8 = vadd.f32 1.0, %v8845_v29  ;;  %8850 = vtanh.f32 %v5628_v62  ;;  %v12741_v50 = vpop.f32.mrf.mxu1 }
 0x95b   : > { %v5248_v56 = vmul.f32 %v5120_v38, %v12690_v63  ;;  %v5857_v58 = vadd.f32 1.0, %v12415_v53  ;;  %v5882_v41 = vadd.f32 1.0, %v8847_v17  ;;  %8852 = vtanh.f32 %v5630_v4  ;;  %13720 = vst [vmem:[#allocation69_spill] sm:$0xff] %v12741_v50  ;;  %v12750_v17 = vpop.f32.mrf.mxu0 }
 0x95c   : > { %v5250_v45 = vmul.f32 %v5122_v37, %v12706_v11  ;;  %v5861_v44 = vadd.f32 1.0, %v12457_v49  ;;  %v12744_v0 = vmul.f32 %v6006_v39, %v12546_v19  ;;  %8854 = vtanh.f32 %v5627_v30  ;;  %13721 = vst [vmem:[#allocation39_spill] sm:$0xff] %v12750_v17  ;;  %v13722_v39 = vld [vmem:[#allocation60_spill] sm:$0xff]  ;;  %v13723_v30 = vld [vmem:[#allocation66_spill] sm:$0xff] }
 0x95d   : > { %v5376_v29 = vmul.f32 0.044715, %v5248_v56  ;;  %v5985_v62 = vmul.f32 0.5, %v5857_v58  ;;  %v12746_v26 = vmul.f32 0.5, %v5880_v8  ;;  %v12748_v38 = vmul.f32 0.7978846, %v5503_v3  ;;  %v12760_v58 = vpop.f32.mrf.mxu1 }
 0x95e   : > { %v5378_v53 = vmul.f32 0.044715, %v5250_v45  ;;  %v5989_v4 = vmul.f32 0.5, %v5861_v44  ;;  %v12752_v37 = vmul.f32 0.5, %v5882_v41  ;;  %8856 = vtanh.f32 %v5629_v25  ;;  %13724 = vst [vmem:[#allocation28_spill] sm:$0xff] %v12760_v58  ;;  %v13725_v17 = vld [vmem:[#allocation74_spill] sm:$0xff] }
 0x95f   : > { %v5504_v49 = vadd.f32 %v5376_v29, %v12690_v63  ;;  %v5859_v50 = vadd.f32 1.0, %v12450_v22  ;;  %v6113_v56 = vmul.f32 %v5985_v62, %v13722_v39  ;;  %v5863_v3 = vadd.f32 1.0, %v12466_v15  ;;  %v13726_v15 = vld [vmem:[#allocation65_spill] sm:$0xff] }
 0x960   : > { %v5506_v19 = vadd.f32 %v5378_v53, %v12706_v11  ;;  %v6117_v8 = vmul.f32 %v5989_v4, %v13723_v30  ;;  %v6200_v41 = vpack.c.bf16 %v12476_v9, %v13725_v17  ;;  %v6202_v25 = vpack.c.bf16 %v12482_v40, %v12460_v57  ;;  %v12770_v53 = vpop.f32.mrf.mxu0  ;;  %v13727_v57 = vld [vmem:[#allocation68_spill] sm:$0xff] }
 0x961   : > { %v5632_v44 = vmul.f32 0.7978846, %v5504_v49  ;;  %v5987_v45 = vmul.f32 0.5, %v5859_v50  ;;  %v5991_v27 = vmul.f32 0.5, %v5863_v3  ;;  %v12768_v62 = vadd.f32 %v12573_v1, %v11454_v16  ;;  %v12788_v49 = vpop.f32.mrf.mxu1 }
 0x962   : > { %v5634_v29 = vmul.f32 0.7978846, %v5506_v19  ;;  %v6201_v22 = vpack.c.bf16 %v6117_v8, %v6113_v56  ;;  %v12775_v50 = vadd.f32 %v12609_v55, %v11456_v20  ;;  %v12779_v9 = vadd.f32 %v12601_v23, %v11450_v12  ;;  %13728 = vst [vmem:[#allocation23_spill] sm:$0xff] %v12788_v49  ;;  %v12809_v8 = vpop.f32.mrf.mxu0 }
 0x963   : > { %8858 = vtanh.f32 %v5632_v44  ;;  %v6115_v4 = vmul.f32 %v5987_v45, %v13726_v15  ;;  %v6119_v40 = vmul.f32 %v5991_v27, %v13727_v57  ;;  %v5121_v1 = vmul.f32 %v12768_v62, %v12768_v62  ;;  %13729 = vst [vmem:[#allocation58_spill] sm:$0xff] %v12809_v8 }
 0x964   : > { %8860 = vtanh.f32 %v5634_v29  ;;  %6599 = vmatprep.mubr.bf16.mxu1 %v6201_v22  ;;  %v12786_v17 = vadd.f32 %v12622_v2, %v11452_v28  ;;  %v5123_v55 = vmul.f32 %v12775_v50, %v12775_v50  ;;  %v5124_v23 = vmul.f32 %v12779_v9, %v12779_v9  ;;  %v12833_v58 = vpop.f32.mrf.mxu0 }
 0x965   : > { %6600 = vmatmul.mubr.bf16.gmra.mxu1 %v6200_v41  ;;  %v12796_v19 = vadd.f32 %v12615_v14, %v11454_v16  ;;  %v12800_v27 = vadd.f32 %v12634_v35, %v11456_v20  ;;  %v6203_v39 = vpack.c.bf16 %v6119_v40, %v6115_v4  ;;  %v5249_v2 = vmul.f32 %v5121_v1, %v12768_v62 }
 0x966   : > { %v5126_v56 = vmul.f32 %v12786_v17, %v12786_v17  ;;  %v12807_v30 = vadd.f32 %v12628_v60, %v11450_v12  ;;  %v12811_v3 = vpop.eup %8848  ;;  %v5251_v14 = vmul.f32 %v5123_v55, %v12775_v50  ;;  %v5252_v44 = vmul.f32 %v5124_v23, %v12779_v9 }
 0x967   : > { %v5125_v35 = vmul.f32 %v12796_v19, %v12796_v19  ;;  %v5127_v45 = vmul.f32 %v12800_v27, %v12800_v27  ;;  %v8851_v41 = vpop.eup %8850  ;;  %6760 = vmatprep.mubr.bf16.mxu0 %v6203_v39  ;;  %v5377_v29 = vmul.f32 0.044715, %v5249_v2  ;;  %v12824_v15 = vadd.f32 %v12674_v43, %v11452_v28 }
 0x968   : > { %v5254_v60 = vmul.f32 %v5126_v56, %v12786_v17  ;;  %v5128_v22 = vmul.f32 %v12807_v30, %v12807_v30  ;;  %v12826_v4 = vpop.f32.mrf.mxu1  ;;  %v8853_v57 = vpop.eup %8852  ;;  %v5884_v40 = vadd.f32 1.0, %v8851_v41  ;;  %6761 = vmatmul.mubr.bf16.gmra.mxu0 %v6202_v25  ;;  %v5379_v1 = vmul.f32 0.044715, %v5251_v14 }
 0x969   : > { %13730 = vst [vmem:[#allocation70_spill] sm:$0xff] %v12824_v15  ;;  %13731 = vst [vmem:[#allocation60_spill] sm:$0xff] %v12826_v4  ;;  %v5380_v55 = vmul.f32 0.044715, %v5252_v44  ;;  %v5253_v23 = vmul.f32 %v5125_v35, %v12796_v19  ;;  %v12829_v39 = vpop.eup %8854  ;;  %v5886_v2 = vadd.f32 1.0, %v8853_v57  ;;  %v5505_v56 = vadd.f32 %v5377_v29, %v12768_v62 }
 0x96a   : > { %v5382_v8 = vmul.f32 0.044715, %v5254_v60  ;;  %v5255_v49 = vmul.f32 %v5127_v45, %v12800_v27  ;;  %v6012_v43 = vmul.f32 0.5, %v5884_v40  ;;  %v5507_v4 = vadd.f32 %v5379_v1, %v12775_v50  ;;  %v12841_v29 = vpop.f32.mrf.mxu1 }
 0x96b   : > { %v5508_v41 = vadd.f32 %v5380_v55, %v12779_v9  ;;  %v5381_v25 = vmul.f32 0.044715, %v5253_v23  ;;  %v12837_v14 = vpop.eup %8856  ;;  %v6014_v44 = vmul.f32 0.5, %v5886_v2  ;;  %8862 = vtanh.f32 %v12748_v38 }
 0x96c   : > { %v5510_v35 = vadd.f32 %v5382_v8, %v12786_v17  ;;  %v5383_v57 = vmul.f32 0.044715, %v5255_v49  ;;  %v12845_v45 = vmul.f32 %v12746_v26, %v12593_v33  ;;  %v12849_v60 = vmul.f32 %v12752_v37, %v12599_v61  ;;  %v12856_v8 = vpop.f32.mrf.mxu0 }
 0x96d   : > { %v5636_v40 = vmul.f32 0.7978846, %v5508_v41  ;;  %v5509_v1 = vadd.f32 %v5381_v25, %v12796_v19  ;;  %v12853_v55 = vmul.f32 %v6012_v43, %v12658_v13  ;;  %v5633_v38 = vmul.f32 0.7978846, %v5505_v56  ;;  %13732 = vst [vmem:[#allocation66_spill] sm:$0xff] %v12856_v8  ;;  %v12866_v43 = vpop.f32.mrf.mxu1 }
 0x96e   : > { %v5638_v23 = vmul.f32 0.7978846, %v5510_v35  ;;  %v5511_v49 = vadd.f32 %v5383_v57, %v12800_v27  ;;  %v12859_v2 = vmul.f32 %v6014_v44, %v12662_v54  ;;  %v5635_v33 = vmul.f32 0.7978846, %v5507_v4  ;;  %13733 = vst [vmem:[#allocation74_spill] sm:$0xff] %v12866_v43  ;;  %v12869_v8 = vpop.f32.mrf.mxu0 }
 0x96f   : > { %v5256_v26 = vmul.f32 %v5128_v22, %v12807_v30  ;;  %v5130_v61 = vmul.f32 %v12824_v15, %v12824_v15  ;;  %8864 = vtanh.f32 %v5636_v40  ;;  %v5637_v41 = vmul.f32 0.7978846, %v5509_v1 }
 0x970   : > { %v8859_v37 = vpop.eup %8858  ;;  %v5865_v13 = vadd.f32 1.0, %v12529_v48  ;;  %v5869_v56 = vadd.f32 1.0, %v12571_v34  ;;  %8866 = vtanh.f32 %v5638_v23  ;;  %v5639_v22 = vmul.f32 0.7978846, %v5511_v49  ;;  %v13734_v34 = vld [vmem:[#allocation71_spill] sm:$0xff] }
 0x971   : > { %v8861_v25 = vpop.eup %8860  ;;  %v5888_v35 = vadd.f32 1.0, %v8859_v37  ;;  %v5384_v54 = vmul.f32 0.044715, %v5256_v26  ;;  %v5258_v4 = vmul.f32 %v5130_v61, %v12824_v15  ;;  %8868 = vtanh.f32 %v5633_v38  ;;  %v12875_v26 = vpop.f32.mrf.mxu1 }
 0x972   : > { %v5993_v44 = vmul.f32 0.5, %v5865_v13  ;;  %v5997_v57 = vmul.f32 0.5, %v5869_v56  ;;  %v5890_v40 = vadd.f32 1.0, %v8861_v25  ;;  %8870 = vtanh.f32 %v5635_v33  ;;  %v13735_v13 = vld [vmem:[#allocation56_spill] sm:$0xff] }
 0x973   : > { %v5512_v48 = vadd.f32 %v5384_v54, %v12807_v30  ;;  %v5386_v1 = vmul.f32 0.044715, %v5258_v4  ;;  %8872 = vtanh.f32 %v5637_v41  ;;  %v5867_v23 = vadd.f32 1.0, %v12562_v5  ;;  %v13736_v54 = vld [vmem:[#allocation75_spill] sm:$0xff]  ;;  %v12883_v4 = vpop.f32.mrf.mxu0 }
 0x974   : > { %v6121_v43 = vmul.f32 %v5993_v44, %v13734_v34  ;;  %v6125_v37 = vmul.f32 %v5997_v57, %v12422_v36  ;;  %v12877_v38 = vmul.f32 0.5, %v5888_v35  ;;  %v5871_v56 = vadd.f32 1.0, %v13735_v13  ;;  %13737 = vst [vmem:[#allocation65_spill] sm:$0xff] %v12883_v4  ;;  %v13739_v35 = vld [vmem:[#allocation29_spill] sm:$0xff] }
 0x975   : > { %v5640_v49 = vmul.f32 0.7978846, %v5512_v48  ;;  %v5514_v61 = vadd.f32 %v5386_v1, %v12824_v15  ;;  %8874 = vtanh.f32 %v5639_v22  ;;  %v5995_v25 = vmul.f32 0.5, %v5867_v23  ;;  %v13740_v48 = vld [vmem:[#allocation72_spill] sm:$0xff]  ;;  %v13742_v22 = vld [vmem:[#allocation63_spill] sm:$0xff] }
 0x976   : > { %v6205_v33 = vpack.c.bf16 %v6125_v37, %v6121_v43  ;;  %v6204_v41 = vpack.c.bf16 %v12637_v7, %v13736_v54  ;;  %v12885_v36 = vpop.f32.mrf.mxu1  ;;  %v5999_v44 = vmul.f32 0.5, %v5871_v56  ;;  %v6206_v57 = vpack.c.bf16 %v12644_v52, %v13739_v35  ;;  %v13744_v52 = vld [vmem:[#allocation73_spill] sm:$0xff] }
 0x977   : > { %13738 = vst [vmem:[#allocation68_spill] sm:$0xff] %v12885_v36  ;;  %8876 = vtanh.f32 %v5640_v49  ;;  %v5642_v5 = vmul.f32 0.7978846, %v5514_v61  ;;  %v6123_v1 = vmul.f32 %v5995_v25, %v13740_v48  ;;  %v12892_v43 = vadd.f32 %v12650_v47, %v11454_v16 }
 0x978   : > { %6607 = vmatprep.mubr.bf16.mxu1 %v6205_v33  ;;  %v12896_v7 = vadd.f32 %v12698_v24, %v11456_v20  ;;  %v12900_v34 = vadd.f32 %v13742_v22, %v11450_v12  ;;  %v12902_v37 = vpop.f32.mrf.mxu1  ;;  %v12904_v23 = vpop.eup %8862  ;;  %v6127_v49 = vmul.f32 %v5999_v44, %v13744_v52  ;;  %v12909_v47 = vadd.f32 %v12724_v31, %v11452_v28  ;;  %v13746_v31 = vld [vmem:[#allocation46_spill] sm:$0xff] }
 0x979   : > { %13743 = vst [vmem:[#allocation56_spill] sm:$0xff] %v12902_v37  ;;  %8878 = vtanh.f32 %v5642_v5  ;;  %6608 = vmatmul.mubr.bf16.gmra.mxu1 %v6204_v41  ;;  %v12913_v24 = vadd.f32 %v12708_v59, %v11454_v16  ;;  %v5129_v12 = vmul.f32 %v12892_v43, %v12892_v43  ;;  %v12923_v56 = vadd.f32 %v12739_v51, %v11456_v20  ;;  %v12925_v33 = vpop.f32.mrf.mxu0 }
 0x97a   : > { %13741 = vst [vmem:[#allocation71_spill] sm:$0xff] %v12896_v7  ;;  %v5131_v61 = vmul.f32 %v12896_v7, %v12896_v7  ;;  %v5132_v13 = vmul.f32 %v12900_v34, %v12900_v34  ;;  %13745 = vst [vmem:[#allocation75_spill] sm:$0xff] %v12925_v33  ;;  %v6207_v28 = vpack.c.bf16 %v6127_v49, %v6123_v1  ;;  %v5873_v25 = vadd.f32 1.0, %v13746_v31  ;;  %v12932_v54 = vpop.f32.mrf.mxu1 }
 0x97b   : > { %v5134_v16 = vmul.f32 %v12909_v47, %v12909_v47  ;;  %v5133_v59 = vmul.f32 %v12913_v24, %v12913_v24  ;;  %13747 = vst [vmem:[#allocation29_spill] sm:$0xff] %v12932_v54  ;;  %v5257_v41 = vmul.f32 %v5129_v12, %v12892_v43  ;;  %v5135_v51 = vmul.f32 %v12923_v56, %v12923_v56 }
 0x97c   : > { %v5259_v5 = vmul.f32 %v5131_v61, %v12896_v7  ;;  %v5260_v20 = vmul.f32 %v5132_v13, %v12900_v34  ;;  %v12939_v44 = vpop.f32.mrf.mxu0  ;;  %v8865_v35 = vpop.eup %8864  ;;  %v6018_v48 = vmul.f32 0.5, %v5890_v40  ;;  %6768 = vmatprep.mubr.bf16.mxu0 %v6207_v28  ;;  %v5877_v52 = vadd.f32 1.0, %v12710_v46 }
 0x97d   : > { %13748 = vst [vmem:[#allocation72_spill] sm:$0xff] %v12939_v44  ;;  %v5262_v1 = vmul.f32 %v5134_v16, %v12909_v47  ;;  %v5261_v22 = vmul.f32 %v5133_v59, %v12913_v24  ;;  %v8867_v49 = vpop.eup %8866  ;;  %v5892_v12 = vadd.f32 1.0, %v8865_v35  ;;  %6769 = vmatmul.mubr.bf16.gmra.mxu0 %v6206_v57  ;;  %v5385_v61 = vmul.f32 0.044715, %v5257_v41  ;;  %v12949_v16 = vpop.f32.mrf.mxu1 }
 0x97e   : > { %v5387_v31 = vmul.f32 0.044715, %v5259_v5  ;;  %v5263_v13 = vmul.f32 %v5135_v51, %v12923_v56  ;;  %v12945_v15 = vpop.f32.mrf.mxu0  ;;  %v12947_v54 = vpop.eup %8868  ;;  %v5894_v44 = vadd.f32 1.0, %v8867_v49  ;;  %v5388_v40 = vmul.f32 0.044715, %v5260_v20  ;;  %13750 = vst [vmem:[#allocation73_spill] sm:$0xff] %v12949_v16 }
 0x97f   : > { %13749 = vst [vmem:[#allocation63_spill] sm:$0xff] %v12945_v15  ;;  %v5390_v28 = vmul.f32 0.044715, %v5262_v1  ;;  %v6001_v37 = vmul.f32 0.5, %v5873_v25  ;;  %v12951_v59 = vpop.eup %8870  ;;  %v5513_v46 = vadd.f32 %v5385_v61, %v12892_v43  ;;  %v5389_v41 = vmul.f32 0.044715, %v5261_v22 }
 0x980   : > { %v5515_v57 = vadd.f32 %v5387_v31, %v12896_v7  ;;  %v6005_v5 = vmul.f32 0.5, %v5877_v52  ;;  %v12955_v35 = vpop.f32.mrf.mxu0  ;;  %v8873_v51 = vpop.eup %8872  ;;  %v12959_v15 = vmul.f32 %v12877_v38, %v12690_v63  ;;  %v5516_v20 = vadd.f32 %v5388_v40, %v12900_v34 }
 0x981   : > { %13751 = vst [vmem:[#allocation46_spill] sm:$0xff] %v12955_v35  ;;  %v5518_v25 = vadd.f32 %v5390_v28, %v12909_v47  ;;  %v5391_v1 = vmul.f32 0.044715, %v5263_v13  ;;  %v6020_v49 = vmul.f32 0.5, %v5892_v12  ;;  %v5641_v16 = vmul.f32 0.7978846, %v5513_v46  ;;  %v12967_v63 = vpop.f32.mrf.mxu1 }
 0x982   : > { %v5643_v36 = vmul.f32 0.7978846, %v5515_v57  ;;  %v5517_v61 = vadd.f32 %v5389_v41, %v12913_v24  ;;  %v12964_v31 = vpop.f32.mrf.mxu0  ;;  %v8875_v22 = vpop.eup %8874  ;;  %v6022_v52 = vmul.f32 0.5, %v5894_v44  ;;  %v5644_v35 = vmul.f32 0.7978846, %v5516_v20  ;;  %v13753_v28 = vld [vmem:[#allocation59_spill] sm:$0xff] }
 0x983   : > { %13752 = vst [vmem:[#allocation76_spill] sm:$0xff] %v12964_v31  ;;  %v5646_v33 = vmul.f32 0.7978846, %v5518_v25  ;;  %v5519_v4 = vadd.f32 %v5391_v1, %v12923_v56  ;;  %8880 = vtanh.f32 %v5641_v16  ;;  %v6129_v13 = vmul.f32 %v6001_v37, %v13753_v28  ;;  %v13754_v12 = vld [vmem:[#allocation26_spill] sm:$0xff] }
 0x984   : > { %v8877_v38 = vpop.eup %8876  ;;  %v5645_v40 = vmul.f32 0.7978846, %v5517_v61  ;;  %v6133_v46 = vmul.f32 %v6005_v5, %v13754_v12  ;;  %8882 = vtanh.f32 %v5643_v36  ;;  %v5875_v31 = vadd.f32 1.0, %v12700_v10  ;;  %v12975_v1 = vpop.f32.mrf.mxu0 }
 0x985   : > { %v5896_v57 = vadd.f32 1.0, %v8877_v38  ;;  %v5647_v41 = vmul.f32 0.7978846, %v5519_v4  ;;  %8884 = vtanh.f32 %v5644_v35  ;;  %v5879_v20 = vadd.f32 1.0, %v12728_v21  ;;  %v12977_v5 = vpop.f32.mrf.mxu1 }
 0x986   : > { %v8879_v7 = vpop.eup %8878  ;;  %v6209_v44 = vpack.c.bf16 %v6133_v46, %v6129_v13  ;;  %v6208_v25 = vpack.c.bf16 %v12721_v18, %v12713_v6  ;;  %8886 = vtanh.f32 %v5646_v33  ;;  %v6003_v37 = vmul.f32 0.5, %v5875_v31  ;;  %v13755_v18 = vld [vmem:[#allocation62_spill] sm:$0xff]  ;;  %v13756_v33 = vld [vmem:[#allocation61_spill] sm:$0xff]  ;;  %v12993_v38 = vpop.f32.mrf.mxu0 }
 0x987   : > { %v6024_v16 = vmul.f32 0.5, %v5896_v57  ;;  %v5898_v61 = vadd.f32 1.0, %v8879_v7  ;;  %v12980_v4 = vmul.f32 %v6018_v48, %v12706_v11  ;;  %8888 = vtanh.f32 %v5645_v40  ;;  %v13758_v57 = vld [vmem:[#allocation20_spill] sm:$0xff] }
 0x988   : > { %6615 = vmatprep.mubr.bf16.mxu1 %v6209_v44  ;;  %v6007_v10 = vmul.f32 0.5, %v5879_v20  ;;  %v5881_v36 = vadd.f32 1.0, %v12811_v3  ;;  %v12984_v21 = vmul.f32 %v6020_v49, %v12779_v9  ;;  %v12987_v6 = vmul.f32 %v6022_v52, %v12786_v17  ;;  %v13003_v52 = vpop.f32.mrf.mxu1  ;;  %v13012_v20 = vpop.f32.mrf.mxu0 }
 0x989   : > { %8890 = vtanh.f32 %v5647_v41  ;;  %v6131_v7 = vmul.f32 %v6003_v37, %v13755_v18  ;;  %6616 = vmatmul.mubr.bf16.gmra.mxu1 %v6208_v25  ;;  %v5885_v11 = vadd.f32 1.0, %v12837_v14  ;;  %v5883_v31 = vadd.f32 1.0, %v12829_v39  ;;  %v13759_v25 = vld [vmem:[#allocation57_spill] sm:$0xff]  ;;  %v13760_v37 = vld [vmem:[#allocation67_spill] sm:$0xff] }
 0x98a   : > { %v6135_v35 = vmul.f32 %v6007_v10, %v13756_v33  ;;  %v6009_v48 = vmul.f32 0.5, %v5881_v36  ;;  %v12996_v3 = vmul.f32 %v6024_v16, %v12807_v30  ;;  %v12998_v9 = vmul.f32 0.5, %v5898_v61  ;;  %v13761_v10 = vld [vmem:[#allocation69_spill] sm:$0xff] }
 0x98b   : > { %v6210_v17 = vpack.c.bf16 %v12744_v0, %v12718_v42  ;;  %v5887_v49 = vadd.f32 1.0, %v12904_v23  ;;  %v6013_v28 = vmul.f32 0.5, %v5885_v11  ;;  %v6011_v14 = vmul.f32 0.5, %v5883_v31  ;;  %v13757_v0 = vld [vmem:[#allocation64_spill] sm:$0xff] }
 0x98c   : > { %v6211_v40 = vpack.c.bf16 %v6135_v35, %v6131_v7  ;;  %v6212_v39 = vpack.c.bf16 %v12853_v55, %v12845_v45  ;;  %v5889_v30 = vadd.f32 1.0, %v12947_v54  ;;  %v5893_v12 = vadd.f32 1.0, %v8873_v51  ;;  %v13020_v54 = vld [vmem:[%s527_s23] ss:$0 sm:$0xff] }
 0x98d   : > { %v6015_v13 = vmul.f32 0.5, %v5887_v49  ;;  %v5891_v46 = vadd.f32 1.0, %v12951_v59  ;;  %v6137_v42 = vmul.f32 %v6009_v48, %v12641_v32  ;;  %v6141_v23 = vmul.f32 %v6013_v28, %v13757_v0  ;;  %v13022_v32 = vpop.f32.mrf.mxu1 }
 0x98e   : > { %6776 = vmatprep.mubr.bf16.mxu0 %v6211_v40  ;;  %v6139_v41 = vmul.f32 %v6011_v14, %v13758_v57  ;;  %v5895_v44 = vadd.f32 1.0, %v8875_v22  ;;  %v6017_v55 = vmul.f32 0.5, %v5889_v30  ;;  %v6021_v16 = vmul.f32 0.5, %v5893_v12  ;;  %v13035_v40 = vpop.f32.mrf.mxu0  ;;  %v13763_v14 = vld [vmem:[#allocation28_spill] sm:$0xff] }
 0x98f   : > { %6777 = vmatmul.mubr.bf16.gmra.mxu0 %v6210_v17  ;;  %v6143_v45 = vmul.f32 %v6015_v13, %v13759_v25  ;;  %v6019_v61 = vmul.f32 0.5, %v5891_v46  ;;  %v6213_v59 = vpack.c.bf16 %v6141_v23, %v6137_v42  ;;  %v6214_v51 = vpack.c.bf16 %v12859_v2, %v12849_v60  ;;  %v13762_v60 = vld [vmem:[#allocation39_spill] sm:$0xff] }
 0x990   : > { %v6023_v22 = vmul.f32 0.5, %v5895_v44  ;;  %v7450_v36 = vadd.f32 %v13761_v10, %v13760_v37  ;;  %v8881_v18 = vpop.eup %8880  ;;  %v6145_v33 = vmul.f32 %v6017_v55, %v12768_v62  ;;  %v6149_v35 = vmul.f32 %v6021_v16, %v12796_v19  ;;  %v13764_v13 = vld [vmem:[#allocation23_spill] sm:$0xff] }
 0x991   : > { %v6215_v7 = vpack.c.bf16 %v6143_v45, %v6139_v41  ;;  %v6147_v11 = vmul.f32 %v6019_v61, %v12775_v50  ;;  %v8883_v48 = vpop.eup %8882  ;;  %6623 = vmatprep.mubr.bf16.mxu1 %v6213_v59  ;;  %v5897_v17 = vadd.f32 1.0, %v8881_v18  ;;  %v7562_v2 = vadd.f32 %v12770_v53, %v13762_v60  ;;  %v13765_v53 = vld [vmem:[#allocation58_spill] sm:$0xff] }
 0x992   : > { %v6151_v31 = vmul.f32 %v6023_v22, %v12800_v27  ;;  %v6522_v49 = vadd.f32 %v7450_v36, %v13020_v54  ;;  %v8885_v28 = vpop.eup %8884  ;;  %6624 = vmatmul.mubr.bf16.gmra.mxu1 %v6212_v39  ;;  %v6217_v62 = vpack.c.bf16 %v6149_v35, %v6145_v33  ;;  %v6216_v19 = vpack.c.bf16 %v12984_v21, %v12959_v15  ;;  %v13041_v27 = vpop.f32.mrf.mxu1  ;;  %v13766_v15 = vld [vmem:[#allocation60_spill] sm:$0xff]  ;;  %v13767_v61 = vld [vmem:[#allocation22_spill] sm:$0xff] }
 0x993   : > { %6784 = vmatprep.mubr.bf16.mxu0 %v6215_v7  ;;  %v5899_v50 = vadd.f32 1.0, %v8883_v48  ;;  %v7453_v30 = vadd.f32 %v13764_v13, %v13763_v14  ;;  %v8887_v12 = vpop.eup %8886  ;;  %v5900_v46 = vadd.f32 1.0, %v8885_v28  ;;  %v7565_v23 = vadd.f32 %v12833_v58, %v13765_v53  ;;  %v13768_v35 = vld [vmem:[#allocation66_spill] sm:$0xff]  ;;  %v13772_v14 = vld [vmem:[#allocation65_spill] sm:$0xff]  ;;  %v13773_v13 = vld [vmem:[#allocation75_spill] sm:$0xff] }
 0x994   : > { %v6219_v42 = vpack.c.bf16 %v6151_v31, %v6147_v11  ;;  %v6683_v0 = vadd.f32 %v7562_v2, %v6522_v49  ;;  %v8889_v57 = vpop.eup %8888  ;;  %v5902_v41 = vadd.f32 1.0, %v8887_v12  ;;  %6631 = vmatprep.mubr.bf16.mxu1 %v6217_v62  ;;  %v6025_v39 = vmul.f32 0.5, %v5897_v17  ;;  %v7473_v37 = vpop.f32.mrf.mxu1  ;;  %v13769_v17 = vld [vmem:[#allocation24_spill] sm:$0xff]  ;;  %v13771_v2 = vld [vmem:[#allocation71_spill] sm:$0xff]  ;;  %v13777_v53 = vld [vmem:[#allocation29_spill] sm:$0xff] }
 0x995   : > { %v6525_v44 = vadd.f32 %v7453_v30, %v13020_v54  ;;  %v7456_v21 = vadd.f32 %v12841_v29, %v13766_v15  ;;  %v6028_v45 = vmul.f32 0.5, %v5900_v46  ;;  %v5901_v55 = vadd.f32 1.0, %v8889_v57  ;;  %v13774_v12 = vld [vmem:[#allocation68_spill] sm:$0xff]  ;;  %v13780_v15 = vld [vmem:[#allocation63_spill] sm:$0xff] }
 0x996   : > { %v8891_v25 = vpop.eup %8890  ;;  %v6027_v16 = vmul.f32 0.5, %v5899_v50  ;;  %v13049_v59 = vadd.f32 %v6683_v0, %v13767_v61  ;;  %v7584_v22 = vpop.f32.mrf.mxu0  ;;  %v6030_v10 = vmul.f32 0.5, %v5902_v41  ;;  %v6218_v58 = vpack.c.bf16 %v12987_v6, %v12980_v4  ;;  %v13770_v4 = vld [vmem:[#allocation74_spill] sm:$0xff] }
 0x997   : > { %6785 = vmatmul.mubr.bf16.gmra.mxu0 %v6214_v51  ;;  %v5903_v36 = vadd.f32 1.0, %v8891_v25  ;;  %v6686_v18 = vadd.f32 %v7565_v23, %v6525_v44  ;;  %v6156_v7 = vmul.f32 %v6028_v45, %v12900_v34  ;;  %v6029_v29 = vmul.f32 0.5, %v5901_v55  ;;  %v7475_v50 = vpop.f32.mrf.mxu1  ;;  %v13779_v44 = vld [vmem:[#allocation72_spill] sm:$0xff] }
 0x998   : > { %6792 = vmatprep.mubr.bf16.mxu0 %v6219_v42  ;;  %6841 = vst [vmem:[#allocation2 + $0xb0] sm:$0xff] %v13049_v59  ;;  %v6530_v33 = vadd.f32 %v7456_v21, %v13020_v54  ;;  %v7568_v11 = vadd.f32 %v12869_v8, %v13768_v35  ;;  %v7585_v48 = vpop.f32.mrf.mxu0  ;;  %v6153_v31 = vmul.f32 %v6025_v39, %v12892_v43  ;;  %v13776_v42 = vld [vmem:[#allocation25_spill] sm:$0xff]  ;;  %v13782_v45 = vld [vmem:[#allocation76_spill] sm:$0xff] }
 0x999   : > { %v6031_v51 = vmul.f32 0.5, %v5903_v36  ;;  %v13060_v49 = vadd.f32 %v6686_v18, %v13769_v17  ;;  %v7459_v6 = vadd.f32 %v12875_v26, %v13770_v4  ;;  %v6158_v34 = vmul.f32 %v6030_v10, %v12909_v47  ;;  %v13775_v26 = vld [vmem:[#allocation56_spill] sm:$0xff]  ;;  %v7476_v10 = vpop.f32.mrf.mxu1  ;;  %v13786_v4 = vld [vmem:[#allocation70_spill] sm:$0xff] }
 0x99a   : > { %v6157_v60 = vmul.f32 %v6029_v29, %v12913_v24  ;;  %v6155_v28 = vmul.f32 %v6027_v16, %v13771_v2  ;;  %v6691_v62 = vadd.f32 %v7568_v11, %v6530_v33  ;;  %6632 = vmatmul.mubr.bf16.gmra.mxu1 %v6216_v19  ;;  %v7571_v30 = vadd.f32 %v13773_v13, %v13772_v14  ;;  %v13778_v19 = vld [vmem:[#allocation73_spill] sm:$0xff]  ;;  %v13783_v36 = vld [vmem:[#allocation36_spill] sm:$0xff] }
 0x99b   : > { %v6159_v8 = vmul.f32 %v6031_v51, %v12923_v56  ;;  %6842 = vst [vmem:[#allocation2] sm:$0xff] %v13060_v49  ;;  %v6533_v43 = vadd.f32 %v7459_v6, %v13020_v54  ;;  %v7462_v46 = vadd.f32 %v13775_v26, %v13774_v12  ;;  %v6220_v24 = vpack.c.bf16 %v6156_v7, %v12996_v3  ;;  %v7587_v56 = vpop.f32.mrf.mxu0  ;;  %v13781_v3 = vld [vmem:[#allocation46_spill] sm:$0xff]  ;;  %v13787_v2 = vld [vmem:[#allocation17_spill] sm:$0xff] }
 0x99c   : > { %v6221_v47 = vpack.c.bf16 %v6157_v60, %v6153_v31  ;;  %v13076_v0 = vadd.f32 %v6691_v62, %v13776_v42  ;;  %v7465_v23 = vadd.f32 %v13778_v19, %v13777_v53  ;;  %v7574_v21 = vadd.f32 %v13780_v15, %v13779_v44 }
 0x99d   : > { %v6223_v57 = vpack.c.bf16 %v6159_v8, %v6155_v28  ;;  %v6694_v41 = vadd.f32 %v7571_v30, %v6533_v43  ;;  %v6538_v39 = vadd.f32 %v7462_v46, %v13020_v54  ;;  %v7577_v55 = vadd.f32 %v13782_v45, %v13781_v3  ;;  %v13790_v43 = vld [vmem:[#allocation41_spill] sm:$0xff] }
 0x99e   : > { %6639 = vmatprep.mubr.bf16.mxu1 %v6221_v47  ;;  %6843 = vst [vmem:[#allocation2 + $0xd8] sm:$0xff] %v13076_v0  ;;  %v6541_v25 = vadd.f32 %v7465_v23, %v13020_v54  ;;  %v7468_v16 = vadd.f32 %v12977_v5, %v12967_v63  ;;  %v7471_v61 = vadd.f32 %v13022_v32, %v13003_v52  ;;  %v7588_v52 = vpop.f32.mrf.mxu0  ;;  %v13784_v32 = vld [vmem:[#allocation34_spill] sm:$0xff] }
 0x99f   : > { %6793 = vmatmul.mubr.bf16.gmra.mxu0 %v6218_v58  ;;  %v13092_v18 = vadd.f32 %v6694_v41, %v13783_v36  ;;  %v6699_v7 = vadd.f32 %v7574_v21, %v6538_v39  ;;  %v7580_v29 = vadd.f32 %v12993_v38, %v12975_v1  ;;  %v7474_v33 = vadd.f32 %v7473_v37, %v13041_v27  ;;  %v13785_v27 = vld [vmem:[#allocation18_spill] sm:$0xff]  ;;  %v13792_v21 = vld [vmem:[#allocation37_spill] sm:$0xff] }
 0x9a0   : > { %6800 = vmatprep.mubr.bf16.mxu0 %v6223_v57  ;;  %v6702_v35 = vadd.f32 %v7577_v55, %v6541_v25  ;;  %v6546_v11 = vadd.f32 %v7468_v16, %v13020_v54  ;;  %v6549_v63 = vadd.f32 %v7471_v61, %v13020_v54  ;;  %v7583_v5 = vadd.f32 %v13035_v40, %v13012_v20  ;;  %v13791_v57 = vld [vmem:[#allocation40_spill] sm:$0xff] }
 0x9a1   : > { %6844 = vst [vmem:[#allocation2 + $0x18] sm:$0xff] %v13092_v18  ;;  %v13103_v58 = vadd.f32 %v6699_v7, %v13784_v32  ;;  %v6554_v31 = vadd.f32 %v7474_v33, %v13020_v54  ;;  %v7586_v1 = vadd.f32 %v7585_v48, %v7584_v22  ;;  %v7477_v38 = vadd.f32 %v7476_v10, %v7475_v50  ;;  %v13788_v48 = vld [vmem:[#allocation19_spill] sm:$0xff] }
 0x9a2   : > { %v13107_v37 = vadd.f32 %v6702_v35, %v13785_v27  ;;  %v6707_v51 = vadd.f32 %v7580_v29, %v6546_v11  ;;  %v6710_v17 = vadd.f32 %v7583_v5, %v6549_v63  ;;  %v6154_v6 = vmul.f32 %v12998_v9, %v13786_v4  ;;  %6640 = vmatmul.mubr.bf16.gmra.mxu1 %v6220_v24  ;;  %v13789_v50 = vld [vmem:[#allocation31_spill] sm:$0xff] }
 0x9a3   : > { %6845 = vst [vmem:[#allocation2 + $0x50] sm:$0xff] %v13103_v58  ;;  %v6715_v20 = vadd.f32 %v7586_v1, %v6554_v31  ;;  %v6557_v40 = vadd.f32 %v7477_v38, %v13020_v54  ;;  %v7589_v60 = vadd.f32 %v7588_v52, %v7587_v56  ;;  %v13793_v52 = vld [vmem:[#allocation30_spill] sm:$0xff]  ;;  %v13794_v38 = vld [vmem:[#allocation32_spill] sm:$0xff] }
 0x9a4   : > { %6846 = vst [vmem:[#allocation2 + $0x68] sm:$0xff] %v13107_v37  ;;  %v13115_v22 = vadd.f32 %v6707_v51, %v13787_v2  ;;  %v13118_v28 = vadd.f32 %v6710_v17, %v13788_v48  ;;  %v6222_v62 = vpack.c.bf16 %v6158_v34, %v6154_v6 }
 0x9a5   : > { %v13121_v8 = vadd.f32 %v6715_v20, %v13789_v50  ;;  %v6718_v9 = vadd.f32 %v7589_v60, %v6557_v40 }
 0x9a6   : > { %6847 = vst [vmem:[#allocation2 + $0x30] sm:$0xff] %v13115_v22  ;;  %6848 = vst [vmem:[#allocation2 + $0x48] sm:$0xff] %v13118_v28 }
 0x9a7   : > { %6801 = vmatmul.mubr.bf16.gmra.mxu0 %v6222_v62  ;;  %6849 = vst [vmem:[#allocation2 + $0x80] sm:$0xff] %v13121_v8  ;;  %v13127_v14 = vadd.f32 %v6718_v9, %v13790_v43 }
 0x9a9   : > { %6850 = vst [vmem:[#allocation2 + $0x88] sm:$0xff] %v13127_v14  ;;  %v7478_v13 = vpop.f32.mrf.mxu1 }
 0x9ab   : > { %v7479_v12 = vpop.f32.mrf.mxu1 }
 0x9ac   : > { %v7590_v30 = vpop.f32.mrf.mxu0  ;;  %v7480_v34 = vadd.f32 %v7479_v12, %v7478_v13 }
 0x9ad   : > { %v7481_v46 = vpop.f32.mrf.mxu1 }
 0x9ae   : > { %v7591_v26 = vpop.f32.mrf.mxu0  ;;  %v6562_v47 = vadd.f32 %v7480_v34, %v13020_v54  ;;  %v13795_v34 = vld [vmem:[#allocation43_spill] sm:$0xff] }
 0x9af   : > { %v7592_v24 = vadd.f32 %v7591_v26, %v7590_v30  ;;  %v7482_v53 = vpop.f32.mrf.mxu1 }
 0x9b0   : > { %v7593_v42 = vpop.f32.mrf.mxu0  ;;  %v7483_v23 = vadd.f32 %v7482_v53, %v7481_v46 }
 0x9b1   : > { %v6723_v19 = vadd.f32 %v7592_v24, %v6562_v47 }
 0x9b2   : > { %v7594_v56 = vpop.f32.mrf.mxu0  ;;  %v6565_v39 = vadd.f32 %v7483_v23, %v13020_v54 }
 0x9b3   : > { %v13132_v41 = vadd.f32 %v6723_v19, %v13791_v57  ;;  %v7595_v44 = vadd.f32 %v7594_v56, %v7593_v42  ;;  %v13796_v57 = vld [vmem:[#allocation48_spill] sm:$0xff] }
 0x9b5   : > { %6851 = vst [vmem:[#allocation2 + $0xe8] sm:$0xff] %v13132_v41  ;;  %v6726_v15 = vadd.f32 %v7595_v44, %v6565_v39 }
 0x9b7   : > { %v13137_v25 = vadd.f32 %v6726_v15, %v13792_v21 }
 0x9b9   : > { %6852 = vst [vmem:[#allocation2 + $0xb8] sm:$0xff] %v13137_v25 }
 0x9e1   : > { %v7484_v3 = vpop.f32.mrf.mxu1 }
 0x9e3   : > { %v7485_v45 = vpop.f32.mrf.mxu1 }
 0x9e4   : > { %v7486_v55 = vadd.f32 %v7485_v45, %v7484_v3 }
 0x9e5   : > { %v7487_v16 = vpop.f32.mrf.mxu1  ;;  %v7596_v61 = vpop.f32.mrf.mxu0 }
 0x9e6   : > { %v6570_v10 = vadd.f32 %v7486_v55, %v13020_v54 }
 0x9e7   : > { %v7488_v36 = vpop.f32.mrf.mxu1  ;;  %v7597_v7 = vpop.f32.mrf.mxu0 }
 0x9e8   : > { %v7489_v29 = vadd.f32 %v7488_v36, %v7487_v16  ;;  %v7598_v33 = vadd.f32 %v7597_v7, %v7596_v61  ;;  %v13797_v16 = vld [vmem:[#allocation47_spill] sm:$0xff] }
 0x9e9   : > { %v7599_v35 = vpop.f32.mrf.mxu0  ;;  %v13798_v7 = vld [vmem:[#allocation51_spill] sm:$0xff] }
 0x9ea   : > { %v6731_v11 = vadd.f32 %v7598_v33, %v6570_v10  ;;  %v6573_v63 = vadd.f32 %v7489_v29, %v13020_v54 }
 0x9eb   : > { %v7600_v5 = vpop.f32.mrf.mxu0 }
 0x9ec   : > { %v13143_v32 = vadd.f32 %v6731_v11, %v13793_v52  ;;  %v7601_v31 = vadd.f32 %v7600_v5, %v7599_v35 }
 0x9ee   : > { %6853 = vst [vmem:[#allocation2 + $0x60] sm:$0xff] %v13143_v32  ;;  %v6734_v1 = vadd.f32 %v7601_v31, %v6573_v63 }
 0x9f0   : > { %v13147_v27 = vadd.f32 %v6734_v1, %v13794_v38 }
 0x9f1   : > { %v7490_v51 = vpop.f32.mrf.mxu1 }
 0x9f2   : > { %6854 = vst [vmem:[#allocation2 + $0xf0] sm:$0xff] %v13147_v27 }
 0x9f3   : > { %v7491_v17 = vpop.f32.mrf.mxu1 }
 0x9f4   : > { %v7492_v4 = vadd.f32 %v7491_v17, %v7490_v51 }
 0x9f5   : > { %v7493_v6 = vpop.f32.mrf.mxu1 }
 0x9f6   : > { %v6578_v40 = vadd.f32 %v7492_v4, %v13020_v54 }
 0x9f7   : > { %v7602_v20 = vpop.f32.mrf.mxu0  ;;  %v7494_v60 = vpop.f32.mrf.mxu1 }
 0x9f8   : > { %v7495_v48 = vadd.f32 %v7494_v60, %v7493_v6 }
 0x9f9   : > { %v7603_v2 = vpop.f32.mrf.mxu0 }
 0x9fa   : > { %v7604_v62 = vadd.f32 %v7603_v2, %v7602_v20  ;;  %v7496_v9 = vpop.f32.mrf.mxu1  ;;  %v6581_v13 = vadd.f32 %v7495_v48, %v13020_v54 }
 0x9fb   : > { %v7605_v50 = vpop.f32.mrf.mxu0 }
 0x9fc   : > { %v6739_v43 = vadd.f32 %v7604_v62, %v6578_v40  ;;  %v7497_v12 = vpop.f32.mrf.mxu1  ;;  %v13799_v40 = vld [vmem:[#allocation45_spill] sm:$0xff]  ;;  %v13800_v62 = vld [vmem:[#allocation44_spill] sm:$0xff] }
 0x9fd   : > { %v7606_v30 = vpop.f32.mrf.mxu0  ;;  %v7498_v47 = vadd.f32 %v7497_v12, %v7496_v9 }
 0x9fe   : > { %v13153_v26 = vadd.f32 %v6739_v43, %v13795_v34  ;;  %v7607_v46 = vadd.f32 %v7606_v30, %v7605_v50  ;;  %v7499_v42 = vpop.f32.mrf.mxu1 }
 0x9ff   : > { %v7608_v24 = vpop.f32.mrf.mxu0  ;;  %v6586_v19 = vadd.f32 %v7498_v47, %v13020_v54 }
 0xa00   : > { %6855 = vst [vmem:[#allocation2 + $0x8] sm:$0xff] %v13153_v26  ;;  %v6742_v53 = vadd.f32 %v7607_v46, %v6581_v13  ;;  %v7500_v56 = vpop.f32.mrf.mxu1 }
 0xa01   : > { %v7609_v23 = vpop.f32.mrf.mxu0  ;;  %v7501_v15 = vadd.f32 %v7500_v56, %v7499_v42 }
 0xa02   : > { %v13158_v39 = vadd.f32 %v6742_v53, %v13796_v57  ;;  %v7610_v44 = vadd.f32 %v7609_v23, %v7608_v24  ;;  %v13801_v57 = vld [vmem:[#allocation52_spill] sm:$0xff] }
 0xa03   : > { %v7611_v21 = vpop.f32.mrf.mxu0  ;;  %v6589_v45 = vadd.f32 %v7501_v15, %v13020_v54 }
 0xa04   : > { %6856 = vst [vmem:[#allocation2 + $0x78] sm:$0xff] %v13158_v39  ;;  %v6747_v3 = vadd.f32 %v7610_v44, %v6586_v19 }
 0xa05   : > { %v7612_v55 = vpop.f32.mrf.mxu0 }
 0xa06   : > { %v13163_v61 = vadd.f32 %v6747_v3, %v13797_v16  ;;  %v7613_v10 = vadd.f32 %v7612_v55, %v7611_v21  ;;  %v13802_v3 = vld [vmem:[#allocation42_spill] sm:$0xff] }
 0xa08   : > { %6857 = vst [vmem:[#allocation2 + $0x38] sm:$0xff] %v13163_v61  ;;  %v6750_v36 = vadd.f32 %v7613_v10, %v6589_v45 }
 0xa0a   : > { %v13167_v29 = vadd.f32 %v6750_v36, %v13798_v7 }
 0xa0c   : > { %6858 = vst [vmem:[#allocation2 + $0x58] sm:$0xff] %v13167_v29 }
 0xa0e   : > { %v7502_v33 = vpop.f32.mrf.mxu1 }
 0xa10   : > { %v7503_v35 = vpop.f32.mrf.mxu1 }
 0xa11   : > { %v7614_v11 = vpop.f32.mrf.mxu0  ;;  %v7504_v63 = vadd.f32 %v7503_v35, %v7502_v33 }
 0xa12   : > { %v7505_v5 = vpop.f32.mrf.mxu1 }
 0xa13   : > { %v6594_v52 = vadd.f32 %v7504_v63, %v13020_v54  ;;  %v7615_v31 = vpop.f32.mrf.mxu0 }
 0xa14   : > { %v7616_v1 = vadd.f32 %v7615_v31, %v7614_v11  ;;  %v7506_v38 = vpop.f32.mrf.mxu1 }
 0xa15   : > { %v7617_v51 = vpop.f32.mrf.mxu0  ;;  %v7507_v17 = vadd.f32 %v7506_v38, %v7505_v5 }
 0xa16   : > { %v6755_v4 = vadd.f32 %v7616_v1, %v6594_v52 }
 0xa17   : > { %v6597_v6 = vadd.f32 %v7507_v17, %v13020_v54  ;;  %v7618_v20 = vpop.f32.mrf.mxu0 }
 0xa18   : > { %v13173_v60 = vadd.f32 %v6755_v4, %v13799_v40  ;;  %v7619_v2 = vadd.f32 %v7618_v20, %v7617_v51  ;;  %v13803_v51 = vld [vmem:[#allocation49_spill] sm:$0xff]  ;;  %v13804_v20 = vld [vmem:[#allocation35_spill] sm:$0xff] }
 0xa1a   : > { %6859 = vst [vmem:[#allocation2 + $0x40] sm:$0xff] %v13173_v60  ;;  %v6758_v48 = vadd.f32 %v7619_v2, %v6597_v6 }
 0xa1c   : > { %v13177_v50 = vadd.f32 %v6758_v48, %v13800_v62 }
 0xa1e   : > { %6860 = vst [vmem:[#allocation2 + $0xc8] sm:$0xff] %v13177_v50 }
 0xa25   : > { %v7508_v9 = vpop.f32.mrf.mxu1 }
 0xa27   : > { %v7509_v43 = vpop.f32.mrf.mxu1 }
 0xa28   : > { %v7510_v13 = vadd.f32 %v7509_v43, %v7508_v9  ;;  %v7620_v30 = vpop.f32.mrf.mxu0 }
 0xa29   : > { %v7511_v12 = vpop.f32.mrf.mxu1 }
 0xa2a   : > { %v6602_v34 = vadd.f32 %v7510_v13, %v13020_v54  ;;  %v7621_v46 = vpop.f32.mrf.mxu0 }
 0xa2b   : > { %v7512_v47 = vpop.f32.mrf.mxu1  ;;  %v7622_v24 = vadd.f32 %v7621_v46, %v7620_v30 }
 0xa2c   : > { %v7513_v42 = vadd.f32 %v7512_v47, %v7511_v12  ;;  %v7623_v53 = vpop.f32.mrf.mxu0 }
 0xa2d   : > { %v6763_v19 = vadd.f32 %v7622_v24, %v6602_v34 }
 0xa2e   : > { %v6605_v23 = vadd.f32 %v7513_v42, %v13020_v54  ;;  %v7624_v56 = vpop.f32.mrf.mxu0 }
 0xa2f   : > { %v13183_v44 = vadd.f32 %v6763_v19, %v13801_v57  ;;  %v7625_v15 = vadd.f32 %v7624_v56, %v7623_v53  ;;  %v13805_v56 = vld [vmem:[#allocation33_spill] sm:$0xff] }
 0xa31   : > { %6861 = vst [vmem:[#allocation2 + $0xe0] sm:$0xff] %v13183_v44  ;;  %v6766_v21 = vadd.f32 %v7625_v15, %v6605_v23 }
 0xa33   : > { %v13187_v45 = vadd.f32 %v6766_v21, %v13802_v3 }
 0xa35   : > { %6862 = vst [vmem:[#allocation2 + $0x90] sm:$0xff] %v13187_v45 }
 0xa39   : > { %v7514_v55 = vpop.f32.mrf.mxu1 }
 0xa3b   : > { %v7515_v16 = vpop.f32.mrf.mxu1 }
 0xa3c   : > { %v7516_v10 = vadd.f32 %v7515_v16, %v7514_v55 }
 0xa3d   : > { %v7517_v36 = vpop.f32.mrf.mxu1  ;;  %v7626_v7 = vpop.f32.mrf.mxu0 }
 0xa3e   : > { %v6610_v33 = vadd.f32 %v7516_v10, %v13020_v54 }
 0xa3f   : > { %v7518_v35 = vpop.f32.mrf.mxu1  ;;  %v7627_v11 = vpop.f32.mrf.mxu0 }
 0xa40   : > { %v7519_v63 = vadd.f32 %v7518_v35, %v7517_v36  ;;  %v7628_v5 = vadd.f32 %v7627_v11, %v7626_v7 }
 0xa41   : > { %v7629_v52 = vpop.f32.mrf.mxu0 }
 0xa42   : > { %v6771_v31 = vadd.f32 %v7628_v5, %v6610_v33  ;;  %v6613_v1 = vadd.f32 %v7519_v63, %v13020_v54  ;;  %v13806_v33 = vld [vmem:[#allocation38_spill] sm:$0xff] }
 0xa43   : > { %v7630_v38 = vpop.f32.mrf.mxu0 }
 0xa44   : > { %v13193_v17 = vadd.f32 %v6771_v31, %v13803_v51  ;;  %v7631_v4 = vadd.f32 %v7630_v38, %v7629_v52 }
 0xa46   : > { %6863 = vst [vmem:[#allocation2 + $0x70] sm:$0xff] %v13193_v17  ;;  %v6774_v6 = vadd.f32 %v7631_v4, %v6613_v1  ;;  %v13807_v4 = vld [vmem:[#allocation53_spill] sm:$0xff] }
 0xa48   : > { %v13197_v40 = vadd.f32 %v6774_v6, %v13804_v20 }
 0xa49   : > { %v7520_v2 = vpop.f32.mrf.mxu1 }
 0xa4a   : > { %6864 = vst [vmem:[#allocation2 + $0xc0] sm:$0xff] %v13197_v40 }
 0xa4b   : > { %v7521_v48 = vpop.f32.mrf.mxu1 }
 0xa4c   : > { %v7522_v62 = vadd.f32 %v7521_v48, %v7520_v2 }
 0xa4d   : > { %v7523_v9 = vpop.f32.mrf.mxu1 }
 0xa4e   : > { %v6618_v30 = vadd.f32 %v7522_v62, %v13020_v54 }
 0xa4f   : > { %v7632_v43 = vpop.f32.mrf.mxu0  ;;  %v7524_v13 = vpop.f32.mrf.mxu1 }
 0xa50   : > { %v7525_v12 = vadd.f32 %v7524_v13, %v7523_v9 }
 0xa51   : > { %v7633_v34 = vpop.f32.mrf.mxu0 }
 0xa52   : > { %v7634_v46 = vadd.f32 %v7633_v34, %v7632_v43  ;;  %v7526_v24 = vpop.f32.mrf.mxu1  ;;  %v6621_v53 = vadd.f32 %v7525_v12, %v13020_v54  ;;  %v13808_v12 = vld [vmem:[#allocation27_spill] sm:$0xff] }
 0xa53   : > { %v7635_v47 = vpop.f32.mrf.mxu0 }
 0xa54   : > { %v6779_v42 = vadd.f32 %v7634_v46, %v6618_v30  ;;  %v7527_v23 = vpop.f32.mrf.mxu1 }
 0xa55   : > { %v7636_v19 = vpop.f32.mrf.mxu0  ;;  %v7528_v21 = vadd.f32 %v7527_v23, %v7526_v24 }
 0xa56   : > { %v13203_v57 = vadd.f32 %v6779_v42, %v13805_v56  ;;  %v7637_v15 = vadd.f32 %v7636_v19, %v7635_v47  ;;  %v7529_v55 = vpop.f32.mrf.mxu1 }
 0xa57   : > { %v7638_v3 = vpop.f32.mrf.mxu0  ;;  %v6626_v10 = vadd.f32 %v7528_v21, %v13020_v54 }
 0xa58   : > { %6865 = vst [vmem:[#allocation2 + $0xa8] sm:$0xff] %v13203_v57  ;;  %v6782_v16 = vadd.f32 %v7637_v15, %v6621_v53  ;;  %v7530_v7 = vpop.f32.mrf.mxu1  ;;  %v13809_v15 = vld [vmem:[#allocation54_spill] sm:$0xff] }
 0xa59   : > { %v7639_v36 = vpop.f32.mrf.mxu0  ;;  %v7531_v63 = vadd.f32 %v7530_v7, %v7529_v55 }
 0xa5a   : > { %v13208_v35 = vadd.f32 %v6782_v16, %v13806_v33  ;;  %v7640_v11 = vadd.f32 %v7639_v36, %v7638_v3  ;;  %v7532_v52 = vpop.f32.mrf.mxu1 }
 0xa5b   : > { %v7641_v5 = vpop.f32.mrf.mxu0  ;;  %v6629_v1 = vadd.f32 %v7531_v63, %v13020_v54  ;;  %v13810_v63 = vld [vmem:[#allocation55_spill] sm:$0xff] }
 0xa5c   : > { %6866 = vst [vmem:[#allocation2 + $0xd0] sm:$0xff] %v13208_v35  ;;  %v6787_v31 = vadd.f32 %v7640_v11, %v6626_v10  ;;  %v7533_v51 = vpop.f32.mrf.mxu1 }
 0xa5d   : > { %v7642_v38 = vpop.f32.mrf.mxu0  ;;  %v7534_v2 = vadd.f32 %v7533_v51, %v7532_v52 }
 0xa5e   : > { %v13213_v6 = vadd.f32 %v6787_v31, %v13807_v4  ;;  %v7643_v20 = vadd.f32 %v7642_v38, %v7641_v5  ;;  %v7535_v62 = vpop.f32.mrf.mxu1 }
 0xa5f   : > { %v7644_v48 = vpop.f32.mrf.mxu0  ;;  %v6634_v43 = vadd.f32 %v7534_v2, %v13020_v54 }
 0xa60   : > { %6867 = vst [vmem:[#allocation2 + $0x10] sm:$0xff] %v13213_v6  ;;  %v6790_v9 = vadd.f32 %v7643_v20, %v6629_v1  ;;  %v7536_v30 = vpop.f32.mrf.mxu1  ;;  %v13811_v20 = vld [vmem:[#allocation21_spill] sm:$0xff] }
 0xa61   : > { %v7645_v13 = vpop.f32.mrf.mxu0  ;;  %v7537_v47 = vadd.f32 %v7536_v30, %v7535_v62 }
 0xa62   : > { %v6836_v34 = vadd.f32 %v6790_v9, %v13808_v12  ;;  %v7646_v46 = vadd.f32 %v7645_v13, %v7644_v48  ;;  %v7538_v42 = vpop.f32.mrf.mxu1  ;;  %v13812_v9 = vld [vmem:[#allocation50_spill] sm:$0xff] }
 0xa63   : > { %v7647_v24 = vpop.f32.mrf.mxu0  ;;  %v6637_v19 = vadd.f32 %v7537_v47, %v13020_v54 }
 0xa64   : > { %6868 = vst [vmem:[#allocation2 + $0x28] sm:$0xff] %v6836_v34  ;;  %v6795_v53 = vadd.f32 %v7646_v46, %v6634_v43  ;;  %v7539_v56 = vpop.f32.mrf.mxu1 }
 0xa65   : > { %v7648_v23 = vpop.f32.mrf.mxu0  ;;  %v7540_v55 = vadd.f32 %v7539_v56, %v7538_v42 }
 0xa66   : > { %v6837_v21 = vadd.f32 %v6795_v53, %v13809_v15  ;;  %v7649_v3 = vadd.f32 %v7648_v23, %v7647_v24  ;;  %v7541_v10 = vpop.f32.mrf.mxu1 }
 0xa67   : > { %v7650_v16 = vpop.f32.mrf.mxu0  ;;  %v6642_v7 = vadd.f32 %v7540_v55, %v13020_v54 }
 0xa68   : > { %6869 = vst [vmem:[#allocation2 + $0xa0] sm:$0xff] %v6837_v21  ;;  %v6798_v36 = vadd.f32 %v7649_v3, %v6637_v19  ;;  %v7542_v11 = vpop.f32.mrf.mxu1 }
 0xa69   : > { %v7651_v33 = vpop.f32.mrf.mxu0  ;;  %v7543_v31 = vadd.f32 %v7542_v11, %v7541_v10 }
 0xa6a   : > { %v6838_v5 = vadd.f32 %v6798_v36, %v13810_v63  ;;  %v7652_v52 = vadd.f32 %v7651_v33, %v7650_v16 }
 0xa6b   : > { %v7653_v1 = vpop.f32.mrf.mxu0  ;;  %v6645_v51 = vadd.f32 %v7543_v31, %v13020_v54 }
 0xa6c   : > { %6870 = vst [vmem:[#allocation2 + $0xf8] sm:$0xff] %v6838_v5  ;;  %v6803_v38 = vadd.f32 %v7652_v52, %v6642_v7 }
 0xa6d   : > { %v7654_v4 = vpop.f32.mrf.mxu0 }
 0xa6e   : > { %v6839_v2 = vadd.f32 %v6803_v38, %v13811_v20  ;;  %v7655_v48 = vadd.f32 %v7654_v4, %v7653_v1 }
 0xa70   : > { %6871 = vst [vmem:[#allocation2 + $0x20] sm:$0xff] %v6839_v2  ;;  %v6806_v62 = vadd.f32 %v7655_v48, %v6645_v51  ;;  %6876 = sbr.rel (%p7243_p1) target bundleno = 2693 (0xa85), region = 68 }
 0xa72   : > { %v6840_v43 = vadd.f32 %v6806_v62, %v13812_v9 }
 0xa74   : > { %6872 = vst [vmem:[#allocation2 + $0x98] sm:$0xff] %v6840_v43 }
 0xa75   : > { %6877 = vst [vmem:[%s9215_s11] sm:$0xff] %v13049_v59  ;;  %6878 = vst [vmem:[%s9215_s11 + $0x8] sm:$0xff] %v13060_v49 }
 0xa76   : > { %6879 = vst [vmem:[%s9215_s11 + $0x10] sm:$0xff] %v13076_v0  ;;  %6880 = vst [vmem:[%s9215_s11 + $0x18] sm:$0xff] %v13092_v18 }
 0xa77   : > { %6881 = vst [vmem:[%s9215_s11 + $0x20] sm:$0xff] %v13103_v58  ;;  %6882 = vst [vmem:[%s9215_s11 + $0x28] sm:$0xff] %v13107_v37 }
 0xa78   : > { %6883 = vst [vmem:[%s9215_s11 + $0x30] sm:$0xff] %v13115_v22  ;;  %6884 = vst [vmem:[%s9215_s11 + $0x38] sm:$0xff] %v13118_v28 }
 0xa79   : > { %6885 = vst [vmem:[%s9215_s11 + $0x40] sm:$0xff] %v13121_v8  ;;  %6886 = vst [vmem:[%s9215_s11 + $0x48] sm:$0xff] %v13127_v14 }
 0xa7a   : > { %6887 = vst [vmem:[%s9215_s11 + $0x50] sm:$0xff] %v13132_v41  ;;  %6888 = vst [vmem:[%s9215_s11 + $0x58] sm:$0xff] %v13137_v25 }
 0xa7b   : > { %6889 = vst [vmem:[%s9215_s11 + $0x60] sm:$0xff] %v13143_v32  ;;  %6890 = vst [vmem:[%s9215_s11 + $0x68] sm:$0xff] %v13147_v27 }
 0xa7c   : > { %6891 = vst [vmem:[%s9215_s11 + $0x70] sm:$0xff] %v13153_v26  ;;  %6892 = vst [vmem:[%s9215_s11 + $0x78] sm:$0xff] %v13158_v39 }
 0xa7d   : > { %6893 = vst [vmem:[%s9215_s11 + $0x80] sm:$0xff] %v13163_v61  ;;  %6894 = vst [vmem:[%s9215_s11 + $0x88] sm:$0xff] %v13167_v29 }
 0xa7e   : > { %6895 = vst [vmem:[%s9215_s11 + $0x90] sm:$0xff] %v13173_v60  ;;  %6896 = vst [vmem:[%s9215_s11 + $0x98] sm:$0xff] %v13177_v50 }
 0xa7f   : > { %6897 = vst [vmem:[%s9215_s11 + $0xa0] sm:$0xff] %v13183_v44  ;;  %6898 = vst [vmem:[%s9215_s11 + $0xa8] sm:$0xff] %v13187_v45 }
 0xa80   : > { %6899 = vst [vmem:[%s9215_s11 + $0xb0] sm:$0xff] %v13193_v17  ;;  %6900 = vst [vmem:[%s9215_s11 + $0xb8] sm:$0xff] %v13197_v40 }
 0xa81   : > { %6901 = vst [vmem:[%s9215_s11 + $0xc0] sm:$0xff] %v13203_v57  ;;  %6902 = vst [vmem:[%s9215_s11 + $0xc8] sm:$0xff] %v13208_v35 }
 0xa82   : > { %6903 = vst [vmem:[%s9215_s11 + $0xd0] sm:$0xff] %v13213_v6  ;;  %6904 = vst [vmem:[%s9215_s11 + $0xd8] sm:$0xff] %v6836_v34 }
 0xa83   : > { %6905 = vst [vmem:[%s9215_s11 + $0xe0] sm:$0xff] %v6837_v21  ;;  %6906 = vst [vmem:[%s9215_s11 + $0xe8] sm:$0xff] %v6838_v5 }
 0xa84   : > { %6907 = vst [vmem:[%s9215_s11 + $0xf0] sm:$0xff] %v6839_v2  ;;  %6908 = vst [vmem:[%s9215_s11 + $0xf8] sm:$0xff] %v6840_v43 }
 0xa85 PF: > { %s13813_s16 = sld [smem:[#allocation7_spill]]  ;;  %s7255_s12 = sshll.u32 %s9010_s17, 12 }
 0xa86   : > { %s13815_s30 = sld [smem:[#allocation80_spill]]  ;;  %s6924_s29 = sshll.u32 %s9215_s11, 4  ;;  %s13292_s29 = int_to_ptr.vmem [resolvable:$true] %s6924_s29 }
 0xa87   : > { %s8930_s25 = scalar_lea.vmem %s13292_s29, 4096  ;;  %s9026_s17 = smov [#allocation3]  }
 0xa88   : > { %p8931_p2 = scmp.ne.s32.totalorder %s13292_s29, %s8930_s25  ;;  %s8934_s26 = sshll.u32 %s9026_s17, 4  ;;  %s8935_s26 = int_to_ptr.vmem [resolvable:$false] %s8934_s26 }
 0xa89   : > { %s8936_s27 = scalar_lea.vmem %s8935_s26, 8192  ;;  %p8937_p6 = scmp.lt.s32.totalorder %s13292_s29, %s8935_s26 }
 0xa8a   : > { %p8932_p4 = pnand %p8931_p2, %p9133_p3  ;;  %p8938_p7 = scmp.lt.s32.totalorder %s8936_s27, %s8930_s25 }
 0xa8b   : > { %s13816_s10 = sand.u32 1, %s13813_s16  }
 0xa8c   : > { %s13289_s18 = scalar_lea.hbm %s13815_s30, %s7255_s12  ;;  %s13296_s20 = scalar_lea.sflag [#allocation4], %s13816_s10 }
 0xa8d   : > { %p8933_p5 = pneg %p8932_p4  ;;  %p8939_p8 = por %p8938_p7, %p8937_p6 }
 0xa8f   : > { %p8940_p10 = pnand %p8939_p8, %p8933_p5 }
 0xa91   : > { %8943 = shalt.err (!%p8940_p10)
}
 0xa92   : > { %s8944_s11 = scalar_lea.hbm %s13289_s18, 4096  ;;  %s8948_s23 = scalar_lea.hbm %s13815_s30, 16384 }
 0xa93   : > { %p8945_p11 = scmp.ne.s32.totalorder %s13289_s18, %s8944_s11  ;;  %p8949_p0 = scmp.lt.s32.totalorder %s13289_s18, %s13815_s30 }
 0xa94   : > { %p8950_p1 = scmp.lt.s32.totalorder %s8948_s23, %s8944_s11 }
 0xa95   : > { %p8946_p12 = pnand %p8945_p11, %p9133_p3 }
 0xa96   : > { %p8951_p2 = por %p8950_p1, %p8949_p0 }
 0xa97   : > { %p8947_p13 = pneg %p8946_p12 }
 0xa99   : > { %p8952_p4 = pnand %p8951_p2, %p8947_p13 }
 0xa9b   : > { %8955 = shalt.err (!%p8952_p4)
}
 0xa9c   : > { %s9027_s14 = smov 128   ;;  %s9028_s24 = smov 8  }
 0xa9d   : > { %8057 = dma.vmem_to_hbm [thread:$0]  (%p9133_p3), %s13292_s29, 4096, %s13289_s18, %s13296_s20, %s9027_s14, %s9027_s14, %s9028_s24  }
 0xa9e PF: > { %s13817_s2 = sld [smem:[#allocation11_spill]] }
 0xa9f   : > { %s13818_s15 = sld [smem:[#allocation6_spill]] }
 0xaa4   : > { %p8063_p5 = scmp.ge.s32.totalorder %s13817_s2, 2 }
 0xaa5   : > { %s6939_s12 = sand.u32 1, %s13818_s15  }
 0xaa6   : > { %p8060_p6 = pnand %p8063_p5, %p9143_p9  ;;  %s6940_s21 = scalar_lea.sflag [#allocation4], %s6939_s12 }
 0xaa8   : > { %p8061_p7 = pneg %p8060_p6 }
 0xaaa   : > { %8989 = dma.done.wait (%p8061_p7), %s6940_s21, 4096  }
 0xaab   : > { %8991 = vsyncadd (%p8061_p7), %s6940_s21, 4294963200  ;;  %s23_s20 = sadd.s32 1, %s13817_s2   ;;  %s13820_s13 = sld [smem:[#allocation7_spill]] }
 0xaac   : > { %p20_p8 = scmp.ge.s32.totalorder %s23_s20, 10   ;;  %s13821_s14 = sld [smem:[#allocation8_spill]] }
 0xaad   : > { %s13822_s15 = sld [smem:[#allocation16_spill]] }
 0xaae   : > { %s13823_s16 = sld [smem:[#allocation9_spill]]  ;;  %22 = sbr.rel (!%p20_p8) target bundleno = 10 (0xa), region = 130 }
 0xaaf   : > { %s13824_s17 = sld [smem:[#allocation10_spill]] }
 0xab0   : > { %s13825_s18 = sld [smem:[#allocation12_spill]] }
 0xab1   : > { %s13826_s19 = sld [smem:[#allocation14_spill]] }
 0xab3   :  { %6945 = vsyncpa [#allocation4], 1 }
 0xab4   :  { %6947 = vsyncpa [#allocation4 + $0x1], 1 }

</bundles_post_ra>
